<compile_context>
chip_gen: v5e
topology: v5e:2x2
jax: 0.10.0
libtpu: 0.0.40
codegen_flags: <defaults>
</compile_context>

<pallas_src>
import functools
import math

import jax
import jax.numpy as jnp
from jax.experimental import pallas as pl
from jax.experimental.pallas import tpu as pltpu


# ----------------------------------------------------------------------------
# helpers (XLA glue)
# ----------------------------------------------------------------------------
def _pick_row_tile(m):
    """Largest sublane-aligned row tile dividing m that still yields >=2 grid
    steps (so both v7x TensorCores get work); falls back to the full extent."""
    for t in (1024, 512, 256, 128, 64, 32, 16, 8):
        if m % t == 0 and m // t >= 2:
            return t
    return m


def _im2col(x, kh, kw):
    """'same'-padded im2col: (B,H,W,C) -> (B, H*W, kh*kw*C).
    Last dim is tap-major then channel, matching a row-major flatten of an
    HWIO conv kernel to (kh*kw*C, Cout)."""
    B, H, W, C = x.shape
    ph, pw = kh // 2, kw // 2
    xp = jnp.pad(x, ((0, 0), (ph, ph), (pw, pw), (0, 0)))
    taps = [xp[:, dy:dy + H, dx:dx + W, :] for dy in range(kh) for dx in range(kw)]
    cols = jnp.stack(taps, axis=3)                       # (B,H,W,T,C)
    return cols.reshape(B, H * W, kh * kw * C)


def _pad_kernel_to(w, k):
    """Zero-pad an HWIO conv kernel to k x k taps (exact for 'same' zero-padded
    convolution: the extra taps have zero weight)."""
    ph, pw = (k - w.shape[0]) // 2, (k - w.shape[1]) // 2
    return jnp.pad(w, ((ph, ph), (pw, pw), (0, 0), (0, 0)))


# ----------------------------------------------------------------------------
# Pallas kernels
# ----------------------------------------------------------------------------
def _mm_kernel(a_ref, w_ref, b_ref, o_ref, *, act):
    """One row tile: (TM,K)bf16 @ (K,N)bf16 -> f32, + bias, + activation."""
    r = jnp.dot(a_ref[...], w_ref[...], preferred_element_type=jnp.float32)
    r = r + b_ref[...]
    if act == "relu":
        r = jnp.maximum(r, 0.0)
    elif act == "sigmoid":
        r = jax.nn.sigmoid(r)
    o_ref[...] = r.astype(o_ref.dtype)


def _front_ca_kernel(c_ref, w_ref, b_ref, w1_ref, b1_ref, w2_ref, b2_ref,
                     h_ref, y_ref):
    """Fused front[1] conv + channel-attention scale for one batch element.

    c_ref : (1, HW, K) bf16  im2col slab
    w_ref : (K, C) bf16      conv weight
    h_ref : (1, HW, C) f32   conv output
    y_ref : (1, 1, C)  f32   CA scale = sigmoid(relu(mean(h)@w1+b1)@w2+b2)
    """
    h = jnp.dot(c_ref[0], w_ref[...], preferred_element_type=jnp.float32)
    h = h + b_ref[...]
    h_ref[0] = h.astype(h_ref.dtype)
    m = jnp.sum(h, axis=0, keepdims=True) * (1.0 / h.shape[0])       # (1,C)
    t = jnp.maximum(
        jnp.dot(m, w1_ref[...], preferred_element_type=jnp.float32) + b1_ref[...],
        0.0)
    y = jax.nn.sigmoid(
        jnp.dot(t, w2_ref[...], preferred_element_type=jnp.float32) + b2_ref[...])
    y_ref[0] = y.astype(y_ref.dtype)


def _afe_tail_kernel(h_ref, y_ref, a1c_ref, wsa_ref, bsa_ref,
                     wfh_ref, wfca_ref, wfsa_ref, bf_ref, x_ref, o_ref):
    """Fused AFE tail for one batch element:
    SA second conv (Cout=1) + sigmoid, CA/SA rescale, concat + 1x1 fusion conv,
    bias, residual.  The (HW,1) attention map and the 3C-wide concat stay in
    registers/VMEM and are never written to HBM."""
    h = h_ref[0]                                                     # (HW,C) f32
    a = jax.nn.sigmoid(
        jnp.dot(a1c_ref[0], wsa_ref[...], preferred_element_type=jnp.float32)
        + bsa_ref[...])                                              # (HW,1)
    ca = h * y_ref[0]                                                # (HW,C)
    sa = h * a                                                       # (HW,C)
    # concat(h, ca, sa) @ fusion_w  ==  sum of three per-branch matmuls
    r = jnp.dot(h.astype(jnp.bfloat16), wfh_ref[...],
                preferred_element_type=jnp.float32)
    r += jnp.dot(ca.astype(jnp.bfloat16), wfca_ref[...],
                 preferred_element_type=jnp.float32)
    r += jnp.dot(sa.astype(jnp.bfloat16), wfsa_ref[...],
                 preferred_element_type=jnp.float32)
    o_ref[0] = (r + bf_ref[...] + x_ref[0]).astype(o_ref.dtype)


def _aib_tail_kernel(b1_ref, b2_ref, w1_ref, w2_ref, b_ref, x_ref, o_ref):
    """Fused AIB tail row tile: cat(br1,br2) @ fusion_w + bias + residual."""
    r = jnp.dot(b1_ref[...], w1_ref[...], preferred_element_type=jnp.float32)
    r += jnp.dot(b2_ref[...], w2_ref[...], preferred_element_type=jnp.float32)
    o_ref[...] = (r + b_ref[...] + x_ref[...]).astype(o_ref.dtype)


# ----------------------------------------------------------------------------
# Pallas wrappers
# ----------------------------------------------------------------------------
def _matmul_bias_act(a, w, b, act):
    """Row-tiled (M,K)bf16 @ (K,N)bf16 + b [+ act] -> (M,N) f32."""
    M, K = a.shape
    N = w.shape[1]
    TM = _pick_row_tile(M)
    cost = pl.CostEstimate(
        flops=2 * M * K * N,
        transcendentals=M * N if act == "sigmoid" else 0,
        bytes_accessed=M * K * 2 + K * N * 2 + N * 4 + M * N * 4,
    )
    return pl.pallas_call(
        functools.partial(_mm_kernel, act=act),
        out_shape=jax.ShapeDtypeStruct((M, N), jnp.float32),
        grid=(M // TM,),
        in_specs=[
            pl.BlockSpec((TM, K), lambda i: (i, 0)),
            pl.BlockSpec((K, N), lambda i: (0, 0)),
            pl.BlockSpec((1, N), lambda i: (0, 0)),
        ],
        out_specs=pl.BlockSpec((TM, N), lambda i: (i, 0)),
        compiler_params=pltpu.CompilerParams(dimension_semantics=("parallel",)),
        cost_estimate=cost,
    )(a, w, b)


def conv2d_pallas(x, w, b, act="none"):
    """'same'-padded stride-1 Conv2d as one row-tiled matmul.
    x: (B,H,W,Cin) f32, w: (KH,KW,Cin,Cout) f32, b: (1,Cout) f32."""
    B, H, W, Cin = x.shape
    KH, KW, _, Cout = w.shape
    cols = _im2col(x.astype(jnp.bfloat16), KH, KW).reshape(B * H * W, KH * KW * Cin)
    wt = w.reshape(KH * KW * Cin, Cout).astype(jnp.bfloat16)
    out = _matmul_bias_act(cols, wt, b, act)
    return out.reshape(B, H, W, Cout)


def conv2d_ca_pallas(x, w, b, ca_p):
    """Fused: front[1] 3x3 conv (no act) + channel-attention scale.
    Returns h: (B,H,W,C) f32 and y: (B,1,C) f32 (the per-batch CA scale)."""
    B, H, W, Cin = x.shape
    KH, KW, _, Cout = w.shape
    HW = H * W
    K = KH * KW * Cin
    cols = _im2col(x.astype(jnp.bfloat16), KH, KW)                   # (B,HW,K)
    wt = w.reshape(K, Cout).astype(jnp.bfloat16)
    cost = pl.CostEstimate(
        flops=2 * B * HW * K * Cout,
        transcendentals=B * Cout,
        bytes_accessed=B * HW * K * 2 + K * Cout * 2 + B * HW * Cout * 4,
    )
    h, y = pl.pallas_call(
        _front_ca_kernel,
        out_shape=(jax.ShapeDtypeStruct((B, HW, Cout), jnp.float32),
                   jax.ShapeDtypeStruct((B, 1, Cout), jnp.float32)),
        grid=(B,),
        in_specs=[
            pl.BlockSpec((1, HW, K), lambda bb: (bb, 0, 0)),
            pl.BlockSpec((K, Cout), lambda bb: (0, 0)),
            pl.BlockSpec((1, Cout), lambda bb: (0, 0)),
            pl.BlockSpec(ca_p["w1"].shape, lambda bb: (0, 0)),
            pl.BlockSpec(ca_p["b1"].shape, lambda bb: (0, 0)),
            pl.BlockSpec(ca_p["w2"].shape, lambda bb: (0, 0)),
            pl.BlockSpec(ca_p["b2"].shape, lambda bb: (0, 0)),
        ],
        out_specs=(pl.BlockSpec((1, HW, Cout), lambda bb: (bb, 0, 0)),
                   pl.BlockSpec((1, 1, Cout), lambda bb: (bb, 0, 0))),
        compiler_params=pltpu.CompilerParams(dimension_semantics=("parallel",)),
        cost_estimate=cost,
    )(cols, wt, b, ca_p["w1"], ca_p["b1"], ca_p["w2"], ca_p["b2"])
    return h.reshape(B, H, W, Cout), y


def afe_forward(x, p):
    """AFE: front convs -> (CA, SA, identity) -> fused concat+1x1+residual."""
    B, H, W, C = x.shape
    HW = H * W
    h0 = conv2d_pallas(x, p["front0_w"], p["front0_b"], act="relu")
    h, y = conv2d_ca_pallas(h0, p["front1_w"], p["front1_b"], p["ca"])
    a1 = conv2d_pallas(h, p["sa"]["w1"], p["sa"]["b1"], act="relu")  # (B,H,W,C//2)
    a1c = _im2col(a1.astype(jnp.bfloat16), 3, 3)                     # (B,HW,9*C//2)
    Ksa = a1c.shape[-1]
    wf = p["fusion_w"].reshape(3 * C, C).astype(jnp.bfloat16)
    wsa2 = p["sa"]["w2"].reshape(Ksa, 1).astype(jnp.bfloat16)
    cost = pl.CostEstimate(
        flops=2 * B * HW * (Ksa + 3 * C * C),
        transcendentals=B * HW,
        bytes_accessed=B * HW * (2 * C * 4 + Ksa * 2 + C * 4) + 3 * C * C * 2,
    )
    out = pl.pallas_call(
        _afe_tail_kernel,
        out_shape=jax.ShapeDtypeStruct((B, HW, C), jnp.float32),
        grid=(B,),
        in_specs=[
            pl.BlockSpec((1, HW, C), lambda bb: (bb, 0, 0)),         # h
            pl.BlockSpec((1, 1, C), lambda bb: (bb, 0, 0)),          # CA scale y
            pl.BlockSpec((1, HW, Ksa), lambda bb: (bb, 0, 0)),       # im2col(a1)
            pl.BlockSpec((Ksa, 1), lambda bb: (0, 0)),               # SA conv2 w
            pl.BlockSpec((1, 1), lambda bb: (0, 0)),                 # SA conv2 b
            pl.BlockSpec((C, C), lambda bb: (0, 0)),                 # fusion w (h)
            pl.BlockSpec((C, C), lambda bb: (0, 0)),                 # fusion w (ca)
            pl.BlockSpec((C, C), lambda bb: (0, 0)),                 # fusion w (sa)
            pl.BlockSpec((1, C), lambda bb: (0, 0)),                 # fusion b
            pl.BlockSpec((1, HW, C), lambda bb: (bb, 0, 0)),         # residual x
        ],
        out_specs=pl.BlockSpec((1, HW, C), lambda bb: (bb, 0, 0)),
        compiler_params=pltpu.CompilerParams(dimension_semantics=("parallel",)),
        cost_estimate=cost,
    )(h.reshape(B, HW, C), y, a1c, wsa2, p["sa"]["b2"],
      wf[:C], wf[C:2 * C], wf[2 * C:], p["fusion_b"], x.reshape(B, HW, C))
    return out.reshape(B, H, W, C)


def aib_tail_pallas(br1, br2, wf, b, x):
    """Fused cat(br1, br2) -> 1x1 fusion conv -> + x (residual)."""
    B, H, W, C2 = br1.shape
    n = x.shape[-1]
    M = B * H * W
    TM = _pick_row_tile(M)
    a1 = br1.reshape(M, C2).astype(jnp.bfloat16)
    a2 = br2.reshape(M, C2).astype(jnp.bfloat16)
    w1, w2 = wf[:C2], wf[C2:]
    cost = pl.CostEstimate(
        flops=4 * M * C2 * n, transcendentals=0,
        bytes_accessed=M * 2 * C2 * 2 + 2 * C2 * n * 2 + M * n * 8,
    )
    out = pl.pallas_call(
        _aib_tail_kernel,
        out_shape=jax.ShapeDtypeStruct((M, n), jnp.float32),
        grid=(M // TM,),
        in_specs=[
            pl.BlockSpec((TM, C2), lambda i: (i, 0)),
            pl.BlockSpec((TM, C2), lambda i: (i, 0)),
            pl.BlockSpec((C2, n), lambda i: (0, 0)),
            pl.BlockSpec((C2, n), lambda i: (0, 0)),
            pl.BlockSpec((1, n), lambda i: (0, 0)),
            pl.BlockSpec((TM, n), lambda i: (i, 0)),
        ],
        out_specs=pl.BlockSpec((TM, n), lambda i: (i, 0)),
        compiler_params=pltpu.CompilerParams(dimension_semantics=("parallel",)),
        cost_estimate=cost,
    )(a1, a2, w1, w2, b, x.reshape(M, n))
    return out.reshape(B, H, W, n)


def aib_forward(x, p):
    B, H, W, n = x.shape
    # Merged scale1_1 (3x3 zero-padded to 5x5) + scale2_1 (5x5) + ReLU:
    # ONE conv produces cat1 directly (Cout order matches torch.cat).
    w1 = jnp.concatenate([_pad_kernel_to(p["s11_w"], 5), p["s21_w"]], axis=-1)
    b1 = jnp.concatenate([p["s11_b"], p["s21_b"]], axis=-1)
    cat1 = conv2d_pallas(x, w1, b1, act="relu")                      # (B,H,W,2n)
    # Merged scale1_2 (3x3 -> 5x5) + scale2_2 (5x5): ONE conv on cat1.
    w2 = jnp.concatenate([_pad_kernel_to(p["s12_w"], 5), p["s22_w"]], axis=-1)
    b2 = jnp.concatenate([p["s12_b"], p["s22_b"]], axis=-1)
    pre = conv2d_pallas(cat1, w2, b2, act="none")                    # (B,H,W,4n)
    br1 = afe_forward(pre[..., :2 * n], p["csab1"])
    br2 = afe_forward(pre[..., 2 * n:], p["csab2"])
    wf = p["fusion_w"].reshape(4 * n, n).astype(jnp.bfloat16)
    return aib_tail_pallas(br1, br2, wf, p["fusion_b"], x)


# ----------------------------------------------------------------------------
# Pure-JAX reference (original module structure; bf16 matmul operands with f32
# accumulation, matching the kernels' numerics)
# ----------------------------------------------------------------------------
def conv2d_ref(x, w, b, act="none"):
    kh, kw = w.shape[0], w.shape[1]
    out = jax.lax.conv_general_dilated(
        x.astype(jnp.bfloat16), w.astype(jnp.bfloat16),
        window_strides=(1, 1),
        padding=[(kh // 2, kh // 2), (kw // 2, kw // 2)],
        dimension_numbers=("NHWC", "HWIO", "NHWC"),
        preferred_element_type=jnp.float32,
    ) + b.reshape(1, 1, 1, -1)
    if act == "relu":
        out = jax.nn.relu(out)
    elif act == "sigmoid":
        out = jax.nn.sigmoid(out)
    return out


def ca_ref(x, p):
    hp = jax.lax.Precision.HIGHEST
    y = jnp.mean(x, axis=(1, 2), keepdims=True)
    y = jax.nn.relu(jnp.einsum("bijc,cd->bijd", y, p["w1"], precision=hp)
                    + p["b1"].reshape(1, 1, 1, -1))
    y = jax.nn.sigmoid(jnp.einsum("bijc,cd->bijd", y, p["w2"], precision=hp)
                       + p["b2"].reshape(1, 1, 1, -1))
    return x * y


def sa_ref(x, p):
    a = conv2d_ref(x, p["w1"], p["b1"], act="relu")
    a = conv2d_ref(a, p["w2"], p["b2"], act="sigmoid")
    return a * x


def afe_ref(x, p):
    h = conv2d_ref(x, p["front0_w"], p["front0_b"], act="relu")
    h = conv2d_ref(h, p["front1_w"], p["front1_b"], act="none")
    att = jnp.concatenate([h, ca_ref(h, p["ca"]), sa_ref(h, p["sa"])], axis=-1)
    return conv2d_ref(att, p["fusion_w"], p["fusion_b"]) + x


def aib_ref(x, p):
    br1_1 = conv2d_ref(x, p["s11_w"], p["s11_b"], act="relu")
    br2_1 = conv2d_ref(x, p["s21_w"], p["s21_b"], act="relu")
    cat1 = jnp.concatenate([br1_1, br2_1], axis=-1)
    br1_2 = afe_ref(conv2d_ref(cat1, p["s12_w"], p["s12_b"]), p["csab1"])
    br2_2 = afe_ref(conv2d_ref(cat1, p["s22_w"], p["s22_b"]), p["csab2"])
    cat2 = jnp.concatenate([br1_2, br2_2], axis=-1)
    return x + conv2d_ref(cat2, p["fusion_w"], p["fusion_b"])


# ----------------------------------------------------------------------------
# Deterministic parameter init (shapes follow the torch module; synthetic values)
# ----------------------------------------------------------------------------
def conv_params(key, kh, kw, cin, cout):
    kw_, kb_ = jax.random.split(key)
    bound = 1.0 / math.sqrt(kh * kw * cin)
    w = jax.random.uniform(kw_, (kh, kw, cin, cout), jnp.float32, -bound, bound)
    b = jax.random.uniform(kb_, (1, cout), jnp.float32, -bound, bound)
    return w, b


def init_afe(key, c, reduction):
    # NOTE: `conv` is assumed to be the standard default_conv (padding=k//2).
    ks = jax.random.split(key, 7)
    p = {}
    p["front0_w"], p["front0_b"] = conv_params(ks[0], 3, 3, c, c)
    p["front1_w"], p["front1_b"] = conv_params(ks[1], 3, 3, c, c)
    w1, b1 = conv_params(ks[2], 1, 1, c, c // reduction)
    w2, b2 = conv_params(ks[3], 1, 1, c // reduction, c)
    p["ca"] = {"w1": w1.reshape(c, c // reduction), "b1": b1,
               "w2": w2.reshape(c // reduction, c), "b2": b2}
    sw1, sb1 = conv_params(ks[4], 3, 3, c, c // 2)
    sw2, sb2 = conv_params(ks[5], 3, 3, c // 2, 1)
    p["sa"] = {"w1": sw1, "b1": sb1, "w2": sw2, "b2": sb2}
    p["fusion_w"], p["fusion_b"] = conv_params(ks[6], 1, 1, 3 * c, c)
    return p


def init_aib(key, n_feat, reduction):
    ks = jax.random.split(key, 7)
    p = {}
    p["s11_w"], p["s11_b"] = conv_params(ks[0], 3, 3, n_feat, n_feat)
    p["s21_w"], p["s21_b"] = conv_params(ks[1], 5, 5, n_feat, n_feat)
    p["s12_w"], p["s12_b"] = conv_params(ks[2], 3, 3, 2 * n_feat, 2 * n_feat)
    p["s22_w"], p["s22_b"] = conv_params(ks[3], 5, 5, 2 * n_feat, 2 * n_feat)
    p["csab1"] = init_afe(ks[4], 2 * n_feat, reduction)
    p["csab2"] = init_afe(ks[5], 2 * n_feat, reduction)
    p["fusion_w"], p["fusion_b"] = conv_params(ks[6], 1, 1, 4 * n_feat, n_feat)
    return p


# ----------------------------------------------------------------------------
if __name__ == "__main__":
    n_feat, reduction = 8, 4
    B, H, W = 2, 16, 16

    # deterministic input; the torch module expects NCHW -> transpose to NHWC
    x_nchw = jax.random.normal(jax.random.PRNGKey(0), (B, n_feat, H, W), jnp.float32)
    x = jnp.transpose(x_nchw, (0, 2, 3, 1))  # (B, H, W, C)

    params = init_aib(jax.random.PRNGKey(42), n_feat=n_feat, reduction=reduction)

    out = jax.jit(aib_forward)(x, params)
    out = jax.block_until_ready(out)

    ref = aib_ref(x, params)
    assert out.shape == (B, H, W, n_feat)
    err = float(jnp.max(jnp.abs(out - ref)))
    assert jnp.allclose(out, ref, atol=2e-2, rtol=2e-2), err
    print("KERNEL_OK")
</pallas_src>

<mosaic_0001>
module attributes {stable_mosaic.version = 11 : i64} {
  func.func @_mm_kernel(%arg0: i32, %arg1: memref<256x200xbf16, #tpu.memory_space<vmem>>, %arg2: memref<200x16xbf16, #tpu.memory_space<vmem>>, %arg3: memref<1x16xf32, #tpu.memory_space<vmem>>, %arg4: memref<256x16xf32, #tpu.memory_space<vmem>>) attributes {dimension_semantics = [#tpu.dimension_semantics<parallel>], iteration_bounds = array<i64: 2>, scalar_prefetch = 0 : i64, scratch_operands = 0 : i64, tpu.core_type = #tpu.core_type<tc>, window_params = [{transform_indices = @transform_0, window_bounds = array<i64: 256, 200>}, {pipeline_mode = #tpu.pipeline_mode<synchronous>, transform_indices = @transform_1, window_bounds = array<i64: 200, 16>}, {pipeline_mode = #tpu.pipeline_mode<synchronous>, transform_indices = @transform_2, window_bounds = array<i64: 1, 16>}, {transform_indices = @transform_3, window_bounds = array<i64: 256, 16>}]} {
    %c0 = arith.constant 0 : index
    %c0_0 = arith.constant 0 : index
    %0 = vector.load %arg1[%c0, %c0_0] : memref<256x200xbf16, #tpu.memory_space<vmem>>, vector<256x200xbf16>
    %c0_1 = arith.constant 0 : index
    %c0_2 = arith.constant 0 : index
    %1 = vector.load %arg2[%c0_1, %c0_2] : memref<200x16xbf16, #tpu.memory_space<vmem>>, vector<200x16xbf16>
    %cst = arith.constant dense<0.000000e+00> : vector<256x16xf32>
    %2 = tpu.matmul %0, %1, %cst {dimension_numbers = #tpu.dot_dimension_numbers<[1], [0], [0], [1], [0, 0, 1, 1], [], []>} : vector<256x200xbf16>, vector<200x16xbf16>, vector<256x16xf32> -> vector<256x16xf32>
    %c0_3 = arith.constant 0 : index
    %c0_4 = arith.constant 0 : index
    %3 = vector.load %arg3[%c0_3, %c0_4] : memref<1x16xf32, #tpu.memory_space<vmem>>, vector<1x16xf32>
    %4 = vector.broadcast %3 : vector<1x16xf32> to vector<256x16xf32>
    %5 = arith.addf %2, %4 : vector<256x16xf32>
    %cst_5 = arith.constant 0.000000e+00 : f32
    %6 = vector.broadcast %cst_5 : f32 to vector<256x16xf32>
    %7 = arith.maximumf %5, %6 : vector<256x16xf32>
    %c0_6 = arith.constant 0 : index
    %c0_7 = arith.constant 0 : index
    %8 = vector.load %arg4[%c0_6, %c0_7] : memref<256x16xf32, #tpu.memory_space<vmem>>, vector<256x16xf32>
    tpu.vector_store %arg4[%c0_6, %c0_7], %7 {strides = array<i32>} : memref<256x16xf32, #tpu.memory_space<vmem>>, vector<256x16xf32>,
    return
  }
  func.func @transform_0(%arg0: i32) -> (i32, i32) {
    %c0_i32 = arith.constant 0 : i32
    %c0_i32_0 = arith.constant 0 : i32
    return %arg0, %c0_i32 : i32, i32
  }
  func.func @transform_1(%arg0: i32) -> (i32, i32) {
    %c0_i32 = arith.constant 0 : i32
    %c0_i32_0 = arith.constant 0 : i32
    %c0_i32_1 = arith.constant 0 : i32
    return %c0_i32, %c0_i32_0 : i32, i32
  }
  func.func @transform_2(%arg0: i32) -> (i32, i32) {
    %c0_i32 = arith.constant 0 : i32
    %c0_i32_0 = arith.constant 0 : i32
    %c0_i32_1 = arith.constant 0 : i32
    return %c0_i32, %c0_i32_0 : i32, i32
  }
  func.func @transform_3(%arg0: i32) -> (i32, i32) {
    %c0_i32 = arith.constant 0 : i32
    %c0_i32_0 = arith.constant 0 : i32
    return %arg0, %c0_i32 : i32, i32
  }
}

module attributes {stable_mosaic.version = 11 : i64} {
  func.func @_mm_kernel(%arg0: i32, %arg1: memref<256x400xbf16, #tpu.memory_space<vmem>>, %arg2: memref<400x32xbf16, #tpu.memory_space<vmem>>, %arg3: memref<1x32xf32, #tpu.memory_space<vmem>>, %arg4: memref<256x32xf32, #tpu.memory_space<vmem>>) attributes {dimension_semantics = [#tpu.dimension_semantics<parallel>], iteration_bounds = array<i64: 2>, scalar_prefetch = 0 : i64, scratch_operands = 0 : i64, tpu.core_type = #tpu.core_type<tc>, window_params = [{transform_indices = @transform_0, window_bounds = array<i64: 256, 400>}, {pipeline_mode = #tpu.pipeline_mode<synchronous>, transform_indices = @transform_1, window_bounds = array<i64: 400, 32>}, {pipeline_mode = #tpu.pipeline_mode<synchronous>, transform_indices = @transform_2, window_bounds = array<i64: 1, 32>}, {transform_indices = @transform_3, window_bounds = array<i64: 256, 32>}]} {
    %c0 = arith.constant 0 : index
    %c0_0 = arith.constant 0 : index
    %0 = vector.load %arg1[%c0, %c0_0] : memref<256x400xbf16, #tpu.memory_space<vmem>>, vector<256x400xbf16>
    %c0_1 = arith.constant 0 : index
    %c0_2 = arith.constant 0 : index
    %1 = vector.load %arg2[%c0_1, %c0_2] : memref<400x32xbf16, #tpu.memory_space<vmem>>, vector<400x32xbf16>
    %cst = arith.constant dense<0.000000e+00> : vector<256x32xf32>
    %2 = tpu.matmul %0, %1, %cst {dimension_numbers = #tpu.dot_dimension_numbers<[1], [0], [0], [1], [0, 0, 1, 1], [], []>} : vector<256x400xbf16>, vector<400x32xbf16>, vector<256x32xf32> -> vector<256x32xf32>
    %c0_3 = arith.constant 0 : index
    %c0_4 = arith.constant 0 : index
    %3 = vector.load %arg3[%c0_3, %c0_4] : memref<1x32xf32, #tpu.memory_space<vmem>>, vector<1x32xf32>
    %4 = vector.broadcast %3 : vector<1x32xf32> to vector<256x32xf32>
    %5 = arith.addf %2, %4 : vector<256x32xf32>
    %c0_5 = arith.constant 0 : index
    %c0_6 = arith.constant 0 : index
    %6 = vector.load %arg4[%c0_5, %c0_6] : memref<256x32xf32, #tpu.memory_space<vmem>>, vector<256x32xf32>
    tpu.vector_store %arg4[%c0_5, %c0_6], %5 {strides = array<i32>} : memref<256x32xf32, #tpu.memory_space<vmem>>, vector<256x32xf32>,
    return
  }
  func.func @transform_0(%arg0: i32) -> (i32, i32) {
    %c0_i32 = arith.constant 0 : i32
    %c0_i32_0 = arith.constant 0 : i32
    return %arg0, %c0_i32 : i32, i32
  }
  func.func @transform_1(%arg0: i32) -> (i32, i32) {
    %c0_i32 = arith.constant 0 : i32
    %c0_i32_0 = arith.constant 0 : i32
    %c0_i32_1 = arith.constant 0 : i32
    return %c0_i32, %c0_i32_0 : i32, i32
  }
  func.func @transform_2(%arg0: i32) -> (i32, i32) {
    %c0_i32 = arith.constant 0 : i32
    %c0_i32_0 = arith.constant 0 : i32
    %c0_i32_1 = arith.constant 0 : i32
    return %c0_i32, %c0_i32_0 : i32, i32
  }
  func.func @transform_3(%arg0: i32) -> (i32, i32) {
    %c0_i32 = arith.constant 0 : i32
    %c0_i32_0 = arith.constant 0 : i32
    return %arg0, %c0_i32 : i32, i32
  }
}

module attributes {stable_mosaic.version = 11 : i64} {
  func.func @_mm_kernel(%arg0: i32, %arg1: memref<256x144xbf16, #tpu.memory_space<vmem>>, %arg2: memref<144x16xbf16, #tpu.memory_space<vmem>>, %arg3: memref<1x16xf32, #tpu.memory_space<vmem>>, %arg4: memref<256x16xf32, #tpu.memory_space<vmem>>) attributes {dimension_semantics = [#tpu.dimension_semantics<parallel>], iteration_bounds = array<i64: 2>, scalar_prefetch = 0 : i64, scratch_operands = 0 : i64, tpu.core_type = #tpu.core_type<tc>, window_params = [{transform_indices = @transform_0, window_bounds = array<i64: 256, 144>}, {pipeline_mode = #tpu.pipeline_mode<synchronous>, transform_indices = @transform_1, window_bounds = array<i64: 144, 16>}, {pipeline_mode = #tpu.pipeline_mode<synchronous>, transform_indices = @transform_2, window_bounds = array<i64: 1, 16>}, {transform_indices = @transform_3, window_bounds = array<i64: 256, 16>}]} {
    %c0 = arith.constant 0 : index
    %c0_0 = arith.constant 0 : index
    %0 = vector.load %arg1[%c0, %c0_0] : memref<256x144xbf16, #tpu.memory_space<vmem>>, vector<256x144xbf16>
    %c0_1 = arith.constant 0 : index
    %c0_2 = arith.constant 0 : index
    %1 = vector.load %arg2[%c0_1, %c0_2] : memref<144x16xbf16, #tpu.memory_space<vmem>>, vector<144x16xbf16>
    %cst = arith.constant dense<0.000000e+00> : vector<256x16xf32>
    %2 = tpu.matmul %0, %1, %cst {dimension_numbers = #tpu.dot_dimension_numbers<[1], [0], [0], [1], [0, 0, 1, 1], [], []>} : vector<256x144xbf16>, vector<144x16xbf16>, vector<256x16xf32> -> vector<256x16xf32>
    %c0_3 = arith.constant 0 : index
    %c0_4 = arith.constant 0 : index
    %3 = vector.load %arg3[%c0_3, %c0_4] : memref<1x16xf32, #tpu.memory_space<vmem>>, vector<1x16xf32>
    %4 = vector.broadcast %3 : vector<1x16xf32> to vector<256x16xf32>
    %5 = arith.addf %2, %4 : vector<256x16xf32>
    %cst_5 = arith.constant 0.000000e+00 : f32
    %6 = vector.broadcast %cst_5 : f32 to vector<256x16xf32>
    %7 = arith.maximumf %5, %6 : vector<256x16xf32>
    %c0_6 = arith.constant 0 : index
    %c0_7 = arith.constant 0 : index
    %8 = vector.load %arg4[%c0_6, %c0_7] : memref<256x16xf32, #tpu.memory_space<vmem>>, vector<256x16xf32>
    tpu.vector_store %arg4[%c0_6, %c0_7], %7 {strides = array<i32>} : memref<256x16xf32, #tpu.memory_space<vmem>>, vector<256x16xf32>,
    return
  }
  func.func @transform_0(%arg0: i32) -> (i32, i32) {
    %c0_i32 = arith.constant 0 : i32
    %c0_i32_0 = arith.constant 0 : i32
    return %arg0, %c0_i32 : i32, i32
  }
  func.func @transform_1(%arg0: i32) -> (i32, i32) {
    %c0_i32 = arith.constant 0 : i32
    %c0_i32_0 = arith.constant 0 : i32
    %c0_i32_1 = arith.constant 0 : i32
    return %c0_i32, %c0_i32_0 : i32, i32
  }
  func.func @transform_2(%arg0: i32) -> (i32, i32) {
    %c0_i32 = arith.constant 0 : i32
    %c0_i32_0 = arith.constant 0 : i32
    %c0_i32_1 = arith.constant 0 : i32
    return %c0_i32, %c0_i32_0 : i32, i32
  }
  func.func @transform_3(%arg0: i32) -> (i32, i32) {
    %c0_i32 = arith.constant 0 : i32
    %c0_i32_0 = arith.constant 0 : i32
    return %arg0, %c0_i32 : i32, i32
  }
}

module attributes {stable_mosaic.version = 11 : i64} {
  func.func @_front_ca_kernel(%arg0: i32, %arg1: memref<1x256x144xbf16, #tpu.memory_space<vmem>>, %arg2: memref<144x16xbf16, #tpu.memory_space<vmem>>, %arg3: memref<1x16xf32, #tpu.memory_space<vmem>>, %arg4: memref<16x4xf32, #tpu.memory_space<vmem>>, %arg5: memref<1x4xf32, #tpu.memory_space<vmem>>, %arg6: memref<4x16xf32, #tpu.memory_space<vmem>>, %arg7: memref<1x16xf32, #tpu.memory_space<vmem>>, %arg8: memref<1x256x16xf32, #tpu.memory_space<vmem>>, %arg9: memref<1x1x16xf32, #tpu.memory_space<vmem>>) attributes {dimension_semantics = [#tpu.dimension_semantics<parallel>], iteration_bounds = array<i64: 2>, scalar_prefetch = 0 : i64, scratch_operands = 0 : i64, tpu.core_type = #tpu.core_type<tc>, window_params = [{transform_indices = @transform_0, window_bounds = array<i64: 1, 256, 144>}, {pipeline_mode = #tpu.pipeline_mode<synchronous>, transform_indices = @transform_1, window_bounds = array<i64: 144, 16>}, {pipeline_mode = #tpu.pipeline_mode<synchronous>, transform_indices = @transform_2, window_bounds = array<i64: 1, 16>}, {pipeline_mode = #tpu.pipeline_mode<synchronous>, transform_indices = @transform_3, window_bounds = array<i64: 16, 4>}, {pipeline_mode = #tpu.pipeline_mode<synchronous>, transform_indices = @transform_4, window_bounds = array<i64: 1, 4>}, {pipeline_mode = #tpu.pipeline_mode<synchronous>, transform_indices = @transform_5, window_bounds = array<i64: 4, 16>}, {pipeline_mode = #tpu.pipeline_mode<synchronous>, transform_indices = @transform_6, window_bounds = array<i64: 1, 16>}, {transform_indices = @transform_7, window_bounds = array<i64: 1, 256, 16>}, {transform_indices = @transform_8, window_bounds = array<i64: 1, 1, 16>}]} {
    %c0 = arith.constant 0 : index
    %c0_0 = arith.constant 0 : index
    %c0_1 = arith.constant 0 : index
    %0 = vector.load %arg1[%c0, %c0_0, %c0_1] : memref<1x256x144xbf16, #tpu.memory_space<vmem>>, vector<1x256x144xbf16>
    %1 = vector.shape_cast %0 : vector<1x256x144xbf16> to vector<256x144xbf16>
    %c0_2 = arith.constant 0 : index
    %c0_3 = arith.constant 0 : index
    %2 = vector.load %arg2[%c0_2, %c0_3] : memref<144x16xbf16, #tpu.memory_space<vmem>>, vector<144x16xbf16>
    %cst = arith.constant dense<0.000000e+00> : vector<256x16xf32>
    %3 = tpu.matmul %1, %2, %cst {dimension_numbers = #tpu.dot_dimension_numbers<[1], [0], [0], [1], [0, 0, 1, 1], [], []>} : vector<256x144xbf16>, vector<144x16xbf16>, vector<256x16xf32> -> vector<256x16xf32>
    %c0_4 = arith.constant 0 : index
    %c0_5 = arith.constant 0 : index
    %4 = vector.load %arg3[%c0_4, %c0_5] : memref<1x16xf32, #tpu.memory_space<vmem>>, vector<1x16xf32>
    %5 = vector.broadcast %4 : vector<1x16xf32> to vector<256x16xf32>
    %6 = arith.addf %3, %5 : vector<256x16xf32>
    %c0_6 = arith.constant 0 : index
    %c0_7 = arith.constant 0 : index
    %c0_8 = arith.constant 0 : index
    %7 = vector.load %arg8[%c0_6, %c0_7, %c0_8] : memref<1x256x16xf32, #tpu.memory_space<vmem>>, vector<1x256x16xf32>
    %8 = vector.shape_cast %7 : vector<1x256x16xf32> to vector<256x16xf32>
    %9 = vector.shape_cast %6 : vector<256x16xf32> to vector<1x256x16xf32>
    tpu.vector_store %arg8[%c0_6, %c0_7, %c0_8], %9 {strides = array<i32>} : memref<1x256x16xf32, #tpu.memory_space<vmem>>, vector<1x256x16xf32>,
    %cst_9 = arith.constant dense<0.000000e+00> : vector<16xf32>
    %10 = vector.multi_reduction <add>, %6, %cst_9 [0] : vector<256x16xf32> to vector<16xf32>
    %11 = vector.shape_cast %10 : vector<16xf32> to vector<1x16xf32>
    %cst_10 = arith.constant 3.906250e-03 : f32
    %12 = vector.broadcast %cst_10 : f32 to vector<1x16xf32>
    %13 = arith.mulf %11, %12 : vector<1x16xf32>
    %c0_11 = arith.constant 0 : index
    %c0_12 = arith.constant 0 : index
    %14 = vector.load %arg4[%c0_11, %c0_12] : memref<16x4xf32, #tpu.memory_space<vmem>>, vector<16x4xf32>
    %cst_13 = arith.constant dense<0.000000e+00> : vector<1x4xf32>
    %15 = tpu.matmul %13, %14, %cst_13 {dimension_numbers = #tpu.dot_dimension_numbers<[1], [0], [0], [1], [0, 0, 1, 1], [], []>} : vector<1x16xf32>, vector<16x4xf32>, vector<1x4xf32> -> vector<1x4xf32>
    %c0_14 = arith.constant 0 : index
    %c0_15 = arith.constant 0 : index
    %16 = vector.load %arg5[%c0_14, %c0_15] : memref<1x4xf32, #tpu.memory_space<vmem>>, vector<1x4xf32>
    %17 = arith.addf %15, %16 : vector<1x4xf32>
    %cst_16 = arith.constant 0.000000e+00 : f32
    %18 = vector.broadcast %cst_16 : f32 to vector<1x4xf32>
    %19 = arith.maximumf %17, %18 : vector<1x4xf32>
    %c0_17 = arith.constant 0 : index
    %c0_18 = arith.constant 0 : index
    %20 = vector.load %arg6[%c0_17, %c0_18] : memref<4x16xf32, #tpu.memory_space<vmem>>, vector<4x16xf32>
    %cst_19 = arith.constant dense<0.000000e+00> : vector<1x16xf32>
    %21 = tpu.matmul %19, %20, %cst_19 {dimension_numbers = #tpu.dot_dimension_numbers<[1], [0], [0], [1], [0, 0, 1, 1], [], []>} : vector<1x4xf32>, vector<4x16xf32>, vector<1x16xf32> -> vector<1x16xf32>
    %c0_20 = arith.constant 0 : index
    %c0_21 = arith.constant 0 : index
    %22 = vector.load %arg7[%c0_20, %c0_21] : memref<1x16xf32, #tpu.memory_space<vmem>>, vector<1x16xf32>
    %23 = arith.addf %21, %22 : vector<1x16xf32>
    %24 = arith.negf %23 : vector<1x16xf32>
    %25 = math.exp %24 : vector<1x16xf32>
    %cst_22 = arith.constant 1.000000e+00 : f32
    %26 = vector.broadcast %cst_22 : f32 to vector<1x16xf32>
    %27 = arith.addf %26, %25 : vector<1x16xf32>
    %28 = arith.divf %26, %27 : vector<1x16xf32>
    %c0_23 = arith.constant 0 : index
    %c0_24 = arith.constant 0 : index
    %c0_25 = arith.constant 0 : index
    %29 = vector.load %arg9[%c0_23, %c0_24, %c0_25] : memref<1x1x16xf32, #tpu.memory_space<vmem>>, vector<1x1x16xf32>
    %30 = vector.shape_cast %29 : vector<1x1x16xf32> to vector<1x16xf32>
    %31 = vector.shape_cast %28 : vector<1x16xf32> to vector<1x1x16xf32>
    tpu.vector_store %arg9[%c0_23, %c0_24, %c0_25], %31 {strides = array<i32>} : memref<1x1x16xf32, #tpu.memory_space<vmem>>, vector<1x1x16xf32>,
    return
  }
  func.func @transform_0(%arg0: i32) -> (i32, i32, i32) {
    %c0_i32 = arith.constant 0 : i32
    %c0_i32_0 = arith.constant 0 : i32
    %c0_i32_1 = arith.constant 0 : i32
    return %arg0, %c0_i32, %c0_i32_0 : i32, i32, i32
  }
  func.func @transform_1(%arg0: i32) -> (i32, i32) {
    %c0_i32 = arith.constant 0 : i32
    %c0_i32_0 = arith.constant 0 : i32
    %c0_i32_1 = arith.constant 0 : i32
    return %c0_i32, %c0_i32_0 : i32, i32
  }
  func.func @transform_2(%arg0: i32) -> (i32, i32) {
    %c0_i32 = arith.constant 0 : i32
    %c0_i32_0 = arith.constant 0 : i32
    %c0_i32_1 = arith.constant 0 : i32
    return %c0_i32, %c0_i32_0 : i32, i32
  }
  func.func @transform_3(%arg0: i32) -> (i32, i32) {
    %c0_i32 = arith.constant 0 : i32
    %c0_i32_0 = arith.constant 0 : i32
    %c0_i32_1 = arith.constant 0 : i32
    return %c0_i32, %c0_i32_0 : i32, i32
  }
  func.func @transform_4(%arg0: i32) -> (i32, i32) {
    %c0_i32 = arith.constant 0 : i32
    %c0_i32_0 = arith.constant 0 : i32
    %c0_i32_1 = arith.constant 0 : i32
    return %c0_i32, %c0_i32_0 : i32, i32
  }
  func.func @transform_5(%arg0: i32) -> (i32, i32) {
    %c0_i32 = arith.constant 0 : i32
    %c0_i32_0 = arith.constant 0 : i32
    %c0_i32_1 = arith.constant 0 : i32
    return %c0_i32, %c0_i32_0 : i32, i32
  }
  func.func @transform_6(%arg0: i32) -> (i32, i32) {
    %c0_i32 = arith.constant 0 : i32
    %c0_i32_0 = arith.constant 0 : i32
    %c0_i32_1 = arith.constant 0 : i32
    return %c0_i32, %c0_i32_0 : i32, i32
  }
  func.func @transform_7(%arg0: i32) -> (i32, i32, i32) {
    %c0_i32 = arith.constant 0 : i32
    %c0_i32_0 = arith.constant 0 : i32
    %c0_i32_1 = arith.constant 0 : i32
    return %arg0, %c0_i32, %c0_i32_0 : i32, i32, i32
  }
  func.func @transform_8(%arg0: i32) -> (i32, i32, i32) {
    %c0_i32 = arith.constant 0 : i32
    %c0_i32_0 = arith.constant 0 : i32
    %c0_i32_1 = arith.constant 0 : i32
    return %arg0, %c0_i32, %c0_i32_0 : i32, i32, i32
  }
}

module attributes {stable_mosaic.version = 11 : i64} {
  func.func @_mm_kernel(%arg0: i32, %arg1: memref<256x144xbf16, #tpu.memory_space<vmem>>, %arg2: memref<144x8xbf16, #tpu.memory_space<vmem>>, %arg3: memref<1x8xf32, #tpu.memory_space<vmem>>, %arg4: memref<256x8xf32, #tpu.memory_space<vmem>>) attributes {dimension_semantics = [#tpu.dimension_semantics<parallel>], iteration_bounds = array<i64: 2>, scalar_prefetch = 0 : i64, scratch_operands = 0 : i64, tpu.core_type = #tpu.core_type<tc>, window_params = [{transform_indices = @transform_0, window_bounds = array<i64: 256, 144>}, {pipeline_mode = #tpu.pipeline_mode<synchronous>, transform_indices = @transform_1, window_bounds = array<i64: 144, 8>}, {pipeline_mode = #tpu.pipeline_mode<synchronous>, transform_indices = @transform_2, window_bounds = array<i64: 1, 8>}, {transform_indices = @transform_3, window_bounds = array<i64: 256, 8>}]} {
    %c0 = arith.constant 0 : index
    %c0_0 = arith.constant 0 : index
    %0 = vector.load %arg1[%c0, %c0_0] : memref<256x144xbf16, #tpu.memory_space<vmem>>, vector<256x144xbf16>
    %c0_1 = arith.constant 0 : index
    %c0_2 = arith.constant 0 : index
    %1 = vector.load %arg2[%c0_1, %c0_2] : memref<144x8xbf16, #tpu.memory_space<vmem>>, vector<144x8xbf16>
    %cst = arith.constant dense<0.000000e+00> : vector<256x8xf32>
    %2 = tpu.matmul %0, %1, %cst {dimension_numbers = #tpu.dot_dimension_numbers<[1], [0], [0], [1], [0, 0, 1, 1], [], []>} : vector<256x144xbf16>, vector<144x8xbf16>, vector<256x8xf32> -> vector<256x8xf32>
    %c0_3 = arith.constant 0 : index
    %c0_4 = arith.constant 0 : index
    %3 = vector.load %arg3[%c0_3, %c0_4] : memref<1x8xf32, #tpu.memory_space<vmem>>, vector<1x8xf32>
    %4 = vector.broadcast %3 : vector<1x8xf32> to vector<256x8xf32>
    %5 = arith.addf %2, %4 : vector<256x8xf32>
    %cst_5 = arith.constant 0.000000e+00 : f32
    %6 = vector.broadcast %cst_5 : f32 to vector<256x8xf32>
    %7 = arith.maximumf %5, %6 : vector<256x8xf32>
    %c0_6 = arith.constant 0 : index
    %c0_7 = arith.constant 0 : index
    %8 = vector.load %arg4[%c0_6, %c0_7] : memref<256x8xf32, #tpu.memory_space<vmem>>, vector<256x8xf32>
    tpu.vector_store %arg4[%c0_6, %c0_7], %7 {strides = array<i32>} : memref<256x8xf32, #tpu.memory_space<vmem>>, vector<256x8xf32>,
    return
  }
  func.func @transform_0(%arg0: i32) -> (i32, i32) {
    %c0_i32 = arith.constant 0 : i32
    %c0_i32_0 = arith.constant 0 : i32
    return %arg0, %c0_i32 : i32, i32
  }
  func.func @transform_1(%arg0: i32) -> (i32, i32) {
    %c0_i32 = arith.constant 0 : i32
    %c0_i32_0 = arith.constant 0 : i32
    %c0_i32_1 = arith.constant 0 : i32
    return %c0_i32, %c0_i32_0 : i32, i32
  }
  func.func @transform_2(%arg0: i32) -> (i32, i32) {
    %c0_i32 = arith.constant 0 : i32
    %c0_i32_0 = arith.constant 0 : i32
    %c0_i32_1 = arith.constant 0 : i32
    return %c0_i32, %c0_i32_0 : i32, i32
  }
  func.func @transform_3(%arg0: i32) -> (i32, i32) {
    %c0_i32 = arith.constant 0 : i32
    %c0_i32_0 = arith.constant 0 : i32
    return %arg0, %c0_i32 : i32, i32
  }
}

module attributes {stable_mosaic.version = 11 : i64} {
  func.func @_afe_tail_kernel(%arg0: i32, %arg1: memref<1x256x16xf32, #tpu.memory_space<vmem>>, %arg2: memref<1x1x16xf32, #tpu.memory_space<vmem>>, %arg3: memref<1x256x72xbf16, #tpu.memory_space<vmem>>, %arg4: memref<72x1xbf16, #tpu.memory_space<vmem>>, %arg5: memref<1x1xf32, #tpu.memory_space<vmem>>, %arg6: memref<16x16xbf16, #tpu.memory_space<vmem>>, %arg7: memref<16x16xbf16, #tpu.memory_space<vmem>>, %arg8: memref<16x16xbf16, #tpu.memory_space<vmem>>, %arg9: memref<1x16xf32, #tpu.memory_space<vmem>>, %arg10: memref<1x256x16xf32, #tpu.memory_space<vmem>>, %arg11: memref<1x256x16xf32, #tpu.memory_space<vmem>>) attributes {dimension_semantics = [#tpu.dimension_semantics<parallel>], iteration_bounds = array<i64: 2>, scalar_prefetch = 0 : i64, scratch_operands = 0 : i64, tpu.core_type = #tpu.core_type<tc>, window_params = [{transform_indices = @transform_0, window_bounds = array<i64: 1, 256, 16>}, {transform_indices = @transform_1, window_bounds = array<i64: 1, 1, 16>}, {transform_indices = @transform_2, window_bounds = array<i64: 1, 256, 72>}, {pipeline_mode = #tpu.pipeline_mode<synchronous>, transform_indices = @transform_3, window_bounds = array<i64: 72, 1>}, {pipeline_mode = #tpu.pipeline_mode<synchronous>, transform_indices = @transform_4, window_bounds = array<i64: 1, 1>}, {pipeline_mode = #tpu.pipeline_mode<synchronous>, transform_indices = @transform_5, window_bounds = array<i64: 16, 16>}, {pipeline_mode = #tpu.pipeline_mode<synchronous>, transform_indices = @transform_6, window_bounds = array<i64: 16, 16>}, {pipeline_mode = #tpu.pipeline_mode<synchronous>, transform_indices = @transform_7, window_bounds = array<i64: 16, 16>}, {pipeline_mode = #tpu.pipeline_mode<synchronous>, transform_indices = @transform_8, window_bounds = array<i64: 1, 16>}, {transform_indices = @transform_9, window_bounds = array<i64: 1, 256, 16>}, {transform_indices = @transform_10, window_bounds = array<i64: 1, 256, 16>}]} {
    %c0 = arith.constant 0 : index
    %c0_0 = arith.constant 0 : index
    %c0_1 = arith.constant 0 : index
    %0 = vector.load %arg1[%c0, %c0_0, %c0_1] : memref<1x256x16xf32, #tpu.memory_space<vmem>>, vector<1x256x16xf32>
    %1 = vector.shape_cast %0 : vector<1x256x16xf32> to vector<256x16xf32>
    %c0_2 = arith.constant 0 : index
    %c0_3 = arith.constant 0 : index
    %c0_4 = arith.constant 0 : index
    %2 = vector.load %arg3[%c0_2, %c0_3, %c0_4] : memref<1x256x72xbf16, #tpu.memory_space<vmem>>, vector<1x256x72xbf16>
    %3 = vector.shape_cast %2 : vector<1x256x72xbf16> to vector<256x72xbf16>
    %c0_5 = arith.constant 0 : index
    %c0_6 = arith.constant 0 : index
    %4 = vector.load %arg4[%c0_5, %c0_6] : memref<72x1xbf16, #tpu.memory_space<vmem>>, vector<72x1xbf16>
    %cst = arith.constant dense<0.000000e+00> : vector<256x1xf32>
    %5 = tpu.matmul %3, %4, %cst {dimension_numbers = #tpu.dot_dimension_numbers<[1], [0], [0], [1], [0, 0, 1, 1], [], []>} : vector<256x72xbf16>, vector<72x1xbf16>, vector<256x1xf32> -> vector<256x1xf32>
    %c0_7 = arith.constant 0 : index
    %c0_8 = arith.constant 0 : index
    %6 = vector.load %arg5[%c0_7, %c0_8] : memref<1x1xf32, #tpu.memory_space<vmem>>, vector<1x1xf32>
    %7 = vector.broadcast %6 : vector<1x1xf32> to vector<256x1xf32>
    %8 = arith.addf %5, %7 : vector<256x1xf32>
    %9 = arith.negf %8 : vector<256x1xf32>
    %10 = math.exp %9 : vector<256x1xf32>
    %cst_9 = arith.constant 1.000000e+00 : f32
    %11 = vector.broadcast %cst_9 : f32 to vector<256x1xf32>
    %12 = arith.addf %11, %10 : vector<256x1xf32>
    %13 = arith.divf %11, %12 : vector<256x1xf32>
    %c0_10 = arith.constant 0 : index
    %c0_11 = arith.constant 0 : index
    %c0_12 = arith.constant 0 : index
    %14 = vector.load %arg2[%c0_10, %c0_11, %c0_12] : memref<1x1x16xf32, #tpu.memory_space<vmem>>, vector<1x1x16xf32>
    %15 = vector.shape_cast %14 : vector<1x1x16xf32> to vector<1x16xf32>
    %16 = vector.broadcast %15 : vector<1x16xf32> to vector<256x16xf32>
    %17 = arith.mulf %1, %16 : vector<256x16xf32>
    %18 = vector.broadcast %13 : vector<256x1xf32> to vector<256x16xf32>
    %19 = arith.mulf %1, %18 : vector<256x16xf32>
    %20 = arith.truncf %1 : vector<256x16xf32> to vector<256x16xbf16>
    %c0_13 = arith.constant 0 : index
    %c0_14 = arith.constant 0 : index
    %21 = vector.load %arg6[%c0_13, %c0_14] : memref<16x16xbf16, #tpu.memory_space<vmem>>, vector<16x16xbf16>
    %cst_15 = arith.constant dense<0.000000e+00> : vector<256x16xf32>
    %22 = tpu.matmul %20, %21, %cst_15 {dimension_numbers = #tpu.dot_dimension_numbers<[1], [0], [0], [1], [0, 0, 1, 1], [], []>} : vector<256x16xbf16>, vector<16x16xbf16>, vector<256x16xf32> -> vector<256x16xf32>
    %23 = arith.truncf %17 : vector<256x16xf32> to vector<256x16xbf16>
    %c0_16 = arith.constant 0 : index
    %c0_17 = arith.constant 0 : index
    %24 = vector.load %arg7[%c0_16, %c0_17] : memref<16x16xbf16, #tpu.memory_space<vmem>>, vector<16x16xbf16>
    %cst_18 = arith.constant dense<0.000000e+00> : vector<256x16xf32>
    %25 = tpu.matmul %23, %24, %cst_18 {dimension_numbers = #tpu.dot_dimension_numbers<[1], [0], [0], [1], [0, 0, 1, 1], [], []>} : vector<256x16xbf16>, vector<16x16xbf16>, vector<256x16xf32> -> vector<256x16xf32>
    %26 = arith.addf %22, %25 : vector<256x16xf32>
    %27 = arith.truncf %19 : vector<256x16xf32> to vector<256x16xbf16>
    %c0_19 = arith.constant 0 : index
    %c0_20 = arith.constant 0 : index
    %28 = vector.load %arg8[%c0_19, %c0_20] : memref<16x16xbf16, #tpu.memory_space<vmem>>, vector<16x16xbf16>
    %cst_21 = arith.constant dense<0.000000e+00> : vector<256x16xf32>
    %29 = tpu.matmul %27, %28, %cst_21 {dimension_numbers = #tpu.dot_dimension_numbers<[1], [0], [0], [1], [0, 0, 1, 1], [], []>} : vector<256x16xbf16>, vector<16x16xbf16>, vector<256x16xf32> -> vector<256x16xf32>
    %30 = arith.addf %26, %29 : vector<256x16xf32>
    %c0_22 = arith.constant 0 : index
    %c0_23 = arith.constant 0 : index
    %31 = vector.load %arg9[%c0_22, %c0_23] : memref<1x16xf32, #tpu.memory_space<vmem>>, vector<1x16xf32>
    %32 = vector.broadcast %31 : vector<1x16xf32> to vector<256x16xf32>
    %33 = arith.addf %30, %32 : vector<256x16xf32>
    %c0_24 = arith.constant 0 : index
    %c0_25 = arith.constant 0 : index
    %c0_26 = arith.constant 0 : index
    %34 = vector.load %arg10[%c0_24, %c0_25, %c0_26] : memref<1x256x16xf32, #tpu.memory_space<vmem>>, vector<1x256x16xf32>
    %35 = vector.shape_cast %34 : vector<1x256x16xf32> to vector<256x16xf32>
    %36 = arith.addf %33, %35 : vector<256x16xf32>
    %c0_27 = arith.constant 0 : index
    %c0_28 = arith.constant 0 : index
    %c0_29 = arith.constant 0 : index
    %37 = vector.load %arg11[%c0_27, %c0_28, %c0_29] : memref<1x256x16xf32, #tpu.memory_space<vmem>>, vector<1x256x16xf32>
    %38 = vector.shape_cast %37 : vector<1x256x16xf32> to vector<256x16xf32>
    %39 = vector.shape_cast %36 : vector<256x16xf32> to vector<1x256x16xf32>
    tpu.vector_store %arg11[%c0_27, %c0_28, %c0_29], %39 {strides = array<i32>} : memref<1x256x16xf32, #tpu.memory_space<vmem>>, vector<1x256x16xf32>,
    return
  }
  func.func @transform_0(%arg0: i32) -> (i32, i32, i32) {
    %c0_i32 = arith.constant 0 : i32
    %c0_i32_0 = arith.constant 0 : i32
    %c0_i32_1 = arith.constant 0 : i32
    return %arg0, %c0_i32, %c0_i32_0 : i32, i32, i32
  }
  func.func @transform_1(%arg0: i32) -> (i32, i32, i32) {
    %c0_i32 = arith.constant 0 : i32
    %c0_i32_0 = arith.constant 0 : i32
    %c0_i32_1 = arith.constant 0 : i32
    return %arg0, %c0_i32, %c0_i32_0 : i32, i32, i32
  }
  func.func @transform_2(%arg0: i32) -> (i32, i32, i32) {
    %c0_i32 = arith.constant 0 : i32
    %c0_i32_0 = arith.constant 0 : i32
    %c0_i32_1 = arith.constant 0 : i32
    return %arg0, %c0_i32, %c0_i32_0 : i32, i32, i32
  }
  func.func @transform_3(%arg0: i32) -> (i32, i32) {
    %c0_i32 = arith.constant 0 : i32
    %c0_i32_0 = arith.constant 0 : i32
    %c0_i32_1 = arith.constant 0 : i32
    return %c0_i32, %c0_i32_0 : i32, i32
  }
  func.func @transform_4(%arg0: i32) -> (i32, i32) {
    %c0_i32 = arith.constant 0 : i32
    %c0_i32_0 = arith.constant 0 : i32
    %c0_i32_1 = arith.constant 0 : i32
    return %c0_i32, %c0_i32_0 : i32, i32
  }
  func.func @transform_5(%arg0: i32) -> (i32, i32) {
    %c0_i32 = arith.constant 0 : i32
    %c0_i32_0 = arith.constant 0 : i32
    %c0_i32_1 = arith.constant 0 : i32
    return %c0_i32, %c0_i32_0 : i32, i32
  }
  func.func @transform_6(%arg0: i32) -> (i32, i32) {
    %c0_i32 = arith.constant 0 : i32
    %c0_i32_0 = arith.constant 0 : i32
    %c0_i32_1 = arith.constant 0 : i32
    return %c0_i32, %c0_i32_0 : i32, i32
  }
  func.func @transform_7(%arg0: i32) -> (i32, i32) {
    %c0_i32 = arith.constant 0 : i32
    %c0_i32_0 = arith.constant 0 : i32
    %c0_i32_1 = arith.constant 0 : i32
    return %c0_i32, %c0_i32_0 : i32, i32
  }
  func.func @transform_8(%arg0: i32) -> (i32, i32) {
    %c0_i32 = arith.constant 0 : i32
    %c0_i32_0 = arith.constant 0 : i32
    %c0_i32_1 = arith.constant 0 : i32
    return %c0_i32, %c0_i32_0 : i32, i32
  }
  func.func @transform_9(%arg0: i32) -> (i32, i32, i32) {
    %c0_i32 = arith.constant 0 : i32
    %c0_i32_0 = arith.constant 0 : i32
    %c0_i32_1 = arith.constant 0 : i32
    return %arg0, %c0_i32, %c0_i32_0 : i32, i32, i32
  }
  func.func @transform_10(%arg0: i32) -> (i32, i32, i32) {
    %c0_i32 = arith.constant 0 : i32
    %c0_i32_0 = arith.constant 0 : i32
    %c0_i32_1 = arith.constant 0 : i32
    return %arg0, %c0_i32, %c0_i32_0 : i32, i32, i32
  }
}

module attributes {stable_mosaic.version = 11 : i64} {
  func.func @_aib_tail_kernel(%arg0: i32, %arg1: memref<256x16xbf16, #tpu.memory_space<vmem>>, %arg2: memref<256x16xbf16, #tpu.memory_space<vmem>>, %arg3: memref<16x8xbf16, #tpu.memory_space<vmem>>, %arg4: memref<16x8xbf16, #tpu.memory_space<vmem>>, %arg5: memref<1x8xf32, #tpu.memory_space<vmem>>, %arg6: memref<256x8xf32, #tpu.memory_space<vmem>>, %arg7: memref<256x8xf32, #tpu.memory_space<vmem>>) attributes {dimension_semantics = [#tpu.dimension_semantics<parallel>], iteration_bounds = array<i64: 2>, scalar_prefetch = 0 : i64, scratch_operands = 0 : i64, tpu.core_type = #tpu.core_type<tc>, window_params = [{transform_indices = @transform_0, window_bounds = array<i64: 256, 16>}, {transform_indices = @transform_1, window_bounds = array<i64: 256, 16>}, {pipeline_mode = #tpu.pipeline_mode<synchronous>, transform_indices = @transform_2, window_bounds = array<i64: 16, 8>}, {pipeline_mode = #tpu.pipeline_mode<synchronous>, transform_indices = @transform_3, window_bounds = array<i64: 16, 8>}, {pipeline_mode = #tpu.pipeline_mode<synchronous>, transform_indices = @transform_4, window_bounds = array<i64: 1, 8>}, {transform_indices = @transform_5, window_bounds = array<i64: 256, 8>}, {transform_indices = @transform_6, window_bounds = array<i64: 256, 8>}]} {
    %c0 = arith.constant 0 : index
    %c0_0 = arith.constant 0 : index
    %0 = vector.load %arg1[%c0, %c0_0] : memref<256x16xbf16, #tpu.memory_space<vmem>>, vector<256x16xbf16>
    %c0_1 = arith.constant 0 : index
    %c0_2 = arith.constant 0 : index
    %1 = vector.load %arg3[%c0_1, %c0_2] : memref<16x8xbf16, #tpu.memory_space<vmem>>, vector<16x8xbf16>
    %cst = arith.constant dense<0.000000e+00> : vector<256x8xf32>
    %2 = tpu.matmul %0, %1, %cst {dimension_numbers = #tpu.dot_dimension_numbers<[1], [0], [0], [1], [0, 0, 1, 1], [], []>} : vector<256x16xbf16>, vector<16x8xbf16>, vector<256x8xf32> -> vector<256x8xf32>
    %c0_3 = arith.constant 0 : index
    %c0_4 = arith.constant 0 : index
    %3 = vector.load %arg2[%c0_3, %c0_4] : memref<256x16xbf16, #tpu.memory_space<vmem>>, vector<256x16xbf16>
    %c0_5 = arith.constant 0 : index
    %c0_6 = arith.constant 0 : index
    %4 = vector.load %arg4[%c0_5, %c0_6] : memref<16x8xbf16, #tpu.memory_space<vmem>>, vector<16x8xbf16>
    %cst_7 = arith.constant dense<0.000000e+00> : vector<256x8xf32>
    %5 = tpu.matmul %3, %4, %cst_7 {dimension_numbers = #tpu.dot_dimension_numbers<[1], [0], [0], [1], [0, 0, 1, 1], [], []>} : vector<256x16xbf16>, vector<16x8xbf16>, vector<256x8xf32> -> vector<256x8xf32>
    %6 = arith.addf %2, %5 : vector<256x8xf32>
    %c0_8 = arith.constant 0 : index
    %c0_9 = arith.constant 0 : index
    %7 = vector.load %arg5[%c0_8, %c0_9] : memref<1x8xf32, #tpu.memory_space<vmem>>, vector<1x8xf32>
    %8 = vector.broadcast %7 : vector<1x8xf32> to vector<256x8xf32>
    %9 = arith.addf %6, %8 : vector<256x8xf32>
    %c0_10 = arith.constant 0 : index
    %c0_11 = arith.constant 0 : index
    %10 = vector.load %arg6[%c0_10, %c0_11] : memref<256x8xf32, #tpu.memory_space<vmem>>, vector<256x8xf32>
    %11 = arith.addf %9, %10 : vector<256x8xf32>
    %c0_12 = arith.constant 0 : index
    %c0_13 = arith.constant 0 : index
    %12 = vector.load %arg7[%c0_12, %c0_13] : memref<256x8xf32, #tpu.memory_space<vmem>>, vector<256x8xf32>
    tpu.vector_store %arg7[%c0_12, %c0_13], %11 {strides = array<i32>} : memref<256x8xf32, #tpu.memory_space<vmem>>, vector<256x8xf32>,
    return
  }
  func.func @transform_0(%arg0: i32) -> (i32, i32) {
    %c0_i32 = arith.constant 0 : i32
    %c0_i32_0 = arith.constant 0 : i32
    return %arg0, %c0_i32 : i32, i32
  }
  func.func @transform_1(%arg0: i32) -> (i32, i32) {
    %c0_i32 = arith.constant 0 : i32
    %c0_i32_0 = arith.constant 0 : i32
    return %arg0, %c0_i32 : i32, i32
  }
  func.func @transform_2(%arg0: i32) -> (i32, i32) {
    %c0_i32 = arith.constant 0 : i32
    %c0_i32_0 = arith.constant 0 : i32
    %c0_i32_1 = arith.constant 0 : i32
    return %c0_i32, %c0_i32_0 : i32, i32
  }
  func.func @transform_3(%arg0: i32) -> (i32, i32) {
    %c0_i32 = arith.constant 0 : i32
    %c0_i32_0 = arith.constant 0 : i32
    %c0_i32_1 = arith.constant 0 : i32
    return %c0_i32, %c0_i32_0 : i32, i32
  }
  func.func @transform_4(%arg0: i32) -> (i32, i32) {
    %c0_i32 = arith.constant 0 : i32
    %c0_i32_0 = arith.constant 0 : i32
    %c0_i32_1 = arith.constant 0 : i32
    return %c0_i32, %c0_i32_0 : i32, i32
  }
  func.func @transform_5(%arg0: i32) -> (i32, i32) {
    %c0_i32 = arith.constant 0 : i32
    %c0_i32_0 = arith.constant 0 : i32
    return %arg0, %c0_i32 : i32, i32
  }
  func.func @transform_6(%arg0: i32) -> (i32, i32) {
    %c0_i32 = arith.constant 0 : i32
    %c0_i32_0 = arith.constant 0 : i32
    return %arg0, %c0_i32 : i32, i32
  }
}

</mosaic_0001>

<bundles_post_ra>
// kernel: aib_forward.11
= control target key start
LH: loop header
LB: loop body
LE: loop exit
PB: predicated region body
PF: predicated region fallthrough
CT: control target
= control target key end

     0   :  { %s1109_s12 = smov 0   ;;  %s1363_s0 = inlined_call_operand.vmem [shape: bf16[512,200], index: 0, kind: input, shape index: {}]   ;;  %s1364_s1 = inlined_call_operand.vmem [shape: bf16[200,16], index: 1, kind: input, shape index: {}]   ;;  %s1365_s2 = inlined_call_operand.vmem [shape: f32[1,16], index: 2, kind: input, shape index: {}]   ;;  %s1366_s3 = inlined_call_operand.vmem [shape: f32[512,16], index: 3, kind: output, shape index: {}]  }
   0x1 LB: > { %s810_s13 = sadd.s32 4294967295, %s1087_s12   ;;  %p814_p0 = scmp.ge.s32.totalorder %s1087_s12, 1  ;;  %s1087_s12 = sphi %s1109_s12, %s13_s12  }
   0x2   : > { %p139_p1 = scmp.lt.s32.totalorder %s1087_s12, 3 }
   0x4   : > { %p140_p2 = pnand %p814_p0, %p139_p1 }
   0x5   : > { %s815_s18 = sshll.u32 (!%p140_p2), %s810_s13, 5 }
   0x6   : > { %143 = sbr.rel (%p140_p2) target bundleno = 304 (0x130), region = 32  ;;  %p165_p3 = scmp.lt.s32.totalorder (!%p140_p2), %s815_s18, 63 }
   0xb   : > { %v1054_v0 = vld [vmem:[%s1364_s1 + $0x38] sm:$0xff]  ;;  %v234_v1 = vld [vmem:[%s1364_s1 + $0x60] sm:$0xf]  ;;  %vm507_vm0 = vcmask 1043456   ;;  %v1053_v3 = vld [vmem:[%s1364_s1 + $0x30] sm:$0xff]  ;;  %s1368_s18 = smov (!%p165_p3, %s815_s18), 63 }
   0xc   : > { %v432_v2 = vunpack.c.l.b16 %v234_v1  ;;  %511 = vmatpush.bf16.msra.mxu0 %v1054_v0  ;;  %1059 = vmatpush.bf16.msra.mxu2 %v1054_v0  ;;  %v1058_v6 = vld [vmem:[%s1364_s1 + $0x58] sm:$0xff]  ;;  %v1052_v7 = vld [vmem:[%s1364_s1 + $0x28] sm:$0xff]  ;;  %v1057_v8 = vld [vmem:[%s1364_s1 + $0x50] sm:$0xff]  ;;  %s1014_s29 = sshll.u32 %s1368_s18, 3  ;;  %vm458_vm1 = vcmask 588800   ;;  %vm721_vm2 = vcmask 130048  }
   0xd   : > { %v1051_v9 = vld [vmem:[%s1364_s1 + $0x20] sm:$0xff]  ;;  %v1056_v10 = vld [vmem:[%s1364_s1 + $0x48] sm:$0xff]  ;;  %v1050_v11 = vld [vmem:[%s1364_s1 + $0x18] sm:$0xff]  ;;  %s1152_s9 = scalar_lea.vmem %s1363_s0, %s1014_s29  ;;  %s1257_s24 = scalar_lea.vmem %s1366_s3, %s1014_s29 }
   0xe   : > { %v445_v4 = vpack.c.b16 %v432_v2, %v432_v2  ;;  %v1055_v12 = vld [vmem:[%s1364_s1 + $0x40] sm:$0xff]  ;;  %v1049_v13 = vld [vmem:[%s1364_s1 + $0x10] sm:$0xff]  ;;  %v824_v15 = vld [vmem:[%s1152_s9 + $0x8] sm:$0xf0] }
   0xf   : > { %v1015_v14 = vld [vmem:[%s1152_s9 + $0x4] sm:$0xf]  ;;  %v1033_v16 = vld [vmem:[%s1152_s9 + $0x94] sm:$0xf]  ;;  %v896_v17 = vld [vmem:[%s1152_s9 + $0x98] sm:$0xf0] }
  0x10   : > { %v509_v5 = vsel %vm507_vm0, %v445_v4, 0  ;;  %512 = vmatpush.bf16.msra.mxu0 %v1053_v3  ;;  %1060 = vmatpush.bf16.msra.mxu2 %v1053_v3  ;;  %v827_v18 = vor.u32 %v1015_v14, %v824_v15  ;;  %v1048_v19 = vld [vmem:[%s1364_s1 + $0x8] sm:$0xff]  ;;  %v899_v20 = vor.u32 %v1033_v16, %v896_v17  ;;  %v1047_v21 = vld [vmem:[%s1364_s1] sm:$0xff]  ;;  %v1017_v28 = vld [vmem:[%s1152_s9 + $0x14] sm:$0xf] }
  0x11   : > { %603 = vmatpush.bf16.msra.mxu1 %v509_v5  ;;  %1067 = vmatpush.bf16.msra.mxu3 %v509_v5  ;;  %v822_v22 = vld [vmem:[%s1152_s9] sm:$0xf]  ;;  %v1016_v23 = vld [vmem:[%s1152_s9 + $0x4] sm:$0xf0]  ;;  %v832_v29 = vld [vmem:[%s1152_s9 + $0x18] sm:$0xf0] }
  0x12   : > { %v886_v24 = vld [vmem:[%s1152_s9 + $0x80] sm:$0xf]  ;;  %v1032_v25 = vld [vmem:[%s1152_s9 + $0x84] sm:$0xf0]  ;;  %v823_v26 = vor.u32 %v1016_v23, %v822_v22  ;;  %v1035_v30 = vld [vmem:[%s1152_s9 + $0xa4] sm:$0xf]  ;;  %v835_v32 = vor.u32 %v1017_v28, %v832_v29 }
  0x13   : > { %v887_v27 = vor.u32 %v1032_v25, %v886_v24  ;;  %v904_v31 = vld [vmem:[%s1152_s9 + $0xa8] sm:$0xf0]  ;;  %v830_v34 = vld [vmem:[%s1152_s9 + $0x10] sm:$0xf]  ;;  %v1018_v35 = vld [vmem:[%s1152_s9 + $0x14] sm:$0xf0] }
  0x14   : > { %513 = vmatpush.bf16.msra.mxu0 %v1052_v7  ;;  %1061 = vmatpush.bf16.msra.mxu2 %v1052_v7  ;;  %v907_v33 = vor.u32 %v1035_v30, %v904_v31  ;;  %v894_v36 = vld [vmem:[%s1152_s9 + $0x90] sm:$0xf]  ;;  %v1034_v37 = vld [vmem:[%s1152_s9 + $0x94] sm:$0xf0]  ;;  %v831_v38 = vor.u32 %v1018_v35, %v830_v34  ;;  %v1019_v40 = vld [vmem:[%s1152_s9 + $0x24] sm:$0xf] }
  0x15   : > { %604 = vmatpush.bf16.msra.mxu1 %v1058_v6  ;;  %1068 = vmatpush.bf16.msra.mxu3 %v1058_v6  ;;  %v895_v39 = vor.u32 %v1034_v37, %v894_v36  ;;  %v840_v41 = vld [vmem:[%s1152_s9 + $0x28] sm:$0xf0]  ;;  %v1037_v42 = vld [vmem:[%s1152_s9 + $0xb4] sm:$0xf]  ;;  %v912_v43 = vld [vmem:[%s1152_s9 + $0xb8] sm:$0xf0] }
  0x16   : > { %v843_v44 = vor.u32 %v1019_v40, %v840_v41  ;;  %v915_v45 = vor.u32 %v1037_v42, %v912_v43  ;;  %v838_v46 = vld [vmem:[%s1152_s9 + $0x20] sm:$0xf]  ;;  %v1020_v47 = vld [vmem:[%s1152_s9 + $0x24] sm:$0xf0]  ;;  %v1021_v52 = vld [vmem:[%s1152_s9 + $0x34] sm:$0xf] }
  0x17   : > { %v902_v48 = vld [vmem:[%s1152_s9 + $0xa0] sm:$0xf]  ;;  %v1036_v49 = vld [vmem:[%s1152_s9 + $0xa4] sm:$0xf0]  ;;  %v839_v50 = vor.u32 %v1020_v47, %v838_v46  ;;  %v848_v53 = vld [vmem:[%s1152_s9 + $0x38] sm:$0xf0] }
  0x18   : > { %514 = vmatpush.bf16.msra.mxu0 %v1051_v9  ;;  %1062 = vmatpush.bf16.msra.mxu2 %v1051_v9  ;;  %v903_v51 = vor.u32 %v1036_v49, %v902_v48  ;;  %v1039_v54 = vld [vmem:[%s1152_s9 + $0xc4] sm:$0xf]  ;;  %v920_v55 = vld [vmem:[%s1152_s9 + $0xc8] sm:$0xf0]  ;;  %v851_v56 = vor.u32 %v1021_v52, %v848_v53  ;;  %v846_v58 = vld [vmem:[%s1152_s9 + $0x30] sm:$0xf] }
  0x19   : > { %605 = vmatpush.bf16.msra.mxu1 %v1057_v8  ;;  %1069 = vmatpush.bf16.msra.mxu3 %v1057_v8  ;;  %v923_v57 = vor.u32 %v1039_v54, %v920_v55  ;;  %v1022_v59 = vld [vmem:[%s1152_s9 + $0x34] sm:$0xf0]  ;;  %v910_v60 = vld [vmem:[%s1152_s9 + $0xb0] sm:$0xf]  ;;  %v1023_v0 = vld [vmem:[%s1152_s9 + $0x44] sm:$0xf] }
  0x1a   : > { %v1038_v61 = vld [vmem:[%s1152_s9 + $0xb4] sm:$0xf0]  ;;  %v847_v62 = vor.u32 %v1022_v59, %v846_v58  ;;  %v856_v1 = vld [vmem:[%s1152_s9 + $0x48] sm:$0xf0]  ;;  %v1041_v2 = vld [vmem:[%s1152_s9 + $0xd4] sm:$0xf] }
  0x1b   : > { %v911_v63 = vor.u32 %v1038_v61, %v910_v60  ;;  %v928_v3 = vld [vmem:[%s1152_s9 + $0xd8] sm:$0xf0]  ;;  %v859_v4 = vor.u32 %v1023_v0, %v856_v1  ;;  %v854_v6 = vld [vmem:[%s1152_s9 + $0x40] sm:$0xf]  ;;  %v1024_v7 = vld [vmem:[%s1152_s9 + $0x44] sm:$0xf0] }
  0x1c   : > { %515 = vmatpush.bf16.msra.mxu0 %v1050_v11  ;;  %1063 = vmatpush.bf16.msra.mxu2 %v1050_v11  ;;  %v931_v5 = vor.u32 %v1041_v2, %v928_v3  ;;  %v918_v8 = vld [vmem:[%s1152_s9 + $0xc0] sm:$0xf]  ;;  %v1040_v9 = vld [vmem:[%s1152_s9 + $0xc4] sm:$0xf0]  ;;  %v1043_v14 = vld [vmem:[%s1152_s9 + $0xe4] sm:$0xf] }
  0x1d   : > { %606 = vmatpush.bf16.msra.mxu1 %v1056_v10  ;;  %1070 = vmatpush.bf16.msra.mxu3 %v1056_v10  ;;  %v855_v10 = vor.u32 %v1024_v7, %v854_v6  ;;  %v919_v11 = vor.u32 %v1040_v9, %v918_v8  ;;  %v936_v15 = vld [vmem:[%s1152_s9 + $0xe8] sm:$0xf0]  ;;  %v1027_v24 = vld [vmem:[%s1152_s9 + $0x64] sm:$0xf]  ;;  %v870_v30 = vld [vmem:[%s1152_s9 + $0x60] sm:$0xf] }
  0x1e   : > { %v939_v17 = vor.u32 %v1043_v14, %v936_v15  ;;  %v872_v25 = vld [vmem:[%s1152_s9 + $0x68] sm:$0xf0]  ;;  %v1028_v31 = vld [vmem:[%s1152_s9 + $0x64] sm:$0xf0]  ;;  %v1029_v36 = vld [vmem:[%s1152_s9 + $0x74] sm:$0xf] }
  0x1f   : > { %v875_v28 = vor.u32 %v1027_v24, %v872_v25  ;;  %v871_v34 = vor.u32 %v1028_v31, %v870_v30  ;;  %v880_v37 = vld [vmem:[%s1152_s9 + $0x78] sm:$0xf0]  ;;  %v1030_v40 = vld [vmem:[%s1152_s9 + $0x74] sm:$0xf0]  ;;  %v942_v41 = vld [vmem:[%s1152_s9 + $0xf0] sm:$0xf] }
  0x20   : > { %516 = vmatpush.bf16.msra.mxu0 %v1049_v13  ;;  %1064 = vmatpush.bf16.msra.mxu2 %v1049_v13  ;;  %v864_v13 = vld [vmem:[%s1152_s9 + $0x58] sm:$0xf0]  ;;  %v1046_v42 = vld [vmem:[%s1152_s9 + $0xf4] sm:$0xf0]  ;;  %v888_v46 = vld [vmem:[%s1152_s9 + $0x88] sm:$0xf0] }
  0x21   : > { %607 = vmatpush.bf16.msra.mxu1 %v1055_v12  ;;  %1071 = vmatpush.bf16.msra.mxu3 %v1055_v12  ;;  %v1025_v12 = vld [vmem:[%s1152_s9 + $0x54] sm:$0xf]  ;;  %v1249_v49 = vld [vmem:[%s1365_s2] ss:$0 sm:$0xff] }
  0x22   : > { %v867_v16 = vor.u32 %v1025_v12, %v864_v13 }
  0x24   : > { %996 = vmatmul.msk.bf16.vlgmr.msra.gmra.mxu1 %vm458_vm1, %v827_v18  ;;  %517 = vmatpush.bf16.msra.mxu0 %v1048_v19  ;;  %v862_v18 = vld [vmem:[%s1152_s9 + $0x50] sm:$0xf] }
  0x25   : > { %1005 = vmatmul.msk.bf16.vlgmr.msra.gmra.mxu3 %vm458_vm1, %v899_v20  ;;  %1065 = vmatpush.bf16.msra.mxu2 %v1048_v19  ;;  %v1026_v19 = vld [vmem:[%s1152_s9 + $0x54] sm:$0xf0]  ;;  %v926_v20 = vld [vmem:[%s1152_s9 + $0xd0] sm:$0xf] }
  0x26   : > { %v863_v22 = vor.u32 %v1026_v19, %v862_v18 }
  0x28   : > { %518 = vmatpush.bf16.msra.mxu0 %v1047_v21 }
  0x29   : > { %1066 = vmatpush.bf16.msra.mxu2 %v1047_v21  ;;  %v1042_v21 = vld [vmem:[%s1152_s9 + $0xd4] sm:$0xf0] }
  0x2a   : > { %v927_v23 = vor.u32 %v1042_v21, %v926_v20 }
  0x2b   : > { %519 = vmatmul.bf16.vlgmr.msra.gmra.mxu0 %v823_v26  ;;  %v1045_v26 = vld [vmem:[%s1152_s9 + $0xf4] sm:$0xf] }
  0x2c   : > { %559 = vmatmul.bf16.vlgmr.msra.gmra.mxu2 %v887_v27  ;;  %v944_v27 = vld [vmem:[%s1152_s9 + $0xf8] sm:$0xf0] }
  0x2d   : > { %v947_v29 = vor.u32 %v1045_v26, %v944_v27 }
  0x34   : > { %997 = vmatmul.msk.bf16.gmra.mxu1 %vm458_vm1, %v835_v32  ;;  %v934_v32 = vld [vmem:[%s1152_s9 + $0xe0] sm:$0xf] }
  0x35   : > { %1006 = vmatmul.msk.bf16.gmra.mxu3 %vm458_vm1, %v907_v33  ;;  %v1044_v33 = vld [vmem:[%s1152_s9 + $0xe4] sm:$0xf0] }
  0x36   : > { %v935_v35 = vor.u32 %v1044_v33, %v934_v32 }
  0x3b   : > { %524 = vmatmul.bf16.gmra.mxu0 %v831_v38  ;;  %v883_v38 = vor.u32 %v1029_v36, %v880_v37 }
  0x3c   : > { %564 = vmatmul.bf16.gmra.mxu2 %v895_v39  ;;  %v878_v39 = vld [vmem:[%s1152_s9 + $0x70] sm:$0xf] }
  0x3d   : > { %v879_v43 = vor.u32 %v1030_v40, %v878_v39 }
  0x44   : > { %998 = vmatmul.msk.bf16.gmra.mxu1 %vm458_vm1, %v843_v44  ;;  %v943_v44 = vor.u32 %v1046_v42, %v942_v41 }
  0x45   : > { %1007 = vmatmul.msk.bf16.gmra.mxu3 %vm458_vm1, %v915_v45  ;;  %v1031_v45 = vld [vmem:[%s1152_s9 + $0x84] sm:$0xf] }
  0x46   : > { %v891_v47 = vor.u32 %v1031_v45, %v888_v46 }
  0x4b   : > { %529 = vmatmul.bf16.gmra.mxu0 %v839_v50 }
  0x4c   : > { %569 = vmatmul.bf16.gmra.mxu2 %v903_v51 }
  0x54   : > { %999 = vmatmul.msk.bf16.gmra.mxu1 %vm458_vm1, %v851_v56 }
  0x55   : > { %1008 = vmatmul.msk.bf16.gmra.mxu3 %vm458_vm1, %v923_v57 }
  0x5b   : > { %534 = vmatmul.bf16.gmra.mxu0 %v847_v62 }
  0x5c   : > { %574 = vmatmul.bf16.gmra.mxu2 %v911_v63 }
  0x64   : > { %1000 = vmatmul.msk.bf16.gmra.mxu1 %vm458_vm1, %v859_v4 }
  0x65   : > { %1009 = vmatmul.msk.bf16.gmra.mxu3 %vm458_vm1, %v931_v5 }
  0x6b   : > { %539 = vmatmul.bf16.gmra.mxu0 %v855_v10 }
  0x6c   : > { %579 = vmatmul.bf16.gmra.mxu2 %v919_v11 }
  0x74   : > { %1001 = vmatmul.msk.bf16.gmra.mxu1 %vm458_vm1, %v867_v16 }
  0x75   : > { %1010 = vmatmul.msk.bf16.gmra.mxu3 %vm458_vm1, %v939_v17 }
  0x7b   : > { %544 = vmatmul.bf16.gmra.mxu0 %v863_v22 }
  0x7c   : > { %584 = vmatmul.bf16.gmra.mxu2 %v927_v23 }
  0x84   : > { %1002 = vmatmul.msk.bf16.gmra.mxu1 %vm458_vm1, %v875_v28 }
  0x85   : > { %1011 = vmatmul.msk.bf16.gmra.mxu3 %vm458_vm1, %v947_v29 }
  0x8b   : > { %549 = vmatmul.bf16.gmra.mxu0 %v871_v34 }
  0x8c   : > { %589 = vmatmul.bf16.gmra.mxu2 %v935_v35 }
  0x94   : > { %1003 = vmatmul.msk.bf16.gmra.mxu1 %vm458_vm1, %v883_v38 }
  0x9b   : > { %554 = vmatmul.bf16.gmra.mxu0 %v879_v43 }
  0x9c   : > { %594 = vmatmul.bf16.gmra.mxu2 %v943_v44 }
  0xa1   : > { %v609_v48 = vpop.f32.mrf.mxu1 }
  0xa4   : > { %1004 = vmatmul.msk.bf16.gmra.mxu1 %vm458_vm1, %v891_v47 }
  0xa8   : > { %v654_v50 = vpop.f32.mrf.mxu3  ;;  %v520_v52 = vpop.f32.mrf.mxu0 }
  0xa9   : > { %v611_v51 = vpop.f32.mrf.mxu1  ;;  %v521_v53 = vadd.f32 %v1249_v49, %v520_v52 }
  0xab   : > { %v610_v54 = vadd.f32 %v609_v48, %v521_v53 }
  0xad   : > { %v689_v55 = vmax.f32 %v610_v54, 0.0 }
  0xaf   : > { %722 = vst.msk [vmem:[%s1257_s24] sm:$0xff] %vm721_vm2, %v689_v55  ;;  %v1261_v56 = vpop.f32.mrf.mxu2 }
  0xb0   : > { %v522_v58 = vpop.f32.mrf.mxu0  ;;  %v656_v60 = vpop.f32.mrf.mxu3 }
  0xb1   : > { %v614_v57 = vpop.f32.mrf.mxu1  ;;  %v523_v59 = vadd.f32 %v1249_v49, %v522_v58 }
  0xb3   : > { %v612_v61 = vadd.f32 %v611_v51, %v523_v59 }
  0xb5   : > { %v690_v62 = vmax.f32 %v612_v61, 0.0 }
  0xb7   : > { %723 = vst.msk [vmem:[%s1257_s24 + $0x8] sm:$0xff] %vm721_vm2, %v690_v62  ;;  %v1266_v63 = vpop.f32.mrf.mxu2 }
  0xb8   : > { %v525_v1 = vpop.f32.mrf.mxu0  ;;  %v659_v4 = vpop.f32.mrf.mxu3 }
  0xb9   : > { %v616_v0 = vpop.f32.mrf.mxu1  ;;  %v526_v2 = vadd.f32 %v1249_v49, %v525_v1 }
  0xbb   : > { %v615_v3 = vadd.f32 %v614_v57, %v526_v2 }
  0xbd   : > { %v691_v5 = vmax.f32 %v615_v3, 0.0 }
  0xbf   : > { %724 = vst.msk [vmem:[%s1257_s24 + $0x10] sm:$0xff] %vm721_vm2, %v691_v5  ;;  %v565_v6 = vpop.f32.mrf.mxu2 }
  0xc0   : > { %v566_v7 = vadd.f32 %v1249_v49, %v565_v6  ;;  %v527_v9 = vpop.f32.mrf.mxu0  ;;  %v661_v15 = vpop.f32.mrf.mxu3 }
  0xc1   : > { %v619_v8 = vpop.f32.mrf.mxu1  ;;  %v528_v10 = vadd.f32 %v1249_v49, %v527_v9 }
  0xc2   : > { %v655_v11 = vadd.f32 %v654_v50, %v566_v7 }
  0xc3   : > { %v617_v12 = vadd.f32 %v616_v0, %v528_v10 }
  0xc4   : > { %v707_v13 = vmax.f32 %v655_v11, 0.0 }
  0xc5   : > { %v692_v14 = vmax.f32 %v617_v12, 0.0 }
  0xc6   : > { %740 = vst.msk [vmem:[%s1257_s24 + $0x90] sm:$0xff] %vm721_vm2, %v707_v13 }
  0xc7   : > { %725 = vst.msk [vmem:[%s1257_s24 + $0x18] sm:$0xff] %vm721_vm2, %v692_v14  ;;  %v567_v16 = vpop.f32.mrf.mxu2 }
  0xc8   : > { %v568_v17 = vadd.f32 %v1249_v49, %v567_v16  ;;  %v530_v19 = vpop.f32.mrf.mxu0  ;;  %v664_v26 = vpop.f32.mrf.mxu3 }
  0xc9   : > { %v621_v18 = vpop.f32.mrf.mxu1  ;;  %v531_v20 = vadd.f32 %v1249_v49, %v530_v19 }
  0xca   : > { %v657_v21 = vadd.f32 %v656_v60, %v568_v17 }
  0xcb   : > { %v620_v22 = vadd.f32 %v619_v8, %v531_v20 }
  0xcc   : > { %v708_v23 = vmax.f32 %v657_v21, 0.0 }
  0xcd   : > { %v693_v24 = vmax.f32 %v620_v22, 0.0 }
  0xce   : > { %741 = vst.msk [vmem:[%s1257_s24 + $0x98] sm:$0xff] %vm721_vm2, %v708_v23 }
  0xcf   : > { %726 = vst.msk [vmem:[%s1257_s24 + $0x20] sm:$0xff] %vm721_vm2, %v693_v24  ;;  %v570_v25 = vpop.f32.mrf.mxu2 }
  0xd0   : > { %v571_v27 = vadd.f32 %v1249_v49, %v570_v25  ;;  %v532_v29 = vpop.f32.mrf.mxu0  ;;  %v666_v40 = vpop.f32.mrf.mxu3 }
  0xd1   : > { %v624_v28 = vpop.f32.mrf.mxu1  ;;  %v533_v30 = vadd.f32 %v1249_v49, %v532_v29 }
  0xd2   : > { %v660_v31 = vadd.f32 %v659_v4, %v571_v27 }
  0xd3   : > { %v622_v32 = vadd.f32 %v621_v18, %v533_v30 }
  0xd4   : > { %v709_v33 = vmax.f32 %v660_v31, 0.0 }
  0xd5   : > { %v694_v34 = vmax.f32 %v622_v32, 0.0 }
  0xd6   : > { %742 = vst.msk [vmem:[%s1257_s24 + $0xa0] sm:$0xff] %vm721_vm2, %v709_v33 }
  0xd7   : > { %727 = vst.msk [vmem:[%s1257_s24 + $0x28] sm:$0xff] %vm721_vm2, %v694_v34  ;;  %v572_v35 = vpop.f32.mrf.mxu2 }
  0xd8   : > { %v573_v36 = vadd.f32 %v1249_v49, %v572_v35  ;;  %v535_v38 = vpop.f32.mrf.mxu0  ;;  %v669_v53 = vpop.f32.mrf.mxu3 }
  0xd9   : > { %v626_v37 = vpop.f32.mrf.mxu1  ;;  %v536_v39 = vadd.f32 %v1249_v49, %v535_v38 }
  0xda   : > { %v662_v41 = vadd.f32 %v661_v15, %v573_v36 }
  0xdb   : > { %v625_v42 = vadd.f32 %v624_v28, %v536_v39 }
  0xdc   : > { %v710_v43 = vmax.f32 %v662_v41, 0.0 }
  0xdd   : > { %v695_v44 = vmax.f32 %v625_v42, 0.0 }
  0xde   : > { %743 = vst.msk [vmem:[%s1257_s24 + $0xa8] sm:$0xff] %vm721_vm2, %v710_v43 }
  0xdf   : > { %728 = vst.msk [vmem:[%s1257_s24 + $0x30] sm:$0xff] %vm721_vm2, %v695_v44  ;;  %v575_v45 = vpop.f32.mrf.mxu2 }
  0xe0   : > { %v576_v46 = vadd.f32 %v1249_v49, %v575_v45  ;;  %v537_v48 = vpop.f32.mrf.mxu0  ;;  %v671_v3 = vpop.f32.mrf.mxu3 }
  0xe1   : > { %v629_v47 = vpop.f32.mrf.mxu1  ;;  %v538_v50 = vadd.f32 %v1249_v49, %v537_v48 }
  0xe2   : > { %v665_v51 = vadd.f32 %v664_v26, %v576_v46 }
  0xe3   : > { %v627_v52 = vadd.f32 %v626_v37, %v538_v50 }
  0xe4   : > { %v711_v54 = vmax.f32 %v665_v51, 0.0 }
  0xe5   : > { %v696_v55 = vmax.f32 %v627_v52, 0.0 }
  0xe6   : > { %744 = vst.msk [vmem:[%s1257_s24 + $0xb0] sm:$0xff] %vm721_vm2, %v711_v54 }
  0xe7   : > { %729 = vst.msk [vmem:[%s1257_s24 + $0x38] sm:$0xff] %vm721_vm2, %v696_v55  ;;  %v577_v57 = vpop.f32.mrf.mxu2 }
  0xe8   : > { %v578_v58 = vadd.f32 %v1249_v49, %v577_v57  ;;  %v540_v60 = vpop.f32.mrf.mxu0  ;;  %v674_v14 = vpop.f32.mrf.mxu3 }
  0xe9   : > { %v631_v59 = vpop.f32.mrf.mxu1  ;;  %v541_v61 = vadd.f32 %v1249_v49, %v540_v60 }
  0xea   : > { %v667_v62 = vadd.f32 %v666_v40, %v578_v58 }
  0xeb   : > { %v630_v0 = vadd.f32 %v629_v47, %v541_v61 }
  0xec   : > { %v712_v1 = vmax.f32 %v667_v62, 0.0 }
  0xed   : > { %v697_v2 = vmax.f32 %v630_v0, 0.0 }
  0xee   : > { %745 = vst.msk [vmem:[%s1257_s24 + $0xb8] sm:$0xff] %vm721_vm2, %v712_v1  ;;  %v561_v1 = vadd.f32 %v1249_v49, %v1261_v56 }
  0xef   : > { %730 = vst.msk [vmem:[%s1257_s24 + $0x40] sm:$0xff] %vm721_vm2, %v697_v2  ;;  %v580_v4 = vpop.f32.mrf.mxu2 }
  0xf0   : > { %v581_v5 = vadd.f32 %v1249_v49, %v580_v4  ;;  %v542_v7 = vpop.f32.mrf.mxu0  ;;  %v676_v28 = vpop.f32.mrf.mxu3 }
  0xf1   : > { %v634_v6 = vpop.f32.mrf.mxu1  ;;  %v543_v8 = vadd.f32 %v1249_v49, %v542_v7 }
  0xf2   : > { %v670_v9 = vadd.f32 %v669_v53, %v581_v5 }
  0xf3   : > { %v632_v10 = vadd.f32 %v631_v59, %v543_v8 }
  0xf4   : > { %v713_v11 = vmax.f32 %v670_v9, 0.0 }
  0xf5   : > { %v698_v12 = vmax.f32 %v632_v10, 0.0 }
  0xf6   : > { %746 = vst.msk [vmem:[%s1257_s24 + $0xc0] sm:$0xff] %vm721_vm2, %v713_v11 }
  0xf7   : > { %731 = vst.msk [vmem:[%s1257_s24 + $0x48] sm:$0xff] %vm721_vm2, %v698_v12  ;;  %v582_v13 = vpop.f32.mrf.mxu2 }
  0xf8   : > { %v583_v15 = vadd.f32 %v1249_v49, %v582_v13  ;;  %v545_v17 = vpop.f32.mrf.mxu0  ;;  %v679_v40 = vpop.f32.mrf.mxu3  ;;  %v563_v13 = vadd.f32 %v1249_v49, %v1266_v63 }
  0xf9   : > { %v636_v16 = vpop.f32.mrf.mxu1  ;;  %v546_v18 = vadd.f32 %v1249_v49, %v545_v17 }
  0xfa   : > { %v672_v19 = vadd.f32 %v671_v3, %v583_v15 }
  0xfb   : > { %v635_v20 = vadd.f32 %v634_v6, %v546_v18 }
  0xfc   : > { %v714_v21 = vmax.f32 %v672_v19, 0.0 }
  0xfd   : > { %v699_v22 = vmax.f32 %v635_v20, 0.0 }
  0xfe   : > { %747 = vst.msk [vmem:[%s1257_s24 + $0xc8] sm:$0xff] %vm721_vm2, %v714_v21 }
  0xff   : > { %732 = vst.msk [vmem:[%s1257_s24 + $0x50] sm:$0xff] %vm721_vm2, %v699_v22  ;;  %v585_v23 = vpop.f32.mrf.mxu2 }
 0x100   : > { %v586_v24 = vadd.f32 %v1249_v49, %v585_v23  ;;  %v547_v26 = vpop.f32.mrf.mxu0  ;;  %v681_v53 = vpop.f32.mrf.mxu3 }
 0x101   : > { %v639_v25 = vpop.f32.mrf.mxu1  ;;  %v548_v27 = vadd.f32 %v1249_v49, %v547_v26 }
 0x102   : > { %v675_v29 = vadd.f32 %v674_v14, %v586_v24 }
 0x103   : > { %v637_v30 = vadd.f32 %v636_v16, %v548_v27 }
 0x104   : > { %v715_v31 = vmax.f32 %v675_v29, 0.0 }
 0x105   : > { %v700_v32 = vmax.f32 %v637_v30, 0.0 }
 0x106   : > { %748 = vst.msk [vmem:[%s1257_s24 + $0xd0] sm:$0xff] %vm721_vm2, %v715_v31 }
 0x107   : > { %733 = vst.msk [vmem:[%s1257_s24 + $0x58] sm:$0xff] %vm721_vm2, %v700_v32  ;;  %v587_v33 = vpop.f32.mrf.mxu2 }
 0x108   : > { %v588_v34 = vadd.f32 %v1249_v49, %v587_v33  ;;  %v550_v36 = vpop.f32.mrf.mxu0  ;;  %v684_v2 = vpop.f32.mrf.mxu3 }
 0x109   : > { %v641_v35 = vpop.f32.mrf.mxu1  ;;  %v551_v37 = vadd.f32 %v1249_v49, %v550_v36 }
 0x10a   : > { %v677_v38 = vadd.f32 %v676_v28, %v588_v34 }
 0x10b   : > { %v640_v39 = vadd.f32 %v639_v25, %v551_v37 }
 0x10c   : > { %v716_v41 = vmax.f32 %v677_v38, 0.0 }
 0x10d   : > { %v701_v42 = vmax.f32 %v640_v39, 0.0 }
 0x10e   : > { %749 = vst.msk [vmem:[%s1257_s24 + $0xd8] sm:$0xff] %vm721_vm2, %v716_v41 }
 0x10f   : > { %734 = vst.msk [vmem:[%s1257_s24 + $0x60] sm:$0xff] %vm721_vm2, %v701_v42  ;;  %v590_v43 = vpop.f32.mrf.mxu2 }
 0x110   : > { %v591_v44 = vadd.f32 %v1249_v49, %v590_v43  ;;  %v552_v46 = vpop.f32.mrf.mxu0  ;;  %v686_v17 = vpop.f32.mrf.mxu3 }
 0x111   : > { %v644_v45 = vpop.f32.mrf.mxu1  ;;  %v553_v47 = vadd.f32 %v1249_v49, %v552_v46 }
 0x112   : > { %v680_v48 = vadd.f32 %v679_v40, %v591_v44 }
 0x113   : > { %v642_v50 = vadd.f32 %v641_v35, %v553_v47 }
 0x114   : > { %v717_v51 = vmax.f32 %v680_v48, 0.0 }
 0x115   : > { %v702_v52 = vmax.f32 %v642_v50, 0.0 }
 0x116   : > { %750 = vst.msk [vmem:[%s1257_s24 + $0xe0] sm:$0xff] %vm721_vm2, %v717_v51 }
 0x117   : > { %735 = vst.msk [vmem:[%s1257_s24 + $0x68] sm:$0xff] %vm721_vm2, %v702_v52  ;;  %v592_v54 = vpop.f32.mrf.mxu2 }
 0x118   : > { %v593_v55 = vadd.f32 %v1249_v49, %v592_v54  ;;  %v555_v58 = vpop.f32.mrf.mxu0 }
 0x119   : > { %v646_v57 = vpop.f32.mrf.mxu1  ;;  %v556_v59 = vadd.f32 %v1249_v49, %v555_v58 }
 0x11a   : > { %v682_v60 = vadd.f32 %v681_v53, %v593_v55 }
 0x11b   : > { %v645_v61 = vadd.f32 %v644_v45, %v556_v59 }
 0x11c   : > { %v718_v62 = vmax.f32 %v682_v60, 0.0 }
 0x11d   : > { %v703_v0 = vmax.f32 %v645_v61, 0.0 }
 0x11e   : > { %751 = vst.msk [vmem:[%s1257_s24 + $0xe8] sm:$0xff] %vm721_vm2, %v718_v62 }
 0x11f   : > { %736 = vst.msk [vmem:[%s1257_s24 + $0x70] sm:$0xff] %vm721_vm2, %v703_v0  ;;  %v595_v3 = vpop.f32.mrf.mxu2 }
 0x120   : > { %v596_v4 = vadd.f32 %v1249_v49, %v595_v3  ;;  %v557_v6 = vpop.f32.mrf.mxu0 }
 0x121   : > { %v649_v5 = vpop.f32.mrf.mxu1  ;;  %v558_v8 = vadd.f32 %v1249_v49, %v557_v6 }
 0x122   : > { %v650_v7 = vadd.f32 %v649_v5, %v561_v1  ;;  %v685_v9 = vadd.f32 %v684_v2, %v596_v4 }
 0x123   : > { %v647_v11 = vadd.f32 %v646_v57, %v558_v8 }
 0x124   : > { %v705_v10 = vmax.f32 %v650_v7, 0.0  ;;  %v719_v12 = vmax.f32 %v685_v9, 0.0 }
 0x125   : > { %v704_v56 = vmax.f32 %v647_v11, 0.0 }
 0x126   : > { %738 = vst.msk [vmem:[%s1257_s24 + $0x80] sm:$0xff] %vm721_vm2, %v705_v10 }
 0x127   : > { %752 = vst.msk [vmem:[%s1257_s24 + $0xf0] sm:$0xff] %vm721_vm2, %v719_v12  ;;  %v597_v14 = vpop.f32.mrf.mxu2 }
 0x128   : > { %737 = vst.msk [vmem:[%s1257_s24 + $0x78] sm:$0xff] %vm721_vm2, %v704_v56  ;;  %v598_v15 = vadd.f32 %v1249_v49, %v597_v14 }
 0x129   : > { %v651_v16 = vpop.f32.mrf.mxu1 }
 0x12a   : > { %v652_v18 = vadd.f32 %v651_v16, %v563_v13  ;;  %v687_v19 = vadd.f32 %v686_v17, %v598_v15 }
 0x12c   : > { %v706_v20 = vmax.f32 %v652_v18, 0.0  ;;  %v720_v21 = vmax.f32 %v687_v19, 0.0 }
 0x12e   : > { %739 = vst.msk [vmem:[%s1257_s24 + $0x88] sm:$0xff] %vm721_vm2, %v706_v20 }
 0x12f   : > { %753 = vst.msk [vmem:[%s1257_s24 + $0xf8] sm:$0xff] %vm721_vm2, %v720_v21 }
 0x130 PF: > { %s13_s12 = sadd.s32 1, %s1087_s12  }
 0x131   : > { %p10_p4 = scmp.ge.s32.totalorder %s13_s12, 4  }
 0x133   :  { %12 = sbr.rel (!%p10_p4) target bundleno = 1 (0x1), region = 62 }

// kernel: aib_forward.12
= control target key start
LH: loop header
LB: loop body
LE: loop exit
PB: predicated region body
PF: predicated region fallthrough
CT: control target
= control target key end

     0   :  { %s1755_s12 = smov 0   ;;  %s2100_s0 = inlined_call_operand.vmem [shape: bf16[512,400], index: 0, kind: input, shape index: {}]   ;;  %s2101_s1 = inlined_call_operand.vmem [shape: bf16[400,32], index: 1, kind: input, shape index: {}]   ;;  %s2102_s2 = inlined_call_operand.vmem [shape: f32[1,32], index: 2, kind: input, shape index: {}]   ;;  %s2103_s3 = inlined_call_operand.vmem [shape: f32[512,32], index: 3, kind: output, shape index: {}]  }
   0x1 LB: > { %s1244_s13 = sadd.s32 4294967295, %s1733_s12   ;;  %p1248_p0 = scmp.ge.s32.totalorder %s1733_s12, 1  ;;  %s1733_s12 = sphi %s1755_s12, %s13_s12  }
   0x2   : > { %p139_p1 = scmp.lt.s32.totalorder %s1733_s12, 3 }
   0x4   : > { %p140_p2 = pnand %p1248_p0, %p139_p1 }
   0x5   : > { %s1249_s20 = sshll.u32 (!%p140_p2), %s1244_s13, 5 }
   0x6   : > { %143 = sbr.rel (%p140_p2) target bundleno = 430 (0x1ae), region = 32  ;;  %p165_p3 = scmp.lt.s32.totalorder (!%p140_p2), %s1249_s20, 63 }
   0xb   : > { %v1700_v0 = vld [vmem:[%s2101_s1 + $0x38] sm:$0xff]  ;;  %v1699_v3 = vld [vmem:[%s2101_s1 + $0x30] sm:$0xff]  ;;  %s2105_s20 = smov (!%p165_p3, %s1249_s20), 63  ;;  %v1698_v6 = vld [vmem:[%s2101_s1 + $0x28] sm:$0xff]  ;;  %vm750_vm0 = vcmask 130048   ;;  %vm1155_vm1 = vcmask 261120  }
   0xc   : > { %v1708_v1 = vld [vmem:[%s2101_s1 + $0x78] sm:$0xff]  ;;  %799 = vmatpush.bf16.msra.mxu0 %v1700_v0  ;;  %v1707_v4 = vld [vmem:[%s2101_s1 + $0x70] sm:$0xff]  ;;  %s1628_s27 = sshll.u32 %s2105_s20, 4  ;;  %v1706_v7 = vld [vmem:[%s2101_s1 + $0x68] sm:$0xff]  ;;  %s1253_s22 = sshll.u32 %s2105_s20, 3 }
   0xd   : > { %v1716_v2 = vld [vmem:[%s2101_s1 + $0xb8] sm:$0xff]  ;;  %888 = vmatpush.bf16.msra.mxu1 %v1708_v1  ;;  %v1715_v5 = vld [vmem:[%s2101_s1 + $0xb0] sm:$0xff]  ;;  %v1717_v8 = vld [vmem:[%s2101_s1 + $0xc0] sm:$0xff]  ;;  %s1796_s9 = scalar_lea.vmem %s2100_s0, %s1628_s27  ;;  %s1942_s25 = scalar_lea.vmem %s2103_s3, %s1253_s22 }
   0xe   : > { %977 = vmatpush.bf16.msra.mxu2 %v1716_v2  ;;  %v1714_v9 = vld [vmem:[%s2101_s1 + $0xa8] sm:$0xff]  ;;  %v1266_v11 = vld [vmem:[%s1796_s9 + $0x18] sm:$0xf0]  ;;  %1073 = vmatpush.bf16.msra.mxu3 %v1717_v8  ;;  %v1697_v13 = vld [vmem:[%s2101_s1 + $0x20] sm:$0xff] }
   0xf   : > { %v1630_v10 = vld [vmem:[%s1796_s9 + $0xc] sm:$0xf]  ;;  %v1705_v14 = vld [vmem:[%s2101_s1 + $0x60] sm:$0xff]  ;;  %v1696_v16 = vld [vmem:[%s2101_s1 + $0x18] sm:$0xff] }
  0x10   : > { %800 = vmatpush.bf16.msra.mxu0 %v1699_v3  ;;  %v1269_v12 = vor.u32 %v1630_v10, %v1266_v11  ;;  %v1713_v15 = vld [vmem:[%s2101_s1 + $0xa0] sm:$0xff]  ;;  %v1704_v17 = vld [vmem:[%s2101_s1 + $0x58] sm:$0xff]  ;;  %v1695_v19 = vld [vmem:[%s2101_s1 + $0x10] sm:$0xff] }
  0x11   : > { %889 = vmatpush.bf16.msra.mxu1 %v1707_v4  ;;  %v1712_v18 = vld [vmem:[%s2101_s1 + $0x98] sm:$0xff]  ;;  %v1703_v20 = vld [vmem:[%s2101_s1 + $0x50] sm:$0xff]  ;;  %v1634_v22 = vld [vmem:[%s1796_s9 + $0x2c] sm:$0xf] }
  0x12   : > { %978 = vmatpush.bf16.msra.mxu2 %v1715_v5  ;;  %1610 = vmatmul.msk.bf16.vlgmr.msra.gmra.mxu3 %vm750_vm0, %v1269_v12  ;;  %v1711_v21 = vld [vmem:[%s2101_s1 + $0x90] sm:$0xff]  ;;  %v1282_v23 = vld [vmem:[%s1796_s9 + $0x38] sm:$0xf0]  ;;  %v1694_v24 = vld [vmem:[%s2101_s1 + $0x8] sm:$0xff] }
  0x13   : > { %v1702_v25 = vld [vmem:[%s2101_s1 + $0x48] sm:$0xff]  ;;  %v1285_v27 = vor.u32 %v1634_v22, %v1282_v23  ;;  %v1693_v28 = vld [vmem:[%s2101_s1] sm:$0xff]  ;;  %v1631_v31 = vld [vmem:[%s1796_s9 + $0xc] sm:$0xf0] }
  0x14   : > { %801 = vmatpush.bf16.msra.mxu0 %v1698_v6  ;;  %v1710_v26 = vld [vmem:[%s2101_s1 + $0x88] sm:$0xff]  ;;  %v1701_v29 = vld [vmem:[%s2101_s1 + $0x40] sm:$0xff]  ;;  %v1258_v33 = vld [vmem:[%s1796_s9 + $0x10] sm:$0xf0] }
  0x15   : > { %890 = vmatpush.bf16.msra.mxu1 %v1706_v7  ;;  %v1256_v30 = vld [vmem:[%s1796_s9] sm:$0xf]  ;;  %v1629_v32 = vld [vmem:[%s1796_s9 + $0x4] sm:$0xf]  ;;  %v1264_v35 = vld [vmem:[%s1796_s9 + $0x8] sm:$0xf] }
  0x16   : > { %979 = vmatpush.bf16.msra.mxu2 %v1714_v9  ;;  %v1709_v34 = vld [vmem:[%s2101_s1 + $0x80] sm:$0xff]  ;;  %v1632_v36 = vld [vmem:[%s1796_s9 + $0x14] sm:$0xf0]  ;;  %v1257_v37 = vor.u32 %v1631_v31, %v1256_v30  ;;  %v1261_v38 = vor.u32 %v1629_v32, %v1258_v33  ;;  %v1638_v40 = vld [vmem:[%s1796_s9 + $0x4c] sm:$0xf] }
  0x17   : > { %v1265_v39 = vor.u32 %v1632_v36, %v1264_v35  ;;  %v1298_v41 = vld [vmem:[%s1796_s9 + $0x58] sm:$0xf0]  ;;  %v1272_v43 = vld [vmem:[%s1796_s9 + $0x20] sm:$0xf]  ;;  %v1635_v44 = vld [vmem:[%s1796_s9 + $0x2c] sm:$0xf0] }
  0x18   : > { %802 = vmatpush.bf16.msra.mxu0 %v1697_v13  ;;  %v1301_v42 = vor.u32 %v1638_v40, %v1298_v41  ;;  %v1633_v45 = vld [vmem:[%s1796_s9 + $0x24] sm:$0xf]  ;;  %v1274_v46 = vld [vmem:[%s1796_s9 + $0x30] sm:$0xf0]  ;;  %v1280_v47 = vld [vmem:[%s1796_s9 + $0x28] sm:$0xf]  ;;  %v1273_v49 = vor.u32 %v1635_v44, %v1272_v43 }
  0x19   : > { %891 = vmatpush.bf16.msra.mxu1 %v1705_v14  ;;  %v1636_v48 = vld [vmem:[%s1796_s9 + $0x34] sm:$0xf0]  ;;  %v1277_v50 = vor.u32 %v1633_v45, %v1274_v46  ;;  %v1642_v52 = vld [vmem:[%s1796_s9 + $0x6c] sm:$0xf]  ;;  %v1314_v53 = vld [vmem:[%s1796_s9 + $0x78] sm:$0xf0] }
  0x1a   : > { %980 = vmatpush.bf16.msra.mxu2 %v1713_v15  ;;  %v1281_v51 = vor.u32 %v1636_v48, %v1280_v47  ;;  %v1317_v54 = vor.u32 %v1642_v52, %v1314_v53  ;;  %v1288_v55 = vld [vmem:[%s1796_s9 + $0x40] sm:$0xf]  ;;  %v1639_v56 = vld [vmem:[%s1796_s9 + $0x4c] sm:$0xf0]  ;;  %v1637_v57 = vld [vmem:[%s1796_s9 + $0x44] sm:$0xf] }
  0x1b   : > { %v1290_v58 = vld [vmem:[%s1796_s9 + $0x50] sm:$0xf0]  ;;  %v1296_v59 = vld [vmem:[%s1796_s9 + $0x48] sm:$0xf]  ;;  %v1640_v60 = vld [vmem:[%s1796_s9 + $0x54] sm:$0xf0]  ;;  %v1289_v61 = vor.u32 %v1639_v56, %v1288_v55 }
  0x1c   : > { %803 = vmatpush.bf16.msra.mxu0 %v1696_v16  ;;  %v1293_v62 = vor.u32 %v1637_v57, %v1290_v58  ;;  %v1297_v63 = vor.u32 %v1640_v60, %v1296_v59  ;;  %v1646_v0 = vld [vmem:[%s1796_s9 + $0x8c] sm:$0xf]  ;;  %v1330_v1 = vld [vmem:[%s1796_s9 + $0x98] sm:$0xf0]  ;;  %v1304_v3 = vld [vmem:[%s1796_s9 + $0x60] sm:$0xf] }
  0x1d   : > { %892 = vmatpush.bf16.msra.mxu1 %v1704_v17  ;;  %v1333_v2 = vor.u32 %v1646_v0, %v1330_v1  ;;  %v1643_v4 = vld [vmem:[%s1796_s9 + $0x6c] sm:$0xf0]  ;;  %v1641_v5 = vld [vmem:[%s1796_s9 + $0x64] sm:$0xf]  ;;  %v1306_v6 = vld [vmem:[%s1796_s9 + $0x70] sm:$0xf0] }
  0x1e   : > { %981 = vmatpush.bf16.msra.mxu2 %v1712_v18  ;;  %v1312_v7 = vld [vmem:[%s1796_s9 + $0x68] sm:$0xf]  ;;  %v1644_v8 = vld [vmem:[%s1796_s9 + $0x74] sm:$0xf0]  ;;  %v1305_v9 = vor.u32 %v1643_v4, %v1304_v3  ;;  %v1309_v10 = vor.u32 %v1641_v5, %v1306_v6  ;;  %v1650_v12 = vld [vmem:[%s1796_s9 + $0xac] sm:$0xf] }
  0x1f   : > { %v1313_v11 = vor.u32 %v1644_v8, %v1312_v7  ;;  %v1346_v13 = vld [vmem:[%s1796_s9 + $0xb8] sm:$0xf0]  ;;  %v1320_v15 = vld [vmem:[%s1796_s9 + $0x80] sm:$0xf]  ;;  %v1647_v16 = vld [vmem:[%s1796_s9 + $0x8c] sm:$0xf0] }
  0x20   : > { %804 = vmatpush.bf16.msra.mxu0 %v1695_v19  ;;  %v1349_v14 = vor.u32 %v1650_v12, %v1346_v13  ;;  %v1645_v17 = vld [vmem:[%s1796_s9 + $0x84] sm:$0xf]  ;;  %v1322_v18 = vld [vmem:[%s1796_s9 + $0x90] sm:$0xf0]  ;;  %v1328_v19 = vld [vmem:[%s1796_s9 + $0x88] sm:$0xf] }
  0x21   : > { %893 = vmatpush.bf16.msra.mxu1 %v1703_v20  ;;  %v1648_v20 = vld [vmem:[%s1796_s9 + $0x94] sm:$0xf0]  ;;  %v1325_v22 = vor.u32 %v1645_v17, %v1322_v18  ;;  %v1338_v30 = vld [vmem:[%s1796_s9 + $0xb0] sm:$0xf0]  ;;  %v1344_v31 = vld [vmem:[%s1796_s9 + $0xa8] sm:$0xf] }
  0x22   : > { %982 = vmatpush.bf16.msra.mxu2 %v1711_v21  ;;  %1611 = vmatmul.msk.bf16.gmra.mxu3 %vm750_vm0, %v1285_v27  ;;  %v1321_v21 = vor.u32 %v1647_v16, %v1320_v15  ;;  %v1329_v23 = vor.u32 %v1648_v20, %v1328_v19  ;;  %v1336_v27 = vld [vmem:[%s1796_s9 + $0xa0] sm:$0xf]  ;;  %v1652_v32 = vld [vmem:[%s1796_s9 + $0xb4] sm:$0xf0]  ;;  %v1658_v36 = vld [vmem:[%s1796_s9 + $0xec] sm:$0xf] }
  0x23   : > { %v1345_v35 = vor.u32 %v1652_v32, %v1344_v31  ;;  %v1655_v40 = vld [vmem:[%s1796_s9 + $0xcc] sm:$0xf0]  ;;  %v1653_v41 = vld [vmem:[%s1796_s9 + $0xc4] sm:$0xf]  ;;  %v1360_v43 = vld [vmem:[%s1796_s9 + $0xc8] sm:$0xf] }
  0x24   : > { %805 = vmatpush.bf16.msra.mxu0 %v1694_v24  ;;  %v1654_v24 = vld [vmem:[%s1796_s9 + $0xcc] sm:$0xf]  ;;  %v1656_v44 = vld [vmem:[%s1796_s9 + $0xd4] sm:$0xf0]  ;;  %v1659_v52 = vld [vmem:[%s1796_s9 + $0xec] sm:$0xf0] }
  0x25   : > { %894 = vmatpush.bf16.msra.mxu1 %v1702_v25  ;;  %v1362_v25 = vld [vmem:[%s1796_s9 + $0xd8] sm:$0xf0]  ;;  %v1361_v47 = vor.u32 %v1656_v44, %v1360_v43  ;;  %v1662_v48 = vld [vmem:[%s1796_s9 + $0x10c] sm:$0xf]  ;;  %v1657_v53 = vld [vmem:[%s1796_s9 + $0xe4] sm:$0xf] }
  0x26   : > { %983 = vmatpush.bf16.msra.mxu2 %v1710_v26  ;;  %v1365_v26 = vor.u32 %v1654_v24, %v1362_v25  ;;  %v1376_v55 = vld [vmem:[%s1796_s9 + $0xe8] sm:$0xf]  ;;  %v1660_v56 = vld [vmem:[%s1796_s9 + $0xf4] sm:$0xf0]  ;;  %v1384_v1 = vld [vmem:[%s1796_s9 + $0x100] sm:$0xf] }
  0x27   : > { %v1377_v59 = vor.u32 %v1660_v56, %v1376_v55  ;;  %v1661_v3 = vld [vmem:[%s1796_s9 + $0x104] sm:$0xf]  ;;  %v1386_v4 = vld [vmem:[%s1796_s9 + $0x110] sm:$0xf0]  ;;  %v1930_v5 = vld [vmem:[%s2102_s2] ss:$0 sm:$0xff] }
  0x28   : > { %806 = vmatpush.bf16.msra.mxu0 %v1693_v28  ;;  %v1651_v28 = vld [vmem:[%s1796_s9 + $0xac] sm:$0xf0]  ;;  %v1392_v6 = vld [vmem:[%s1796_s9 + $0x108] sm:$0xf]  ;;  %v1664_v7 = vld [vmem:[%s1796_s9 + $0x114] sm:$0xf0] }
  0x29   : > { %895 = vmatpush.bf16.msra.mxu1 %v1701_v29  ;;  %v1649_v29 = vld [vmem:[%s1796_s9 + $0xa4] sm:$0xf]  ;;  %v1337_v33 = vor.u32 %v1651_v28, %v1336_v27  ;;  %v1393_v12 = vor.u32 %v1664_v7, %v1392_v6  ;;  %v1670_v16 = vld [vmem:[%s1796_s9 + $0x14c] sm:$0xf]  ;;  %v1426_v17 = vld [vmem:[%s1796_s9 + $0x158] sm:$0xf0] }
  0x2a   : > { %984 = vmatpush.bf16.msra.mxu2 %v1709_v34  ;;  %v1341_v34 = vor.u32 %v1649_v29, %v1338_v30  ;;  %v1667_v27 = vld [vmem:[%s1796_s9 + $0x12c] sm:$0xf0]  ;;  %v1665_v28 = vld [vmem:[%s1796_s9 + $0x124] sm:$0xf]  ;;  %v1402_v29 = vld [vmem:[%s1796_s9 + $0x130] sm:$0xf0] }
  0x2b   : > { %807 = vmatmul.bf16.vlgmr.msra.gmra.mxu0 %v1257_v37  ;;  %v1378_v37 = vld [vmem:[%s1796_s9 + $0xf8] sm:$0xf0]  ;;  %v1408_v30 = vld [vmem:[%s1796_s9 + $0x128] sm:$0xf]  ;;  %v1668_v31 = vld [vmem:[%s1796_s9 + $0x134] sm:$0xf0] }
  0x2c   : > { %896 = vmatmul.bf16.vlgmr.msra.gmra.mxu1 %v1261_v38  ;;  %v1381_v38 = vor.u32 %v1658_v36, %v1378_v37  ;;  %v1674_v44 = vld [vmem:[%s1796_s9 + $0x16c] sm:$0xf]  ;;  %v1671_v55 = vld [vmem:[%s1796_s9 + $0x14c] sm:$0xf0]  ;;  %v1669_v56 = vld [vmem:[%s1796_s9 + $0x144] sm:$0xf] }
  0x2d   : > { %985 = vmatmul.bf16.vlgmr.msra.gmra.mxu2 %v1265_v39  ;;  %v1352_v39 = vld [vmem:[%s1796_s9 + $0xc0] sm:$0xf] }
  0x2e   : > { %v1353_v45 = vor.u32 %v1655_v40, %v1352_v39  ;;  %v1409_v39 = vor.u32 %v1668_v31, %v1408_v30 }
  0x32   : > { %1612 = vmatmul.msk.bf16.gmra.mxu3 %vm750_vm0, %v1301_v42  ;;  %v1354_v42 = vld [vmem:[%s1796_s9 + $0xd0] sm:$0xf0] }
  0x33   : > { %v1357_v46 = vor.u32 %v1653_v41, %v1354_v42 }
  0x3b   : > { %812 = vmatmul.bf16.gmra.mxu0 %v1273_v49  ;;  %v1394_v49 = vld [vmem:[%s1796_s9 + $0x118] sm:$0xf0] }
  0x3c   : > { %901 = vmatmul.bf16.gmra.mxu1 %v1277_v50  ;;  %v1397_v50 = vor.u32 %v1662_v48, %v1394_v49 }
  0x3d   : > { %990 = vmatmul.bf16.gmra.mxu2 %v1281_v51  ;;  %v1368_v51 = vld [vmem:[%s1796_s9 + $0xe0] sm:$0xf] }
  0x3e   : > { %v1369_v57 = vor.u32 %v1659_v52, %v1368_v51 }
  0x42   : > { %1613 = vmatmul.msk.bf16.gmra.mxu3 %vm750_vm0, %v1317_v54  ;;  %v1370_v54 = vld [vmem:[%s1796_s9 + $0xf0] sm:$0xf0] }
  0x43   : > { %v1373_v58 = vor.u32 %v1657_v53, %v1370_v54  ;;  %v1416_v54 = vld [vmem:[%s1796_s9 + $0x140] sm:$0xf] }
  0x4b   : > { %817 = vmatmul.bf16.gmra.mxu0 %v1289_v61  ;;  %v1666_v61 = vld [vmem:[%s1796_s9 + $0x12c] sm:$0xf] }
  0x4c   : > { %906 = vmatmul.bf16.gmra.mxu1 %v1293_v62  ;;  %v1410_v62 = vld [vmem:[%s1796_s9 + $0x138] sm:$0xf0] }
  0x4d   : > { %995 = vmatmul.bf16.gmra.mxu2 %v1297_v63  ;;  %v1413_v0 = vor.u32 %v1666_v61, %v1410_v62  ;;  %v1417_v62 = vor.u32 %v1671_v55, %v1416_v54 }
  0x52   : > { %1614 = vmatmul.msk.bf16.gmra.mxu3 %vm750_vm0, %v1333_v2  ;;  %v1663_v2 = vld [vmem:[%s1796_s9 + $0x10c] sm:$0xf0] }
  0x53   : > { %v1385_v8 = vor.u32 %v1663_v2, %v1384_v1 }
  0x5b   : > { %822 = vmatmul.bf16.gmra.mxu0 %v1305_v9  ;;  %v1389_v9 = vor.u32 %v1661_v3, %v1386_v4 }
  0x5c   : > { %911 = vmatmul.bf16.gmra.mxu1 %v1309_v10 }
  0x5d   : > { %1000 = vmatmul.bf16.gmra.mxu2 %v1313_v11 }
  0x62   : > { %1615 = vmatmul.msk.bf16.gmra.mxu3 %vm750_vm0, %v1349_v14 }
  0x6b   : > { %827 = vmatmul.bf16.gmra.mxu0 %v1321_v21 }
  0x6c   : > { %916 = vmatmul.bf16.gmra.mxu1 %v1325_v22 }
  0x6d   : > { %1005 = vmatmul.bf16.gmra.mxu2 %v1329_v23  ;;  %v1429_v23 = vor.u32 %v1670_v16, %v1426_v17 }
  0x72   : > { %1616 = vmatmul.msk.bf16.gmra.mxu3 %vm750_vm0, %v1365_v26  ;;  %v1400_v26 = vld [vmem:[%s1796_s9 + $0x120] sm:$0xf] }
  0x7b   : > { %832 = vmatmul.bf16.gmra.mxu0 %v1337_v33 }
  0x7c   : > { %921 = vmatmul.bf16.gmra.mxu1 %v1341_v34  ;;  %v1401_v34 = vor.u32 %v1667_v27, %v1400_v26 }
  0x7d   : > { %1010 = vmatmul.bf16.gmra.mxu2 %v1345_v35  ;;  %v1405_v35 = vor.u32 %v1665_v28, %v1402_v29 }
  0x82   : > { %1617 = vmatmul.msk.bf16.gmra.mxu3 %vm750_vm0, %v1381_v38 }
  0x8b   : > { %837 = vmatmul.bf16.gmra.mxu0 %v1353_v45  ;;  %v1442_v45 = vld [vmem:[%s1796_s9 + $0x178] sm:$0xf0] }
  0x8c   : > { %926 = vmatmul.bf16.gmra.mxu1 %v1357_v46  ;;  %v1445_v51 = vor.u32 %v1674_v44, %v1442_v45 }
  0x8d   : > { %1015 = vmatmul.bf16.gmra.mxu2 %v1361_v47 }
  0x92   : > { %1618 = vmatmul.msk.bf16.gmra.mxu3 %vm750_vm0, %v1397_v50 }
  0x95   : > { %v1075_v60 = vpop.f32.mrf.mxu3 }
  0x9b   : > { %842 = vmatmul.bf16.gmra.mxu0 %v1369_v57  ;;  %v1418_v57 = vld [vmem:[%s1796_s9 + $0x150] sm:$0xf0] }
  0x9c   : > { %931 = vmatmul.bf16.gmra.mxu1 %v1373_v58  ;;  %v1424_v58 = vld [vmem:[%s1796_s9 + $0x148] sm:$0xf] }
  0x9d   : > { %1020 = vmatmul.bf16.gmra.mxu2 %v1377_v59  ;;  %v1077_v63 = vpop.f32.mrf.mxu3  ;;  %v1672_v59 = vld [vmem:[%s1796_s9 + $0x154] sm:$0xf0] }
  0x9e   : > { %v1425_v3 = vor.u32 %v1672_v59, %v1424_v58 }
  0xa2   : > { %1619 = vmatmul.msk.bf16.gmra.mxu3 %vm750_vm0, %v1413_v0 }
  0xa5   : > { %v1080_v14 = vpop.f32.mrf.mxu3 }
  0xa8   : > { %v808_v10 = vpop.f32.mrf.mxu0 }
  0xa9   : > { %v897_v11 = vpop.f32.mrf.mxu1  ;;  %v809_v13 = vadd.f32 %v1930_v5, %v808_v10  ;;  %v1458_v10 = vld [vmem:[%s1796_s9 + $0x198] sm:$0xf0] }
  0xab   : > { %847 = vmatmul.bf16.gmra.mxu0 %v1385_v8  ;;  %v898_v15 = vadd.f32 %v897_v11, %v809_v13 }
  0xac   : > { %936 = vmatmul.bf16.gmra.mxu1 %v1389_v9  ;;  %v1678_v9 = vld [vmem:[%s1796_s9 + $0x18c] sm:$0xf] }
  0xad   : > { %1025 = vmatmul.bf16.gmra.mxu2 %v1393_v12  ;;  %v1082_v22 = vpop.f32.mrf.mxu3  ;;  %v1461_v16 = vor.u32 %v1678_v9, %v1458_v10 }
  0xb0   : > { %v986_v18 = vpop.f32.mrf.mxu2  ;;  %v810_v20 = vpop.f32.mrf.mxu0 }
  0xb1   : > { %v987_v19 = vadd.f32 %v986_v18, %v898_v15  ;;  %v899_v21 = vpop.f32.mrf.mxu1  ;;  %v811_v25 = vadd.f32 %v1930_v5, %v810_v20  ;;  %v1675_v20 = vld [vmem:[%s1796_s9 + $0x16c] sm:$0xf0] }
  0xb2   : > { %1620 = vmatmul.msk.bf16.gmra.mxu3 %vm750_vm0, %v1429_v23  ;;  %v1440_v23 = vld [vmem:[%s1796_s9 + $0x168] sm:$0xf] }
  0xb3   : > { %v1076_v24 = vadd.f32 %v1075_v60, %v987_v19  ;;  %v900_v32 = vadd.f32 %v899_v21, %v811_v25  ;;  %v1432_v19 = vld [vmem:[%s1796_s9 + $0x160] sm:$0xf]  ;;  %v1673_v21 = vld [vmem:[%s1796_s9 + $0x164] sm:$0xf] }
  0xb4   : > { %v1433_v27 = vor.u32 %v1675_v20, %v1432_v19 }
  0xb5   : > { %1156 = vst.msk [vmem:[%s1942_s25] sm:$0xff] %vm1155_vm1, %v1076_v24  ;;  %v1085_v41 = vpop.f32.mrf.mxu3  ;;  %v1676_v24 = vld [vmem:[%s1796_s9 + $0x174] sm:$0xf0] }
  0xb8   : > { %v988_v33 = vpop.f32.mrf.mxu2  ;;  %v813_v37 = vpop.f32.mrf.mxu0 }
  0xb9   : > { %v989_v36 = vadd.f32 %v988_v33, %v900_v32  ;;  %v902_v38 = vpop.f32.mrf.mxu1  ;;  %v814_v40 = vadd.f32 %v1930_v5, %v813_v37  ;;  %v1441_v32 = vor.u32 %v1676_v24, %v1440_v23  ;;  %v1682_v37 = vld [vmem:[%s1796_s9 + $0x1ac] sm:$0xf] }
  0xbb   : > { %v1078_v42 = vadd.f32 %v1077_v63, %v989_v36  ;;  %852 = vmatmul.bf16.gmra.mxu0 %v1401_v34  ;;  %v903_v43 = vadd.f32 %v902_v38, %v814_v40  ;;  %v1421_v63 = vor.u32 %v1669_v56, %v1418_v57  ;;  %v1474_v38 = vld [vmem:[%s1796_s9 + $0x1b8] sm:$0xf0] }
  0xbc   : > { %941 = vmatmul.bf16.gmra.mxu1 %v1405_v35  ;;  %v1477_v44 = vor.u32 %v1682_v37, %v1474_v38 }
  0xbd   : > { %1157 = vst.msk [vmem:[%s1942_s25 + $0x8] sm:$0xff] %vm1155_vm1, %v1078_v42  ;;  %1030 = vmatmul.bf16.gmra.mxu2 %v1409_v39  ;;  %v1087_v50 = vpop.f32.mrf.mxu3 }
  0xc0   : > { %v991_v46 = vpop.f32.mrf.mxu2  ;;  %v815_v48 = vpop.f32.mrf.mxu0 }
  0xc1   : > { %v992_v47 = vadd.f32 %v991_v46, %v903_v43  ;;  %v904_v49 = vpop.f32.mrf.mxu1  ;;  %v816_v53 = vadd.f32 %v1930_v5, %v815_v48  ;;  %v1679_v48 = vld [vmem:[%s1796_s9 + $0x18c] sm:$0xf0] }
  0xc2   : > { %1621 = vmatmul.msk.bf16.gmra.mxu3 %vm750_vm0, %v1445_v51  ;;  %v1456_v51 = vld [vmem:[%s1796_s9 + $0x188] sm:$0xf] }
  0xc3   : > { %v1081_v52 = vadd.f32 %v1080_v14, %v992_v47  ;;  %v905_v60 = vadd.f32 %v904_v49, %v816_v53  ;;  %v1448_v47 = vld [vmem:[%s1796_s9 + $0x180] sm:$0xf]  ;;  %v1677_v49 = vld [vmem:[%s1796_s9 + $0x184] sm:$0xf] }
  0xc4   : > { %v1449_v55 = vor.u32 %v1679_v48, %v1448_v47 }
  0xc5   : > { %1158 = vst.msk [vmem:[%s1942_s25 + $0x10] sm:$0xff] %vm1155_vm1, %v1081_v52  ;;  %v1090_v6 = vpop.f32.mrf.mxu3  ;;  %v1680_v52 = vld [vmem:[%s1796_s9 + $0x194] sm:$0xf0] }
  0xc8   : > { %v993_v61 = vpop.f32.mrf.mxu2  ;;  %v818_v1 = vpop.f32.mrf.mxu0 }
  0xc9   : > { %v994_v0 = vadd.f32 %v993_v61, %v905_v60  ;;  %v907_v2 = vpop.f32.mrf.mxu1  ;;  %v819_v4 = vadd.f32 %v1930_v5, %v818_v1  ;;  %v1457_v60 = vor.u32 %v1680_v52, %v1456_v51  ;;  %v1686_v1 = vld [vmem:[%s1796_s9 + $0x1cc] sm:$0xf] }
  0xcb   : > { %v1083_v7 = vadd.f32 %v1082_v22, %v994_v0  ;;  %857 = vmatmul.bf16.gmra.mxu0 %v1417_v62  ;;  %v908_v8 = vadd.f32 %v907_v2, %v819_v4  ;;  %v1434_v22 = vld [vmem:[%s1796_s9 + $0x170] sm:$0xf0]  ;;  %v1490_v2 = vld [vmem:[%s1796_s9 + $0x1d8] sm:$0xf0] }
  0xcc   : > { %946 = vmatmul.bf16.gmra.mxu1 %v1421_v63  ;;  %v1437_v28 = vor.u32 %v1673_v21, %v1434_v22  ;;  %v1493_v9 = vor.u32 %v1686_v1, %v1490_v2  ;;  %v1496_v1 = vld [vmem:[%s1796_s9 + $0x1e0] sm:$0xf]  ;;  %v1691_v2 = vld [vmem:[%s1796_s9 + $0x1ec] sm:$0xf0] }
  0xcd   : > { %1159 = vst.msk [vmem:[%s1942_s25 + $0x18] sm:$0xff] %vm1155_vm1, %v1083_v7  ;;  %1035 = vmatmul.bf16.gmra.mxu2 %v1425_v3  ;;  %v1092_v15 = vpop.f32.mrf.mxu3 }
  0xd0   : > { %v996_v11 = vpop.f32.mrf.mxu2  ;;  %v820_v13 = vpop.f32.mrf.mxu0 }
  0xd1   : > { %v997_v12 = vadd.f32 %v996_v11, %v908_v8  ;;  %v909_v14 = vpop.f32.mrf.mxu1  ;;  %v821_v18 = vadd.f32 %v1930_v5, %v820_v13  ;;  %v1683_v13 = vld [vmem:[%s1796_s9 + $0x1ac] sm:$0xf0] }
  0xd2   : > { %1622 = vmatmul.msk.bf16.gmra.mxu3 %vm750_vm0, %v1461_v16  ;;  %v1472_v16 = vld [vmem:[%s1796_s9 + $0x1a8] sm:$0xf] }
  0xd3   : > { %v1086_v17 = vadd.f32 %v1085_v41, %v997_v12  ;;  %v910_v25 = vadd.f32 %v909_v14, %v821_v18  ;;  %v1464_v12 = vld [vmem:[%s1796_s9 + $0x1a0] sm:$0xf]  ;;  %v1681_v14 = vld [vmem:[%s1796_s9 + $0x1a4] sm:$0xf] }
  0xd4   : > { %v1465_v20 = vor.u32 %v1683_v13, %v1464_v12 }
  0xd5   : > { %1160 = vst.msk [vmem:[%s1942_s25 + $0x20] sm:$0xff] %vm1155_vm1, %v1086_v17  ;;  %v1095_v34 = vpop.f32.mrf.mxu3  ;;  %v1684_v17 = vld [vmem:[%s1796_s9 + $0x1b4] sm:$0xf0] }
  0xd8   : > { %v998_v26 = vpop.f32.mrf.mxu2  ;;  %v823_v30 = vpop.f32.mrf.mxu0 }
  0xd9   : > { %v999_v29 = vadd.f32 %v998_v26, %v910_v25  ;;  %v912_v31 = vpop.f32.mrf.mxu1  ;;  %v824_v33 = vadd.f32 %v1930_v5, %v823_v30  ;;  %v1473_v25 = vor.u32 %v1684_v17, %v1472_v16  ;;  %v1690_v30 = vld [vmem:[%s1796_s9 + $0x1ec] sm:$0xf] }
  0xdb   : > { %v1088_v35 = vadd.f32 %v1087_v50, %v999_v29  ;;  %862 = vmatmul.bf16.gmra.mxu0 %v1433_v27  ;;  %v913_v36 = vadd.f32 %v912_v31, %v824_v33  ;;  %v1450_v50 = vld [vmem:[%s1796_s9 + $0x190] sm:$0xf0]  ;;  %v1506_v31 = vld [vmem:[%s1796_s9 + $0x1f8] sm:$0xf0] }
  0xdc   : > { %951 = vmatmul.bf16.gmra.mxu1 %v1437_v28  ;;  %v1453_v56 = vor.u32 %v1677_v49, %v1450_v50  ;;  %v1509_v37 = vor.u32 %v1690_v30, %v1506_v31 }
  0xdd   : > { %1161 = vst.msk [vmem:[%s1942_s25 + $0x28] sm:$0xff] %vm1155_vm1, %v1088_v35  ;;  %1040 = vmatmul.bf16.gmra.mxu2 %v1441_v32  ;;  %v1097_v43 = vpop.f32.mrf.mxu3 }
  0xe0   : > { %v1001_v39 = vpop.f32.mrf.mxu2  ;;  %v825_v41 = vpop.f32.mrf.mxu0 }
  0xe1   : > { %v1002_v40 = vadd.f32 %v1001_v39, %v913_v36  ;;  %v914_v42 = vpop.f32.mrf.mxu1  ;;  %v826_v46 = vadd.f32 %v1930_v5, %v825_v41  ;;  %v1687_v41 = vld [vmem:[%s1796_s9 + $0x1cc] sm:$0xf0] }
  0xe2   : > { %1623 = vmatmul.msk.bf16.gmra.mxu3 %vm750_vm0, %v1477_v44  ;;  %v1488_v44 = vld [vmem:[%s1796_s9 + $0x1c8] sm:$0xf] }
  0xe3   : > { %v1091_v45 = vadd.f32 %v1090_v6, %v1002_v40  ;;  %v915_v53 = vadd.f32 %v914_v42, %v826_v46  ;;  %v1480_v40 = vld [vmem:[%s1796_s9 + $0x1c0] sm:$0xf]  ;;  %v1685_v42 = vld [vmem:[%s1796_s9 + $0x1c4] sm:$0xf] }
  0xe4   : > { %v1481_v48 = vor.u32 %v1687_v41, %v1480_v40 }
  0xe5   : > { %1162 = vst.msk [vmem:[%s1942_s25 + $0x30] sm:$0xff] %vm1155_vm1, %v1091_v45  ;;  %v1100_v62 = vpop.f32.mrf.mxu3  ;;  %v1688_v45 = vld [vmem:[%s1796_s9 + $0x1d4] sm:$0xf0] }
  0xe8   : > { %v1003_v54 = vpop.f32.mrf.mxu2  ;;  %v828_v58 = vpop.f32.mrf.mxu0 }
  0xe9   : > { %v1004_v57 = vadd.f32 %v1003_v54, %v915_v53  ;;  %v917_v59 = vpop.f32.mrf.mxu1  ;;  %v829_v61 = vadd.f32 %v1930_v5, %v828_v58  ;;  %v1489_v53 = vor.u32 %v1688_v45, %v1488_v44 }
  0xeb   : > { %v1093_v63 = vadd.f32 %v1092_v15, %v1004_v57  ;;  %867 = vmatmul.bf16.gmra.mxu0 %v1449_v55  ;;  %v918_v0 = vadd.f32 %v917_v59, %v829_v61  ;;  %v1466_v15 = vld [vmem:[%s1796_s9 + $0x1b0] sm:$0xf0] }
  0xec   : > { %956 = vmatmul.bf16.gmra.mxu1 %v1453_v56  ;;  %v1469_v21 = vor.u32 %v1681_v14, %v1466_v15 }
  0xed   : > { %1163 = vst.msk [vmem:[%s1942_s25 + $0x38] sm:$0xff] %vm1155_vm1, %v1093_v63  ;;  %1045 = vmatmul.bf16.gmra.mxu2 %v1457_v60  ;;  %v1102_v8 = vpop.f32.mrf.mxu3 }
  0xf0   : > { %v1006_v3 = vpop.f32.mrf.mxu2  ;;  %v830_v6 = vpop.f32.mrf.mxu0 }
  0xf1   : > { %v1007_v4 = vadd.f32 %v1006_v3, %v918_v0  ;;  %v919_v7 = vpop.f32.mrf.mxu1  ;;  %v831_v11 = vadd.f32 %v1930_v5, %v830_v6  ;;  %v1689_v3 = vld [vmem:[%s1796_s9 + $0x1e4] sm:$0xf]  ;;  %v1504_v6 = vld [vmem:[%s1796_s9 + $0x1e8] sm:$0xf] }
  0xf2   : > { %1624 = vmatmul.msk.bf16.gmra.mxu3 %vm750_vm0, %v1493_v9 }
  0xf3   : > { %v1096_v10 = vadd.f32 %v1095_v34, %v1007_v4  ;;  %v920_v18 = vadd.f32 %v919_v7, %v831_v11  ;;  %v1498_v4 = vld [vmem:[%s1796_s9 + $0x1f0] sm:$0xf0]  ;;  %v1692_v7 = vld [vmem:[%s1796_s9 + $0x1f4] sm:$0xf0] }
  0xf4   : > { %v1501_v11 = vor.u32 %v1689_v3, %v1498_v4  ;;  %v1505_v15 = vor.u32 %v1692_v7, %v1504_v6 }
  0xf5   : > { %1164 = vst.msk [vmem:[%s1942_s25 + $0x40] sm:$0xff] %vm1155_vm1, %v1096_v10  ;;  %v1105_v27 = vpop.f32.mrf.mxu3  ;;  %v1497_v10 = vor.u32 %v1691_v2, %v1496_v1 }
  0xf8   : > { %v1008_v19 = vpop.f32.mrf.mxu2  ;;  %v833_v23 = vpop.f32.mrf.mxu0 }
  0xf9   : > { %v1009_v22 = vadd.f32 %v1008_v19, %v920_v18  ;;  %v922_v24 = vpop.f32.mrf.mxu1  ;;  %v834_v26 = vadd.f32 %v1930_v5, %v833_v23 }
  0xfb   : > { %v1098_v28 = vadd.f32 %v1097_v43, %v1009_v22  ;;  %872 = vmatmul.bf16.gmra.mxu0 %v1465_v20  ;;  %v923_v29 = vadd.f32 %v922_v24, %v834_v26  ;;  %v1482_v43 = vld [vmem:[%s1796_s9 + $0x1d0] sm:$0xf0] }
  0xfc   : > { %961 = vmatmul.bf16.gmra.mxu1 %v1469_v21  ;;  %v1485_v49 = vor.u32 %v1685_v42, %v1482_v43 }
  0xfd   : > { %1165 = vst.msk [vmem:[%s1942_s25 + $0x48] sm:$0xff] %vm1155_vm1, %v1098_v28  ;;  %1050 = vmatmul.bf16.gmra.mxu2 %v1473_v25  ;;  %v1107_v36 = vpop.f32.mrf.mxu3 }
 0x100   : > { %v1011_v32 = vpop.f32.mrf.mxu2  ;;  %v835_v34 = vpop.f32.mrf.mxu0 }
 0x101   : > { %v1012_v33 = vadd.f32 %v1011_v32, %v923_v29  ;;  %v924_v35 = vpop.f32.mrf.mxu1  ;;  %v836_v39 = vadd.f32 %v1930_v5, %v835_v34 }
 0x102   : > { %1625 = vmatmul.msk.bf16.gmra.mxu3 %vm750_vm0, %v1509_v37 }
 0x103   : > { %v1101_v38 = vadd.f32 %v1100_v62, %v1012_v33  ;;  %v925_v46 = vadd.f32 %v924_v35, %v836_v39 }
 0x105   : > { %1166 = vst.msk [vmem:[%s1942_s25 + $0x50] sm:$0xff] %vm1155_vm1, %v1101_v38  ;;  %v1110_v55 = vpop.f32.mrf.mxu3 }
 0x108   : > { %v1013_v47 = vpop.f32.mrf.mxu2  ;;  %v838_v51 = vpop.f32.mrf.mxu0 }
 0x109   : > { %v1014_v50 = vadd.f32 %v1013_v47, %v925_v46  ;;  %v927_v52 = vpop.f32.mrf.mxu1  ;;  %v839_v54 = vadd.f32 %v1930_v5, %v838_v51 }
 0x10b   : > { %v1103_v56 = vadd.f32 %v1102_v8, %v1014_v50  ;;  %877 = vmatmul.bf16.gmra.mxu0 %v1481_v48  ;;  %v928_v57 = vadd.f32 %v927_v52, %v839_v54 }
 0x10c   : > { %966 = vmatmul.bf16.gmra.mxu1 %v1485_v49 }
 0x10d   : > { %1167 = vst.msk [vmem:[%s1942_s25 + $0x58] sm:$0xff] %vm1155_vm1, %v1103_v56  ;;  %1055 = vmatmul.bf16.gmra.mxu2 %v1489_v53  ;;  %v1112_v62 = vpop.f32.mrf.mxu3 }
 0x110   : > { %v1016_v58 = vpop.f32.mrf.mxu2  ;;  %v840_v60 = vpop.f32.mrf.mxu0 }
 0x111   : > { %v1017_v59 = vadd.f32 %v1016_v58, %v928_v57  ;;  %v929_v61 = vpop.f32.mrf.mxu1  ;;  %v841_v0 = vadd.f32 %v1930_v5, %v840_v60 }
 0x113   : > { %v1106_v63 = vadd.f32 %v1105_v27, %v1017_v59  ;;  %v930_v8 = vadd.f32 %v929_v61, %v841_v0 }
 0x115   : > { %1168 = vst.msk [vmem:[%s1942_s25 + $0x60] sm:$0xff] %vm1155_vm1, %v1106_v63  ;;  %v1115_v17 = vpop.f32.mrf.mxu3 }
 0x118   : > { %v1018_v9 = vpop.f32.mrf.mxu2  ;;  %v843_v13 = vpop.f32.mrf.mxu0 }
 0x119   : > { %v1019_v12 = vadd.f32 %v1018_v9, %v930_v8  ;;  %v932_v14 = vpop.f32.mrf.mxu1  ;;  %v844_v16 = vadd.f32 %v1930_v5, %v843_v13 }
 0x11b   : > { %v1108_v18 = vadd.f32 %v1107_v36, %v1019_v12  ;;  %882 = vmatmul.bf16.gmra.mxu0 %v1497_v10  ;;  %v933_v19 = vadd.f32 %v932_v14, %v844_v16 }
 0x11c   : > { %971 = vmatmul.bf16.gmra.mxu1 %v1501_v11 }
 0x11d   : > { %1169 = vst.msk [vmem:[%s1942_s25 + $0x68] sm:$0xff] %vm1155_vm1, %v1108_v18  ;;  %1060 = vmatmul.bf16.gmra.mxu2 %v1505_v15  ;;  %v1117_v24 = vpop.f32.mrf.mxu3 }
 0x120   : > { %v1021_v20 = vpop.f32.mrf.mxu2  ;;  %v845_v22 = vpop.f32.mrf.mxu0 }
 0x121   : > { %v1022_v21 = vadd.f32 %v1021_v20, %v933_v19  ;;  %v934_v23 = vpop.f32.mrf.mxu1  ;;  %v846_v26 = vadd.f32 %v1930_v5, %v845_v22 }
 0x123   : > { %v1111_v25 = vadd.f32 %v1110_v55, %v1022_v21  ;;  %v935_v27 = vadd.f32 %v934_v23, %v846_v26 }
 0x125   : > { %1170 = vst.msk [vmem:[%s1942_s25 + $0x70] sm:$0xff] %vm1155_vm1, %v1111_v25  ;;  %v1120_v33 = vpop.f32.mrf.mxu3 }
 0x128   : > { %v1023_v28 = vpop.f32.mrf.mxu2  ;;  %v848_v30 = vpop.f32.mrf.mxu0 }
 0x129   : > { %v1024_v29 = vadd.f32 %v1023_v28, %v935_v27  ;;  %v937_v31 = vpop.f32.mrf.mxu1  ;;  %v849_v32 = vadd.f32 %v1930_v5, %v848_v30 }
 0x12b   : > { %v1113_v34 = vadd.f32 %v1112_v62, %v1024_v29  ;;  %v938_v35 = vadd.f32 %v937_v31, %v849_v32 }
 0x12d   : > { %1171 = vst.msk [vmem:[%s1942_s25 + $0x78] sm:$0xff] %vm1155_vm1, %v1113_v34  ;;  %v1122_v40 = vpop.f32.mrf.mxu3 }
 0x130   : > { %v1026_v36 = vpop.f32.mrf.mxu2  ;;  %v850_v38 = vpop.f32.mrf.mxu0 }
 0x131   : > { %v1027_v37 = vadd.f32 %v1026_v36, %v938_v35  ;;  %v939_v39 = vpop.f32.mrf.mxu1  ;;  %v851_v42 = vadd.f32 %v1930_v5, %v850_v38 }
 0x133   : > { %v1116_v41 = vadd.f32 %v1115_v17, %v1027_v37  ;;  %v940_v43 = vadd.f32 %v939_v39, %v851_v42 }
 0x135   : > { %1172 = vst.msk [vmem:[%s1942_s25 + $0x80] sm:$0xff] %vm1155_vm1, %v1116_v41  ;;  %v1125_v50 = vpop.f32.mrf.mxu3 }
 0x138   : > { %v1028_v44 = vpop.f32.mrf.mxu2  ;;  %v853_v46 = vpop.f32.mrf.mxu0 }
 0x139   : > { %v1029_v45 = vadd.f32 %v1028_v44, %v940_v43  ;;  %v942_v47 = vpop.f32.mrf.mxu1  ;;  %v854_v48 = vadd.f32 %v1930_v5, %v853_v46 }
 0x13b   : > { %v1118_v49 = vadd.f32 %v1117_v24, %v1029_v45  ;;  %v943_v51 = vadd.f32 %v942_v47, %v854_v48 }
 0x13d   : > { %1173 = vst.msk [vmem:[%s1942_s25 + $0x88] sm:$0xff] %vm1155_vm1, %v1118_v49  ;;  %v1127_v58 = vpop.f32.mrf.mxu3 }
 0x140   : > { %v1031_v52 = vpop.f32.mrf.mxu2  ;;  %v855_v54 = vpop.f32.mrf.mxu0 }
 0x141   : > { %v1032_v53 = vadd.f32 %v1031_v52, %v943_v51  ;;  %v944_v55 = vpop.f32.mrf.mxu1  ;;  %v856_v57 = vadd.f32 %v1930_v5, %v855_v54 }
 0x143   : > { %v1121_v56 = vadd.f32 %v1120_v33, %v1032_v53  ;;  %v945_v59 = vadd.f32 %v944_v55, %v856_v57 }
 0x145   : > { %1174 = vst.msk [vmem:[%s1942_s25 + $0x90] sm:$0xff] %vm1155_vm1, %v1121_v56  ;;  %v1130_v4 = vpop.f32.mrf.mxu3 }
 0x148   : > { %v1033_v60 = vpop.f32.mrf.mxu2  ;;  %v858_v62 = vpop.f32.mrf.mxu0 }
 0x149   : > { %v1034_v61 = vadd.f32 %v1033_v60, %v945_v59  ;;  %v947_v63 = vpop.f32.mrf.mxu1  ;;  %v859_v0 = vadd.f32 %v1930_v5, %v858_v62 }
 0x14b   : > { %v1123_v1 = vadd.f32 %v1122_v40, %v1034_v61  ;;  %v948_v2 = vadd.f32 %v947_v63, %v859_v0 }
 0x14d   : > { %1175 = vst.msk [vmem:[%s1942_s25 + $0x98] sm:$0xff] %vm1155_vm1, %v1123_v1  ;;  %v1132_v17 = vpop.f32.mrf.mxu3 }
 0x150   : > { %v1036_v3 = vpop.f32.mrf.mxu2  ;;  %v860_v7 = vpop.f32.mrf.mxu0 }
 0x151   : > { %v1037_v6 = vadd.f32 %v1036_v3, %v948_v2  ;;  %v949_v8 = vpop.f32.mrf.mxu1  ;;  %v861_v10 = vadd.f32 %v1930_v5, %v860_v7 }
 0x153   : > { %v1126_v9 = vadd.f32 %v1125_v50, %v1037_v6  ;;  %v950_v11 = vadd.f32 %v949_v8, %v861_v10 }
 0x155   : > { %1176 = vst.msk [vmem:[%s1942_s25 + $0xa0] sm:$0xff] %vm1155_vm1, %v1126_v9  ;;  %v1135_v26 = vpop.f32.mrf.mxu3 }
 0x158   : > { %v1038_v12 = vpop.f32.mrf.mxu2  ;;  %v863_v14 = vpop.f32.mrf.mxu0 }
 0x159   : > { %v1039_v13 = vadd.f32 %v1038_v12, %v950_v11  ;;  %v952_v15 = vpop.f32.mrf.mxu1  ;;  %v864_v16 = vadd.f32 %v1930_v5, %v863_v14 }
 0x15b   : > { %v1128_v18 = vadd.f32 %v1127_v58, %v1039_v13  ;;  %v953_v19 = vadd.f32 %v952_v15, %v864_v16 }
 0x15d   : > { %1177 = vst.msk [vmem:[%s1942_s25 + $0xa8] sm:$0xff] %vm1155_vm1, %v1128_v18  ;;  %v1137_v35 = vpop.f32.mrf.mxu3 }
 0x160   : > { %v1041_v20 = vpop.f32.mrf.mxu2  ;;  %v865_v22 = vpop.f32.mrf.mxu0 }
 0x161   : > { %v1042_v21 = vadd.f32 %v1041_v20, %v953_v19  ;;  %v954_v23 = vpop.f32.mrf.mxu1  ;;  %v866_v25 = vadd.f32 %v1930_v5, %v865_v22 }
 0x163   : > { %v1131_v24 = vadd.f32 %v1130_v4, %v1042_v21  ;;  %v955_v27 = vadd.f32 %v954_v23, %v866_v25 }
 0x165   : > { %1178 = vst.msk [vmem:[%s1942_s25 + $0xb0] sm:$0xff] %vm1155_vm1, %v1131_v24  ;;  %v1140_v44 = vpop.f32.mrf.mxu3 }
 0x168   : > { %v1043_v28 = vpop.f32.mrf.mxu2  ;;  %v868_v30 = vpop.f32.mrf.mxu0 }
 0x169   : > { %v1044_v29 = vadd.f32 %v1043_v28, %v955_v27  ;;  %v957_v31 = vpop.f32.mrf.mxu1  ;;  %v869_v32 = vadd.f32 %v1930_v5, %v868_v30 }
 0x16b   : > { %v1133_v33 = vadd.f32 %v1132_v17, %v1044_v29  ;;  %v958_v34 = vadd.f32 %v957_v31, %v869_v32 }
 0x16d   : > { %1179 = vst.msk [vmem:[%s1942_s25 + $0xb8] sm:$0xff] %vm1155_vm1, %v1133_v33  ;;  %v1142_v55 = vpop.f32.mrf.mxu3 }
 0x170   : > { %v1046_v36 = vpop.f32.mrf.mxu2  ;;  %v870_v38 = vpop.f32.mrf.mxu0 }
 0x171   : > { %v1047_v37 = vadd.f32 %v1046_v36, %v958_v34  ;;  %v959_v39 = vpop.f32.mrf.mxu1  ;;  %v871_v41 = vadd.f32 %v1930_v5, %v870_v38 }
 0x173   : > { %v1136_v40 = vadd.f32 %v1135_v26, %v1047_v37  ;;  %v960_v42 = vadd.f32 %v959_v39, %v871_v41 }
 0x175   : > { %1180 = vst.msk [vmem:[%s1942_s25 + $0xc0] sm:$0xff] %vm1155_vm1, %v1136_v40  ;;  %v1145_v1 = vpop.f32.mrf.mxu3 }
 0x178   : > { %v1048_v43 = vpop.f32.mrf.mxu2  ;;  %v873_v46 = vpop.f32.mrf.mxu0 }
 0x179   : > { %v1049_v45 = vadd.f32 %v1048_v43, %v960_v42  ;;  %v962_v47 = vpop.f32.mrf.mxu1  ;;  %v874_v48 = vadd.f32 %v1930_v5, %v873_v46 }
 0x17b   : > { %v1138_v49 = vadd.f32 %v1137_v35, %v1049_v45  ;;  %v963_v50 = vadd.f32 %v962_v47, %v874_v48 }
 0x17d   : > { %1181 = vst.msk [vmem:[%s1942_s25 + $0xc8] sm:$0xff] %vm1155_vm1, %v1138_v49  ;;  %v1147_v10 = vpop.f32.mrf.mxu3 }
 0x180   : > { %v1051_v51 = vpop.f32.mrf.mxu2  ;;  %v875_v53 = vpop.f32.mrf.mxu0 }
 0x181   : > { %v1052_v52 = vadd.f32 %v1051_v51, %v963_v50  ;;  %v964_v54 = vpop.f32.mrf.mxu1  ;;  %v876_v57 = vadd.f32 %v1930_v5, %v875_v53 }
 0x183   : > { %v1141_v56 = vadd.f32 %v1140_v44, %v1052_v52  ;;  %v965_v58 = vadd.f32 %v964_v54, %v876_v57 }
 0x185   : > { %1182 = vst.msk [vmem:[%s1942_s25 + $0xd0] sm:$0xff] %vm1155_vm1, %v1141_v56  ;;  %v1150_v19 = vpop.f32.mrf.mxu3 }
 0x188   : > { %v1053_v59 = vpop.f32.mrf.mxu2  ;;  %v878_v61 = vpop.f32.mrf.mxu0 }
 0x189   : > { %v1054_v60 = vadd.f32 %v1053_v59, %v965_v58  ;;  %v967_v62 = vpop.f32.mrf.mxu1  ;;  %v879_v63 = vadd.f32 %v1930_v5, %v878_v61 }
 0x18b   : > { %v1143_v0 = vadd.f32 %v1142_v55, %v1054_v60  ;;  %v968_v2 = vadd.f32 %v967_v62, %v879_v63 }
 0x18d   : > { %1183 = vst.msk [vmem:[%s1942_s25 + $0xd8] sm:$0xff] %vm1155_vm1, %v1143_v0  ;;  %v1152_v29 = vpop.f32.mrf.mxu3 }
 0x190   : > { %v1056_v3 = vpop.f32.mrf.mxu2  ;;  %v880_v6 = vpop.f32.mrf.mxu0 }
 0x191   : > { %v1057_v4 = vadd.f32 %v1056_v3, %v968_v2  ;;  %v969_v7 = vpop.f32.mrf.mxu1  ;;  %v881_v9 = vadd.f32 %v1930_v5, %v880_v6 }
 0x193   : > { %v1146_v8 = vadd.f32 %v1145_v1, %v1057_v4  ;;  %v970_v11 = vadd.f32 %v969_v7, %v881_v9 }
 0x195   : > { %1184 = vst.msk [vmem:[%s1942_s25 + $0xe0] sm:$0xff] %vm1155_vm1, %v1146_v8 }
 0x198   : > { %v1058_v12 = vpop.f32.mrf.mxu2  ;;  %v883_v14 = vpop.f32.mrf.mxu0 }
 0x199   : > { %v1059_v13 = vadd.f32 %v1058_v12, %v970_v11  ;;  %v884_v15 = vadd.f32 %v1930_v5, %v883_v14  ;;  %v972_v17 = vpop.f32.mrf.mxu1 }
 0x19b   : > { %v1148_v16 = vadd.f32 %v1147_v10, %v1059_v13  ;;  %v973_v18 = vadd.f32 %v972_v17, %v884_v15 }
 0x19d   : > { %1185 = vst.msk [vmem:[%s1942_s25 + $0xe8] sm:$0xff] %vm1155_vm1, %v1148_v16 }
 0x1a0   : > { %v1061_v20 = vpop.f32.mrf.mxu2  ;;  %v885_v22 = vpop.f32.mrf.mxu0 }
 0x1a1   : > { %v1062_v21 = vadd.f32 %v1061_v20, %v973_v18  ;;  %v886_v24 = vadd.f32 %v1930_v5, %v885_v22  ;;  %v974_v25 = vpop.f32.mrf.mxu1 }
 0x1a3   : > { %v1151_v23 = vadd.f32 %v1150_v19, %v1062_v21  ;;  %v975_v26 = vadd.f32 %v974_v25, %v886_v24 }
 0x1a5   : > { %1186 = vst.msk [vmem:[%s1942_s25 + $0xf0] sm:$0xff] %vm1155_vm1, %v1151_v23 }
 0x1a8   : > { %v1063_v27 = vpop.f32.mrf.mxu2 }
 0x1a9   : > { %v1064_v28 = vadd.f32 %v1063_v27, %v975_v26 }
 0x1ab   : > { %v1153_v30 = vadd.f32 %v1152_v29, %v1064_v28 }
 0x1ad   : > { %1187 = vst.msk [vmem:[%s1942_s25 + $0xf8] sm:$0xff] %vm1155_vm1, %v1153_v30 }
 0x1ae PF: > { %s13_s12 = sadd.s32 1, %s1733_s12  }
 0x1af   : > { %p10_p4 = scmp.ge.s32.totalorder %s13_s12, 4  }
 0x1b1   :  { %12 = sbr.rel (!%p10_p4) target bundleno = 1 (0x1), region = 62 }

// kernel: aib_forward.17
= control target key start
LH: loop header
LB: loop body
LE: loop exit
PB: predicated region body
PF: predicated region fallthrough
CT: control target
= control target key end

     0   :  { %s1057_s12 = smov 0   ;;  %s1299_s0 = inlined_call_operand.vmem [shape: bf16[512,144], index: 0, kind: input, shape index: {}]   ;;  %s1300_s1 = inlined_call_operand.vmem [shape: bf16[144,16], index: 1, kind: input, shape index: {}]   ;;  %s1301_s2 = inlined_call_operand.vmem [shape: f32[1,16], index: 2, kind: input, shape index: {}]   ;;  %s1302_s3 = inlined_call_operand.vmem [shape: f32[512,16], index: 3, kind: output, shape index: {}]  }
   0x1 LB: > { %s777_s13 = sadd.s32 4294967295, %s1035_s12   ;;  %p781_p0 = scmp.ge.s32.totalorder %s1035_s12, 1  ;;  %s1035_s12 = sphi %s1057_s12, %s13_s12  }
   0x2   : > { %p139_p1 = scmp.lt.s32.totalorder %s1035_s12, 3 }
   0x4   : > { %p140_p2 = pnand %p781_p0, %p139_p1 }
   0x5   : > { %s782_s18 = sshll.u32 (!%p140_p2), %s777_s13, 5 }
   0x6   : > { %143 = sbr.rel (%p140_p2) target bundleno = 302 (0x12e), region = 32  ;;  %p165_p3 = scmp.lt.s32.totalorder (!%p140_p2), %s782_s18, 63 }
   0xb   : > { %v1009_v0 = vld [vmem:[%s1300_s1 + $0x38] sm:$0xff]  ;;  %v1010_v1 = vld [vmem:[%s1300_s1 + $0x40] sm:$0xff]  ;;  %v1008_v2 = vld [vmem:[%s1300_s1 + $0x30] sm:$0xff]  ;;  %s1304_s18 = smov (!%p165_p3, %s782_s18), 63  ;;  %vm430_vm0 = vcmask 130048  }
   0xc   : > { %479 = vmatpush.bf16.msra.mxu0 %v1009_v0  ;;  %1011 = vmatpush.bf16.msra.mxu2 %v1009_v0  ;;  %s969_s21 = sshll.u32 %s1304_s18, 3  ;;  %v1007_v3 = vld [vmem:[%s1300_s1 + $0x28] sm:$0xff]  ;;  %v1006_v7 = vld [vmem:[%s1300_s1 + $0x20] sm:$0xff]  ;;  %v1005_v11 = vld [vmem:[%s1300_s1 + $0x18] sm:$0xff] }
   0xd   : > { %575 = vmatpush.bf16.msra.mxu1 %v1010_v1  ;;  %1019 = vmatpush.bf16.msra.mxu3 %v1010_v1  ;;  %s1082_s24 = scalar_lea.vmem %s1299_s0, %s969_s21  ;;  %v1004_v12 = vld [vmem:[%s1300_s1 + $0x10] sm:$0xff]  ;;  %v1003_v16 = vld [vmem:[%s1300_s1 + $0x8] sm:$0xff]  ;;  %v1002_v19 = vld [vmem:[%s1300_s1] sm:$0xff]  ;;  %s1193_s15 = scalar_lea.vmem %s1302_s3, %s969_s21 }
   0xe   : > { %v970_v4 = vld [vmem:[%s1082_s24 + $0x4] sm:$0xf]  ;;  %v791_v5 = vld [vmem:[%s1082_s24 + $0x8] sm:$0xf0]  ;;  %v988_v8 = vld [vmem:[%s1082_s24 + $0x94] sm:$0xf] }
   0xf   : > { %v794_v6 = vor.u32 %v970_v4, %v791_v5  ;;  %v863_v9 = vld [vmem:[%s1082_s24 + $0x98] sm:$0xf0]  ;;  %v972_v13 = vld [vmem:[%s1082_s24 + $0x14] sm:$0xf]  ;;  %v990_v17 = vld [vmem:[%s1082_s24 + $0xa4] sm:$0xf] }
  0x10   : > { %480 = vmatpush.bf16.msra.mxu0 %v1008_v2  ;;  %1012 = vmatpush.bf16.msra.mxu2 %v1008_v2  ;;  %v866_v10 = vor.u32 %v988_v8, %v863_v9  ;;  %v799_v14 = vld [vmem:[%s1082_s24 + $0x18] sm:$0xf0]  ;;  %v871_v18 = vld [vmem:[%s1082_s24 + $0xa8] sm:$0xf0]  ;;  %v789_v20 = vld [vmem:[%s1082_s24] sm:$0xf] }
  0x11   : > { %951 = vmatmul.msk.bf16.vlgmr.msra.gmra.mxu1 %vm430_vm0, %v794_v6  ;;  %v802_v15 = vor.u32 %v972_v13, %v799_v14  ;;  %v971_v21 = vld [vmem:[%s1082_s24 + $0x4] sm:$0xf0]  ;;  %v874_v22 = vor.u32 %v990_v17, %v871_v18  ;;  %v853_v23 = vld [vmem:[%s1082_s24 + $0x80] sm:$0xf]  ;;  %v974_v27 = vld [vmem:[%s1082_s24 + $0x24] sm:$0xf] }
  0x12   : > { %960 = vmatmul.msk.bf16.vlgmr.msra.gmra.mxu3 %vm430_vm0, %v866_v10  ;;  %v987_v24 = vld [vmem:[%s1082_s24 + $0x84] sm:$0xf0]  ;;  %v790_v25 = vor.u32 %v971_v21, %v789_v20  ;;  %v807_v28 = vld [vmem:[%s1082_s24 + $0x28] sm:$0xf0]  ;;  %v992_v30 = vld [vmem:[%s1082_s24 + $0xb4] sm:$0xf] }
  0x13   : > { %v854_v26 = vor.u32 %v987_v24, %v853_v23  ;;  %v810_v29 = vor.u32 %v974_v27, %v807_v28  ;;  %v879_v31 = vld [vmem:[%s1082_s24 + $0xb8] sm:$0xf0]  ;;  %v797_v32 = vld [vmem:[%s1082_s24 + $0x10] sm:$0xf]  ;;  %v973_v33 = vld [vmem:[%s1082_s24 + $0x14] sm:$0xf0] }
  0x14   : > { %481 = vmatpush.bf16.msra.mxu0 %v1007_v3  ;;  %1013 = vmatpush.bf16.msra.mxu2 %v1007_v3  ;;  %v882_v34 = vor.u32 %v992_v30, %v879_v31  ;;  %v861_v35 = vld [vmem:[%s1082_s24 + $0x90] sm:$0xf]  ;;  %v989_v36 = vld [vmem:[%s1082_s24 + $0x94] sm:$0xf0]  ;;  %v798_v37 = vor.u32 %v973_v33, %v797_v32  ;;  %v976_v39 = vld [vmem:[%s1082_s24 + $0x34] sm:$0xf] }
  0x15   : > { %v862_v38 = vor.u32 %v989_v36, %v861_v35  ;;  %v815_v40 = vld [vmem:[%s1082_s24 + $0x38] sm:$0xf0]  ;;  %v994_v42 = vld [vmem:[%s1082_s24 + $0xc4] sm:$0xf]  ;;  %v887_v43 = vld [vmem:[%s1082_s24 + $0xc8] sm:$0xf0] }
  0x16   : > { %v818_v41 = vor.u32 %v976_v39, %v815_v40  ;;  %v805_v44 = vld [vmem:[%s1082_s24 + $0x20] sm:$0xf]  ;;  %v975_v45 = vld [vmem:[%s1082_s24 + $0x24] sm:$0xf0]  ;;  %v890_v46 = vor.u32 %v994_v42, %v887_v43  ;;  %v978_v51 = vld [vmem:[%s1082_s24 + $0x44] sm:$0xf] }
  0x17   : > { %v869_v47 = vld [vmem:[%s1082_s24 + $0xa0] sm:$0xf]  ;;  %v991_v48 = vld [vmem:[%s1082_s24 + $0xa4] sm:$0xf0]  ;;  %v806_v49 = vor.u32 %v975_v45, %v805_v44  ;;  %v823_v52 = vld [vmem:[%s1082_s24 + $0x48] sm:$0xf0] }
  0x18   : > { %482 = vmatpush.bf16.msra.mxu0 %v1006_v7  ;;  %1014 = vmatpush.bf16.msra.mxu2 %v1006_v7  ;;  %v870_v50 = vor.u32 %v991_v48, %v869_v47  ;;  %v826_v53 = vor.u32 %v978_v51, %v823_v52  ;;  %v996_v54 = vld [vmem:[%s1082_s24 + $0xd4] sm:$0xf]  ;;  %v895_v55 = vld [vmem:[%s1082_s24 + $0xd8] sm:$0xf0]  ;;  %v813_v56 = vld [vmem:[%s1082_s24 + $0x30] sm:$0xf] }
  0x19   : > { %v977_v57 = vld [vmem:[%s1082_s24 + $0x34] sm:$0xf0]  ;;  %v898_v58 = vor.u32 %v996_v54, %v895_v55  ;;  %v877_v59 = vld [vmem:[%s1082_s24 + $0xb0] sm:$0xf]  ;;  %v980_v63 = vld [vmem:[%s1082_s24 + $0x54] sm:$0xf] }
  0x1a   : > { %v993_v60 = vld [vmem:[%s1082_s24 + $0xb4] sm:$0xf0]  ;;  %v814_v61 = vor.u32 %v977_v57, %v813_v56  ;;  %v831_v0 = vld [vmem:[%s1082_s24 + $0x58] sm:$0xf0]  ;;  %v998_v2 = vld [vmem:[%s1082_s24 + $0xe4] sm:$0xf] }
  0x1b   : > { %v878_v62 = vor.u32 %v993_v60, %v877_v59  ;;  %v834_v1 = vor.u32 %v980_v63, %v831_v0  ;;  %v903_v3 = vld [vmem:[%s1082_s24 + $0xe8] sm:$0xf0]  ;;  %v821_v4 = vld [vmem:[%s1082_s24 + $0x40] sm:$0xf]  ;;  %v979_v5 = vld [vmem:[%s1082_s24 + $0x44] sm:$0xf0] }
  0x1c   : > { %483 = vmatpush.bf16.msra.mxu0 %v1005_v11  ;;  %1015 = vmatpush.bf16.msra.mxu2 %v1005_v11  ;;  %v906_v6 = vor.u32 %v998_v2, %v903_v3  ;;  %v885_v7 = vld [vmem:[%s1082_s24 + $0xc0] sm:$0xf]  ;;  %v995_v8 = vld [vmem:[%s1082_s24 + $0xc4] sm:$0xf0]  ;;  %v822_v9 = vor.u32 %v979_v5, %v821_v4  ;;  %v982_v11 = vld [vmem:[%s1082_s24 + $0x64] sm:$0xf] }
  0x1d   : > { %v886_v10 = vor.u32 %v995_v8, %v885_v7  ;;  %v1000_v14 = vld [vmem:[%s1082_s24 + $0xf4] sm:$0xf]  ;;  %v981_v17 = vld [vmem:[%s1082_s24 + $0x54] sm:$0xf0]  ;;  %v847_v24 = vld [vmem:[%s1082_s24 + $0x78] sm:$0xf0] }
  0x1e   : > { %v997_v20 = vld [vmem:[%s1082_s24 + $0xd4] sm:$0xf0]  ;;  %v984_v23 = vld [vmem:[%s1082_s24 + $0x74] sm:$0xf]  ;;  %v983_v27 = vld [vmem:[%s1082_s24 + $0x64] sm:$0xf0] }
  0x1f   : > { %v901_v28 = vld [vmem:[%s1082_s24 + $0xe0] sm:$0xf]  ;;  %v986_v32 = vld [vmem:[%s1082_s24 + $0x84] sm:$0xf]  ;;  %v855_v33 = vld [vmem:[%s1082_s24 + $0x88] sm:$0xf0] }
  0x20   : > { %484 = vmatpush.bf16.msra.mxu0 %v1004_v12  ;;  %1016 = vmatpush.bf16.msra.mxu2 %v1004_v12  ;;  %v839_v12 = vld [vmem:[%s1082_s24 + $0x68] sm:$0xf0]  ;;  %v845_v36 = vld [vmem:[%s1082_s24 + $0x70] sm:$0xf]  ;;  %v1001_v39 = vld [vmem:[%s1082_s24 + $0xf4] sm:$0xf0] }
  0x21   : > { %952 = vmatmul.msk.bf16.gmra.mxu1 %vm430_vm0, %v802_v15  ;;  %v842_v13 = vor.u32 %v982_v11, %v839_v12  ;;  %v911_v15 = vld [vmem:[%s1082_s24 + $0xf8] sm:$0xf0]  ;;  %v1185_v44 = vld [vmem:[%s1301_s2] ss:$0 sm:$0xff] }
  0x22   : > { %961 = vmatmul.msk.bf16.gmra.mxu3 %vm430_vm0, %v874_v22  ;;  %v914_v18 = vor.u32 %v1000_v14, %v911_v15 }
  0x24   : > { %485 = vmatpush.bf16.msra.mxu0 %v1003_v16  ;;  %1017 = vmatpush.bf16.msra.mxu2 %v1003_v16  ;;  %v829_v16 = vld [vmem:[%s1082_s24 + $0x50] sm:$0xf] }
  0x25   : > { %v830_v21 = vor.u32 %v981_v17, %v829_v16 }
  0x28   : > { %486 = vmatpush.bf16.msra.mxu0 %v1002_v19  ;;  %1018 = vmatpush.bf16.msra.mxu2 %v1002_v19  ;;  %v893_v19 = vld [vmem:[%s1082_s24 + $0xd0] sm:$0xf] }
  0x29   : > { %v894_v22 = vor.u32 %v997_v20, %v893_v19 }
  0x2b   : > { %487 = vmatmul.bf16.vlgmr.msra.gmra.mxu0 %v790_v25  ;;  %527 = vmatmul.bf16.vlgmr.msra.gmra.mxu2 %v854_v26  ;;  %v850_v25 = vor.u32 %v984_v23, %v847_v24  ;;  %v837_v26 = vld [vmem:[%s1082_s24 + $0x60] sm:$0xf] }
  0x2c   : > { %v838_v30 = vor.u32 %v983_v27, %v837_v26 }
  0x31   : > { %953 = vmatmul.msk.bf16.gmra.mxu1 %vm430_vm0, %v810_v29  ;;  %v999_v29 = vld [vmem:[%s1082_s24 + $0xe4] sm:$0xf0] }
  0x32   : > { %962 = vmatmul.msk.bf16.gmra.mxu3 %vm430_vm0, %v882_v34  ;;  %v902_v31 = vor.u32 %v999_v29, %v901_v28  ;;  %v858_v34 = vor.u32 %v986_v32, %v855_v33 }
  0x3b   : > { %492 = vmatmul.bf16.gmra.mxu0 %v798_v37  ;;  %532 = vmatmul.bf16.gmra.mxu2 %v862_v38  ;;  %v985_v37 = vld [vmem:[%s1082_s24 + $0x74] sm:$0xf0]  ;;  %v909_v38 = vld [vmem:[%s1082_s24 + $0xf0] sm:$0xf] }
  0x3c   : > { %v846_v40 = vor.u32 %v985_v37, %v845_v36 }
  0x41   : > { %954 = vmatmul.msk.bf16.gmra.mxu1 %vm430_vm0, %v818_v41  ;;  %v910_v41 = vor.u32 %v1001_v39, %v909_v38 }
  0x42   : > { %963 = vmatmul.msk.bf16.gmra.mxu3 %vm430_vm0, %v890_v46 }
  0x4b   : > { %497 = vmatmul.bf16.gmra.mxu0 %v806_v49  ;;  %537 = vmatmul.bf16.gmra.mxu2 %v870_v50 }
  0x51   : > { %955 = vmatmul.msk.bf16.gmra.mxu1 %vm430_vm0, %v826_v53 }
  0x52   : > { %964 = vmatmul.msk.bf16.gmra.mxu3 %vm430_vm0, %v898_v58 }
  0x5b   : > { %502 = vmatmul.bf16.gmra.mxu0 %v814_v61  ;;  %542 = vmatmul.bf16.gmra.mxu2 %v878_v62 }
  0x61   : > { %956 = vmatmul.msk.bf16.gmra.mxu1 %vm430_vm0, %v834_v1 }
  0x62   : > { %965 = vmatmul.msk.bf16.gmra.mxu3 %vm430_vm0, %v906_v6 }
  0x6b   : > { %507 = vmatmul.bf16.gmra.mxu0 %v822_v9  ;;  %547 = vmatmul.bf16.gmra.mxu2 %v886_v10 }
  0x71   : > { %957 = vmatmul.msk.bf16.gmra.mxu1 %vm430_vm0, %v842_v13 }
  0x72   : > { %966 = vmatmul.msk.bf16.gmra.mxu3 %vm430_vm0, %v914_v18 }
  0x7b   : > { %512 = vmatmul.bf16.gmra.mxu0 %v830_v21  ;;  %552 = vmatmul.bf16.gmra.mxu2 %v894_v22 }
  0x81   : > { %958 = vmatmul.msk.bf16.gmra.mxu1 %vm430_vm0, %v850_v25 }
  0x8b   : > { %517 = vmatmul.bf16.gmra.mxu0 %v838_v30  ;;  %557 = vmatmul.bf16.gmra.mxu2 %v902_v31 }
  0x8e   : > { %v577_v35 = vpop.f32.mrf.mxu1 }
  0x91   : > { %959 = vmatmul.msk.bf16.gmra.mxu1 %vm430_vm0, %v858_v34 }
  0x95   : > { %v622_v45 = vpop.f32.mrf.mxu3 }
  0x96   : > { %v579_v42 = vpop.f32.mrf.mxu1 }
  0x9b   : > { %522 = vmatmul.bf16.gmra.mxu0 %v846_v40  ;;  %562 = vmatmul.bf16.gmra.mxu2 %v910_v41 }
  0x9d   : > { %v624_v55 = vpop.f32.mrf.mxu3 }
  0x9e   : > { %v582_v43 = vpop.f32.mrf.mxu1 }
  0xa5   : > { %v627_v63 = vpop.f32.mrf.mxu3 }
  0xa6   : > { %v584_v48 = vpop.f32.mrf.mxu1 }
  0xa8   : > { %v488_v46 = vpop.f32.mrf.mxu0 }
  0xa9   : > { %v489_v47 = vadd.f32 %v1185_v44, %v488_v46 }
  0xab   : > { %v578_v49 = vadd.f32 %v577_v35, %v489_v47 }
  0xad   : > { %v657_v50 = vmax.f32 %v578_v49, 0.0  ;;  %v629_v10 = vpop.f32.mrf.mxu3 }
  0xae   : > { %v1197_v51 = vpop.f32.mrf.mxu2  ;;  %v587_v54 = vpop.f32.mrf.mxu1 }
  0xaf   : > { %689 = vst.msk [vmem:[%s1193_s15] sm:$0xff] %vm430_vm0, %v657_v50 }
  0xb0   : > { %v490_v52 = vpop.f32.mrf.mxu0 }
  0xb1   : > { %v491_v53 = vadd.f32 %v1185_v44, %v490_v52 }
  0xb3   : > { %v580_v56 = vadd.f32 %v579_v42, %v491_v53 }
  0xb5   : > { %v658_v57 = vmax.f32 %v580_v56, 0.0  ;;  %v632_v21 = vpop.f32.mrf.mxu3 }
  0xb6   : > { %v1202_v58 = vpop.f32.mrf.mxu2  ;;  %v589_v61 = vpop.f32.mrf.mxu1 }
  0xb7   : > { %690 = vst.msk [vmem:[%s1193_s15 + $0x8] sm:$0xff] %vm430_vm0, %v658_v57 }
  0xb8   : > { %v493_v59 = vpop.f32.mrf.mxu0 }
  0xb9   : > { %v494_v60 = vadd.f32 %v1185_v44, %v493_v59 }
  0xbb   : > { %v583_v62 = vadd.f32 %v582_v43, %v494_v60 }
  0xbd   : > { %v659_v0 = vmax.f32 %v583_v62, 0.0  ;;  %v634_v35 = vpop.f32.mrf.mxu3 }
  0xbe   : > { %v533_v1 = vpop.f32.mrf.mxu2  ;;  %v592_v5 = vpop.f32.mrf.mxu1 }
  0xbf   : > { %691 = vst.msk [vmem:[%s1193_s15 + $0x10] sm:$0xff] %vm430_vm0, %v659_v0  ;;  %v534_v2 = vadd.f32 %v1185_v44, %v533_v1 }
  0xc0   : > { %v495_v3 = vpop.f32.mrf.mxu0 }
  0xc1   : > { %v496_v4 = vadd.f32 %v1185_v44, %v495_v3  ;;  %v623_v6 = vadd.f32 %v622_v45, %v534_v2 }
  0xc3   : > { %v585_v7 = vadd.f32 %v584_v48, %v496_v4  ;;  %v675_v8 = vmax.f32 %v623_v6, 0.0 }
  0xc5   : > { %v660_v9 = vmax.f32 %v585_v7, 0.0  ;;  %707 = vst.msk [vmem:[%s1193_s15 + $0x90] sm:$0xff] %vm430_vm0, %v675_v8  ;;  %v637_v48 = vpop.f32.mrf.mxu3 }
  0xc6   : > { %v535_v11 = vpop.f32.mrf.mxu2  ;;  %v594_v15 = vpop.f32.mrf.mxu1 }
  0xc7   : > { %692 = vst.msk [vmem:[%s1193_s15 + $0x18] sm:$0xff] %vm430_vm0, %v660_v9  ;;  %v536_v12 = vadd.f32 %v1185_v44, %v535_v11 }
  0xc8   : > { %v498_v13 = vpop.f32.mrf.mxu0 }
  0xc9   : > { %v499_v14 = vadd.f32 %v1185_v44, %v498_v13  ;;  %v625_v16 = vadd.f32 %v624_v55, %v536_v12 }
  0xcb   : > { %v588_v17 = vadd.f32 %v587_v54, %v499_v14  ;;  %v676_v18 = vmax.f32 %v625_v16, 0.0 }
  0xcd   : > { %v661_v19 = vmax.f32 %v588_v17, 0.0  ;;  %708 = vst.msk [vmem:[%s1193_s15 + $0x98] sm:$0xff] %vm430_vm0, %v676_v18  ;;  %v639_v62 = vpop.f32.mrf.mxu3 }
  0xce   : > { %v538_v20 = vpop.f32.mrf.mxu2  ;;  %v597_v25 = vpop.f32.mrf.mxu1 }
  0xcf   : > { %693 = vst.msk [vmem:[%s1193_s15 + $0x20] sm:$0xff] %vm430_vm0, %v661_v19  ;;  %v539_v22 = vadd.f32 %v1185_v44, %v538_v20 }
  0xd0   : > { %v500_v23 = vpop.f32.mrf.mxu0 }
  0xd1   : > { %v501_v24 = vadd.f32 %v1185_v44, %v500_v23  ;;  %v628_v26 = vadd.f32 %v627_v63, %v539_v22 }
  0xd3   : > { %v590_v27 = vadd.f32 %v589_v61, %v501_v24  ;;  %v677_v28 = vmax.f32 %v628_v26, 0.0 }
  0xd5   : > { %v662_v29 = vmax.f32 %v590_v27, 0.0  ;;  %709 = vst.msk [vmem:[%s1193_s15 + $0xa0] sm:$0xff] %vm430_vm0, %v677_v28  ;;  %v642_v9 = vpop.f32.mrf.mxu3 }
  0xd6   : > { %v540_v30 = vpop.f32.mrf.mxu2  ;;  %v599_v34 = vpop.f32.mrf.mxu1 }
  0xd7   : > { %694 = vst.msk [vmem:[%s1193_s15 + $0x28] sm:$0xff] %vm430_vm0, %v662_v29  ;;  %v541_v31 = vadd.f32 %v1185_v44, %v540_v30 }
  0xd8   : > { %v503_v32 = vpop.f32.mrf.mxu0 }
  0xd9   : > { %v504_v33 = vadd.f32 %v1185_v44, %v503_v32  ;;  %v630_v36 = vadd.f32 %v629_v10, %v541_v31 }
  0xdb   : > { %v593_v37 = vadd.f32 %v592_v5, %v504_v33  ;;  %v678_v38 = vmax.f32 %v630_v36, 0.0 }
  0xdd   : > { %v663_v39 = vmax.f32 %v593_v37, 0.0  ;;  %710 = vst.msk [vmem:[%s1193_s15 + $0xa8] sm:$0xff] %vm430_vm0, %v678_v38  ;;  %v644_v23 = vpop.f32.mrf.mxu3 }
  0xde   : > { %v543_v40 = vpop.f32.mrf.mxu2  ;;  %v602_v45 = vpop.f32.mrf.mxu1 }
  0xdf   : > { %695 = vst.msk [vmem:[%s1193_s15 + $0x30] sm:$0xff] %vm430_vm0, %v663_v39  ;;  %v544_v41 = vadd.f32 %v1185_v44, %v543_v40  ;;  %v529_v39 = vadd.f32 %v1185_v44, %v1197_v51 }
  0xe0   : > { %v505_v42 = vpop.f32.mrf.mxu0 }
  0xe1   : > { %v506_v43 = vadd.f32 %v1185_v44, %v505_v42  ;;  %v633_v46 = vadd.f32 %v632_v21, %v544_v41 }
  0xe3   : > { %v595_v47 = vadd.f32 %v594_v15, %v506_v43  ;;  %v679_v49 = vmax.f32 %v633_v46, 0.0 }
  0xe5   : > { %v664_v50 = vmax.f32 %v595_v47, 0.0  ;;  %711 = vst.msk [vmem:[%s1193_s15 + $0xb0] sm:$0xff] %vm430_vm0, %v679_v49 }
  0xe6   : > { %v545_v52 = vpop.f32.mrf.mxu2  ;;  %v604_v56 = vpop.f32.mrf.mxu1 }
  0xe7   : > { %696 = vst.msk [vmem:[%s1193_s15 + $0x38] sm:$0xff] %vm430_vm0, %v664_v50  ;;  %v546_v53 = vadd.f32 %v1185_v44, %v545_v52 }
  0xe8   : > { %v508_v54 = vpop.f32.mrf.mxu0 }
  0xe9   : > { %v509_v55 = vadd.f32 %v1185_v44, %v508_v54  ;;  %v635_v57 = vadd.f32 %v634_v35, %v546_v53  ;;  %v647_v35 = vpop.f32.mrf.mxu3  ;;  %v531_v53 = vadd.f32 %v1185_v44, %v1202_v58 }
  0xeb   : > { %v598_v59 = vadd.f32 %v597_v25, %v509_v55  ;;  %v680_v60 = vmax.f32 %v635_v57, 0.0 }
  0xed   : > { %v665_v61 = vmax.f32 %v598_v59, 0.0  ;;  %712 = vst.msk [vmem:[%s1193_s15 + $0xb8] sm:$0xff] %vm430_vm0, %v680_v60 }
  0xee   : > { %v548_v63 = vpop.f32.mrf.mxu2  ;;  %v607_v3 = vpop.f32.mrf.mxu1 }
  0xef   : > { %697 = vst.msk [vmem:[%s1193_s15 + $0x40] sm:$0xff] %vm430_vm0, %v665_v61  ;;  %v549_v0 = vadd.f32 %v1185_v44, %v548_v63 }
  0xf0   : > { %v510_v1 = vpop.f32.mrf.mxu0 }
  0xf1   : > { %v511_v2 = vadd.f32 %v1185_v44, %v510_v1  ;;  %v638_v4 = vadd.f32 %v637_v48, %v549_v0  ;;  %v649_v52 = vpop.f32.mrf.mxu3 }
  0xf3   : > { %v600_v5 = vadd.f32 %v599_v34, %v511_v2  ;;  %v681_v6 = vmax.f32 %v638_v4, 0.0 }
  0xf5   : > { %v666_v7 = vmax.f32 %v600_v5, 0.0  ;;  %713 = vst.msk [vmem:[%s1193_s15 + $0xc0] sm:$0xff] %vm430_vm0, %v681_v6 }
  0xf6   : > { %v550_v8 = vpop.f32.mrf.mxu2  ;;  %v609_v13 = vpop.f32.mrf.mxu1 }
  0xf7   : > { %698 = vst.msk [vmem:[%s1193_s15 + $0x48] sm:$0xff] %vm430_vm0, %v666_v7  ;;  %v551_v10 = vadd.f32 %v1185_v44, %v550_v8 }
  0xf8   : > { %v513_v11 = vpop.f32.mrf.mxu0 }
  0xf9   : > { %v514_v12 = vadd.f32 %v1185_v44, %v513_v11  ;;  %v640_v14 = vadd.f32 %v639_v62, %v551_v10  ;;  %v652_v58 = vpop.f32.mrf.mxu3 }
  0xfb   : > { %v603_v15 = vadd.f32 %v602_v45, %v514_v12  ;;  %v682_v16 = vmax.f32 %v640_v14, 0.0 }
  0xfd   : > { %v667_v17 = vmax.f32 %v603_v15, 0.0  ;;  %714 = vst.msk [vmem:[%s1193_s15 + $0xc8] sm:$0xff] %vm430_vm0, %v682_v16 }
  0xfe   : > { %v553_v18 = vpop.f32.mrf.mxu2  ;;  %v612_v22 = vpop.f32.mrf.mxu1 }
  0xff   : > { %699 = vst.msk [vmem:[%s1193_s15 + $0x50] sm:$0xff] %vm430_vm0, %v667_v17  ;;  %v554_v19 = vadd.f32 %v1185_v44, %v553_v18 }
 0x100   : > { %v515_v20 = vpop.f32.mrf.mxu0 }
 0x101   : > { %v516_v21 = vadd.f32 %v1185_v44, %v515_v20  ;;  %v643_v24 = vadd.f32 %v642_v9, %v554_v19  ;;  %v654_v11 = vpop.f32.mrf.mxu3 }
 0x103   : > { %v605_v25 = vadd.f32 %v604_v56, %v516_v21  ;;  %v683_v26 = vmax.f32 %v643_v24, 0.0 }
 0x105   : > { %v668_v27 = vmax.f32 %v605_v25, 0.0  ;;  %715 = vst.msk [vmem:[%s1193_s15 + $0xd0] sm:$0xff] %vm430_vm0, %v683_v26 }
 0x106   : > { %v555_v28 = vpop.f32.mrf.mxu2  ;;  %v614_v32 = vpop.f32.mrf.mxu1 }
 0x107   : > { %700 = vst.msk [vmem:[%s1193_s15 + $0x58] sm:$0xff] %vm430_vm0, %v668_v27  ;;  %v556_v29 = vadd.f32 %v1185_v44, %v555_v28 }
 0x108   : > { %v518_v30 = vpop.f32.mrf.mxu0 }
 0x109   : > { %v519_v31 = vadd.f32 %v1185_v44, %v518_v30  ;;  %v645_v33 = vadd.f32 %v644_v23, %v556_v29 }
 0x10b   : > { %v608_v34 = vadd.f32 %v607_v3, %v519_v31  ;;  %v684_v36 = vmax.f32 %v645_v33, 0.0 }
 0x10d   : > { %v669_v37 = vmax.f32 %v608_v34, 0.0  ;;  %716 = vst.msk [vmem:[%s1193_s15 + $0xd8] sm:$0xff] %vm430_vm0, %v684_v36 }
 0x10e   : > { %v558_v38 = vpop.f32.mrf.mxu2  ;;  %v617_v43 = vpop.f32.mrf.mxu1 }
 0x10f   : > { %701 = vst.msk [vmem:[%s1193_s15 + $0x60] sm:$0xff] %vm430_vm0, %v669_v37  ;;  %v559_v40 = vadd.f32 %v1185_v44, %v558_v38  ;;  %v618_v46 = vadd.f32 %v617_v43, %v529_v39 }
 0x110   : > { %v520_v41 = vpop.f32.mrf.mxu0 }
 0x111   : > { %v521_v42 = vadd.f32 %v1185_v44, %v520_v41  ;;  %v648_v45 = vadd.f32 %v647_v35, %v559_v40  ;;  %v673_v49 = vmax.f32 %v618_v46, 0.0 }
 0x113   : > { %v610_v47 = vadd.f32 %v609_v13, %v521_v42  ;;  %v685_v48 = vmax.f32 %v648_v45, 0.0  ;;  %705 = vst.msk [vmem:[%s1193_s15 + $0x80] sm:$0xff] %vm430_vm0, %v673_v49 }
 0x115   : > { %v670_v50 = vmax.f32 %v610_v47, 0.0  ;;  %717 = vst.msk [vmem:[%s1193_s15 + $0xe0] sm:$0xff] %vm430_vm0, %v685_v48 }
 0x116   : > { %v560_v51 = vpop.f32.mrf.mxu2  ;;  %v619_v57 = vpop.f32.mrf.mxu1 }
 0x117   : > { %702 = vst.msk [vmem:[%s1193_s15 + $0x68] sm:$0xff] %vm430_vm0, %v670_v50  ;;  %v561_v54 = vadd.f32 %v1185_v44, %v560_v51  ;;  %v620_v60 = vadd.f32 %v619_v57, %v531_v53 }
 0x118   : > { %v523_v55 = vpop.f32.mrf.mxu0 }
 0x119   : > { %v524_v56 = vadd.f32 %v1185_v44, %v523_v55  ;;  %v650_v59 = vadd.f32 %v649_v52, %v561_v54  ;;  %v674_v63 = vmax.f32 %v620_v60, 0.0 }
 0x11b   : > { %v613_v61 = vadd.f32 %v612_v22, %v524_v56  ;;  %v686_v62 = vmax.f32 %v650_v59, 0.0  ;;  %706 = vst.msk [vmem:[%s1193_s15 + $0x88] sm:$0xff] %vm430_vm0, %v674_v63 }
 0x11d   : > { %v671_v0 = vmax.f32 %v613_v61, 0.0  ;;  %718 = vst.msk [vmem:[%s1193_s15 + $0xe8] sm:$0xff] %vm430_vm0, %v686_v62 }
 0x11e   : > { %v563_v1 = vpop.f32.mrf.mxu2 }
 0x11f   : > { %703 = vst.msk [vmem:[%s1193_s15 + $0x70] sm:$0xff] %vm430_vm0, %v671_v0  ;;  %v564_v2 = vadd.f32 %v1185_v44, %v563_v1 }
 0x120   : > { %v525_v3 = vpop.f32.mrf.mxu0 }
 0x121   : > { %v526_v4 = vadd.f32 %v1185_v44, %v525_v3  ;;  %v653_v5 = vadd.f32 %v652_v58, %v564_v2 }
 0x123   : > { %v615_v6 = vadd.f32 %v614_v32, %v526_v4  ;;  %v687_v7 = vmax.f32 %v653_v5, 0.0 }
 0x125   : > { %v672_v8 = vmax.f32 %v615_v6, 0.0  ;;  %719 = vst.msk [vmem:[%s1193_s15 + $0xf0] sm:$0xff] %vm430_vm0, %v687_v7 }
 0x126   : > { %v565_v9 = vpop.f32.mrf.mxu2 }
 0x127   : > { %704 = vst.msk [vmem:[%s1193_s15 + $0x78] sm:$0xff] %vm430_vm0, %v672_v8  ;;  %v566_v10 = vadd.f32 %v1185_v44, %v565_v9 }
 0x129   : > { %v655_v12 = vadd.f32 %v654_v11, %v566_v10 }
 0x12b   : > { %v688_v13 = vmax.f32 %v655_v12, 0.0 }
 0x12d   : > { %720 = vst.msk [vmem:[%s1193_s15 + $0xf8] sm:$0xff] %vm430_vm0, %v688_v13 }
 0x12e PF: > { %s13_s12 = sadd.s32 1, %s1035_s12  }
 0x12f   : > { %p10_p4 = scmp.ge.s32.totalorder %s13_s12, 4  }
 0x131   :  { %12 = sbr.rel (!%p10_p4) target bundleno = 1 (0x1), region = 62 }

// kernel: aib_forward.18
= control target key start
LH: loop header
LB: loop body
LE: loop exit
PB: predicated region body
PF: predicated region fallthrough
CT: control target
= control target key end

     0   :  { %s1368_s27 = smov 0   ;;  %s1726_s0 = inlined_call_operand.vmem [shape: bf16[2,256,144], index: 0, kind: input, shape index: {}]   ;;  %s1727_s1 = inlined_call_operand.vmem [shape: bf16[144,16], index: 1, kind: input, shape index: {}]   ;;  %s1728_s2 = inlined_call_operand.vmem [shape: f32[1,16], index: 2, kind: input, shape index: {}]   ;;  %s1729_s3 = inlined_call_operand.vmem [shape: f32[16,4], index: 3, kind: input, shape index: {}]   ;;  %s1730_s4 = inlined_call_operand.vmem [shape: f32[1,4], index: 4, kind: input, shape index: {}]   ;;  %s1731_s5 = inlined_call_operand.vmem [shape: f32[4,16], index: 5, kind: input, shape index: {}]   ;;  %s1732_s6 = inlined_call_operand.vmem [shape: f32[1,16], index: 6, kind: input, shape index: {}]   ;;  %s1733_s7 = inlined_call_operand.vmem [shape: f32[2,256,16], index: 7, kind: output, shape index: {0}]   ;;  %s1734_s8 = inlined_call_operand.vmem [shape: f32[2,1,16], index: 8, kind: output, shape index: {1}]  }
   0x1 LB: > { %s1055_s28 = sadd.s32 4294967295, %s1321_s27   ;;  %p1059_p0 = scmp.ge.s32.totalorder %s1321_s27, 1  ;;  %s1321_s27 = sphi %s1368_s27, %s19_s27  }
   0x2   : > { %p265_p1 = scmp.lt.s32.totalorder %s1321_s27, 3 }
   0x4   : > { %p266_p2 = pnand %p1059_p0, %p265_p1 }
   0x5   : > { %p302_p3 = scmp.lt.s32.totalorder (!%p266_p2), %s1055_s28, 1 }
   0x6   : > { %269 = sbr.rel (%p266_p2) target bundleno = 641 (0x281), region = 48 }
   0xb   : > { %v1291_v0 = vld [vmem:[%s1727_s1 + $0x38] sm:$0xff]  ;;  %v1292_v1 = vld [vmem:[%s1727_s1 + $0x40] sm:$0xff]  ;;  %v1290_v2 = vld [vmem:[%s1727_s1 + $0x30] sm:$0xff]  ;;  %s1736_s28 = smov (!%p302_p3, %s1055_s28), 1  ;;  %vm568_vm0 = vcmask 130048   ;;  %vm930_vm1 = vcmask 1043456  }
   0xc   : > { %617 = vmatpush.bf16.msra.mxu0 %v1291_v0  ;;  %713 = vmatpush.bf16.msra.mxu1 %v1292_v1  ;;  %s1250_s13 = sshll.u32 %s1736_s28, 8  ;;  %v1289_v5 = vld [vmem:[%s1727_s1 + $0x28] sm:$0xff]  ;;  %v1288_v7 = vld [vmem:[%s1727_s1 + $0x20] sm:$0xff]  ;;  %v1287_v8 = vld [vmem:[%s1727_s1 + $0x18] sm:$0xff]  ;;  %vm926_vm2 = vcmask 31744   ;;  %s314_s26 = scalar_lea.vmem %s1734_s8, %s1736_s28  ;;  %vm973_vm6 = vcmask 122880  }
   0xd   : > { %1293 = vmatpush.bf16.msra.mxu3 %v1291_v0  ;;  %1301 = vmatpush.bf16.msra.mxu2 %v1292_v1  ;;  %s1393_s16 = scalar_lea.vmem %s1726_s0, %s1250_s13  ;;  %v1286_v9 = vld [vmem:[%s1727_s1 + $0x10] sm:$0xff]  ;;  %v1285_v13 = vld [vmem:[%s1727_s1 + $0x8] sm:$0xff]  ;;  %v1284_v14 = vld [vmem:[%s1727_s1] sm:$0xff]  ;;  %s1504_s14 = scalar_lea.vmem %s1733_s7, %s1250_s13 }
   0xe   : > { %v1252_v3 = vld [vmem:[%s1393_s16 + $0x4] sm:$0xf]  ;;  %v1068_v4 = vld [vmem:[%s1393_s16 + $0x8] sm:$0xf0]  ;;  %v1254_v10 = vld [vmem:[%s1393_s16 + $0x14] sm:$0xf] }
   0xf   : > { %v1071_v6 = vor.u32 %v1252_v3, %v1068_v4  ;;  %v1076_v11 = vld [vmem:[%s1393_s16 + $0x18] sm:$0xf0]  ;;  %v1066_v15 = vld [vmem:[%s1393_s16] sm:$0xf]  ;;  %v1253_v16 = vld [vmem:[%s1393_s16 + $0x4] sm:$0xf0] }
  0x10   : > { %618 = vmatpush.bf16.msra.mxu0 %v1290_v2  ;;  %v1079_v12 = vor.u32 %v1254_v10, %v1076_v11  ;;  %v1130_v17 = vld [vmem:[%s1393_s16 + $0x80] sm:$0xf]  ;;  %v1269_v18 = vld [vmem:[%s1393_s16 + $0x84] sm:$0xf0]  ;;  %v1067_v19 = vor.u32 %v1253_v16, %v1066_v15  ;;  %v1256_v21 = vld [vmem:[%s1393_s16 + $0x24] sm:$0xf] }
  0x11   : > { %1294 = vmatpush.bf16.msra.mxu3 %v1290_v2  ;;  %1228 = vmatmul.msk.bf16.vlgmr.msra.gmra.mxu1 %vm568_vm0, %v1071_v6  ;;  %v1131_v20 = vor.u32 %v1269_v18, %v1130_v17  ;;  %v1084_v22 = vld [vmem:[%s1393_s16 + $0x28] sm:$0xf0]  ;;  %v1074_v24 = vld [vmem:[%s1393_s16 + $0x10] sm:$0xf]  ;;  %v1255_v25 = vld [vmem:[%s1393_s16 + $0x14] sm:$0xf0] }
  0x12   : > { %v1087_v23 = vor.u32 %v1256_v21, %v1084_v22  ;;  %v1138_v26 = vld [vmem:[%s1393_s16 + $0x90] sm:$0xf]  ;;  %v1271_v27 = vld [vmem:[%s1393_s16 + $0x94] sm:$0xf0]  ;;  %v1075_v28 = vor.u32 %v1255_v25, %v1074_v24  ;;  %v1272_v30 = vld [vmem:[%s1393_s16 + $0xa4] sm:$0xf] }
  0x13   : > { %v1139_v29 = vor.u32 %v1271_v27, %v1138_v26  ;;  %v1148_v31 = vld [vmem:[%s1393_s16 + $0xa8] sm:$0xf0]  ;;  %v1258_v32 = vld [vmem:[%s1393_s16 + $0x34] sm:$0xf]  ;;  %v1092_v33 = vld [vmem:[%s1393_s16 + $0x38] sm:$0xf0] }
  0x14   : > { %619 = vmatpush.bf16.msra.mxu0 %v1289_v5  ;;  %v1151_v34 = vor.u32 %v1272_v30, %v1148_v31  ;;  %v1095_v35 = vor.u32 %v1258_v32, %v1092_v33  ;;  %v1082_v36 = vld [vmem:[%s1393_s16 + $0x20] sm:$0xf]  ;;  %v1257_v37 = vld [vmem:[%s1393_s16 + $0x24] sm:$0xf0]  ;;  %v1274_v42 = vld [vmem:[%s1393_s16 + $0xb4] sm:$0xf] }
  0x15   : > { %1295 = vmatpush.bf16.msra.mxu3 %v1289_v5  ;;  %v1146_v38 = vld [vmem:[%s1393_s16 + $0xa0] sm:$0xf]  ;;  %v1273_v39 = vld [vmem:[%s1393_s16 + $0xa4] sm:$0xf0]  ;;  %v1083_v40 = vor.u32 %v1257_v37, %v1082_v36  ;;  %v1156_v43 = vld [vmem:[%s1393_s16 + $0xb8] sm:$0xf0] }
  0x16   : > { %1238 = vmatmul.msk.bf16.vlgmr.msra.gmra.mxu2 %vm568_vm0, %v1151_v34  ;;  %v1147_v41 = vor.u32 %v1273_v39, %v1146_v38  ;;  %v1260_v44 = vld [vmem:[%s1393_s16 + $0x44] sm:$0xf]  ;;  %v1100_v45 = vld [vmem:[%s1393_s16 + $0x48] sm:$0xf0]  ;;  %v1159_v46 = vor.u32 %v1274_v42, %v1156_v43  ;;  %v1090_v48 = vld [vmem:[%s1393_s16 + $0x30] sm:$0xf] }
  0x17   : > { %v1103_v47 = vor.u32 %v1260_v44, %v1100_v45  ;;  %v1259_v49 = vld [vmem:[%s1393_s16 + $0x34] sm:$0xf0]  ;;  %v1154_v50 = vld [vmem:[%s1393_s16 + $0xb0] sm:$0xf]  ;;  %v1276_v54 = vld [vmem:[%s1393_s16 + $0xc4] sm:$0xf] }
  0x18   : > { %620 = vmatpush.bf16.msra.mxu0 %v1288_v7  ;;  %v1275_v51 = vld [vmem:[%s1393_s16 + $0xb4] sm:$0xf0]  ;;  %v1091_v52 = vor.u32 %v1259_v49, %v1090_v48  ;;  %v1164_v55 = vld [vmem:[%s1393_s16 + $0xc8] sm:$0xf0]  ;;  %v1262_v56 = vld [vmem:[%s1393_s16 + $0x54] sm:$0xf] }
  0x19   : > { %1296 = vmatpush.bf16.msra.mxu3 %v1288_v7  ;;  %v1155_v53 = vor.u32 %v1275_v51, %v1154_v50  ;;  %v1108_v57 = vld [vmem:[%s1393_s16 + $0x58] sm:$0xf0]  ;;  %v1167_v58 = vor.u32 %v1276_v54, %v1164_v55  ;;  %v1098_v60 = vld [vmem:[%s1393_s16 + $0x40] sm:$0xf]  ;;  %v1261_v61 = vld [vmem:[%s1393_s16 + $0x44] sm:$0xf0] }
  0x1a   : > { %v1111_v59 = vor.u32 %v1262_v56, %v1108_v57  ;;  %v1162_v62 = vld [vmem:[%s1393_s16 + $0xc0] sm:$0xf]  ;;  %v1277_v63 = vld [vmem:[%s1393_s16 + $0xc4] sm:$0xf0]  ;;  %v1099_v0 = vor.u32 %v1261_v61, %v1098_v60  ;;  %v1264_v2 = vld [vmem:[%s1393_s16 + $0x64] sm:$0xf] }
  0x1b   : > { %v1163_v1 = vor.u32 %v1277_v63, %v1162_v62  ;;  %v1116_v3 = vld [vmem:[%s1393_s16 + $0x68] sm:$0xf0]  ;;  %v1278_v4 = vld [vmem:[%s1393_s16 + $0xd4] sm:$0xf]  ;;  %v1172_v5 = vld [vmem:[%s1393_s16 + $0xd8] sm:$0xf0] }
  0x1c   : > { %621 = vmatpush.bf16.msra.mxu0 %v1287_v8  ;;  %v1175_v6 = vor.u32 %v1278_v4, %v1172_v5  ;;  %v1119_v7 = vor.u32 %v1264_v2, %v1116_v3  ;;  %v1170_v10 = vld [vmem:[%s1393_s16 + $0xd0] sm:$0xf]  ;;  %v1279_v11 = vld [vmem:[%s1393_s16 + $0xd4] sm:$0xf0]  ;;  %v1124_v15 = vld [vmem:[%s1393_s16 + $0x78] sm:$0xf0] }
  0x1d   : > { %1297 = vmatpush.bf16.msra.mxu3 %v1287_v8  ;;  %v1106_v8 = vld [vmem:[%s1393_s16 + $0x50] sm:$0xf]  ;;  %v1280_v16 = vld [vmem:[%s1393_s16 + $0xe4] sm:$0xf]  ;;  %v1180_v17 = vld [vmem:[%s1393_s16 + $0xe8] sm:$0xf0] }
  0x1e   : > { %v1183_v18 = vor.u32 %v1280_v16, %v1180_v17  ;;  %v1265_v21 = vld [vmem:[%s1393_s16 + $0x64] sm:$0xf0]  ;;  %v1178_v22 = vld [vmem:[%s1393_s16 + $0xe0] sm:$0xf]  ;;  %v1268_v26 = vld [vmem:[%s1393_s16 + $0x84] sm:$0xf] }
  0x1f   : > { %v1132_v27 = vld [vmem:[%s1393_s16 + $0x88] sm:$0xf0]  ;;  %v1122_v33 = vld [vmem:[%s1393_s16 + $0x70] sm:$0xf]  ;;  %v1267_v34 = vld [vmem:[%s1393_s16 + $0x74] sm:$0xf0] }
  0x20   : > { %622 = vmatpush.bf16.msra.mxu0 %v1286_v9  ;;  %v1135_v31 = vor.u32 %v1268_v26, %v1132_v27  ;;  %v1283_v36 = vld [vmem:[%s1393_s16 + $0xf4] sm:$0xf0]  ;;  %v1123_v37 = vor.u32 %v1267_v34, %v1122_v33  ;;  %v1496_v44 = vld [vmem:[%s1728_s2] ss:$0 sm:$0xff] }
  0x21   : > { %1298 = vmatpush.bf16.msra.mxu3 %v1286_v9  ;;  %1229 = vmatmul.msk.bf16.gmra.mxu1 %vm568_vm0, %v1079_v12  ;;  %v1263_v9 = vld [vmem:[%s1393_s16 + $0x54] sm:$0xf0] }
  0x22   : > { %v1107_v12 = vor.u32 %v1263_v9, %v1106_v8 }
  0x24   : > { %623 = vmatpush.bf16.msra.mxu0 %v1285_v13 }
  0x25   : > { %1299 = vmatpush.bf16.msra.mxu3 %v1285_v13  ;;  %v1171_v13 = vor.u32 %v1279_v11, %v1170_v10 }
  0x26   : > { %1239 = vmatmul.msk.bf16.gmra.mxu2 %vm568_vm0, %v1159_v46 }
  0x28   : > { %624 = vmatpush.bf16.msra.mxu0 %v1284_v14 }
  0x29   : > { %1300 = vmatpush.bf16.msra.mxu3 %v1284_v14  ;;  %v1266_v14 = vld [vmem:[%s1393_s16 + $0x74] sm:$0xf] }
  0x2b   : > { %625 = vmatmul.bf16.vlgmr.msra.gmra.mxu0 %v1067_v19  ;;  %v1127_v19 = vor.u32 %v1266_v14, %v1124_v15 }
  0x2c   : > { %665 = vmatmul.bf16.vlgmr.msra.gmra.mxu3 %v1131_v20  ;;  %v1114_v20 = vld [vmem:[%s1393_s16 + $0x60] sm:$0xf] }
  0x2d   : > { %v1115_v24 = vor.u32 %v1265_v21, %v1114_v20 }
  0x31   : > { %1230 = vmatmul.msk.bf16.gmra.mxu1 %vm568_vm0, %v1087_v23  ;;  %v1281_v23 = vld [vmem:[%s1393_s16 + $0xe4] sm:$0xf0] }
  0x32   : > { %v1179_v25 = vor.u32 %v1281_v23, %v1178_v22 }
  0x36   : > { %1240 = vmatmul.msk.bf16.gmra.mxu2 %vm568_vm0, %v1167_v58 }
  0x3b   : > { %630 = vmatmul.bf16.gmra.mxu0 %v1075_v28  ;;  %v1282_v28 = vld [vmem:[%s1393_s16 + $0xf4] sm:$0xf] }
  0x3c   : > { %670 = vmatmul.bf16.gmra.mxu3 %v1139_v29  ;;  %v1188_v29 = vld [vmem:[%s1393_s16 + $0xf8] sm:$0xf0] }
  0x3d   : > { %v1191_v30 = vor.u32 %v1282_v28, %v1188_v29 }
  0x41   : > { %1231 = vmatmul.msk.bf16.gmra.mxu1 %vm568_vm0, %v1095_v35  ;;  %v1186_v35 = vld [vmem:[%s1393_s16 + $0xf0] sm:$0xf] }
  0x42   : > { %v1187_v39 = vor.u32 %v1283_v36, %v1186_v35 }
  0x46   : > { %1241 = vmatmul.msk.bf16.gmra.mxu2 %vm568_vm0, %v1175_v6 }
  0x4b   : > { %635 = vmatmul.bf16.gmra.mxu0 %v1083_v40  ;;  %v1270_v40 = vld [vmem:[%s1393_s16 + $0x94] sm:$0xf] }
  0x4c   : > { %675 = vmatmul.bf16.gmra.mxu3 %v1147_v41  ;;  %v1140_v41 = vld [vmem:[%s1393_s16 + $0x98] sm:$0xf0] }
  0x4d   : > { %v1143_v42 = vor.u32 %v1270_v40, %v1140_v41 }
  0x51   : > { %1232 = vmatmul.msk.bf16.gmra.mxu1 %vm568_vm0, %v1103_v47 }
  0x56   : > { %1242 = vmatmul.msk.bf16.gmra.mxu2 %vm568_vm0, %v1183_v18 }
  0x5b   : > { %640 = vmatmul.bf16.gmra.mxu0 %v1091_v52 }
  0x5c   : > { %680 = vmatmul.bf16.gmra.mxu3 %v1155_v53 }
  0x61   : > { %1233 = vmatmul.msk.bf16.gmra.mxu1 %vm568_vm0, %v1111_v59 }
  0x66   : > { %1243 = vmatmul.msk.bf16.gmra.mxu2 %vm568_vm0, %v1191_v30 }
  0x6b   : > { %645 = vmatmul.bf16.gmra.mxu0 %v1099_v0 }
  0x6c   : > { %685 = vmatmul.bf16.gmra.mxu3 %v1163_v1 }
  0x71   : > { %1234 = vmatmul.msk.bf16.gmra.mxu1 %vm568_vm0, %v1119_v7 }
  0x7b   : > { %650 = vmatmul.bf16.gmra.mxu0 %v1107_v12 }
  0x7c   : > { %690 = vmatmul.bf16.gmra.mxu3 %v1171_v13 }
  0x81   : > { %1235 = vmatmul.msk.bf16.gmra.mxu1 %vm568_vm0, %v1127_v19 }
  0x8b   : > { %655 = vmatmul.bf16.gmra.mxu0 %v1115_v24  ;;  %v898_v24 = vld [vmem:[%s1729_s3 + $0x8] sm:$0xff] }
  0x8c   : > { %695 = vmatmul.bf16.gmra.mxu3 %v1179_v25  ;;  %917 = vmatpush.msrb.mxu2 %v898_v24 }
  0x8e   : > { %v715_v32 = vpop.f32.mrf.mxu1 }
  0x91   : > { %1236 = vmatmul.msk.bf16.gmra.mxu1 %vm568_vm0, %v1135_v31 }
  0x96   : > { %v717_v38 = vpop.f32.mrf.mxu1 }
  0x99   : > { %v765_v4 = vpop.f32.mrf.mxu2 }
  0x9b   : > { %660 = vmatmul.bf16.gmra.mxu0 %v1123_v37 }
  0x9c   : > { %700 = vmatmul.bf16.gmra.mxu3 %v1187_v39 }
  0x9e   : > { %v720_v43 = vpop.f32.mrf.mxu1 }
  0xa1   : > { %1237 = vmatmul.msk.bf16.gmra.mxu1 %vm568_vm0, %v1143_v42  ;;  %v767_v12 = vpop.f32.mrf.mxu2 }
  0xa6   : > { %v722_v45 = vpop.f32.mrf.mxu1 }
  0xa8   : > { %v626_v46 = vpop.f32.mrf.mxu0 }
  0xa9   : > { %v627_v47 = vadd.f32 %v1496_v44, %v626_v46  ;;  %v770_v22 = vpop.f32.mrf.mxu2 }
  0xab   : > { %v716_v48 = vadd.f32 %v715_v32, %v627_v47 }
  0xad   : > { %795 = vst.msk [vmem:[%s1504_s14] sm:$0xff] %vm568_vm0, %v716_v48  ;;  %v827_v54 = vsel %vm568_vm0, %v716_v48, 0.0 }
  0xae   : > { %v725_v50 = vpop.f32.mrf.mxu1 }
  0xaf   : > { %v1508_v49 = vpop.f32.mrf.mxu3 }
  0xb0   : > { %v628_v51 = vpop.f32.mrf.mxu0 }
  0xb1   : > { %v629_v52 = vadd.f32 %v1496_v44, %v628_v51  ;;  %v772_v31 = vpop.f32.mrf.mxu2 }
  0xb3   : > { %v718_v53 = vadd.f32 %v717_v38, %v629_v52 }
  0xb5   : > { %796 = vst.msk [vmem:[%s1504_s14 + $0x8] sm:$0xff] %vm568_vm0, %v718_v53  ;;  %v828_v55 = vsel %vm568_vm0, %v718_v53, 0.0 }
  0xb6   : > { %v829_v56 = vadd.f32 %v828_v55, %v827_v54  ;;  %v727_v58 = vpop.f32.mrf.mxu1 }
  0xb7   : > { %v1515_v57 = vpop.f32.mrf.mxu3 }
  0xb8   : > { %v631_v59 = vpop.f32.mrf.mxu0 }
  0xb9   : > { %v632_v60 = vadd.f32 %v1496_v44, %v631_v59  ;;  %v775_v39 = vpop.f32.mrf.mxu2 }
  0xbb   : > { %v721_v61 = vadd.f32 %v720_v43, %v632_v60 }
  0xbd   : > { %797 = vst.msk [vmem:[%s1504_s14 + $0x10] sm:$0xff] %vm568_vm0, %v721_v61  ;;  %v830_v62 = vsel %vm568_vm0, %v721_v61, 0.0 }
  0xbe   : > { %v831_v63 = vadd.f32 %v830_v62, %v829_v56  ;;  %v730_v1 = vpop.f32.mrf.mxu1 }
  0xbf   : > { %v1521_v0 = vpop.f32.mrf.mxu3 }
  0xc0   : > { %v633_v2 = vpop.f32.mrf.mxu0 }
  0xc1   : > { %v634_v3 = vadd.f32 %v1496_v44, %v633_v2 }
  0xc3   : > { %v723_v5 = vadd.f32 %v722_v45, %v634_v3 }
  0xc5   : > { %798 = vst.msk [vmem:[%s1504_s14 + $0x18] sm:$0xff] %vm568_vm0, %v723_v5  ;;  %v832_v6 = vsel %vm568_vm0, %v723_v5, 0.0 }
  0xc6   : > { %v833_v7 = vadd.f32 %v832_v6, %v831_v63  ;;  %v732_v9 = vpop.f32.mrf.mxu1 }
  0xc7   : > { %v1527_v8 = vpop.f32.mrf.mxu3 }
  0xc8   : > { %v636_v10 = vpop.f32.mrf.mxu0 }
  0xc9   : > { %v637_v11 = vadd.f32 %v1496_v44, %v636_v10 }
  0xcb   : > { %v726_v13 = vadd.f32 %v725_v50, %v637_v11  ;;  %v777_v50 = vpop.f32.mrf.mxu2 }
  0xcd   : > { %799 = vst.msk [vmem:[%s1504_s14 + $0x20] sm:$0xff] %vm568_vm0, %v726_v13  ;;  %v834_v14 = vsel %vm568_vm0, %v726_v13, 0.0 }
  0xce   : > { %v1533_v15 = vadd.f32 %v834_v14, %v833_v7  ;;  %v735_v17 = vpop.f32.mrf.mxu1 }
  0xcf   : > { %v676_v16 = vpop.f32.mrf.mxu3 }
  0xd0   : > { %v638_v18 = vpop.f32.mrf.mxu0  ;;  %v677_v19 = vadd.f32 %v1496_v44, %v676_v16 }
  0xd1   : > { %v639_v20 = vadd.f32 %v1496_v44, %v638_v18  ;;  %v897_v18 = vld [vmem:[%s1729_s3] sm:$0xff] }
  0xd2   : > { %v1537_v21 = vadd.f32 %v765_v4, %v677_v19  ;;  %918 = vmatpush.msrb.mxu2 %v897_v18 }
  0xd3   : > { %v1539_v23 = vadd.f32 %v727_v58, %v639_v20  ;;  %v780_v59 = vpop.f32.mrf.mxu2 }
  0xd4   : > { %815 = vst.msk [vmem:[%s1504_s14 + $0xa0] sm:$0xff] %vm568_vm0, %v1537_v21 }
  0xd5   : > { %800 = vst.msk [vmem:[%s1504_s14 + $0x28] sm:$0xff] %vm568_vm0, %v1539_v23 }
  0xd6   : > { %v737_v26 = vpop.f32.mrf.mxu1 }
  0xd7   : > { %v678_v25 = vpop.f32.mrf.mxu3 }
  0xd8   : > { %v641_v27 = vpop.f32.mrf.mxu0  ;;  %v679_v28 = vadd.f32 %v1496_v44, %v678_v25  ;;  %v667_v25 = vadd.f32 %v1496_v44, %v1508_v49 }
  0xd9   : > { %v642_v29 = vadd.f32 %v1496_v44, %v641_v27 }
  0xda   : > { %v1552_v30 = vadd.f32 %v767_v12, %v679_v28 }
  0xdb   : > { %v1554_v32 = vadd.f32 %v730_v1, %v642_v29  ;;  %v782_v5 = vpop.f32.mrf.mxu2 }
  0xdc   : > { %816 = vst.msk [vmem:[%s1504_s14 + $0xa8] sm:$0xff] %vm568_vm0, %v1552_v30 }
  0xdd   : > { %801 = vst.msk [vmem:[%s1504_s14 + $0x30] sm:$0xff] %vm568_vm0, %v1554_v32 }
  0xde   : > { %v740_v34 = vpop.f32.mrf.mxu1 }
  0xdf   : > { %v681_v33 = vpop.f32.mrf.mxu3 }
  0xe0   : > { %v643_v35 = vpop.f32.mrf.mxu0  ;;  %v682_v36 = vadd.f32 %v1496_v44, %v681_v33  ;;  %v838_v33 = vsel %vm568_vm0, %v1554_v32, 0.0 }
  0xe1   : > { %v644_v37 = vadd.f32 %v1496_v44, %v643_v35 }
  0xe2   : > { %v1564_v38 = vadd.f32 %v770_v22, %v682_v36 }
  0xe3   : > { %v1566_v40 = vadd.f32 %v732_v9, %v644_v37  ;;  %v785_v20 = vpop.f32.mrf.mxu2 }
  0xe4   : > { %817 = vst.msk [vmem:[%s1504_s14 + $0xb0] sm:$0xff] %vm568_vm0, %v1564_v38 }
  0xe5   : > { %802 = vst.msk [vmem:[%s1504_s14 + $0x38] sm:$0xff] %vm568_vm0, %v1566_v40  ;;  %v840_v49 = vsel %vm568_vm0, %v1566_v40, 0.0 }
  0xe6   : > { %v742_v42 = vpop.f32.mrf.mxu1 }
  0xe7   : > { %v683_v41 = vpop.f32.mrf.mxu3 }
  0xe8   : > { %v646_v43 = vpop.f32.mrf.mxu0  ;;  %v684_v45 = vadd.f32 %v1496_v44, %v683_v41 }
  0xe9   : > { %v647_v46 = vadd.f32 %v1496_v44, %v646_v43 }
  0xea   : > { %v1576_v47 = vadd.f32 %v772_v31, %v684_v45 }
  0xeb   : > { %v736_v48 = vadd.f32 %v735_v17, %v647_v46 }
  0xec   : > { %818 = vst.msk [vmem:[%s1504_s14 + $0xb8] sm:$0xff] %vm568_vm0, %v1576_v47 }
  0xed   : > { %803 = vst.msk [vmem:[%s1504_s14 + $0x40] sm:$0xff] %vm568_vm0, %v736_v48  ;;  %v842_v32 = vsel %vm568_vm0, %v736_v48, 0.0 }
  0xee   : > { %v745_v52 = vpop.f32.mrf.mxu1 }
  0xef   : > { %v686_v51 = vpop.f32.mrf.mxu3 }
  0xf0   : > { %v648_v53 = vpop.f32.mrf.mxu0  ;;  %v687_v54 = vadd.f32 %v1496_v44, %v686_v51 }
  0xf1   : > { %v649_v55 = vadd.f32 %v1496_v44, %v648_v53 }
  0xf2   : > { %v1585_v56 = vadd.f32 %v775_v39, %v687_v54  ;;  %v787_v39 = vpop.f32.mrf.mxu2 }
  0xf3   : > { %v738_v58 = vadd.f32 %v737_v26, %v649_v55  ;;  %v836_v26 = vsel %vm568_vm0, %v1539_v23, 0.0 }
  0xf4   : > { %819 = vst.msk [vmem:[%s1504_s14 + $0xc0] sm:$0xff] %vm568_vm0, %v1585_v56  ;;  %v837_v36 = vadd.f32 %v836_v26, %v1533_v15  ;;  %v669_v15 = vadd.f32 %v1496_v44, %v1515_v57 }
  0xf5   : > { %804 = vst.msk [vmem:[%s1504_s14 + $0x48] sm:$0xff] %vm568_vm0, %v738_v58  ;;  %v844_v40 = vsel %vm568_vm0, %v738_v58, 0.0 }
  0xf6   : > { %v747_v61 = vpop.f32.mrf.mxu1  ;;  %v839_v41 = vadd.f32 %v838_v33, %v837_v36 }
  0xf7   : > { %v688_v60 = vpop.f32.mrf.mxu3 }
  0xf8   : > { %v651_v62 = vpop.f32.mrf.mxu0  ;;  %v689_v63 = vadd.f32 %v1496_v44, %v688_v60 }
  0xf9   : > { %v652_v1 = vadd.f32 %v1496_v44, %v651_v62 }
  0xfa   : > { %v1594_v2 = vadd.f32 %v777_v50, %v689_v63  ;;  %v672_v63 = vadd.f32 %v1496_v44, %v1521_v0 }
  0xfb   : > { %v741_v3 = vadd.f32 %v740_v34, %v652_v1 }
  0xfc   : > { %820 = vst.msk [vmem:[%s1504_s14 + $0xc8] sm:$0xff] %vm568_vm0, %v1594_v2 }
  0xfd   : > { %805 = vst.msk [vmem:[%s1504_s14 + $0x50] sm:$0xff] %vm568_vm0, %v741_v3 }
  0xfe   : > { %v750_v6 = vpop.f32.mrf.mxu1 }
  0xff   : > { %v691_v4 = vpop.f32.mrf.mxu3 }
 0x100   : > { %v653_v7 = vpop.f32.mrf.mxu0  ;;  %v692_v9 = vadd.f32 %v1496_v44, %v691_v4 }
 0x101   : > { %v654_v10 = vadd.f32 %v1496_v44, %v653_v7 }
 0x102   : > { %v1603_v11 = vadd.f32 %v780_v59, %v692_v9 }
 0x103   : > { %v743_v12 = vadd.f32 %v742_v42, %v654_v10  ;;  %v841_v42 = vadd.f32 %v840_v49, %v839_v41 }
 0x104   : > { %821 = vst.msk [vmem:[%s1504_s14 + $0xd0] sm:$0xff] %vm568_vm0, %v1603_v11 }
 0x105   : > { %806 = vst.msk [vmem:[%s1504_s14 + $0x58] sm:$0xff] %vm568_vm0, %v743_v12  ;;  %v843_v45 = vadd.f32 %v842_v32, %v841_v42  ;;  %v848_v57 = vsel %vm568_vm0, %v743_v12, 0.0  ;;  %v870_v32 = vsel %vm568_vm0, %v1564_v38, 0.0  ;;  %v878_v38 = vsel %vm568_vm0, %v1603_v11, 0.0 }
 0x106   : > { %v1610_v14 = vpop.f32.mrf.mxu1 }
 0x107   : > { %v693_v13 = vpop.f32.mrf.mxu3  ;;  %v845_v54 = vadd.f32 %v844_v40, %v843_v45 }
 0x108   : > { %v656_v16 = vpop.f32.mrf.mxu0  ;;  %v694_v17 = vadd.f32 %v1496_v44, %v693_v13 }
 0x109   : > { %v657_v19 = vadd.f32 %v1496_v44, %v656_v16 }
 0x10a   : > { %v1617_v22 = vadd.f32 %v782_v5, %v694_v17 }
 0x10b   : > { %v746_v24 = vadd.f32 %v745_v52, %v657_v19  ;;  %v846_v52 = vsel %vm568_vm0, %v741_v3, 0.0 }
 0x10c   : > { %822 = vst.msk [vmem:[%s1504_s14 + $0xd8] sm:$0xff] %vm568_vm0, %v1617_v22  ;;  %v847_v59 = vadd.f32 %v846_v52, %v845_v54 }
 0x10d   : > { %807 = vst.msk [vmem:[%s1504_s14 + $0x60] sm:$0xff] %vm568_vm0, %v746_v24  ;;  %v850_v60 = vsel %vm568_vm0, %v746_v24, 0.0 }
 0x10e   : > { %v755_v28 = vpop.f32.mrf.mxu1  ;;  %v849_v62 = vadd.f32 %v848_v57, %v847_v59 }
 0x10f   : > { %v696_v27 = vpop.f32.mrf.mxu3  ;;  %v756_v34 = vadd.f32 %v755_v28, %v667_v25 }
 0x110   : > { %v658_v29 = vpop.f32.mrf.mxu0  ;;  %v697_v31 = vadd.f32 %v1496_v44, %v696_v27  ;;  %v851_v4 = vadd.f32 %v850_v60, %v849_v62 }
 0x111   : > { %v659_v35 = vadd.f32 %v1496_v44, %v658_v29  ;;  %811 = vst.msk [vmem:[%s1504_s14 + $0x80] sm:$0xff] %vm568_vm0, %v756_v34  ;;  %v858_v24 = vsel %vm568_vm0, %v756_v34, 0.0 }
 0x112   : > { %v1633_v37 = vadd.f32 %v785_v20, %v697_v31  ;;  %v674_v20 = vadd.f32 %v1496_v44, %v1527_v8 }
 0x113   : > { %v748_v23 = vadd.f32 %v747_v61, %v659_v35  ;;  %v790_v61 = vpop.f32.mrf.mxu2 }
 0x114   : > { %823 = vst.msk [vmem:[%s1504_s14 + $0xe0] sm:$0xff] %vm568_vm0, %v1633_v37  ;;  %v882_v52 = vsel %vm568_vm0, %v1633_v37, 0.0  ;;  %v899_v37 = vld [vmem:[%s1730_s4] sm:$0x1] }
 0x115   : > { %808 = vst.msk [vmem:[%s1504_s14 + $0x68] sm:$0xff] %vm568_vm0, %v748_v23  ;;  %v852_v1 = vsel %vm568_vm0, %v748_v23, 0.0  ;;  %v866_v23 = vsel %vm568_vm0, %v1537_v21, 0.0  ;;  %v874_v21 = vsel %vm568_vm0, %v1585_v56, 0.0 }
 0x116   : > { %v757_v46 = vpop.f32.mrf.mxu1  ;;  %v853_v13 = vadd.f32 %v852_v1, %v851_v4  ;;  %v925_v4 = vld [vmem:[%s1732_s6] sm:$0x1] }
 0x117   : > { %v698_v43 = vpop.f32.mrf.mxu3  ;;  %v758_v48 = vadd.f32 %v757_v46, %v669_v15  ;;  %v872_v15 = vsel %vm568_vm0, %v1576_v47, 0.0  ;;  %v880_v47 = vsel %vm568_vm0, %v1617_v22, 0.0 }
 0x118   : > { %v661_v50 = vpop.f32.mrf.mxu0  ;;  %v699_v51 = vadd.f32 %v1496_v44, %v698_v43  ;;  %v924_v43 = vld [vmem:[%s1731_s5] sm:$0xf] }
 0x119   : > { %v662_v53 = vadd.f32 %v1496_v44, %v661_v50  ;;  %812 = vst.msk [vmem:[%s1504_s14 + $0x88] sm:$0xff] %vm568_vm0, %v758_v48  ;;  %v860_v29 = vsel %vm568_vm0, %v758_v48, 0.0  ;;  %1245 = vmatpush.msk.msra.mxu2 %vm930_vm1, %v924_v43 }
 0x11a   : > { %v1651_v55 = vadd.f32 %v787_v39, %v699_v51 }
 0x11b   : > { %v751_v58 = vadd.f32 %v750_v6, %v662_v53  ;;  %v792_v26 = vpop.f32.mrf.mxu2 }
 0x11c   : > { %824 = vst.msk [vmem:[%s1504_s14 + $0xe8] sm:$0xff] %vm568_vm0, %v1651_v55  ;;  %v884_v56 = vsel %vm568_vm0, %v1651_v55, 0.0 }
 0x11d   : > { %809 = vst.msk [vmem:[%s1504_s14 + $0x70] sm:$0xff] %vm568_vm0, %v751_v58  ;;  %v854_v9 = vsel %vm568_vm0, %v751_v58, 0.0 }
 0x11e   : > { %v760_v5 = vpop.f32.mrf.mxu1  ;;  %v855_v17 = vadd.f32 %v854_v9, %v853_v13 }
 0x11f   : > { %v701_v3 = vpop.f32.mrf.mxu3  ;;  %v761_v10 = vadd.f32 %v760_v5, %v672_v63 }
 0x120   : > { %v663_v6 = vpop.f32.mrf.mxu0  ;;  %v702_v7 = vadd.f32 %v1496_v44, %v701_v3 }
 0x121   : > { %v664_v12 = vadd.f32 %v1496_v44, %v663_v6  ;;  %813 = vst.msk [vmem:[%s1504_s14 + $0x90] sm:$0xff] %vm568_vm0, %v761_v10  ;;  %v862_v36 = vsel %vm568_vm0, %v761_v10, 0.0 }
 0x122   : > { %v791_v16 = vadd.f32 %v790_v61, %v702_v7 }
 0x123   : > { %v753_v0 = vadd.f32 %v1610_v14, %v664_v12 }
 0x124   : > { %825 = vst.msk [vmem:[%s1504_s14 + $0xf0] sm:$0xff] %vm568_vm0, %v791_v16  ;;  %v886_v54 = vsel %vm568_vm0, %v791_v16, 0.0 }
 0x125   : > { %810 = vst.msk [vmem:[%s1504_s14 + $0x78] sm:$0xff] %vm568_vm0, %v753_v0  ;;  %v856_v18 = vsel %vm568_vm0, %v753_v0, 0.0 }
 0x126   : > { %v857_v19 = vadd.f32 %v856_v18, %v855_v17  ;;  %v762_v28 = vpop.f32.mrf.mxu1 }
 0x127   : > { %v703_v25 = vpop.f32.mrf.mxu3  ;;  %v763_v31 = vadd.f32 %v762_v28, %v674_v20 }
 0x128   : > { %v859_v27 = vadd.f32 %v858_v24, %v857_v19  ;;  %v704_v14 = vadd.f32 %v1496_v44, %v703_v25  ;;  %v868_v44 = vsel %vm568_vm0, %v1552_v30, 0.0  ;;  %v876_v30 = vsel %vm568_vm0, %v1594_v2, 0.0 }
 0x129   : > { %814 = vst.msk [vmem:[%s1504_s14 + $0x98] sm:$0xff] %vm568_vm0, %v763_v31  ;;  %v864_v8 = vsel %vm568_vm0, %v763_v31, 0.0 }
 0x12a   : > { %v861_v33 = vadd.f32 %v860_v29, %v859_v27  ;;  %v793_v35 = vadd.f32 %v792_v26, %v704_v14 }
 0x12c   : > { %v863_v49 = vadd.f32 %v862_v36, %v861_v33  ;;  %826 = vst.msk [vmem:[%s1504_s14 + $0xf8] sm:$0xff] %vm568_vm0, %v793_v35  ;;  %v888_v57 = vsel %vm568_vm0, %v793_v35, 0.0 }
 0x12e   : > { %v865_v34 = vadd.f32 %v864_v8, %v863_v49 }
 0x130   : > { %v867_v39 = vadd.f32 %v866_v23, %v865_v34 }
 0x132   : > { %v869_v41 = vadd.f32 %v868_v44, %v867_v39 }
 0x134   : > { %v871_v42 = vadd.f32 %v870_v32, %v869_v41 }
 0x136   : > { %v873_v40 = vadd.f32 %v872_v15, %v871_v42 }
 0x138   : > { %v875_v45 = vadd.f32 %v874_v21, %v873_v40 }
 0x13a   : > { %v877_v46 = vadd.f32 %v876_v30, %v875_v45 }
 0x13c   : > { %v879_v50 = vadd.f32 %v878_v38, %v877_v46 }
 0x13e   : > { %v881_v51 = vadd.f32 %v880_v47, %v879_v50 }
 0x140   : > { %v883_v48 = vadd.f32 %v882_v52, %v881_v51 }
 0x142   : > { %v885_v53 = vadd.f32 %v884_v56, %v883_v48 }
 0x144   : > { %v887_v2 = vadd.f32 %v886_v54, %v885_v53 }
 0x146   : > { %v889_v58 = vadd.f32 %v888_v57, %v887_v2 }
 0x148   : > { %v890_v11 = vrot.slane %v889_v58, 4 }
 0x14a   : > { %v891_v59 = vadd.f32 %v890_v11, %v889_v58 }
 0x14c   : > { %v892_v60 = vrot.slane %v891_v59, 2 }
 0x14e   : > { %v893_v61 = vadd.f32 %v892_v60, %v891_v59 }
 0x150   : > { %v894_v22 = vrot.slane %v893_v61, 1 }
 0x152   : > { %v895_v62 = vadd.f32 %v894_v22, %v893_v61 }
 0x154   : > { %v896_v63 = vmul.f32 0.00390625, %v895_v62 }
 0x156   : > { %1244 = vmatmul.msk.f32.vlgmr.msrb.gmra.mxu2 %vm568_vm0, %v896_v63 }
 0x1d9   : > { %v920_v55 = vpop.f32.mrf.mxu2 }
 0x1da   : > { %v921_v1 = vadd.f32 %v920_v55, %v899_v37 }
 0x1dc   : > { %v923_v3 = vmax.f32 %v921_v1, 0.0 }
 0x1de   : > { %1246 = vmatmul.msk.f32.vlgmr.msra.gmra.mxu2 %vm926_vm2, %v923_v3 }
 0x261   : > { %v951_v5 = vpop.f32.mrf.mxu2 }
 0x262   : > { %v952_v6 = vadd.f32 %v951_v5, %v925_v4 }
 0x264   : > { %v1247_v7 = vmul.f32 -1.442695, %v952_v6 }
 0x266   : > { %1311 = vpow2.f32 %v1247_v7 }
 0x26c   : > { %v1312_v9 = vpop.eup %1311 }
 0x26d   : > { %v957_v10 = vadd.f32 1.0, %v1312_v9 }
 0x26f   : > { %1313 = vrcp.f32 %v957_v10  ;;  %v969_v0 = vand.u32 2147483648, %v957_v10  ;;  %v967_v18 = vand.u32 2147483647, %v957_v10  ;;  %vm963_vm4 = vweird.f32 %v957_v10 }
 0x271   : > { %v970_v20 = vor.u32 1.1754944e-38, %v969_v0  ;;  %vm968_vm7 = vcmp.eq.f32.partialorder %v967_v18, 8.507059e+37 }
 0x275   : > { %v1314_v12 = vpop.eup %1313 }
 0x276   : > { %v959_v13 = vmul.f32 %v1314_v12, %v957_v10  ;;  %vm964_vm3 = vweird.f32 %v1314_v12 }
 0x277   : > { %vm965_vm5 = vmor %vm963_vm4, %vm964_vm3 }
 0x278   : > { %v960_v16 = vsub.f32 1.0, %v959_v13 }
 0x27a   : > { %v961_v17 = vmul.f32 %v1314_v12, %v960_v16 }
 0x27c   : > { %v962_v19 = vadd.f32 %v1314_v12, %v961_v17 }
 0x27e   : > { %v966_v24 = vsel %vm965_vm5, %v1314_v12, %v962_v19 }
 0x27f   : > { %v971_v25 = vsel %vm968_vm7, %v970_v20, %v966_v24 }
 0x280   : > { %974 = vst.msk [vmem:[%s314_s26] sm:$0x1] %vm973_vm6, %v971_v25 }
 0x281 PF: > { %s19_s27 = sadd.s32 1, %s1321_s27  }
 0x282   : > { %p16_p4 = scmp.ge.s32.totalorder %s19_s27, 4  }
 0x284   :  { %18 = sbr.rel (!%p16_p4) target bundleno = 1 (0x1), region = 90 }

// kernel: aib_forward.19
= control target key start
LH: loop header
LB: loop body
LE: loop exit
PB: predicated region body
PF: predicated region fallthrough
CT: control target
= control target key end

     0   :  { %s1058_s12 = smov 0   ;;  %s1300_s0 = inlined_call_operand.vmem [shape: bf16[512,144], index: 0, kind: input, shape index: {}]   ;;  %s1301_s1 = inlined_call_operand.vmem [shape: bf16[144,8], index: 1, kind: input, shape index: {}]   ;;  %s1302_s2 = inlined_call_operand.vmem [shape: f32[1,8], index: 2, kind: input, shape index: {}]   ;;  %s1303_s3 = inlined_call_operand.vmem [shape: f32[512,8], index: 3, kind: output, shape index: {}]  }
   0x1 LB: > { %s778_s13 = sadd.s32 4294967295, %s1036_s12   ;;  %p782_p0 = scmp.ge.s32.totalorder %s1036_s12, 1  ;;  %s1036_s12 = sphi %s1058_s12, %s13_s12  }
   0x2   : > { %p139_p1 = scmp.lt.s32.totalorder %s1036_s12, 3 }
   0x4   : > { %p140_p2 = pnand %p782_p0, %p139_p1 }
   0x5   : > { %s783_s18 = sshll.u32 (!%p140_p2), %s778_s13, 5 }
   0x6   : > { %143 = sbr.rel (%p140_p2) target bundleno = 302 (0x12e), region = 32  ;;  %p165_p3 = scmp.lt.s32.totalorder (!%p140_p2), %s783_s18, 63 }
   0xb   : > { %v1010_v0 = vld [vmem:[%s1301_s1 + $0x38] sm:$0xff]  ;;  %v1011_v1 = vld [vmem:[%s1301_s1 + $0x40] sm:$0xff]  ;;  %v1009_v2 = vld [vmem:[%s1301_s1 + $0x30] sm:$0xff]  ;;  %s1305_s18 = smov (!%p165_p3, %s783_s18), 63  ;;  %vm430_vm0 = vcmask 130048   ;;  %vm689_vm1 = vcmask 64512  }
   0xc   : > { %479 = vmatpush.bf16.msra.mxu0 %v1010_v0  ;;  %1012 = vmatpush.bf16.msra.mxu2 %v1010_v0  ;;  %s970_s21 = sshll.u32 %s1305_s18, 3  ;;  %v1008_v3 = vld [vmem:[%s1301_s1 + $0x28] sm:$0xff]  ;;  %v1007_v7 = vld [vmem:[%s1301_s1 + $0x20] sm:$0xff]  ;;  %v1006_v11 = vld [vmem:[%s1301_s1 + $0x18] sm:$0xff] }
   0xd   : > { %575 = vmatpush.bf16.msra.mxu1 %v1011_v1  ;;  %1020 = vmatpush.bf16.msra.mxu3 %v1011_v1  ;;  %s1083_s24 = scalar_lea.vmem %s1300_s0, %s970_s21  ;;  %v1005_v12 = vld [vmem:[%s1301_s1 + $0x10] sm:$0xff]  ;;  %v1004_v16 = vld [vmem:[%s1301_s1 + $0x8] sm:$0xff]  ;;  %v1003_v19 = vld [vmem:[%s1301_s1] sm:$0xff]  ;;  %s1194_s15 = scalar_lea.vmem %s1303_s3, %s970_s21 }
   0xe   : > { %v971_v4 = vld [vmem:[%s1083_s24 + $0x4] sm:$0xf]  ;;  %v792_v5 = vld [vmem:[%s1083_s24 + $0x8] sm:$0xf0]  ;;  %v989_v8 = vld [vmem:[%s1083_s24 + $0x94] sm:$0xf] }
   0xf   : > { %v795_v6 = vor.u32 %v971_v4, %v792_v5  ;;  %v864_v9 = vld [vmem:[%s1083_s24 + $0x98] sm:$0xf0]  ;;  %v973_v13 = vld [vmem:[%s1083_s24 + $0x14] sm:$0xf]  ;;  %v991_v17 = vld [vmem:[%s1083_s24 + $0xa4] sm:$0xf] }
  0x10   : > { %480 = vmatpush.bf16.msra.mxu0 %v1009_v2  ;;  %1013 = vmatpush.bf16.msra.mxu2 %v1009_v2  ;;  %v867_v10 = vor.u32 %v989_v8, %v864_v9  ;;  %v800_v14 = vld [vmem:[%s1083_s24 + $0x18] sm:$0xf0]  ;;  %v872_v18 = vld [vmem:[%s1083_s24 + $0xa8] sm:$0xf0]  ;;  %v790_v20 = vld [vmem:[%s1083_s24] sm:$0xf] }
  0x11   : > { %952 = vmatmul.msk.bf16.vlgmr.msra.gmra.mxu1 %vm430_vm0, %v795_v6  ;;  %v803_v15 = vor.u32 %v973_v13, %v800_v14  ;;  %v972_v21 = vld [vmem:[%s1083_s24 + $0x4] sm:$0xf0]  ;;  %v875_v22 = vor.u32 %v991_v17, %v872_v18  ;;  %v854_v23 = vld [vmem:[%s1083_s24 + $0x80] sm:$0xf]  ;;  %v975_v27 = vld [vmem:[%s1083_s24 + $0x24] sm:$0xf] }
  0x12   : > { %961 = vmatmul.msk.bf16.vlgmr.msra.gmra.mxu3 %vm430_vm0, %v867_v10  ;;  %v988_v24 = vld [vmem:[%s1083_s24 + $0x84] sm:$0xf0]  ;;  %v791_v25 = vor.u32 %v972_v21, %v790_v20  ;;  %v808_v28 = vld [vmem:[%s1083_s24 + $0x28] sm:$0xf0]  ;;  %v993_v30 = vld [vmem:[%s1083_s24 + $0xb4] sm:$0xf] }
  0x13   : > { %v855_v26 = vor.u32 %v988_v24, %v854_v23  ;;  %v811_v29 = vor.u32 %v975_v27, %v808_v28  ;;  %v880_v31 = vld [vmem:[%s1083_s24 + $0xb8] sm:$0xf0]  ;;  %v798_v32 = vld [vmem:[%s1083_s24 + $0x10] sm:$0xf]  ;;  %v974_v33 = vld [vmem:[%s1083_s24 + $0x14] sm:$0xf0] }
  0x14   : > { %481 = vmatpush.bf16.msra.mxu0 %v1008_v3  ;;  %1014 = vmatpush.bf16.msra.mxu2 %v1008_v3  ;;  %v883_v34 = vor.u32 %v993_v30, %v880_v31  ;;  %v862_v35 = vld [vmem:[%s1083_s24 + $0x90] sm:$0xf]  ;;  %v990_v36 = vld [vmem:[%s1083_s24 + $0x94] sm:$0xf0]  ;;  %v799_v37 = vor.u32 %v974_v33, %v798_v32  ;;  %v977_v39 = vld [vmem:[%s1083_s24 + $0x34] sm:$0xf] }
  0x15   : > { %v863_v38 = vor.u32 %v990_v36, %v862_v35  ;;  %v816_v40 = vld [vmem:[%s1083_s24 + $0x38] sm:$0xf0]  ;;  %v995_v42 = vld [vmem:[%s1083_s24 + $0xc4] sm:$0xf]  ;;  %v888_v43 = vld [vmem:[%s1083_s24 + $0xc8] sm:$0xf0] }
  0x16   : > { %v819_v41 = vor.u32 %v977_v39, %v816_v40  ;;  %v806_v44 = vld [vmem:[%s1083_s24 + $0x20] sm:$0xf]  ;;  %v976_v45 = vld [vmem:[%s1083_s24 + $0x24] sm:$0xf0]  ;;  %v891_v46 = vor.u32 %v995_v42, %v888_v43  ;;  %v979_v51 = vld [vmem:[%s1083_s24 + $0x44] sm:$0xf] }
  0x17   : > { %v870_v47 = vld [vmem:[%s1083_s24 + $0xa0] sm:$0xf]  ;;  %v992_v48 = vld [vmem:[%s1083_s24 + $0xa4] sm:$0xf0]  ;;  %v807_v49 = vor.u32 %v976_v45, %v806_v44  ;;  %v824_v52 = vld [vmem:[%s1083_s24 + $0x48] sm:$0xf0] }
  0x18   : > { %482 = vmatpush.bf16.msra.mxu0 %v1007_v7  ;;  %1015 = vmatpush.bf16.msra.mxu2 %v1007_v7  ;;  %v871_v50 = vor.u32 %v992_v48, %v870_v47  ;;  %v827_v53 = vor.u32 %v979_v51, %v824_v52  ;;  %v997_v54 = vld [vmem:[%s1083_s24 + $0xd4] sm:$0xf]  ;;  %v896_v55 = vld [vmem:[%s1083_s24 + $0xd8] sm:$0xf0]  ;;  %v814_v56 = vld [vmem:[%s1083_s24 + $0x30] sm:$0xf] }
  0x19   : > { %v978_v57 = vld [vmem:[%s1083_s24 + $0x34] sm:$0xf0]  ;;  %v899_v58 = vor.u32 %v997_v54, %v896_v55  ;;  %v878_v59 = vld [vmem:[%s1083_s24 + $0xb0] sm:$0xf]  ;;  %v981_v63 = vld [vmem:[%s1083_s24 + $0x54] sm:$0xf] }
  0x1a   : > { %v994_v60 = vld [vmem:[%s1083_s24 + $0xb4] sm:$0xf0]  ;;  %v815_v61 = vor.u32 %v978_v57, %v814_v56  ;;  %v832_v0 = vld [vmem:[%s1083_s24 + $0x58] sm:$0xf0]  ;;  %v999_v2 = vld [vmem:[%s1083_s24 + $0xe4] sm:$0xf] }
  0x1b   : > { %v879_v62 = vor.u32 %v994_v60, %v878_v59  ;;  %v835_v1 = vor.u32 %v981_v63, %v832_v0  ;;  %v904_v3 = vld [vmem:[%s1083_s24 + $0xe8] sm:$0xf0]  ;;  %v822_v4 = vld [vmem:[%s1083_s24 + $0x40] sm:$0xf]  ;;  %v980_v5 = vld [vmem:[%s1083_s24 + $0x44] sm:$0xf0] }
  0x1c   : > { %483 = vmatpush.bf16.msra.mxu0 %v1006_v11  ;;  %1016 = vmatpush.bf16.msra.mxu2 %v1006_v11  ;;  %v907_v6 = vor.u32 %v999_v2, %v904_v3  ;;  %v886_v7 = vld [vmem:[%s1083_s24 + $0xc0] sm:$0xf]  ;;  %v996_v8 = vld [vmem:[%s1083_s24 + $0xc4] sm:$0xf0]  ;;  %v823_v9 = vor.u32 %v980_v5, %v822_v4  ;;  %v983_v11 = vld [vmem:[%s1083_s24 + $0x64] sm:$0xf] }
  0x1d   : > { %v887_v10 = vor.u32 %v996_v8, %v886_v7  ;;  %v1001_v14 = vld [vmem:[%s1083_s24 + $0xf4] sm:$0xf]  ;;  %v982_v17 = vld [vmem:[%s1083_s24 + $0x54] sm:$0xf0]  ;;  %v848_v24 = vld [vmem:[%s1083_s24 + $0x78] sm:$0xf0] }
  0x1e   : > { %v998_v20 = vld [vmem:[%s1083_s24 + $0xd4] sm:$0xf0]  ;;  %v985_v23 = vld [vmem:[%s1083_s24 + $0x74] sm:$0xf]  ;;  %v984_v27 = vld [vmem:[%s1083_s24 + $0x64] sm:$0xf0] }
  0x1f   : > { %v902_v28 = vld [vmem:[%s1083_s24 + $0xe0] sm:$0xf]  ;;  %v987_v32 = vld [vmem:[%s1083_s24 + $0x84] sm:$0xf]  ;;  %v856_v33 = vld [vmem:[%s1083_s24 + $0x88] sm:$0xf0] }
  0x20   : > { %484 = vmatpush.bf16.msra.mxu0 %v1005_v12  ;;  %1017 = vmatpush.bf16.msra.mxu2 %v1005_v12  ;;  %v840_v12 = vld [vmem:[%s1083_s24 + $0x68] sm:$0xf0]  ;;  %v846_v36 = vld [vmem:[%s1083_s24 + $0x70] sm:$0xf]  ;;  %v1002_v39 = vld [vmem:[%s1083_s24 + $0xf4] sm:$0xf0] }
  0x21   : > { %953 = vmatmul.msk.bf16.gmra.mxu1 %vm430_vm0, %v803_v15  ;;  %v843_v13 = vor.u32 %v983_v11, %v840_v12  ;;  %v912_v15 = vld [vmem:[%s1083_s24 + $0xf8] sm:$0xf0]  ;;  %v1186_v44 = vld [vmem:[%s1302_s2] ss:$0 sm:$0xff] }
  0x22   : > { %962 = vmatmul.msk.bf16.gmra.mxu3 %vm430_vm0, %v875_v22  ;;  %v915_v18 = vor.u32 %v1001_v14, %v912_v15 }
  0x24   : > { %485 = vmatpush.bf16.msra.mxu0 %v1004_v16  ;;  %1018 = vmatpush.bf16.msra.mxu2 %v1004_v16  ;;  %v830_v16 = vld [vmem:[%s1083_s24 + $0x50] sm:$0xf] }
  0x25   : > { %v831_v21 = vor.u32 %v982_v17, %v830_v16 }
  0x28   : > { %486 = vmatpush.bf16.msra.mxu0 %v1003_v19  ;;  %1019 = vmatpush.bf16.msra.mxu2 %v1003_v19  ;;  %v894_v19 = vld [vmem:[%s1083_s24 + $0xd0] sm:$0xf] }
  0x29   : > { %v895_v22 = vor.u32 %v998_v20, %v894_v19 }
  0x2b   : > { %487 = vmatmul.bf16.vlgmr.msra.gmra.mxu0 %v791_v25  ;;  %527 = vmatmul.bf16.vlgmr.msra.gmra.mxu2 %v855_v26  ;;  %v851_v25 = vor.u32 %v985_v23, %v848_v24  ;;  %v838_v26 = vld [vmem:[%s1083_s24 + $0x60] sm:$0xf] }
  0x2c   : > { %v839_v30 = vor.u32 %v984_v27, %v838_v26 }
  0x31   : > { %954 = vmatmul.msk.bf16.gmra.mxu1 %vm430_vm0, %v811_v29  ;;  %v1000_v29 = vld [vmem:[%s1083_s24 + $0xe4] sm:$0xf0] }
  0x32   : > { %963 = vmatmul.msk.bf16.gmra.mxu3 %vm430_vm0, %v883_v34  ;;  %v903_v31 = vor.u32 %v1000_v29, %v902_v28  ;;  %v859_v34 = vor.u32 %v987_v32, %v856_v33 }
  0x3b   : > { %492 = vmatmul.bf16.gmra.mxu0 %v799_v37  ;;  %532 = vmatmul.bf16.gmra.mxu2 %v863_v38  ;;  %v986_v37 = vld [vmem:[%s1083_s24 + $0x74] sm:$0xf0]  ;;  %v910_v38 = vld [vmem:[%s1083_s24 + $0xf0] sm:$0xf] }
  0x3c   : > { %v847_v40 = vor.u32 %v986_v37, %v846_v36 }
  0x41   : > { %955 = vmatmul.msk.bf16.gmra.mxu1 %vm430_vm0, %v819_v41  ;;  %v911_v41 = vor.u32 %v1002_v39, %v910_v38 }
  0x42   : > { %964 = vmatmul.msk.bf16.gmra.mxu3 %vm430_vm0, %v891_v46 }
  0x4b   : > { %497 = vmatmul.bf16.gmra.mxu0 %v807_v49  ;;  %537 = vmatmul.bf16.gmra.mxu2 %v871_v50 }
  0x51   : > { %956 = vmatmul.msk.bf16.gmra.mxu1 %vm430_vm0, %v827_v53 }
  0x52   : > { %965 = vmatmul.msk.bf16.gmra.mxu3 %vm430_vm0, %v899_v58 }
  0x5b   : > { %502 = vmatmul.bf16.gmra.mxu0 %v815_v61  ;;  %542 = vmatmul.bf16.gmra.mxu2 %v879_v62 }
  0x61   : > { %957 = vmatmul.msk.bf16.gmra.mxu1 %vm430_vm0, %v835_v1 }
  0x62   : > { %966 = vmatmul.msk.bf16.gmra.mxu3 %vm430_vm0, %v907_v6 }
  0x6b   : > { %507 = vmatmul.bf16.gmra.mxu0 %v823_v9  ;;  %547 = vmatmul.bf16.gmra.mxu2 %v887_v10 }
  0x71   : > { %958 = vmatmul.msk.bf16.gmra.mxu1 %vm430_vm0, %v843_v13 }
  0x72   : > { %967 = vmatmul.msk.bf16.gmra.mxu3 %vm430_vm0, %v915_v18 }
  0x7b   : > { %512 = vmatmul.bf16.gmra.mxu0 %v831_v21  ;;  %552 = vmatmul.bf16.gmra.mxu2 %v895_v22 }
  0x81   : > { %959 = vmatmul.msk.bf16.gmra.mxu1 %vm430_vm0, %v851_v25 }
  0x8b   : > { %517 = vmatmul.bf16.gmra.mxu0 %v839_v30  ;;  %557 = vmatmul.bf16.gmra.mxu2 %v903_v31 }
  0x8e   : > { %v577_v35 = vpop.f32.mrf.mxu1 }
  0x91   : > { %960 = vmatmul.msk.bf16.gmra.mxu1 %vm430_vm0, %v859_v34 }
  0x95   : > { %v622_v45 = vpop.f32.mrf.mxu3 }
  0x96   : > { %v579_v42 = vpop.f32.mrf.mxu1 }
  0x9b   : > { %522 = vmatmul.bf16.gmra.mxu0 %v847_v40  ;;  %562 = vmatmul.bf16.gmra.mxu2 %v911_v41 }
  0x9d   : > { %v624_v55 = vpop.f32.mrf.mxu3 }
  0x9e   : > { %v582_v43 = vpop.f32.mrf.mxu1 }
  0xa5   : > { %v627_v63 = vpop.f32.mrf.mxu3 }
  0xa6   : > { %v584_v48 = vpop.f32.mrf.mxu1 }
  0xa8   : > { %v488_v46 = vpop.f32.mrf.mxu0 }
  0xa9   : > { %v489_v47 = vadd.f32 %v1186_v44, %v488_v46 }
  0xab   : > { %v578_v49 = vadd.f32 %v577_v35, %v489_v47 }
  0xad   : > { %v657_v50 = vmax.f32 %v578_v49, 0.0  ;;  %v629_v10 = vpop.f32.mrf.mxu3 }
  0xae   : > { %v1198_v51 = vpop.f32.mrf.mxu2  ;;  %v587_v54 = vpop.f32.mrf.mxu1 }
  0xaf   : > { %690 = vst.msk [vmem:[%s1194_s15] sm:$0xff] %vm689_vm1, %v657_v50 }
  0xb0   : > { %v490_v52 = vpop.f32.mrf.mxu0 }
  0xb1   : > { %v491_v53 = vadd.f32 %v1186_v44, %v490_v52 }
  0xb3   : > { %v580_v56 = vadd.f32 %v579_v42, %v491_v53 }
  0xb5   : > { %v658_v57 = vmax.f32 %v580_v56, 0.0  ;;  %v632_v21 = vpop.f32.mrf.mxu3 }
  0xb6   : > { %v1203_v58 = vpop.f32.mrf.mxu2  ;;  %v589_v61 = vpop.f32.mrf.mxu1 }
  0xb7   : > { %691 = vst.msk [vmem:[%s1194_s15 + $0x8] sm:$0xff] %vm689_vm1, %v658_v57 }
  0xb8   : > { %v493_v59 = vpop.f32.mrf.mxu0 }
  0xb9   : > { %v494_v60 = vadd.f32 %v1186_v44, %v493_v59 }
  0xbb   : > { %v583_v62 = vadd.f32 %v582_v43, %v494_v60 }
  0xbd   : > { %v659_v0 = vmax.f32 %v583_v62, 0.0  ;;  %v634_v35 = vpop.f32.mrf.mxu3 }
  0xbe   : > { %v533_v1 = vpop.f32.mrf.mxu2  ;;  %v592_v5 = vpop.f32.mrf.mxu1 }
  0xbf   : > { %692 = vst.msk [vmem:[%s1194_s15 + $0x10] sm:$0xff] %vm689_vm1, %v659_v0  ;;  %v534_v2 = vadd.f32 %v1186_v44, %v533_v1 }
  0xc0   : > { %v495_v3 = vpop.f32.mrf.mxu0 }
  0xc1   : > { %v496_v4 = vadd.f32 %v1186_v44, %v495_v3  ;;  %v623_v6 = vadd.f32 %v622_v45, %v534_v2 }
  0xc3   : > { %v585_v7 = vadd.f32 %v584_v48, %v496_v4  ;;  %v675_v8 = vmax.f32 %v623_v6, 0.0 }
  0xc5   : > { %v660_v9 = vmax.f32 %v585_v7, 0.0  ;;  %708 = vst.msk [vmem:[%s1194_s15 + $0x90] sm:$0xff] %vm689_vm1, %v675_v8  ;;  %v637_v48 = vpop.f32.mrf.mxu3 }
  0xc6   : > { %v535_v11 = vpop.f32.mrf.mxu2  ;;  %v594_v15 = vpop.f32.mrf.mxu1 }
  0xc7   : > { %693 = vst.msk [vmem:[%s1194_s15 + $0x18] sm:$0xff] %vm689_vm1, %v660_v9  ;;  %v536_v12 = vadd.f32 %v1186_v44, %v535_v11 }
  0xc8   : > { %v498_v13 = vpop.f32.mrf.mxu0 }
  0xc9   : > { %v499_v14 = vadd.f32 %v1186_v44, %v498_v13  ;;  %v625_v16 = vadd.f32 %v624_v55, %v536_v12 }
  0xcb   : > { %v588_v17 = vadd.f32 %v587_v54, %v499_v14  ;;  %v676_v18 = vmax.f32 %v625_v16, 0.0 }
  0xcd   : > { %v661_v19 = vmax.f32 %v588_v17, 0.0  ;;  %709 = vst.msk [vmem:[%s1194_s15 + $0x98] sm:$0xff] %vm689_vm1, %v676_v18  ;;  %v639_v62 = vpop.f32.mrf.mxu3 }
  0xce   : > { %v538_v20 = vpop.f32.mrf.mxu2  ;;  %v597_v25 = vpop.f32.mrf.mxu1 }
  0xcf   : > { %694 = vst.msk [vmem:[%s1194_s15 + $0x20] sm:$0xff] %vm689_vm1, %v661_v19  ;;  %v539_v22 = vadd.f32 %v1186_v44, %v538_v20 }
  0xd0   : > { %v500_v23 = vpop.f32.mrf.mxu0 }
  0xd1   : > { %v501_v24 = vadd.f32 %v1186_v44, %v500_v23  ;;  %v628_v26 = vadd.f32 %v627_v63, %v539_v22 }
  0xd3   : > { %v590_v27 = vadd.f32 %v589_v61, %v501_v24  ;;  %v677_v28 = vmax.f32 %v628_v26, 0.0 }
  0xd5   : > { %v662_v29 = vmax.f32 %v590_v27, 0.0  ;;  %710 = vst.msk [vmem:[%s1194_s15 + $0xa0] sm:$0xff] %vm689_vm1, %v677_v28  ;;  %v642_v9 = vpop.f32.mrf.mxu3 }
  0xd6   : > { %v540_v30 = vpop.f32.mrf.mxu2  ;;  %v599_v34 = vpop.f32.mrf.mxu1 }
  0xd7   : > { %695 = vst.msk [vmem:[%s1194_s15 + $0x28] sm:$0xff] %vm689_vm1, %v662_v29  ;;  %v541_v31 = vadd.f32 %v1186_v44, %v540_v30 }
  0xd8   : > { %v503_v32 = vpop.f32.mrf.mxu0 }
  0xd9   : > { %v504_v33 = vadd.f32 %v1186_v44, %v503_v32  ;;  %v630_v36 = vadd.f32 %v629_v10, %v541_v31 }
  0xdb   : > { %v593_v37 = vadd.f32 %v592_v5, %v504_v33  ;;  %v678_v38 = vmax.f32 %v630_v36, 0.0 }
  0xdd   : > { %v663_v39 = vmax.f32 %v593_v37, 0.0  ;;  %711 = vst.msk [vmem:[%s1194_s15 + $0xa8] sm:$0xff] %vm689_vm1, %v678_v38  ;;  %v644_v23 = vpop.f32.mrf.mxu3 }
  0xde   : > { %v543_v40 = vpop.f32.mrf.mxu2  ;;  %v602_v45 = vpop.f32.mrf.mxu1 }
  0xdf   : > { %696 = vst.msk [vmem:[%s1194_s15 + $0x30] sm:$0xff] %vm689_vm1, %v663_v39  ;;  %v544_v41 = vadd.f32 %v1186_v44, %v543_v40  ;;  %v529_v39 = vadd.f32 %v1186_v44, %v1198_v51 }
  0xe0   : > { %v505_v42 = vpop.f32.mrf.mxu0 }
  0xe1   : > { %v506_v43 = vadd.f32 %v1186_v44, %v505_v42  ;;  %v633_v46 = vadd.f32 %v632_v21, %v544_v41 }
  0xe3   : > { %v595_v47 = vadd.f32 %v594_v15, %v506_v43  ;;  %v679_v49 = vmax.f32 %v633_v46, 0.0 }
  0xe5   : > { %v664_v50 = vmax.f32 %v595_v47, 0.0  ;;  %712 = vst.msk [vmem:[%s1194_s15 + $0xb0] sm:$0xff] %vm689_vm1, %v679_v49 }
  0xe6   : > { %v545_v52 = vpop.f32.mrf.mxu2  ;;  %v604_v56 = vpop.f32.mrf.mxu1 }
  0xe7   : > { %697 = vst.msk [vmem:[%s1194_s15 + $0x38] sm:$0xff] %vm689_vm1, %v664_v50  ;;  %v546_v53 = vadd.f32 %v1186_v44, %v545_v52 }
  0xe8   : > { %v508_v54 = vpop.f32.mrf.mxu0 }
  0xe9   : > { %v509_v55 = vadd.f32 %v1186_v44, %v508_v54  ;;  %v635_v57 = vadd.f32 %v634_v35, %v546_v53  ;;  %v647_v35 = vpop.f32.mrf.mxu3  ;;  %v531_v53 = vadd.f32 %v1186_v44, %v1203_v58 }
  0xeb   : > { %v598_v59 = vadd.f32 %v597_v25, %v509_v55  ;;  %v680_v60 = vmax.f32 %v635_v57, 0.0 }
  0xed   : > { %v665_v61 = vmax.f32 %v598_v59, 0.0  ;;  %713 = vst.msk [vmem:[%s1194_s15 + $0xb8] sm:$0xff] %vm689_vm1, %v680_v60 }
  0xee   : > { %v548_v63 = vpop.f32.mrf.mxu2  ;;  %v607_v3 = vpop.f32.mrf.mxu1 }
  0xef   : > { %698 = vst.msk [vmem:[%s1194_s15 + $0x40] sm:$0xff] %vm689_vm1, %v665_v61  ;;  %v549_v0 = vadd.f32 %v1186_v44, %v548_v63 }
  0xf0   : > { %v510_v1 = vpop.f32.mrf.mxu0 }
  0xf1   : > { %v511_v2 = vadd.f32 %v1186_v44, %v510_v1  ;;  %v638_v4 = vadd.f32 %v637_v48, %v549_v0  ;;  %v649_v52 = vpop.f32.mrf.mxu3 }
  0xf3   : > { %v600_v5 = vadd.f32 %v599_v34, %v511_v2  ;;  %v681_v6 = vmax.f32 %v638_v4, 0.0 }
  0xf5   : > { %v666_v7 = vmax.f32 %v600_v5, 0.0  ;;  %714 = vst.msk [vmem:[%s1194_s15 + $0xc0] sm:$0xff] %vm689_vm1, %v681_v6 }
  0xf6   : > { %v550_v8 = vpop.f32.mrf.mxu2  ;;  %v609_v13 = vpop.f32.mrf.mxu1 }
  0xf7   : > { %699 = vst.msk [vmem:[%s1194_s15 + $0x48] sm:$0xff] %vm689_vm1, %v666_v7  ;;  %v551_v10 = vadd.f32 %v1186_v44, %v550_v8 }
  0xf8   : > { %v513_v11 = vpop.f32.mrf.mxu0 }
  0xf9   : > { %v514_v12 = vadd.f32 %v1186_v44, %v513_v11  ;;  %v640_v14 = vadd.f32 %v639_v62, %v551_v10  ;;  %v652_v58 = vpop.f32.mrf.mxu3 }
  0xfb   : > { %v603_v15 = vadd.f32 %v602_v45, %v514_v12  ;;  %v682_v16 = vmax.f32 %v640_v14, 0.0 }
  0xfd   : > { %v667_v17 = vmax.f32 %v603_v15, 0.0  ;;  %715 = vst.msk [vmem:[%s1194_s15 + $0xc8] sm:$0xff] %vm689_vm1, %v682_v16 }
  0xfe   : > { %v553_v18 = vpop.f32.mrf.mxu2  ;;  %v612_v22 = vpop.f32.mrf.mxu1 }
  0xff   : > { %700 = vst.msk [vmem:[%s1194_s15 + $0x50] sm:$0xff] %vm689_vm1, %v667_v17  ;;  %v554_v19 = vadd.f32 %v1186_v44, %v553_v18 }
 0x100   : > { %v515_v20 = vpop.f32.mrf.mxu0 }
 0x101   : > { %v516_v21 = vadd.f32 %v1186_v44, %v515_v20  ;;  %v643_v24 = vadd.f32 %v642_v9, %v554_v19  ;;  %v654_v11 = vpop.f32.mrf.mxu3 }
 0x103   : > { %v605_v25 = vadd.f32 %v604_v56, %v516_v21  ;;  %v683_v26 = vmax.f32 %v643_v24, 0.0 }
 0x105   : > { %v668_v27 = vmax.f32 %v605_v25, 0.0  ;;  %716 = vst.msk [vmem:[%s1194_s15 + $0xd0] sm:$0xff] %vm689_vm1, %v683_v26 }
 0x106   : > { %v555_v28 = vpop.f32.mrf.mxu2  ;;  %v614_v32 = vpop.f32.mrf.mxu1 }
 0x107   : > { %701 = vst.msk [vmem:[%s1194_s15 + $0x58] sm:$0xff] %vm689_vm1, %v668_v27  ;;  %v556_v29 = vadd.f32 %v1186_v44, %v555_v28 }
 0x108   : > { %v518_v30 = vpop.f32.mrf.mxu0 }
 0x109   : > { %v519_v31 = vadd.f32 %v1186_v44, %v518_v30  ;;  %v645_v33 = vadd.f32 %v644_v23, %v556_v29 }
 0x10b   : > { %v608_v34 = vadd.f32 %v607_v3, %v519_v31  ;;  %v684_v36 = vmax.f32 %v645_v33, 0.0 }
 0x10d   : > { %v669_v37 = vmax.f32 %v608_v34, 0.0  ;;  %717 = vst.msk [vmem:[%s1194_s15 + $0xd8] sm:$0xff] %vm689_vm1, %v684_v36 }
 0x10e   : > { %v558_v38 = vpop.f32.mrf.mxu2  ;;  %v617_v43 = vpop.f32.mrf.mxu1 }
 0x10f   : > { %702 = vst.msk [vmem:[%s1194_s15 + $0x60] sm:$0xff] %vm689_vm1, %v669_v37  ;;  %v559_v40 = vadd.f32 %v1186_v44, %v558_v38  ;;  %v618_v46 = vadd.f32 %v617_v43, %v529_v39 }
 0x110   : > { %v520_v41 = vpop.f32.mrf.mxu0 }
 0x111   : > { %v521_v42 = vadd.f32 %v1186_v44, %v520_v41  ;;  %v648_v45 = vadd.f32 %v647_v35, %v559_v40  ;;  %v673_v49 = vmax.f32 %v618_v46, 0.0 }
 0x113   : > { %v610_v47 = vadd.f32 %v609_v13, %v521_v42  ;;  %v685_v48 = vmax.f32 %v648_v45, 0.0  ;;  %706 = vst.msk [vmem:[%s1194_s15 + $0x80] sm:$0xff] %vm689_vm1, %v673_v49 }
 0x115   : > { %v670_v50 = vmax.f32 %v610_v47, 0.0  ;;  %718 = vst.msk [vmem:[%s1194_s15 + $0xe0] sm:$0xff] %vm689_vm1, %v685_v48 }
 0x116   : > { %v560_v51 = vpop.f32.mrf.mxu2  ;;  %v619_v57 = vpop.f32.mrf.mxu1 }
 0x117   : > { %703 = vst.msk [vmem:[%s1194_s15 + $0x68] sm:$0xff] %vm689_vm1, %v670_v50  ;;  %v561_v54 = vadd.f32 %v1186_v44, %v560_v51  ;;  %v620_v60 = vadd.f32 %v619_v57, %v531_v53 }
 0x118   : > { %v523_v55 = vpop.f32.mrf.mxu0 }
 0x119   : > { %v524_v56 = vadd.f32 %v1186_v44, %v523_v55  ;;  %v650_v59 = vadd.f32 %v649_v52, %v561_v54  ;;  %v674_v63 = vmax.f32 %v620_v60, 0.0 }
 0x11b   : > { %v613_v61 = vadd.f32 %v612_v22, %v524_v56  ;;  %v686_v62 = vmax.f32 %v650_v59, 0.0  ;;  %707 = vst.msk [vmem:[%s1194_s15 + $0x88] sm:$0xff] %vm689_vm1, %v674_v63 }
 0x11d   : > { %v671_v0 = vmax.f32 %v613_v61, 0.0  ;;  %719 = vst.msk [vmem:[%s1194_s15 + $0xe8] sm:$0xff] %vm689_vm1, %v686_v62 }
 0x11e   : > { %v563_v1 = vpop.f32.mrf.mxu2 }
 0x11f   : > { %704 = vst.msk [vmem:[%s1194_s15 + $0x70] sm:$0xff] %vm689_vm1, %v671_v0  ;;  %v564_v2 = vadd.f32 %v1186_v44, %v563_v1 }
 0x120   : > { %v525_v3 = vpop.f32.mrf.mxu0 }
 0x121   : > { %v526_v4 = vadd.f32 %v1186_v44, %v525_v3  ;;  %v653_v5 = vadd.f32 %v652_v58, %v564_v2 }
 0x123   : > { %v615_v6 = vadd.f32 %v614_v32, %v526_v4  ;;  %v687_v7 = vmax.f32 %v653_v5, 0.0 }
 0x125   : > { %v672_v8 = vmax.f32 %v615_v6, 0.0  ;;  %720 = vst.msk [vmem:[%s1194_s15 + $0xf0] sm:$0xff] %vm689_vm1, %v687_v7 }
 0x126   : > { %v565_v9 = vpop.f32.mrf.mxu2 }
 0x127   : > { %705 = vst.msk [vmem:[%s1194_s15 + $0x78] sm:$0xff] %vm689_vm1, %v672_v8  ;;  %v566_v10 = vadd.f32 %v1186_v44, %v565_v9 }
 0x129   : > { %v655_v12 = vadd.f32 %v654_v11, %v566_v10 }
 0x12b   : > { %v688_v13 = vmax.f32 %v655_v12, 0.0 }
 0x12d   : > { %721 = vst.msk [vmem:[%s1194_s15 + $0xf8] sm:$0xff] %vm689_vm1, %v688_v13 }
 0x12e PF: > { %s13_s12 = sadd.s32 1, %s1036_s12  }
 0x12f   : > { %p10_p4 = scmp.ge.s32.totalorder %s13_s12, 4  }
 0x131   :  { %12 = sbr.rel (!%p10_p4) target bundleno = 1 (0x1), region = 62 }

// kernel: aib_forward.20
= control target key start
LH: loop header
LB: loop body
LE: loop exit
PB: predicated region body
PF: predicated region fallthrough
CT: control target
= control target key end

     0   :  { %s2757_s15 = smov 0   ;;  %s3476_s0 = inlined_call_operand.vmem [shape: f32[2,256,16], index: 0, kind: input, shape index: {}]   ;;  %s3477_s1 = inlined_call_operand.vmem [shape: f32[2,1,16], index: 1, kind: input, shape index: {}]   ;;  %s3478_s2 = inlined_call_operand.vmem [shape: bf16[2,256,72], index: 2, kind: input, shape index: {}]   ;;  %s3479_s3 = inlined_call_operand.vmem [shape: bf16[72,1], index: 3, kind: input, shape index: {}]   ;;  %s3480_s4 = inlined_call_operand.<no memory space> [shape: f32[1,1], index: 4, kind: input, shape index: {}]   ;;  %s3481_s5 = inlined_call_operand.vmem [shape: bf16[16,16], index: 5, kind: input, shape index: {}]   ;;  %s3482_s6 = inlined_call_operand.vmem [shape: bf16[16,16], index: 6, kind: input, shape index: {}]   ;;  %s3483_s7 = inlined_call_operand.vmem [shape: bf16[16,16], index: 7, kind: input, shape index: {}]   ;;  %s3484_s8 = inlined_call_operand.vmem [shape: f32[1,16], index: 8, kind: input, shape index: {}]   ;;  %s3485_s9 = inlined_call_operand.vmem [shape: f32[2,256,16], index: 9, kind: input, shape index: {}]   ;;  %s3486_s10 = inlined_call_operand.vmem [shape: f32[2,256,16], index: 10, kind: output, shape index: {}]  }
   0x1   :  { %v15_v0 = vstv %s3480_s4 }
   0x2   :  { %16 = vst [vmem:[#allocation2] sm:$0x1] %v15_v0 }
   0x3 LB: > { %s2315_s16 = sadd.s32 4294967295, %s2696_s15   ;;  %p2319_p0 = scmp.ge.s32.totalorder %s2696_s15, 1  ;;  %s2696_s15 = sphi %s2757_s15, %s22_s15  }
   0x4   : > { %p342_p1 = scmp.lt.s32.totalorder %s2696_s15, 3 }
   0x6   : > { %p343_p2 = pnand %p2319_p0, %p342_p1 }
   0x7   : > { %p393_p3 = scmp.lt.s32.totalorder (!%p343_p2), %s2315_s16, 1 }
   0x8   : > { %346 = sbr.rel (%p343_p2) target bundleno = 708 (0x2c4), region = 60 }
   0xd   : > { %v489_v1 = vld [vmem:[%s3479_s3 + $0x20] sm:$0xf]  ;;  %vm650_vm0 = vcmask 1043456   ;;  %s3488_s16 = smov (!%p393_p3, %s2315_s16), 1  ;;  %v2541_v5 = vld [vmem:[%s3479_s3 + $0x18] sm:$0xff]  ;;  %v2540_v6 = vld [vmem:[%s3479_s3 + $0x10] sm:$0xff] }
   0xe   : > { %v591_v2 = vunpack.c.l.b16 %v489_v1  ;;  %s2774_s20 = scalar_lea.vmem %s3477_s1, %s3488_s16  ;;  %v2539_v7 = vld [vmem:[%s3479_s3 + $0x8] sm:$0xff]  ;;  %s2519_s27 = sshll.u32 %s3488_s16, 7  ;;  %v2538_v8 = vld [vmem:[%s3479_s3] sm:$0xff]  ;;  %vm601_vm1 = vcmask 588800   ;;  %v2698_v18 = vmov 0  }
   0xf   : > { %s2792_s12 = scalar_lea.vmem %s3478_s2, %s2519_s27  ;;  %v2810_v17 = vld [vmem:[#allocation2] ss:$0 sm:$0xff]  ;;  %2554 = vset.pattern.permute.xlu0 %v2698_v18  ;;  %2555 = vset.pattern.permute.xlu1 %v2698_v18  ;;  %s2843_s13 = sshll.u32 %s3488_s16, 8 }
  0x10   : > { %v596_v3 = vpack.c.b16 %v591_v2, %v591_v2  ;;  %v2522_v9 = vld [vmem:[%s2792_s12] sm:$0xff]  ;;  %v2523_v10 = vld [vmem:[%s2792_s12 + $0x8] sm:$0xff]  ;;  %v2524_v11 = vld [vmem:[%s2792_s12 + $0x10] sm:$0xff]  ;;  %2556 = vset.pattern.permute.xlu2 %v2698_v18  ;;  %s2851_s18 = scalar_lea.vmem %s3476_s0, %s2843_s13  ;;  %s3191_s25 = scalar_lea.vmem %s3485_s9, %s2843_s13 }
  0x11   : > { %v2525_v12 = vld [vmem:[%s2792_s12 + $0x18] sm:$0xff]  ;;  %v2526_v13 = vld [vmem:[%s2792_s12 + $0x20] sm:$0xff]  ;;  %v2527_v14 = vld [vmem:[%s2792_s12 + $0x28] sm:$0xff]  ;;  %s3216_s30 = scalar_lea.vmem %s3486_s10, %s2843_s13 }
  0x12   : > { %v652_v4 = vsel %vm650_vm0, %v596_v3, 0  ;;  %v2528_v15 = vld [vmem:[%s2792_s12 + $0x30] sm:$0xff]  ;;  %v2529_v16 = vld [vmem:[%s2792_s12 + $0x38] sm:$0xff]  ;;  %v2530_v19 = vld [vmem:[%s2792_s12 + $0x40] sm:$0xff] }
  0x13   : > { %657 = vmatpush.bf16.msra.mxu0 %v652_v4  ;;  %v2531_v28 = vld [vmem:[%s2792_s12 + $0x48] sm:$0xff]  ;;  %v2532_v51 = vld [vmem:[%s2792_s12 + $0x50] sm:$0xff] }
  0x17   : > { %658 = vmatpush.bf16.msra.mxu0 %v2541_v5 }
  0x1b   : > { %659 = vmatpush.bf16.msra.mxu0 %v2540_v6 }
  0x1f   : > { %660 = vmatpush.bf16.msra.mxu0 %v2539_v7 }
  0x23   : > { %661 = vmatpush.bf16.msra.mxu0 %v2538_v8 }
  0x26   : > { %2408 = vmatmul.msk.bf16.vlgmr.msra.gmra.mxu0 %vm601_vm1, %v2522_v9 }
  0x36   : > { %2409 = vmatmul.msk.bf16.gmra.mxu0 %vm601_vm1, %v2523_v10 }
  0x46   : > { %2410 = vmatmul.msk.bf16.gmra.mxu0 %vm601_vm1, %v2524_v11 }
  0x56   : > { %2411 = vmatmul.msk.bf16.gmra.mxu0 %vm601_vm1, %v2525_v12 }
  0x66   : > { %2412 = vmatmul.msk.bf16.gmra.mxu0 %vm601_vm1, %v2526_v13 }
  0x76   : > { %2413 = vmatmul.msk.bf16.gmra.mxu0 %vm601_vm1, %v2527_v14 }
  0x86   : > { %2414 = vmatmul.msk.bf16.gmra.mxu0 %vm601_vm1, %v2528_v15 }
  0x96   : > { %2415 = vmatmul.msk.bf16.gmra.mxu0 %vm601_vm1, %v2529_v16 }
  0xa3   : > { %v663_v20 = vpop.f32.mrf.mxu0 }
  0xa4   : > { %v664_v21 = vadd.f32 %v2810_v17, %v663_v20 }
  0xa6   : > { %v2424_v22 = vmul.f32 -1.442695, %v664_v21  ;;  %2416 = vmatmul.msk.bf16.gmra.mxu0 %vm601_vm1, %v2530_v19  ;;  %v2533_v19 = vld [vmem:[%s2792_s12 + $0x58] sm:$0xff] }
  0xa8   : > { %2560 = vpow2.f32 %v2424_v22 }
  0xab   : > { %v665_v23 = vpop.f32.mrf.mxu0 }
  0xac   : > { %v666_v24 = vadd.f32 %v2810_v17, %v665_v23 }
  0xae   : > { %v2561_v25 = vpop.eup %2560  ;;  %v2425_v26 = vmul.f32 -1.442695, %v666_v24 }
  0xaf   : > { %v839_v27 = vadd.f32 1.0, %v2561_v25 }
  0xb0   : > { %2562 = vpow2.f32 %v2425_v26 }
  0xb1   : > { %2564 = vrcp.f32 %v839_v27  ;;  %v882_v38 = vand.u32 2147483648, %v839_v27  ;;  %v880_v41 = vand.u32 2147483647, %v839_v27  ;;  %vm876_vm3 = vweird.f32 %v839_v27 }
  0xb3   : > { %v668_v29 = vpop.f32.mrf.mxu0  ;;  %v883_v47 = vor.u32 1.1754944e-38, %v882_v38  ;;  %vm881_vm5 = vcmp.eq.f32.partialorder %v880_v41, 8.507059e+37 }
  0xb4   : > { %v669_v30 = vadd.f32 %v2810_v17, %v668_v29 }
  0xb6   : > { %v2563_v31 = vpop.eup %2562  ;;  %v2426_v32 = vmul.f32 -1.442695, %v669_v30  ;;  %2417 = vmatmul.msk.bf16.gmra.mxu0 %vm601_vm1, %v2531_v28 }
  0xb7   : > { %v2565_v33 = vpop.eup %2564  ;;  %v840_v34 = vadd.f32 1.0, %v2563_v31 }
  0xb8   : > { %2566 = vpow2.f32 %v2426_v32  ;;  %v872_v35 = vmul.f32 %v2565_v33, %v839_v27  ;;  %vm877_vm2 = vweird.f32 %v2565_v33 }
  0xb9   : > { %2568 = vrcp.f32 %v840_v34  ;;  %vm878_vm4 = vmor %vm876_vm3, %vm877_vm2  ;;  %v897_v54 = vand.u32 2147483648, %v840_v34  ;;  %v895_v57 = vand.u32 2147483647, %v840_v34  ;;  %vm891_vm7 = vweird.f32 %v840_v34 }
  0xba   : > { %v873_v36 = vsub.f32 1.0, %v872_v35 }
  0xbb   : > { %v670_v37 = vpop.f32.mrf.mxu0  ;;  %v898_v63 = vor.u32 1.1754944e-38, %v897_v54  ;;  %vm896_vm9 = vcmp.eq.f32.partialorder %v895_v57, 8.507059e+37 }
  0xbc   : > { %v671_v39 = vadd.f32 %v2810_v17, %v670_v37  ;;  %v874_v40 = vmul.f32 %v2565_v33, %v873_v36 }
  0xbe   : > { %v2567_v42 = vpop.eup %2566  ;;  %v2427_v43 = vmul.f32 -1.442695, %v671_v39  ;;  %v875_v44 = vadd.f32 %v2565_v33, %v874_v40 }
  0xbf   : > { %v2569_v45 = vpop.eup %2568  ;;  %v841_v46 = vadd.f32 1.0, %v2567_v42 }
  0xc0   : > { %2570 = vpow2.f32 %v2427_v43  ;;  %v879_v48 = vsel %vm878_vm4, %v2565_v33, %v875_v44  ;;  %v887_v49 = vmul.f32 %v2569_v45, %v840_v34  ;;  %vm892_vm6 = vweird.f32 %v2569_v45 }
  0xc1   : > { %2572 = vrcp.f32 %v841_v46  ;;  %v884_v50 = vsel %vm881_vm5, %v883_v47, %v879_v48  ;;  %vm893_vm8 = vmor %vm891_vm7, %vm892_vm6  ;;  %v912_v5 = vand.u32 2147483648, %v841_v46  ;;  %v910_v8 = vand.u32 2147483647, %v841_v46 }
  0xc2   : > { %1389 = vperm.xlu0 %2554, %v884_v50   ;;  %v888_v52 = vsub.f32 1.0, %v887_v49  ;;  %vm906_vm11 = vweird.f32 %v841_v46  ;;  %v2534_v50 = vld [vmem:[%s2792_s12 + $0x60] sm:$0xff] }
  0xc3   : > { %v673_v53 = vpop.f32.mrf.mxu0  ;;  %v913_v14 = vor.u32 1.1754944e-38, %v912_v5  ;;  %vm911_vm13 = vcmp.eq.f32.partialorder %v910_v8, 8.507059e+37 }
  0xc4   : > { %v674_v55 = vadd.f32 %v2810_v17, %v673_v53  ;;  %v889_v56 = vmul.f32 %v2569_v45, %v888_v52 }
  0xc6   : > { %v2571_v58 = vpop.eup %2570  ;;  %v2428_v59 = vmul.f32 -1.442695, %v674_v55  ;;  %2418 = vmatmul.msk.bf16.gmra.mxu0 %vm601_vm1, %v2532_v51  ;;  %v890_v60 = vadd.f32 %v2569_v45, %v889_v56 }
  0xc7   : > { %v2573_v61 = vpop.eup %2572  ;;  %v842_v62 = vadd.f32 1.0, %v2571_v58 }
  0xc8   : > { %2574 = vpow2.f32 %v2428_v59  ;;  %v894_v0 = vsel %vm893_vm8, %v2569_v45, %v890_v60  ;;  %v902_v1 = vmul.f32 %v2573_v61, %v841_v46  ;;  %vm907_vm10 = vweird.f32 %v2573_v61 }
  0xc9   : > { %2576 = vrcp.f32 %v842_v62  ;;  %v899_v2 = vsel %vm896_vm9, %v898_v63, %v894_v0  ;;  %vm908_vm12 = vmor %vm906_vm11, %vm907_vm10  ;;  %v927_v22 = vand.u32 2147483648, %v842_v62  ;;  %v925_v25 = vand.u32 2147483647, %v842_v62 }
  0xca   : > { %1394 = vperm.xlu0 %2554, %v899_v2   ;;  %v903_v3 = vsub.f32 1.0, %v902_v1  ;;  %vm921_vm15 = vweird.f32 %v842_v62 }
  0xcb   : > { %v675_v4 = vpop.f32.mrf.mxu0  ;;  %v928_v31 = vor.u32 1.1754944e-38, %v927_v22  ;;  %vm926_vm2 = vcmp.eq.f32.partialorder %v925_v25, 8.507059e+37 }
  0xcc   : > { %v676_v6 = vadd.f32 %v2810_v17, %v675_v4  ;;  %v904_v7 = vmul.f32 %v2573_v61, %v903_v3 }
  0xce   : > { %v2575_v9 = vpop.eup %2574  ;;  %v2429_v10 = vmul.f32 -1.442695, %v676_v6  ;;  %v905_v11 = vadd.f32 %v2573_v61, %v904_v7 }
  0xcf   : > { %v2577_v12 = vpop.eup %2576  ;;  %v843_v13 = vadd.f32 1.0, %v2575_v9 }
  0xd0   : > { %2578 = vpow2.f32 %v2429_v10  ;;  %v909_v15 = vsel %vm908_vm12, %v2573_v61, %v905_v11  ;;  %v917_v16 = vmul.f32 %v2577_v12, %v842_v62  ;;  %vm922_vm14 = vweird.f32 %v2577_v12 }
  0xd1   : > { %2580 = vrcp.f32 %v843_v13  ;;  %v914_v18 = vsel %vm911_vm13, %v913_v14, %v909_v15  ;;  %vm923_vm0 = vmor %vm921_vm15, %vm922_vm14  ;;  %v942_v37 = vand.u32 2147483648, %v843_v13  ;;  %v940_v40 = vand.u32 2147483647, %v843_v13 }
  0xd2   : > { %1399 = vperm.xlu1 %2555, %v914_v18   ;;  %v918_v20 = vsub.f32 1.0, %v917_v16  ;;  %vm936_vm4 = vweird.f32 %v843_v13  ;;  %v2535_v18 = vld [vmem:[%s2792_s12 + $0x68] sm:$0xff] }
  0xd3   : > { %v678_v21 = vpop.f32.mrf.mxu0  ;;  %v943_v46 = vor.u32 1.1754944e-38, %v942_v37  ;;  %vm941_vm6 = vcmp.eq.f32.partialorder %v940_v40, 8.507059e+37 }
  0xd4   : > { %v679_v23 = vadd.f32 %v2810_v17, %v678_v21  ;;  %v919_v24 = vmul.f32 %v2577_v12, %v918_v20 }
  0xd6   : > { %v2579_v26 = vpop.eup %2578  ;;  %v2430_v27 = vmul.f32 -1.442695, %v679_v23  ;;  %2419 = vmatmul.msk.bf16.gmra.mxu0 %vm601_vm1, %v2533_v19  ;;  %v920_v28 = vadd.f32 %v2577_v12, %v919_v24 }
  0xd7   : > { %v2581_v29 = vpop.eup %2580  ;;  %v844_v30 = vadd.f32 1.0, %v2579_v26 }
  0xd8   : > { %2582 = vpow2.f32 %v2430_v27  ;;  %v924_v32 = vsel %vm923_vm0, %v2577_v12, %v920_v28  ;;  %v932_v33 = vmul.f32 %v2581_v29, %v843_v13  ;;  %vm937_vm3 = vweird.f32 %v2581_v29 }
  0xd9   : > { %2584 = vrcp.f32 %v844_v30  ;;  %v929_v34 = vsel %vm926_vm2, %v928_v31, %v924_v32  ;;  %vm938_vm5 = vmor %vm936_vm4, %vm937_vm3  ;;  %v957_v53 = vand.u32 2147483648, %v844_v30  ;;  %v955_v56 = vand.u32 2147483647, %v844_v30 }
  0xda   : > { %1404 = vperm.xlu1 %2555, %v929_v34   ;;  %v933_v35 = vsub.f32 1.0, %v932_v33  ;;  %vm951_vm8 = vweird.f32 %v844_v30 }
  0xdb   : > { %v680_v36 = vpop.f32.mrf.mxu0  ;;  %v958_v62 = vor.u32 1.1754944e-38, %v957_v53  ;;  %vm956_vm10 = vcmp.eq.f32.partialorder %v955_v56, 8.507059e+37 }
  0xdc   : > { %v681_v38 = vadd.f32 %v2810_v17, %v680_v36  ;;  %v934_v39 = vmul.f32 %v2581_v29, %v933_v35 }
  0xde   : > { %v2583_v41 = vpop.eup %2582  ;;  %v2431_v42 = vmul.f32 -1.442695, %v681_v38  ;;  %v935_v43 = vadd.f32 %v2581_v29, %v934_v39 }
  0xdf   : > { %v2585_v44 = vpop.eup %2584  ;;  %v845_v45 = vadd.f32 1.0, %v2583_v41 }
  0xe0   : > { %2586 = vpow2.f32 %v2431_v42  ;;  %v939_v47 = vsel %vm938_vm5, %v2581_v29, %v935_v43  ;;  %v947_v48 = vmul.f32 %v2585_v44, %v844_v30  ;;  %vm952_vm7 = vweird.f32 %v2585_v44 }
  0xe1   : > { %2588 = vrcp.f32 %v845_v45  ;;  %v944_v49 = vsel %vm941_vm6, %v943_v46, %v939_v47  ;;  %vm953_vm9 = vmor %vm951_vm8, %vm952_vm7  ;;  %v972_v4 = vand.u32 2147483648, %v845_v45  ;;  %v970_v7 = vand.u32 2147483647, %v845_v45 }
  0xe2   : > { %1409 = vperm.xlu2 %2556, %v944_v49   ;;  %v948_v51 = vsub.f32 1.0, %v947_v48  ;;  %vm966_vm12 = vweird.f32 %v845_v45  ;;  %v2536_v49 = vld [vmem:[%s2792_s12 + $0x70] sm:$0xff] }
  0xe3   : > { %v683_v52 = vpop.f32.mrf.mxu0  ;;  %v973_v13 = vor.u32 1.1754944e-38, %v972_v4  ;;  %vm971_vm14 = vcmp.eq.f32.partialorder %v970_v7, 8.507059e+37 }
  0xe4   : > { %v684_v54 = vadd.f32 %v2810_v17, %v683_v52  ;;  %v949_v55 = vmul.f32 %v2585_v44, %v948_v51 }
  0xe6   : > { %v2587_v57 = vpop.eup %2586  ;;  %v2432_v58 = vmul.f32 -1.442695, %v684_v54  ;;  %2420 = vmatmul.msk.bf16.gmra.mxu0 %vm601_vm1, %v2534_v50  ;;  %v950_v59 = vadd.f32 %v2585_v44, %v949_v55 }
  0xe7   : > { %v2589_v60 = vpop.eup %2588  ;;  %v846_v61 = vadd.f32 1.0, %v2587_v57 }
  0xe8   : > { %2590 = vpow2.f32 %v2432_v58  ;;  %v954_v63 = vsel %vm953_vm9, %v2585_v44, %v950_v59  ;;  %v962_v0 = vmul.f32 %v2589_v60, %v845_v45  ;;  %vm967_vm11 = vweird.f32 %v2589_v60 }
  0xe9   : > { %2592 = vrcp.f32 %v846_v61  ;;  %v959_v1 = vsel %vm956_vm10, %v958_v62, %v954_v63  ;;  %vm968_vm13 = vmor %vm966_vm12, %vm967_vm11  ;;  %v987_v21 = vand.u32 2147483648, %v846_v61  ;;  %v985_v24 = vand.u32 2147483647, %v846_v61 }
  0xea   : > { %1414 = vperm.xlu2 %2556, %v959_v1   ;;  %v963_v2 = vsub.f32 1.0, %v962_v0  ;;  %vm981_vm0 = vweird.f32 %v846_v61 }
  0xeb   : > { %v685_v3 = vpop.f32.mrf.mxu0  ;;  %v988_v30 = vor.u32 1.1754944e-38, %v987_v21  ;;  %vm986_vm3 = vcmp.eq.f32.partialorder %v985_v24, 8.507059e+37  ;;  %v2542_v21 = vld [vmem:[%s3481_s5] sm:$0xff] }
  0xec   : > { %v686_v5 = vadd.f32 %v2810_v17, %v685_v3  ;;  %v964_v6 = vmul.f32 %v2589_v60, %v963_v2  ;;  %1820 = vmatpush.bf16.msra.mxu2 %v2542_v21 }
  0xee   : > { %v2591_v8 = vpop.eup %2590  ;;  %v2433_v9 = vmul.f32 -1.442695, %v686_v5  ;;  %v965_v10 = vadd.f32 %v2589_v60, %v964_v6 }
  0xef   : > { %v2593_v11 = vpop.eup %2592  ;;  %v847_v12 = vadd.f32 1.0, %v2591_v8 }
  0xf0   : > { %2594 = vpow2.f32 %v2433_v9  ;;  %v969_v14 = vsel %vm968_vm13, %v2589_v60, %v965_v10  ;;  %v977_v15 = vmul.f32 %v2593_v11, %v846_v61  ;;  %vm982_vm15 = vweird.f32 %v2593_v11 }
  0xf1   : > { %2596 = vrcp.f32 %v847_v12  ;;  %v974_v16 = vsel %vm971_vm14, %v973_v13, %v969_v14  ;;  %vm983_vm2 = vmor %vm981_vm0, %vm982_vm15  ;;  %v1002_v36 = vand.u32 2147483648, %v847_v12  ;;  %v1000_v39 = vand.u32 2147483647, %v847_v12 }
  0xf2   : > { %1419 = vperm.xlu0 %2554, %v974_v16   ;;  %v978_v19 = vsub.f32 1.0, %v977_v15  ;;  %vm996_vm5 = vweird.f32 %v847_v12  ;;  %v2537_v16 = vld [vmem:[%s2792_s12 + $0x78] sm:$0xff] }
  0xf3   : > { %v688_v20 = vpop.f32.mrf.mxu0  ;;  %v1003_v45 = vor.u32 1.1754944e-38, %v1002_v36  ;;  %vm1001_vm7 = vcmp.eq.f32.partialorder %v1000_v39, 8.507059e+37 }
  0xf4   : > { %v689_v22 = vadd.f32 %v2810_v17, %v688_v20  ;;  %v979_v23 = vmul.f32 %v2593_v11, %v978_v19 }
  0xf6   : > { %v2595_v25 = vpop.eup %2594  ;;  %v2434_v26 = vmul.f32 -1.442695, %v689_v22  ;;  %2421 = vmatmul.msk.bf16.gmra.mxu0 %vm601_vm1, %v2535_v18  ;;  %v980_v27 = vadd.f32 %v2593_v11, %v979_v23 }
  0xf7   : > { %v2597_v28 = vpop.eup %2596  ;;  %v848_v29 = vadd.f32 1.0, %v2595_v25  ;;  %v2858_v25 = vld [vmem:[%s2851_s18] sm:$0xff] }
  0xf8   : > { %2598 = vpow2.f32 %v2434_v26  ;;  %v984_v31 = vsel %vm983_vm2, %v2593_v11, %v980_v27  ;;  %v992_v32 = vmul.f32 %v2597_v28, %v847_v12  ;;  %vm997_vm4 = vweird.f32 %v2597_v28  ;;  %v2861_v26 = vld [vmem:[%s2851_s18 + $0x8] sm:$0xff] }
  0xf9   : > { %2600 = vrcp.f32 %v848_v29  ;;  %v989_v33 = vsel %vm986_vm3, %v988_v30, %v984_v31  ;;  %vm998_vm6 = vmor %vm996_vm5, %vm997_vm4  ;;  %v1017_v52 = vand.u32 2147483648, %v848_v29  ;;  %v1015_v55 = vand.u32 2147483647, %v848_v29 }
  0xfa   : > { %1424 = vperm.xlu1 %2555, %v989_v33   ;;  %v993_v34 = vsub.f32 1.0, %v992_v32  ;;  %vm1011_vm9 = vweird.f32 %v848_v29  ;;  %v1579_v31 = vpack.c.bf16 %v2861_v26, %v2858_v25  ;;  %vm1621_vm4 = vcmask 130048  }
  0xfb   : > { %v690_v35 = vpop.f32.mrf.mxu0  ;;  %v1018_v61 = vor.u32 1.1754944e-38, %v1017_v52  ;;  %vm1016_vm11 = vcmp.eq.f32.partialorder %v1015_v55, 8.507059e+37 }
  0xfc   : > { %v691_v37 = vadd.f32 %v2810_v17, %v690_v35  ;;  %v994_v38 = vmul.f32 %v2597_v28, %v993_v34  ;;  %2480 = vmatmul.msk.bf16.vlgmr.msra.gmra.mxu2 %vm1621_vm4, %v1579_v31 }
  0xfe   : > { %v2599_v40 = vpop.eup %2598  ;;  %v2435_v41 = vmul.f32 -1.442695, %v691_v37  ;;  %v995_v42 = vadd.f32 %v2597_v28, %v994_v38  ;;  %v2543_v38 = vld [vmem:[%s3482_s6] sm:$0xff] }
  0xff   : > { %v2601_v43 = vpop.eup %2600  ;;  %v849_v44 = vadd.f32 1.0, %v2599_v40  ;;  %1677 = vmatpush.bf16.msra.mxu1 %v2543_v38 }
 0x100   : > { %2602 = vpow2.f32 %v2435_v41  ;;  %v999_v46 = vsel %vm998_vm6, %v2597_v28, %v995_v42  ;;  %v1007_v47 = vmul.f32 %v2601_v43, %v848_v29  ;;  %vm1012_vm8 = vweird.f32 %v2601_v43  ;;  %v2864_v28 = vld [vmem:[%s2774_s20] ss:$0 sm:$0xff] }
 0x101   : > { %2604 = vrcp.f32 %v849_v44  ;;  %v1004_v48 = vsel %vm1001_vm7, %v1003_v45, %v999_v46  ;;  %vm1013_vm10 = vmor %vm1011_vm9, %vm1012_vm8  ;;  %v1032_v3 = vand.u32 2147483648, %v849_v44  ;;  %v1030_v6 = vand.u32 2147483647, %v849_v44 }
 0x102   : > { %1429 = vperm.xlu2 %2556, %v1004_v48   ;;  %v1008_v50 = vsub.f32 1.0, %v1007_v47  ;;  %vm1026_vm13 = vweird.f32 %v849_v44  ;;  %v1355_v40 = vmul.f32 %v2864_v28, %v2858_v25  ;;  %v1356_v41 = vmul.f32 %v2864_v28, %v2861_v26  ;;  %v2544_v48 = vld [vmem:[%s3483_s7] sm:$0xff] }
 0x103   : > { %v693_v51 = vpop.f32.mrf.mxu0  ;;  %v1033_v12 = vor.u32 1.1754944e-38, %v1032_v3  ;;  %vm1031_vm15 = vcmp.eq.f32.partialorder %v1030_v6, 8.507059e+37  ;;  %1981 = vmatpush.bf16.msra.mxu3 %v2544_v48 }
 0x104   : > { %v694_v53 = vadd.f32 %v2810_v17, %v693_v51  ;;  %v1009_v54 = vmul.f32 %v2601_v43, %v1008_v50  ;;  %v1597_v47 = vpack.c.bf16 %v1356_v41, %v1355_v40  ;;  %v2914_v41 = vld [vmem:[%s2851_s18 + $0x20] sm:$0xff] }
 0x106   : > { %v2603_v56 = vpop.eup %2602  ;;  %v2436_v57 = vmul.f32 -1.442695, %v694_v53  ;;  %2422 = vmatmul.msk.bf16.gmra.mxu0 %vm601_vm1, %v2536_v49  ;;  %v1010_v58 = vadd.f32 %v2601_v43, %v1009_v54  ;;  %2460 = vmatmul.msk.bf16.vlgmr.msra.gmra.mxu1 %vm1621_vm4, %v1597_v47 }
 0x107   : > { %v2605_v59 = vpop.eup %2604  ;;  %v850_v60 = vadd.f32 1.0, %v2603_v56 }
 0x108   : > { %2606 = vpow2.f32 %v2436_v57  ;;  %v1014_v62 = vsel %vm1013_vm10, %v2601_v43, %v1010_v58  ;;  %v1022_v63 = vmul.f32 %v2605_v59, %v849_v44  ;;  %vm1027_vm12 = vweird.f32 %v2605_v59 }
 0x109   : > { %2608 = vrcp.f32 %v850_v60  ;;  %v1019_v0 = vsel %vm1016_vm11, %v1018_v61, %v1014_v62  ;;  %vm1028_vm14 = vmor %vm1026_vm13, %vm1027_vm12  ;;  %v1047_v20 = vand.u32 2147483648, %v850_v60  ;;  %v1045_v24 = vand.u32 2147483647, %v850_v60 }
 0x10a   : > { %1434 = vperm.xlu0 %2554, %v1019_v0   ;;  %v1023_v1 = vsub.f32 1.0, %v1022_v63  ;;  %vm1041_vm2 = vweird.f32 %v850_v60  ;;  %v2894_v0 = vld [vmem:[%s2851_s18 + $0x10] sm:$0xff] }
 0x10b   : > { %v695_v2 = vpop.f32.mrf.mxu0  ;;  %v1048_v34 = vor.u32 1.1754944e-38, %v1047_v20  ;;  %vm1046_vm5 = vcmp.eq.f32.partialorder %v1045_v24, 8.507059e+37 }
 0x10c   : > { %v696_v4 = vadd.f32 %v2810_v17, %v695_v2  ;;  %v1024_v5 = vmul.f32 %v2605_v59, %v1023_v1  ;;  %v2897_v1 = vld [vmem:[%s2851_s18 + $0x18] sm:$0xff] }
 0x10e   : > { %v2607_v7 = vpop.eup %2606  ;;  %v2437_v8 = vmul.f32 -1.442695, %v696_v4  ;;  %v1025_v9 = vadd.f32 %v2605_v59, %v1024_v5  ;;  %v1580_v5 = vpack.c.bf16 %v2897_v1, %v2894_v0 }
 0x10f   : > { %v2609_v10 = vpop.eup %2608  ;;  %v2840_v11 = vadd.f32 1.0, %v2607_v7 }
 0x110   : > { %2610 = vpow2.f32 %v2437_v8  ;;  %v1029_v13 = vsel %vm1028_vm14, %v2605_v59, %v1025_v9  ;;  %v1037_v14 = vmul.f32 %v2609_v10, %v850_v60  ;;  %vm1042_vm0 = vweird.f32 %v2609_v10  ;;  %2481 = vmatmul.msk.bf16.gmra.mxu2 %vm1621_vm4, %v1580_v5 }
 0x111   : > { %2612 = vrcp.f32 %v2840_v11  ;;  %v1034_v15 = vsel %vm1031_vm15, %v1033_v12, %v1029_v13  ;;  %vm1043_vm3 = vmor %vm1041_vm2, %vm1042_vm0  ;;  %v1060_v43 = vand.u32 2147483647, %v2840_v11  ;;  %v1062_v44 = vand.u32 2147483648, %v2840_v11 }
 0x112   : > { %1439 = vperm.xlu1 %2555, %v1034_v15   ;;  %v1038_v18 = vsub.f32 1.0, %v1037_v14  ;;  %vm1056_vm6 = vweird.f32 %v2840_v11  ;;  %v1357_v13 = vmul.f32 %v2864_v28, %v2894_v0 }
 0x113   : > { %v698_v19 = vpop.f32.mrf.mxu0  ;;  %v1063_v54 = vor.u32 1.1754944e-38, %v1062_v44  ;;  %vm1061_vm8 = vcmp.eq.f32.partialorder %v1060_v43, 8.507059e+37 }
 0x114   : > { %v699_v22 = vadd.f32 %v2810_v17, %v698_v19  ;;  %v1039_v23 = vmul.f32 %v2609_v10, %v1038_v18 }
 0x116   : > { %v2611_v27 = vpop.eup %2610  ;;  %v2438_v29 = vmul.f32 -1.442695, %v699_v22  ;;  %2423 = vmatmul.msk.bf16.gmra.mxu0 %vm601_vm1, %v2537_v16  ;;  %v1040_v30 = vadd.f32 %v2609_v10, %v1039_v23  ;;  %v1358_v16 = vmul.f32 %v2864_v28, %v2897_v1 }
 0x117   : > { %v2613_v32 = vpop.eup %2612  ;;  %v2869_v33 = vadd.f32 1.0, %v2611_v27 }
 0x118   : > { %2614 = vpow2.f32 %v2438_v29  ;;  %v1044_v35 = vsel %vm1043_vm3, %v2609_v10, %v1040_v30  ;;  %v1052_v36 = vmul.f32 %v2613_v32, %v2840_v11  ;;  %vm1057_vm1 = vweird.f32 %v2613_v32 }
 0x119   : > { %2616 = vrcp.f32 %v2869_v33  ;;  %v1049_v37 = vsel %vm1046_vm5, %v1048_v34, %v1044_v35  ;;  %vm1058_vm7 = vmor %vm1056_vm6, %vm1057_vm1  ;;  %v1077_v60 = vand.u32 2147483648, %v2869_v33  ;;  %v1075_v63 = vand.u32 2147483647, %v2869_v33 }
 0x11a   : > { %1444 = vperm.xlu2 %2556, %v1049_v37   ;;  %v1053_v39 = vsub.f32 1.0, %v1052_v36  ;;  %vm1071_vm10 = vweird.f32 %v2869_v33  ;;  %v1598_v21 = vpack.c.bf16 %v1358_v16, %v1357_v13 }
 0x11b   : > { %v700_v42 = vpop.f32.mrf.mxu0  ;;  %v1078_v8 = vor.u32 1.1754944e-38, %v1077_v60  ;;  %vm1076_vm12 = vcmp.eq.f32.partialorder %v1075_v63, 8.507059e+37 }
 0x11c   : > { %v701_v45 = vadd.f32 %v2810_v17, %v700_v42  ;;  %v1054_v46 = vmul.f32 %v2613_v32, %v1053_v39  ;;  %2461 = vmatmul.msk.bf16.gmra.mxu1 %vm1621_vm4, %v1598_v21  ;;  %v2917_v42 = vld [vmem:[%s2851_s18 + $0x28] sm:$0xff] }
 0x11e   : > { %v2615_v49 = vpop.eup %2614  ;;  %v2439_v50 = vmul.f32 -1.442695, %v701_v45  ;;  %v1055_v51 = vadd.f32 %v2613_v32, %v1054_v46  ;;  %v1581_v46 = vpack.c.bf16 %v2917_v42, %v2914_v41 }
 0x11f   : > { %v2617_v52 = vpop.eup %2616  ;;  %v853_v53 = vadd.f32 1.0, %v2615_v49 }
 0x120   : > { %2618 = vpow2.f32 %v2439_v50  ;;  %v1059_v55 = vsel %vm1058_vm7, %v2613_v32, %v1055_v51  ;;  %v1067_v56 = vmul.f32 %v2617_v52, %v2869_v33  ;;  %vm1072_vm9 = vweird.f32 %v2617_v52  ;;  %2482 = vmatmul.msk.bf16.gmra.mxu2 %vm1621_vm4, %v1581_v46 }
 0x121   : > { %2620 = vrcp.f32 %v853_v53  ;;  %v1064_v57 = vsel %vm1061_vm8, %v1063_v54, %v1059_v55  ;;  %vm1073_vm11 = vmor %vm1071_vm10, %vm1072_vm9  ;;  %v1092_v15 = vand.u32 2147483648, %v853_v53  ;;  %v1090_v20 = vand.u32 2147483647, %v853_v53 }
 0x122   : > { %1449 = vperm.xlu0 %2554, %v1064_v57   ;;  %v1068_v58 = vsub.f32 1.0, %v1067_v56  ;;  %vm1086_vm14 = vweird.f32 %v853_v53  ;;  %v1359_v50 = vmul.f32 %v2864_v28, %v2914_v41 }
 0x123   : > { %v703_v59 = vpop.f32.mrf.mxu0  ;;  %v1093_v30 = vor.u32 1.1754944e-38, %v1092_v15  ;;  %vm1091_vm0 = vcmp.eq.f32.partialorder %v1090_v20, 8.507059e+37  ;;  %v2949_v20 = vld [vmem:[%s2851_s18 + $0x38] sm:$0xff] }
 0x124   : > { %v704_v61 = vadd.f32 %v2810_v17, %v703_v59  ;;  %v1069_v62 = vmul.f32 %v2617_v52, %v1068_v58 }
 0x126   : > { %v2619_v2 = vpop.eup %2618  ;;  %v2440_v3 = vmul.f32 -1.442695, %v704_v61  ;;  %v1070_v4 = vadd.f32 %v2617_v52, %v1069_v62 }
 0x127   : > { %v2621_v6 = vpop.eup %2620  ;;  %v854_v7 = vadd.f32 1.0, %v2619_v2 }
 0x128   : > { %2622 = vpow2.f32 %v2440_v3  ;;  %v1074_v9 = vsel %vm1073_vm11, %v2617_v52, %v1070_v4  ;;  %v1082_v10 = vmul.f32 %v2621_v6, %v853_v53  ;;  %vm1087_vm13 = vweird.f32 %v2621_v6 }
 0x129   : > { %2624 = vrcp.f32 %v854_v7  ;;  %v1079_v11 = vsel %vm1076_vm12, %v1078_v8, %v1074_v9  ;;  %vm1088_vm15 = vmor %vm1086_vm14, %vm1087_vm13  ;;  %v1105_v36 = vand.u32 2147483647, %v854_v7  ;;  %v1107_v37 = vand.u32 2147483648, %v854_v7 }
 0x12a   : > { %1454 = vperm.xlu1 %2555, %v1079_v11   ;;  %v1083_v12 = vsub.f32 1.0, %v1082_v10  ;;  %vm1101_vm3 = vweird.f32 %v854_v7  ;;  %v1360_v53 = vmul.f32 %v2864_v28, %v2917_v42 }
 0x12b   : > { %v705_v14 = vpop.f32.mrf.mxu0  ;;  %vm1106_vm1 = vcmp.eq.f32.partialorder %v1105_v36, 8.507059e+37  ;;  %v1108_v49 = vor.u32 1.1754944e-38, %v1107_v37 }
 0x12c   : > { %v706_v18 = vadd.f32 %v2810_v17, %v705_v14  ;;  %v1084_v19 = vmul.f32 %v2621_v6, %v1083_v12  ;;  %v1599_v62 = vpack.c.bf16 %v1360_v53, %v1359_v50 }
 0x12e   : > { %v2623_v22 = vpop.eup %2622  ;;  %v2441_v23 = vmul.f32 -1.442695, %v706_v18  ;;  %v1085_v24 = vadd.f32 %v2621_v6, %v1084_v19  ;;  %2462 = vmatmul.msk.bf16.gmra.mxu1 %vm1621_vm4, %v1599_v62  ;;  %v2946_v19 = vld [vmem:[%s2851_s18 + $0x30] sm:$0xff] }
 0x12f   : > { %v2625_v27 = vpop.eup %2624  ;;  %v2908_v29 = vadd.f32 1.0, %v2623_v22 }
 0x130   : > { %2626 = vpow2.f32 %v2441_v23  ;;  %v1089_v31 = vsel %vm1088_vm15, %v2621_v6, %v1085_v24  ;;  %v1097_v32 = vmul.f32 %v2625_v27, %v854_v7  ;;  %vm1102_vm2 = vweird.f32 %v2625_v27 }
 0x131   : > { %2628 = vrcp.f32 %v2908_v29  ;;  %v1094_v33 = vsel %vm1091_vm0, %v1093_v30, %v1089_v31  ;;  %vm1103_vm5 = vmor %vm1101_vm3, %vm1102_vm2  ;;  %v1120_v57 = vand.u32 2147483647, %v2908_v29  ;;  %v1122_v58 = vand.u32 2147483648, %v2908_v29 }
 0x132   : > { %1459 = vperm.xlu2 %2556, %v1094_v33   ;;  %v1098_v34 = vsub.f32 1.0, %v1097_v32  ;;  %vm1116_vm7 = vweird.f32 %v2908_v29  ;;  %v1582_v24 = vpack.c.bf16 %v2949_v20, %v2946_v19 }
 0x133   : > { %v708_v35 = vpop.f32.mrf.mxu0  ;;  %v1123_v9 = vor.u32 1.1754944e-38, %v1122_v58  ;;  %vm1121_vm9 = vcmp.eq.f32.partialorder %v1120_v57, 8.507059e+37 }
 0x134   : > { %v709_v38 = vadd.f32 %v2810_v17, %v708_v35  ;;  %v1390_v39 = vpop.permute.xlu0 %1389  ;;  %v1099_v40 = vmul.f32 %v2625_v27, %v1098_v34  ;;  %2483 = vmatmul.msk.bf16.gmra.mxu2 %vm1621_vm4, %v1582_v24  ;;  %v1361_v35 = vmul.f32 %v2864_v28, %v2946_v19 }
 0x135   : > { %v1547_v63 = vmul.f32 %v1390_v39, %v2858_v25 }
 0x136   : > { %v2627_v43 = vpop.eup %2626  ;;  %v2442_v44 = vmul.f32 -1.442695, %v709_v38  ;;  %v1100_v45 = vadd.f32 %v2625_v27, %v1099_v40  ;;  %v1362_v38 = vmul.f32 %v2864_v28, %v2949_v20 }
 0x137   : > { %v2629_v47 = vpop.eup %2628  ;;  %v2921_v48 = vadd.f32 1.0, %v2627_v43 }
 0x138   : > { %2630 = vpow2.f32 %v2442_v44  ;;  %v1104_v51 = vsel %vm1103_vm5, %v2625_v27, %v1100_v45  ;;  %v1112_v52 = vmul.f32 %v2629_v47, %v2908_v29  ;;  %vm1117_vm6 = vweird.f32 %v2629_v47 }
 0x139   : > { %2632 = vrcp.f32 %v2921_v48  ;;  %v1109_v54 = vsel %vm1106_vm1, %v1108_v49, %v1104_v51  ;;  %vm1118_vm8 = vmor %vm1116_vm7, %vm1117_vm6  ;;  %v1137_v13 = vand.u32 2147483648, %v2921_v48  ;;  %v1135_v18 = vand.u32 2147483647, %v2921_v48 }
 0x13a   : > { %1464 = vperm.xlu0 %2554, %v1109_v54   ;;  %v1113_v55 = vsub.f32 1.0, %v1112_v52  ;;  %vm1131_vm11 = vweird.f32 %v2921_v48 }
 0x13b   : > { %v710_v56 = vpop.f32.mrf.mxu0  ;;  %v1138_v30 = vor.u32 1.1754944e-38, %v1137_v13  ;;  %vm1136_vm13 = vcmp.eq.f32.partialorder %v1135_v18, 8.507059e+37 }
 0x13c   : > { %v711_v59 = vadd.f32 %v2810_v17, %v710_v56  ;;  %v1395_v60 = vpop.permute.xlu0 %1394  ;;  %v1114_v61 = vmul.f32 %v2629_v47, %v1113_v55  ;;  %v1410_v49 = vpop.permute.xlu2 %1409 }
 0x13d   : > { %v1548_v2 = vmul.f32 %v1395_v60, %v2861_v26 }
 0x13e   : > { %v2631_v3 = vpop.eup %2630  ;;  %v2443_v4 = vmul.f32 -1.442695, %v711_v59  ;;  %v1115_v5 = vadd.f32 %v2629_v47, %v1114_v61  ;;  %v2976_v59 = vld [vmem:[#allocation2] ss:$0 sm:$0xff] }
 0x13f   : > { %v2633_v6 = vpop.eup %2632  ;;  %v2936_v7 = vadd.f32 1.0, %v2631_v3  ;;  %v1902_v8 = vpack.c.bf16 %v1548_v2, %v1547_v63  ;;  %v2981_v63 = vld [vmem:[%s2851_s18 + $0x40] sm:$0xff]  ;;  %v2984_v2 = vld [vmem:[%s2851_s18 + $0x48] sm:$0xff] }
 0x140   : > { %2634 = vpow2.f32 %v2443_v4  ;;  %v1119_v10 = vsel %vm1118_vm8, %v2629_v47, %v1115_v5  ;;  %v1127_v25 = vmul.f32 %v2633_v6, %v2921_v48  ;;  %vm1132_vm10 = vweird.f32 %v2633_v6 }
 0x141   : > { %2636 = vrcp.f32 %v2936_v7  ;;  %2500 = vmatmul.msk.bf16.vlgmr.msra.gmra.mxu3 %vm1621_vm4, %v1902_v8  ;;  %v1124_v26 = vsel %vm1121_vm9, %v1123_v9, %v1119_v10  ;;  %vm1133_vm12 = vmor %vm1131_vm11, %vm1132_vm10  ;;  %v1152_v37 = vand.u32 2147483648, %v2936_v7  ;;  %v1150_v44 = vand.u32 2147483647, %v2936_v7 }
 0x142   : > { %1469 = vperm.xlu1 %2555, %v1124_v26   ;;  %v1128_v11 = vsub.f32 1.0, %v1127_v25  ;;  %v1600_v47 = vpack.c.bf16 %v1362_v38, %v1361_v35  ;;  %vm1146_vm15 = vweird.f32 %v2936_v7  ;;  %v1363_v10 = vmul.f32 %v2864_v28, %v2981_v63 }
 0x143   : > { %v713_v12 = vpop.f32.mrf.mxu0  ;;  %v1153_v54 = vor.u32 1.1754944e-38, %v1152_v37  ;;  %vm1151_vm2 = vcmp.eq.f32.partialorder %v1150_v44, 8.507059e+37 }
 0x144   : > { %v714_v14 = vadd.f32 %v2810_v17, %v713_v12  ;;  %v1400_v15 = vpop.permute.xlu1 %1399  ;;  %v1129_v16 = vmul.f32 %v2633_v6, %v1128_v11  ;;  %2463 = vmatmul.msk.bf16.gmra.mxu1 %vm1621_vm4, %v1600_v47  ;;  %v1415_v25 = vpop.permute.xlu2 %1414 }
 0x145   : > { %v1549_v45 = vmul.f32 %v1400_v15, %v2894_v0  ;;  %v1552_v15 = vmul.f32 %v1415_v25, %v2917_v42 }
 0x146   : > { %v2635_v21 = vpop.eup %2634  ;;  %v2444_v22 = vmul.f32 -1.442695, %v714_v14  ;;  %v1130_v23 = vadd.f32 %v2633_v6, %v1129_v16  ;;  %v1364_v14 = vmul.f32 %v2864_v28, %v2984_v2 }
 0x147   : > { %v2637_v27 = vpop.eup %2636  ;;  %v2954_v29 = vadd.f32 1.0, %v2635_v21 }
 0x148   : > { %2638 = vpow2.f32 %v2444_v22  ;;  %v1134_v31 = vsel %vm1133_vm12, %v2633_v6, %v1130_v23  ;;  %v1142_v32 = vmul.f32 %v2637_v27, %v2936_v7  ;;  %vm1147_vm14 = vweird.f32 %v2637_v27 }
 0x149   : > { %2640 = vrcp.f32 %v2954_v29  ;;  %v1139_v33 = vsel %vm1136_vm13, %v1138_v30, %v1134_v31  ;;  %vm1148_vm0 = vmor %vm1146_vm15, %vm1147_vm14  ;;  %v1167_v58 = vand.u32 2147483648, %v2954_v29  ;;  %v1165_v62 = vand.u32 2147483647, %v2954_v29 }
 0x14a   : > { %1474 = vperm.xlu2 %2556, %v1139_v33   ;;  %v1143_v34 = vsub.f32 1.0, %v1142_v32  ;;  %vm1161_vm5 = vweird.f32 %v2954_v29  ;;  %v1583_v6 = vpack.c.bf16 %v2984_v2, %v2981_v63  ;;  %v1601_v24 = vpack.c.bf16 %v1364_v14, %v1363_v10 }
 0x14b   : > { %v715_v36 = vpop.f32.mrf.mxu0  ;;  %v1168_v9 = vor.u32 1.1754944e-38, %v1167_v58  ;;  %vm1166_vm6 = vcmp.eq.f32.partialorder %v1165_v62, 8.507059e+37 }
 0x14c   : > { %v716_v39 = vadd.f32 %v2810_v17, %v715_v36  ;;  %v1405_v40 = vpop.permute.xlu1 %1404  ;;  %v1144_v43 = vmul.f32 %v2637_v27, %v1143_v34  ;;  %2484 = vmatmul.msk.bf16.gmra.mxu2 %vm1621_vm4, %v1583_v6 }
 0x14d   : > { %v1550_v46 = vmul.f32 %v1405_v40, %v2897_v1 }
 0x14e   : > { %v2639_v48 = vpop.eup %2638  ;;  %v2445_v50 = vmul.f32 -1.442695, %v716_v39  ;;  %v1145_v51 = vadd.f32 %v2637_v27, %v1144_v43 }
 0x14f   : > { %v2641_v52 = vpop.eup %2640  ;;  %v2969_v53 = vadd.f32 1.0, %v2639_v48  ;;  %v1903_v17 = vpack.c.bf16 %v1550_v46, %v1549_v45  ;;  %v3008_v45 = vld [vmem:[%s2851_s18 + $0x58] sm:$0xff]  ;;  %v3011_v46 = vld [vmem:[%s2851_s18 + $0x50] sm:$0xff] }
 0x150   : > { %2642 = vpow2.f32 %v2445_v50  ;;  %v1149_v0 = vsel %vm1148_vm0, %v2637_v27, %v1145_v51  ;;  %v1157_v1 = vmul.f32 %v2641_v52, %v2954_v29  ;;  %vm1162_vm3 = vweird.f32 %v2641_v52 }
 0x151   : > { %2644 = vrcp.f32 %v2969_v53  ;;  %2501 = vmatmul.msk.bf16.gmra.mxu3 %vm1621_vm4, %v1903_v17  ;;  %v1154_v55 = vsel %vm1151_vm2, %v1153_v54, %v1149_v0  ;;  %vm1163_vm1 = vmor %vm1161_vm5, %vm1162_vm3  ;;  %v1180_v18 = vand.u32 2147483647, %v2969_v53  ;;  %v1182_v21 = vand.u32 2147483648, %v2969_v53 }
 0x152   : > { %1479 = vperm.xlu0 %2554, %v1154_v55   ;;  %v1158_v56 = vsub.f32 1.0, %v1157_v1  ;;  %v1551_v27 = vmul.f32 %v1410_v49, %v2914_v41  ;;  %vm1176_vm8 = vweird.f32 %v2969_v53  ;;  %v1584_v50 = vpack.c.bf16 %v3008_v45, %v3011_v46 }
 0x153   : > { %v718_v57 = vpop.f32.mrf.mxu0  ;;  %v1183_v34 = vor.u32 1.1754944e-38, %v1182_v21  ;;  %vm1181_vm10 = vcmp.eq.f32.partialorder %v1180_v18, 8.507059e+37  ;;  %v1366_v0 = vmul.f32 %v2864_v28, %v3008_v45 }
 0x154   : > { %v719_v60 = vadd.f32 %v2976_v59, %v718_v57  ;;  %v1159_v61 = vmul.f32 %v2641_v52, %v1158_v56  ;;  %v1904_v33 = vpack.c.bf16 %v1552_v15, %v1551_v27  ;;  %2464 = vmatmul.msk.bf16.gmra.mxu1 %vm1621_vm4, %v1601_v24  ;;  %v1365_v57 = vmul.f32 %v2864_v28, %v3011_v46  ;;  %v3043_v24 = vld [vmem:[%s2851_s18 + $0x68] sm:$0xff] }
 0x156   : > { %v2643_v3 = vpop.eup %2642  ;;  %v2446_v4 = vmul.f32 -1.442695, %v719_v60  ;;  %v1160_v5 = vadd.f32 %v2641_v52, %v1159_v61 }
 0x157   : > { %v2645_v7 = vpop.eup %2644  ;;  %v860_v8 = vadd.f32 1.0, %v2643_v3 }
 0x158   : > { %2646 = vpow2.f32 %v2446_v4  ;;  %v1164_v26 = vsel %vm1163_vm1, %v2641_v52, %v1160_v5  ;;  %v1172_v11 = vmul.f32 %v2645_v7, %v2969_v53  ;;  %vm1177_vm7 = vweird.f32 %v2645_v7 }
 0x159   : > { %2648 = vrcp.f32 %v860_v8  ;;  %v1169_v12 = vsel %vm1166_vm6, %v1168_v9, %v1164_v26  ;;  %vm1178_vm9 = vmor %vm1176_vm8, %vm1177_vm7  ;;  %v1195_v39 = vand.u32 2147483647, %v860_v8  ;;  %v1197_v40 = vand.u32 2147483648, %v860_v8 }
 0x15a   : > { %1484 = vperm.xlu1 %2555, %v1169_v12   ;;  %v1173_v13 = vsub.f32 1.0, %v1172_v11  ;;  %vm1191_vm12 = vweird.f32 %v860_v8  ;;  %v1602_v5 = vpack.c.bf16 %v1366_v0, %v1365_v57 }
 0x15b   : > { %v720_v16 = vpop.f32.mrf.mxu0  ;;  %vm1196_vm14 = vcmp.eq.f32.partialorder %v1195_v39, 8.507059e+37  ;;  %v1198_v53 = vor.u32 1.1754944e-38, %v1197_v40 }
 0x15c   : > { %v721_v22 = vadd.f32 %v2976_v59, %v720_v16  ;;  %v1174_v23 = vmul.f32 %v2645_v7, %v1173_v13  ;;  %2485 = vmatmul.msk.bf16.gmra.mxu2 %vm1621_vm4, %v1584_v50 }
 0x15e   : > { %v2647_v29 = vpop.eup %2646  ;;  %v2447_v30 = vmul.f32 -1.442695, %v721_v22  ;;  %v1175_v31 = vadd.f32 %v2645_v7, %v1174_v23  ;;  %v3040_v23 = vld [vmem:[%s2851_s18 + $0x60] sm:$0xff] }
 0x15f   : > { %v2649_v32 = vpop.eup %2648  ;;  %v3001_v42 = vadd.f32 1.0, %v2647_v29 }
 0x160   : > { %2650 = vpow2.f32 %v2447_v30  ;;  %v1179_v35 = vsel %vm1178_vm9, %v2645_v7, %v1175_v31  ;;  %v1187_v36 = vmul.f32 %v2649_v32, %v860_v8  ;;  %vm1192_vm11 = vweird.f32 %v2649_v32 }
 0x161   : > { %2652 = vrcp.f32 %v3001_v42  ;;  %2502 = vmatmul.msk.bf16.gmra.mxu3 %vm1621_vm4, %v1904_v33  ;;  %v1184_v41 = vsel %vm1181_vm10, %v1183_v34, %v1179_v35  ;;  %vm1193_vm13 = vmor %vm1191_vm12, %vm1192_vm11  ;;  %v1210_v60 = vand.u32 2147483647, %v3001_v42  ;;  %v1212_v61 = vand.u32 2147483648, %v3001_v42 }
 0x162   : > { %1489 = vperm.xlu2 %2556, %v1184_v41   ;;  %v1188_v37 = vsub.f32 1.0, %v1187_v36  ;;  %vm1206_vm0 = vweird.f32 %v3001_v42  ;;  %v1585_v31 = vpack.c.bf16 %v3043_v24, %v3040_v23  ;;  %v1430_v41 = vpop.permute.xlu2 %1429 }
 0x163   : > { %v723_v38 = vpop.f32.mrf.mxu0  ;;  %v1213_v12 = vor.u32 1.1754944e-38, %v1212_v61  ;;  %vm1211_vm3 = vcmp.eq.f32.partialorder %v1210_v60, 8.507059e+37  ;;  %v1555_v50 = vmul.f32 %v1430_v41, %v2981_v63 }
 0x164   : > { %v724_v43 = vadd.f32 %v2976_v59, %v723_v38  ;;  %v1189_v44 = vmul.f32 %v2649_v32, %v1188_v37  ;;  %v1420_v55 = vpop.permute.xlu0 %1419  ;;  %2465 = vmatmul.msk.bf16.gmra.mxu1 %vm1621_vm4, %v1602_v5  ;;  %v1367_v38 = vmul.f32 %v2864_v28, %v3040_v23  ;;  %v3073_v5 = vld [vmem:[%s2851_s18 + $0x70] sm:$0xff] }
 0x165   : > { %v1553_v6 = vmul.f32 %v1420_v55, %v2946_v19 }
 0x166   : > { %v2651_v47 = vpop.eup %2650  ;;  %v2448_v48 = vmul.f32 -1.442695, %v724_v43  ;;  %v1190_v49 = vadd.f32 %v2649_v32, %v1189_v44  ;;  %v1368_v43 = vmul.f32 %v2864_v28, %v3043_v24 }
 0x167   : > { %v2653_v51 = vpop.eup %2652  ;;  %v3015_v52 = vadd.f32 1.0, %v2651_v47 }
 0x168   : > { %2654 = vpow2.f32 %v2448_v48  ;;  %v1194_v17 = vsel %vm1193_vm13, %v2649_v32, %v1190_v49  ;;  %v1202_v54 = vmul.f32 %v2653_v51, %v3001_v42  ;;  %vm1207_vm15 = vweird.f32 %v2653_v51 }
 0x169   : > { %2656 = vrcp.f32 %v3015_v52  ;;  %v1199_v1 = vsel %vm1196_vm14, %v1198_v53, %v1194_v17  ;;  %vm1208_vm2 = vmor %vm1206_vm0, %vm1207_vm15  ;;  %v1227_v16 = vand.u32 2147483648, %v3015_v52  ;;  %v1225_v22 = vand.u32 2147483647, %v3015_v52 }
 0x16a   : > { %1494 = vperm.xlu0 %2554, %v1199_v1   ;;  %v1203_v56 = vsub.f32 1.0, %v1202_v54  ;;  %vm1221_vm1 = vweird.f32 %v3015_v52 }
 0x16b   : > { %v725_v58 = vpop.f32.mrf.mxu0  ;;  %v1228_v42 = vor.u32 1.1754944e-38, %v1227_v16  ;;  %vm1226_vm7 = vcmp.eq.f32.partialorder %v1225_v22, 8.507059e+37 }
 0x16c   : > { %v726_v62 = vadd.f32 %v2976_v59, %v725_v58  ;;  %v1425_v3 = vpop.permute.xlu1 %1424  ;;  %v1204_v4 = vmul.f32 %v2653_v51, %v1203_v56  ;;  %2486 = vmatmul.msk.bf16.gmra.mxu2 %vm1621_vm4, %v1585_v31 }
 0x16d   : > { %v1554_v7 = vmul.f32 %v1425_v3, %v2949_v20 }
 0x16e   : > { %v2655_v8 = vpop.eup %2654  ;;  %v2449_v9 = vmul.f32 -1.442695, %v726_v62  ;;  %v1205_v10 = vadd.f32 %v2653_v51, %v1204_v4 }
 0x16f   : > { %v2657_v25 = vpop.eup %2656  ;;  %v3030_v26 = vadd.f32 1.0, %v2655_v8  ;;  %v1905_v11 = vpack.c.bf16 %v1554_v7, %v1553_v6  ;;  %v3076_v6 = vld [vmem:[%s2851_s18 + $0x78] sm:$0xff] }
 0x170   : > { %2658 = vpow2.f32 %v2449_v9  ;;  %v1209_v13 = vsel %vm1208_vm2, %v2653_v51, %v1205_v10  ;;  %v1217_v19 = vmul.f32 %v2657_v25, %v3015_v52  ;;  %vm1222_vm5 = vweird.f32 %v2657_v25 }
 0x171   : > { %2660 = vrcp.f32 %v3030_v26  ;;  %2503 = vmatmul.msk.bf16.gmra.mxu3 %vm1621_vm4, %v1905_v11  ;;  %v1214_v20 = vsel %vm1211_vm3, %v1213_v12, %v1209_v13  ;;  %vm1223_vm6 = vmor %vm1221_vm1, %vm1222_vm5  ;;  %v1242_v40 = vand.u32 2147483648, %v3030_v26  ;;  %v1240_v49 = vand.u32 2147483647, %v3030_v26 }
 0x172   : > { %1499 = vperm.xlu1 %2555, %v1214_v20   ;;  %v1218_v14 = vsub.f32 1.0, %v1217_v19  ;;  %v1603_v52 = vpack.c.bf16 %v1368_v43, %v1367_v38  ;;  %vm1236_vm9 = vweird.f32 %v3030_v26  ;;  %v1586_v10 = vpack.c.bf16 %v3076_v6, %v3073_v5 }
 0x173   : > { %v728_v15 = vpop.f32.mrf.mxu0  ;;  %v1243_v56 = vor.u32 1.1754944e-38, %v1242_v40  ;;  %vm1241_vm11 = vcmp.eq.f32.partialorder %v1240_v49, 8.507059e+37  ;;  %v1369_v12 = vmul.f32 %v2864_v28, %v3073_v5 }
 0x174   : > { %v729_v18 = vadd.f32 %v2976_v59, %v728_v15  ;;  %v1219_v21 = vmul.f32 %v2657_v25, %v1218_v14  ;;  %2466 = vmatmul.msk.bf16.gmra.mxu1 %vm1621_vm4, %v1603_v52  ;;  %v1445_v15 = vpop.permute.xlu2 %1444 }
 0x176   : > { %v2659_v27 = vpop.eup %2658  ;;  %v2450_v29 = vmul.f32 -1.442695, %v729_v18  ;;  %v1220_v30 = vadd.f32 %v2657_v25, %v1219_v21  ;;  %v1370_v18 = vmul.f32 %v2864_v28, %v3076_v6 }
 0x177   : > { %v2661_v32 = vpop.eup %2660  ;;  %v3048_v33 = vadd.f32 1.0, %v2659_v27 }
 0x178   : > { %2662 = vpow2.f32 %v2450_v29  ;;  %v1224_v34 = vsel %vm1223_vm6, %v2657_v25, %v1220_v30  ;;  %v1232_v35 = vmul.f32 %v2661_v32, %v3030_v26  ;;  %vm1237_vm8 = vweird.f32 %v2661_v32 }
 0x179   : > { %2664 = vrcp.f32 %v3048_v33  ;;  %v1229_v36 = vsel %vm1226_vm7, %v1228_v42, %v1224_v34  ;;  %vm1238_vm10 = vmor %vm1236_vm9, %vm1237_vm8  ;;  %v1257_v61 = vand.u32 2147483648, %v3048_v33  ;;  %v1255_v4 = vand.u32 2147483647, %v3048_v33 }
 0x17a   : > { %1504 = vperm.xlu2 %2556, %v1229_v36   ;;  %v1233_v37 = vsub.f32 1.0, %v1232_v35  ;;  %vm1251_vm13 = vweird.f32 %v3048_v33 }
 0x17b   : > { %v730_v39 = vpop.f32.mrf.mxu0  ;;  %v1258_v11 = vor.u32 1.1754944e-38, %v1257_v61  ;;  %vm1256_vm15 = vcmp.eq.f32.partialorder %v1255_v4, 8.507059e+37 }
 0x17c   : > { %v731_v44 = vadd.f32 %v2976_v59, %v730_v39  ;;  %v1435_v47 = vpop.permute.xlu0 %1434  ;;  %v1234_v48 = vmul.f32 %v2661_v32, %v1233_v37  ;;  %2487 = vmatmul.msk.bf16.gmra.mxu2 %vm1621_vm4, %v1586_v10 }
 0x17d   : > { %v1556_v51 = vmul.f32 %v1435_v47, %v2984_v2 }
 0x17e   : > { %v2663_v53 = vpop.eup %2662  ;;  %v2451_v17 = vmul.f32 -1.442695, %v731_v44  ;;  %v1235_v54 = vadd.f32 %v2661_v32, %v1234_v48 }
 0x17f   : > { %v2665_v0 = vpop.eup %2664  ;;  %v3063_v1 = vadd.f32 1.0, %v2663_v53  ;;  %v1906_v55 = vpack.c.bf16 %v1556_v51, %v1555_v50  ;;  %v3100_v50 = vld [vmem:[%s2851_s18 + $0x80] sm:$0xff]  ;;  %v3103_v51 = vld [vmem:[%s2851_s18 + $0x88] sm:$0xff] }
 0x180   : > { %2666 = vpow2.f32 %v2451_v17  ;;  %v1239_v63 = vsel %vm1238_vm10, %v2661_v32, %v1235_v54  ;;  %v1247_v2 = vmul.f32 %v2665_v0, %v3048_v33  ;;  %vm1252_vm12 = vweird.f32 %v2665_v0 }
 0x181   : > { %2668 = vrcp.f32 %v3063_v1  ;;  %2504 = vmatmul.msk.bf16.gmra.mxu3 %vm1621_vm4, %v1906_v55  ;;  %v1244_v57 = vsel %vm1241_vm11, %v1243_v56, %v1239_v63  ;;  %vm1253_vm14 = vmor %vm1251_vm13, %vm1252_vm12  ;;  %v1270_v27 = vand.u32 2147483647, %v3063_v1  ;;  %v1272_v29 = vand.u32 2147483648, %v3063_v1 }
 0x182   : > { %1509 = vperm.xlu0 %2554, %v1244_v57   ;;  %v1248_v58 = vsub.f32 1.0, %v1247_v2  ;;  %v1604_v32 = vpack.c.bf16 %v1370_v18, %v1369_v12  ;;  %v1558_v33 = vmul.f32 %v1445_v15, %v3008_v45  ;;  %vm1266_vm2 = vweird.f32 %v3063_v1 }
 0x183   : > { %v733_v60 = vpop.f32.mrf.mxu0  ;;  %v1273_v37 = vor.u32 1.1754944e-38, %v1272_v29  ;;  %vm1271_vm5 = vcmp.eq.f32.partialorder %v1270_v27, 8.507059e+37  ;;  %v1587_v54 = vpack.c.bf16 %v3103_v51, %v3100_v50  ;;  %v1372_v56 = vmul.f32 %v2864_v28, %v3103_v51 }
 0x184   : > { %v734_v62 = vadd.f32 %v2976_v59, %v733_v60  ;;  %v1249_v3 = vmul.f32 %v2665_v0, %v1248_v58  ;;  %v1440_v13 = vpop.permute.xlu1 %1439  ;;  %2467 = vmatmul.msk.bf16.gmra.mxu1 %vm1621_vm4, %v1604_v32  ;;  %v1371_v57 = vmul.f32 %v2864_v28, %v3100_v50  ;;  %v3121_v28 = vpop.f32.mrf.mxu2  ;;  %v3139_v32 = vld [vmem:[%s2851_s18 + $0x98] sm:$0xff] }
 0x185   : > { %v1557_v21 = vmul.f32 %v1440_v13, %v3011_v46 }
 0x186   : > { %v2667_v7 = vpop.eup %2666  ;;  %v2452_v8 = vmul.f32 -1.442695, %v734_v62  ;;  %v1250_v9 = vadd.f32 %v2665_v0, %v1249_v3 }
 0x187   : > { %v2669_v25 = vpop.eup %2668  ;;  %v866_v26 = vadd.f32 1.0, %v2667_v7  ;;  %v1907_v46 = vpack.c.bf16 %v1558_v33, %v1557_v21  ;;  %v3118_v7 = vpop.f32.mrf.mxu1 }
 0x188   : > { %2670 = vpow2.f32 %v2452_v8  ;;  %v1254_v19 = vsel %vm1253_vm14, %v2665_v0, %v1250_v9  ;;  %v1262_v20 = vmul.f32 %v2669_v25, %v3063_v1  ;;  %vm1267_vm0 = vweird.f32 %v2669_v25 }
 0x189   : > { %2672 = vrcp.f32 %v866_v26  ;;  %v1259_v14 = vsel %vm1256_vm15, %v1258_v11, %v1254_v19  ;;  %vm1268_vm3 = vmor %vm1266_vm2, %vm1267_vm0  ;;  %v1285_v44 = vand.u32 2147483647, %v866_v26  ;;  %v1287_v47 = vand.u32 2147483648, %v866_v26 }
 0x18a   : > { %1514 = vperm.xlu1 %2555, %v1259_v14   ;;  %v1263_v16 = vsub.f32 1.0, %v1262_v20  ;;  %vm1281_vm6 = vweird.f32 %v866_v26 }
 0x18b   : > { %v735_v22 = vpop.f32.mrf.mxu0  ;;  %vm1286_vm8 = vcmp.eq.f32.partialorder %v1285_v44, 8.507059e+37  ;;  %v1288_v55 = vor.u32 1.1754944e-38, %v1287_v47 }
 0x18c   : > { %v736_v30 = vadd.f32 %v2976_v59, %v735_v22  ;;  %v1264_v31 = vmul.f32 %v2669_v25, %v1263_v16  ;;  %2488 = vmatmul.msk.bf16.gmra.mxu2 %vm1621_vm4, %v1587_v54 }
 0x18e   : > { %v2671_v42 = vpop.eup %2670  ;;  %v2453_v34 = vmul.f32 -1.442695, %v736_v30  ;;  %v1265_v35 = vadd.f32 %v2669_v25, %v1264_v31  ;;  %v3133_v30 = vpop.f32.mrf.mxu2  ;;  %v3136_v31 = vld [vmem:[%s2851_s18 + $0x90] sm:$0xff] }
 0x18f   : > { %v2673_v36 = vpop.eup %2672  ;;  %v3093_v41 = vadd.f32 1.0, %v2671_v42  ;;  %v3130_v22 = vpop.f32.mrf.mxu1 }
 0x190   : > { %2674 = vpow2.f32 %v2453_v34  ;;  %v1269_v38 = vsel %vm1268_vm3, %v2669_v25, %v1265_v35  ;;  %v1277_v39 = vmul.f32 %v2673_v36, %v866_v26  ;;  %vm1282_vm1 = vweird.f32 %v2673_v36 }
 0x191   : > { %2676 = vrcp.f32 %v3093_v41  ;;  %2505 = vmatmul.msk.bf16.gmra.mxu3 %vm1621_vm4, %v1907_v46  ;;  %v1274_v45 = vsel %vm1271_vm5, %v1273_v37, %v1269_v38  ;;  %vm1283_vm7 = vmor %vm1281_vm6, %vm1282_vm1  ;;  %v1300_v3 = vand.u32 2147483647, %v3093_v41  ;;  %v1302_v4 = vand.u32 2147483648, %v3093_v41  ;;  %v3145_v38 = vld [vmem:[%s2774_s20] ss:$0 sm:$0xff] }
 0x192   : > { %1519 = vperm.xlu2 %2556, %v1274_v45   ;;  %v1278_v40 = vsub.f32 1.0, %v1277_v39  ;;  %v1605_v25 = vpack.c.bf16 %v1372_v56, %v1371_v57  ;;  %vm1296_vm10 = vweird.f32 %v3093_v41  ;;  %v1588_v34 = vpack.c.bf16 %v3139_v32, %v3136_v31 }
 0x193   : > { %v738_v43 = vpop.f32.mrf.mxu0  ;;  %vm1301_vm12 = vcmp.eq.f32.partialorder %v1300_v3, 8.507059e+37  ;;  %v1373_v39 = vmul.f32 %v3145_v38, %v3136_v31  ;;  %v1374_v44 = vmul.f32 %v3145_v38, %v3139_v32 }
 0x194   : > { %v739_v48 = vadd.f32 %v2976_v59, %v738_v43  ;;  %v1279_v49 = vmul.f32 %v2673_v36, %v1278_v40  ;;  %v1450_v60 = vpop.permute.xlu0 %1449  ;;  %2468 = vmatmul.msk.bf16.gmra.mxu1 %vm1621_vm4, %v1605_v25  ;;  %v1460_v40 = vpop.permute.xlu2 %1459 }
 0x195   : > { %v1559_v26 = vmul.f32 %v1450_v60, %v3040_v23  ;;  %v1561_v54 = vmul.f32 %v1460_v40, %v3073_v5 }
 0x196   : > { %v2675_v52 = vpop.eup %2674  ;;  %v2454_v53 = vmul.f32 -1.442695, %v739_v48  ;;  %v1280_v17 = vadd.f32 %v2673_v36, %v1279_v49 }
 0x197   : > { %v2677_v0 = vpop.eup %2676  ;;  %v3107_v1 = vadd.f32 1.0, %v2675_v52 }
 0x198   : > { %2678 = vpow2.f32 %v2454_v53  ;;  %v1284_v63 = vsel %vm1283_vm7, %v2673_v36, %v1280_v17  ;;  %v1292_v2 = vmul.f32 %v2677_v0, %v3093_v41  ;;  %vm1297_vm9 = vweird.f32 %v2677_v0 }
 0x199   : > { %2680 = vrcp.f32 %v3107_v1  ;;  %v1289_v58 = vsel %vm1286_vm8, %v1288_v55, %v1284_v63  ;;  %vm1298_vm11 = vmor %vm1296_vm10, %vm1297_vm9  ;;  %v1317_v21 = vand.u32 2147483648, %v3107_v1  ;;  %v1315_v29 = vand.u32 2147483647, %v3107_v1  ;;  %v3152_v53 = vpop.f32.mrf.mxu1 }
 0x19a   : > { %1524 = vperm.xlu0 %2554, %v1289_v58   ;;  %v1293_v61 = vsub.f32 1.0, %v1292_v2  ;;  %vm1311_vm14 = vweird.f32 %v3107_v1  ;;  %v1606_v17 = vpack.c.bf16 %v1374_v44, %v1373_v39  ;;  %v1825_v39 = vadd.f32 %v3133_v30, %v3130_v22 }
 0x19b   : > { %v740_v62 = vpop.f32.mrf.mxu0  ;;  %v1318_v41 = vor.u32 1.1754944e-38, %v1317_v21  ;;  %vm1316_vm0 = vcmp.eq.f32.partialorder %v1315_v29, 8.507059e+37  ;;  %v1823_v21 = vadd.f32 %v3121_v28, %v3118_v7 }
 0x19c   : > { %v741_v8 = vadd.f32 %v2976_v59, %v740_v62  ;;  %v1455_v9 = vpop.permute.xlu1 %1454  ;;  %v1294_v10 = vmul.f32 %v2677_v0, %v1293_v61  ;;  %v1303_v59 = vor.u32 1.1754944e-38, %v1302_v4  ;;  %2489 = vmatmul.msk.bf16.gmra.mxu2 %vm1621_vm4, %v1588_v34  ;;  %v3163_v4 = vld [vmem:[%s2851_s18 + $0xa0] sm:$0xff] }
 0x19d   : > { %v1560_v11 = vmul.f32 %v1455_v9, %v3043_v24  ;;  %v3168_v9 = vld [vmem:[%s2851_s18 + $0xa8] sm:$0xff] }
 0x19e   : > { %v2679_v12 = vpop.eup %2678  ;;  %v2455_v13 = vmul.f32 -1.442695, %v741_v8  ;;  %v1295_v19 = vadd.f32 %v2677_v0, %v1294_v10  ;;  %v1589_v25 = vpack.c.bf16 %v3168_v9, %v3163_v4 }
 0x19f   : > { %v2681_v20 = vpop.eup %2680  ;;  %v869_v14 = vadd.f32 1.0, %v2679_v12  ;;  %v1908_v15 = vpack.c.bf16 %v1560_v11, %v1559_v26 }
 0x1a0   : > { %2682 = vpow2.f32 %v2455_v13  ;;  %v1299_v16 = vsel %vm1298_vm11, %v2677_v0, %v1295_v19  ;;  %v1307_v23 = vmul.f32 %v2681_v20, %v3107_v1  ;;  %vm1312_vm13 = vweird.f32 %v2681_v20  ;;  %v3156_v1 = vpop.f32.mrf.mxu2 }
 0x1a1   : > { %2684 = vrcp.f32 %v869_v14  ;;  %2506 = vmatmul.msk.bf16.gmra.mxu3 %vm1621_vm4, %v1908_v15  ;;  %v1304_v24 = vsel %vm1301_vm12, %v1303_v59, %v1299_v16  ;;  %vm1313_vm15 = vmor %vm1311_vm14, %vm1312_vm13  ;;  %v1332_v47 = vand.u32 2147483648, %v869_v14  ;;  %v1330_v52 = vand.u32 2147483647, %v869_v14  ;;  %v3160_v3 = vpop.f32.mrf.mxu1 }
 0x1a2   : > { %1529 = vperm.xlu1 %2555, %v1304_v24   ;;  %v1308_v18 = vsub.f32 1.0, %v1307_v23  ;;  %vm1326_vm3 = vweird.f32 %v869_v14  ;;  %v1375_v13 = vmul.f32 %v3145_v38, %v3163_v4 }
 0x1a3   : > { %v1333_v2 = vor.u32 1.1754944e-38, %v1332_v47  ;;  %vm1331_vm1 = vcmp.eq.f32.partialorder %v1330_v52, 8.507059e+37 }
 0x1a4   : > { %v1309_v27 = vmul.f32 %v2681_v20, %v1308_v18  ;;  %2469 = vmatmul.msk.bf16.gmra.mxu1 %vm1621_vm4, %v1606_v17  ;;  %v2132_v17 = vld [vmem:[%s3191_s25 + $0x8] sm:$0xff] }
 0x1a6   : > { %v2683_v33 = vpop.eup %2682  ;;  %v1310_v42 = vadd.f32 %v2681_v20, %v1309_v27  ;;  %v3199_v27 = vld [vmem:[%s2851_s18 + $0xb0] sm:$0xff] }
 0x1a7   : > { %v2685_v35 = vpop.eup %2684  ;;  %v870_v36 = vadd.f32 1.0, %v2683_v33  ;;  %v3202_v33 = vld [vmem:[%s2851_s18 + $0xb8] sm:$0xff] }
 0x1a8   : > { %v1314_v46 = vsel %vm1313_vm15, %v2681_v20, %v1310_v42  ;;  %v1322_v37 = vmul.f32 %v2685_v35, %v869_v14  ;;  %vm1327_vm2 = vweird.f32 %v2685_v35  ;;  %v3165_v8 = vpop.f32.mrf.mxu2  ;;  %v1475_v20 = vpop.permute.xlu2 %1474  ;;  %v1376_v14 = vmul.f32 %v3145_v38, %v3168_v9  ;;  %v2131_v42 = vld [vmem:[%s3191_s25] sm:$0xff] }
 0x1a9   : > { %2686 = vrcp.f32 %v870_v36  ;;  %v1319_v45 = vsel %vm1316_vm0, %v1318_v41, %v1314_v46  ;;  %vm1328_vm5 = vmor %vm1326_vm3, %vm1327_vm2  ;;  %v1347_v60 = vand.u32 2147483648, %v870_v36  ;;  %v1345_v62 = vand.u32 2147483647, %v870_v36 }
 0x1aa   : > { %1534 = vperm.xlu2 %2556, %v1319_v45   ;;  %v1323_v43 = vsub.f32 1.0, %v1322_v37  ;;  %vm1341_vm7 = vweird.f32 %v870_v36  ;;  %v1607_v16 = vpack.c.bf16 %v1376_v14, %v1375_v13  ;;  %v1564_v23 = vmul.f32 %v1475_v20, %v3103_v51  ;;  %v2134_v20 = vld [vmem:[%s3191_s25 + $0x18] sm:$0xff] }
 0x1ab   : > { %v1348_v26 = vor.u32 1.1754944e-38, %v1347_v60  ;;  %vm1346_vm9 = vcmp.eq.f32.partialorder %v1345_v62, 8.507059e+37  ;;  %v3178_v59 = vpop.f32.mrf.mxu1  ;;  %v1590_v34 = vpack.c.bf16 %v3202_v33, %v3199_v27  ;;  %v1377_v41 = vmul.f32 %v3145_v38, %v3199_v27 }
 0x1ac   : > { %v1465_v48 = vpop.permute.xlu0 %1464  ;;  %v1324_v49 = vmul.f32 %v2685_v35, %v1323_v43  ;;  %2490 = vmatmul.msk.bf16.gmra.mxu2 %vm1621_vm4, %v1589_v25 }
 0x1ad   : > { %v1562_v0 = vmul.f32 %v1465_v48, %v3076_v6 }
 0x1ae   : > { %v1325_v55 = vadd.f32 %v2685_v35, %v1324_v49 }
 0x1af   : > { %v2687_v56 = vpop.eup %2686  ;;  %v1909_v63 = vpack.c.bf16 %v1562_v0, %v1561_v54  ;;  %v1828_v54 = vadd.f32 %v3156_v1, %v3152_v53 }
 0x1b0   : > { %v1329_v57 = vsel %vm1328_vm5, %v2685_v35, %v1325_v55  ;;  %v1337_v58 = vmul.f32 %v2687_v56, %v870_v36  ;;  %vm1342_vm6 = vweird.f32 %v2687_v56  ;;  %v3181_v24 = vpop.f32.mrf.mxu2  ;;  %v1378_v36 = vmul.f32 %v3145_v38, %v3202_v33  ;;  %v3245_v55 = vld [vmem:[%s2851_s18 + $0xc8] sm:$0xff] }
 0x1b1   : > { %2507 = vmatmul.msk.bf16.gmra.mxu3 %vm1621_vm4, %v1909_v63  ;;  %v1334_v5 = vsel %vm1331_vm1, %v1333_v2, %v1329_v57  ;;  %vm1343_vm8 = vmor %vm1341_vm7, %vm1342_vm6  ;;  %v2133_v57 = vld [vmem:[%s3191_s25 + $0x10] sm:$0xff]  ;;  %v1833_v14 = vadd.f32 %v3181_v24, %v3178_v59  ;;  %v2135_v59 = vld [vmem:[%s3191_s25 + $0x20] sm:$0xff] }
 0x1b2   : > { %1539 = vperm.xlu0 %2554, %v1334_v5   ;;  %v1338_v6 = vsub.f32 1.0, %v1337_v58  ;;  %v1608_v43 = vpack.c.bf16 %v1378_v36, %v1377_v41  ;;  %v1380_v5 = vmul.f32 %v3145_v38, %v3245_v55 }
 0x1b3   : > { %v3204_v7 = vpop.f32.mrf.mxu1 }
 0x1b4   : > { %v1339_v61 = vmul.f32 %v2687_v56, %v1338_v6  ;;  %v1470_v11 = vpop.permute.xlu1 %1469  ;;  %2470 = vmatmul.msk.bf16.gmra.mxu1 %vm1621_vm4, %v1607_v16 }
 0x1b5   : > { %v1563_v15 = vmul.f32 %v1470_v11, %v3100_v50  ;;  %v3196_v50 = vld [vmem:[%s3484_s8] ss:$0 sm:$0xff] }
 0x1b6   : > { %v1340_v10 = vadd.f32 %v2687_v56, %v1339_v61  ;;  %v1830_v61 = vadd.f32 %v3165_v8, %v3160_v3 }
 0x1b7   : > { %v1910_v18 = vpack.c.bf16 %v1564_v23, %v1563_v15 }
 0x1b8   : > { %v1344_v12 = vsel %vm1343_vm8, %v2687_v56, %v1340_v10  ;;  %v3206_v28 = vpop.f32.mrf.mxu2 }
 0x1b9   : > { %v1349_v19 = vsel %vm1346_vm9, %v1348_v26, %v1344_v12  ;;  %v1835_v41 = vadd.f32 %v3206_v28, %v3204_v7 }
 0x1ba   : > { %1544 = vperm.xlu1 %2555, %v1349_v19  }
 0x1bc   : > { %2491 = vmatmul.msk.bf16.gmra.mxu2 %vm1621_vm4, %v1590_v34  ;;  %v1490_v60 = vpop.permute.xlu2 %1489 }
 0x1bd   : > { %v1567_v26 = vmul.f32 %v1490_v60, %v3163_v4  ;;  %v3277_v4 = vld [vmem:[%s2851_s18 + $0xd8] sm:$0xff] }
 0x1c0   : > { %v3231_v52 = vpop.f32.mrf.mxu2 }
 0x1c1   : > { %2508 = vmatmul.msk.bf16.gmra.mxu3 %vm1621_vm4, %v1910_v18  ;;  %v3229_v49 = vpop.f32.mrf.mxu1 }
 0x1c4   : > { %v1983_v51 = vpop.f32.mrf.mxu3  ;;  %v1480_v37 = vpop.permute.xlu0 %1479  ;;  %2471 = vmatmul.msk.bf16.gmra.mxu1 %vm1621_vm4, %v1608_v43 }
 0x1c5   : > { %v2063_v29 = vadd.f32 %v1983_v51, %v1823_v21  ;;  %v1565_v44 = vmul.f32 %v1480_v37, %v3136_v31 }
 0x1c7   : > { %v2099_v35 = vadd.f32 %v3196_v50, %v2063_v29 }
 0x1c8   : > { %v3249_v2 = vpop.f32.mrf.mxu2 }
 0x1c9   : > { %v2163_v46 = vadd.f32 %v2131_v42, %v2099_v35  ;;  %v3247_v63 = vpop.f32.mrf.mxu1  ;;  %v1382_v42 = vmul.f32 %v3145_v38, %v3277_v4 }
 0x1cb   : > { %2195 = vst.msk [vmem:[%s3216_s30] sm:$0xff] %vm1621_vm4, %v2163_v46 }
 0x1cc   : > { %v1485_v45 = vpop.permute.xlu1 %1484  ;;  %v1985_v40 = vpop.f32.mrf.mxu3 }
 0x1cd   : > { %v1566_v47 = vmul.f32 %v1485_v45, %v3139_v32  ;;  %v2064_v48 = vadd.f32 %v1985_v40, %v1825_v39  ;;  %v3242_v32 = vld [vmem:[%s2851_s18 + $0xc0] sm:$0xff] }
 0x1ce   : > { %v1591_v53 = vpack.c.bf16 %v3245_v55, %v3242_v32  ;;  %v1379_v58 = vmul.f32 %v3145_v38, %v3242_v32 }
 0x1cf   : > { %v1911_v22 = vpack.c.bf16 %v1566_v47, %v1565_v44  ;;  %v2100_v30 = vadd.f32 %v3196_v50, %v2064_v48  ;;  %v2136_v47 = vld [vmem:[%s3191_s25 + $0x28] sm:$0xff] }
 0x1d0   : > { %2492 = vmatmul.msk.bf16.gmra.mxu2 %vm1621_vm4, %v1591_v53  ;;  %v1609_v62 = vpack.c.bf16 %v1380_v5, %v1379_v58  ;;  %v3268_v19 = vpop.f32.mrf.mxu2  ;;  %v1840_v58 = vadd.f32 %v3249_v2, %v3247_v63 }
 0x1d1   : > { %v2164_v0 = vadd.f32 %v2132_v17, %v2100_v30  ;;  %2509 = vmatmul.msk.bf16.gmra.mxu3 %vm1621_vm4, %v1911_v22  ;;  %v3266_v13 = vpop.f32.mrf.mxu1  ;;  %v3316_v17 = vld [vmem:[%s2851_s18 + $0xe8] sm:$0xff]  ;;  %v3319_v22 = vld [vmem:[%s2851_s18 + $0xe0] sm:$0xff] }
 0x1d2   : > { %v1843_v2 = vadd.f32 %v3268_v19, %v3266_v13 }
 0x1d3   : > { %2196 = vst.msk [vmem:[%s3216_s30 + $0x8] sm:$0xff] %vm1621_vm4, %v2164_v0 }
 0x1d4   : > { %v1988_v31 = vpop.f32.mrf.mxu3  ;;  %2472 = vmatmul.msk.bf16.gmra.mxu1 %vm1621_vm4, %v1609_v62  ;;  %v1505_v36 = vpop.permute.xlu2 %1504 }
 0x1d5   : > { %v2065_v56 = vadd.f32 %v1988_v31, %v1828_v54  ;;  %v1570_v45 = vmul.f32 %v1505_v36, %v3202_v33  ;;  %v1593_v31 = vpack.c.bf16 %v3316_v17, %v3319_v22 }
 0x1d7   : > { %v2101_v1 = vadd.f32 %v3196_v50, %v2065_v56  ;;  %v1384_v56 = vmul.f32 %v3145_v38, %v3316_v17 }
 0x1d8   : > { %v3288_v51 = vpop.f32.mrf.mxu2 }
 0x1d9   : > { %v2165_v6 = vadd.f32 %v2133_v57, %v2101_v1  ;;  %v3286_v21 = vpop.f32.mrf.mxu1  ;;  %v1383_v57 = vmul.f32 %v3145_v38, %v3319_v22 }
 0x1db   : > { %2197 = vst.msk [vmem:[%s3216_s30 + $0x10] sm:$0xff] %vm1621_vm4, %v2165_v6  ;;  %v1611_v5 = vpack.c.bf16 %v1384_v56, %v1383_v57  ;;  %v2142_v56 = vld [vmem:[%s3191_s25 + $0x58] sm:$0xff] }
 0x1dc   : > { %v1495_v10 = vpop.permute.xlu0 %1494  ;;  %v1990_v25 = vpop.f32.mrf.mxu3 }
 0x1dd   : > { %v1568_v11 = vmul.f32 %v1495_v10, %v3168_v9  ;;  %v2066_v12 = vadd.f32 %v1990_v25, %v1830_v61  ;;  %v3282_v9 = vld [vmem:[%s2851_s18 + $0xd0] sm:$0xff] }
 0x1de   : > { %v1592_v23 = vpack.c.bf16 %v3277_v4, %v3282_v9  ;;  %v1381_v29 = vmul.f32 %v3145_v38, %v3282_v9 }
 0x1df   : > { %v1912_v3 = vpack.c.bf16 %v1568_v11, %v1567_v26  ;;  %v2102_v8 = vadd.f32 %v3196_v50, %v2066_v12  ;;  %v2138_v11 = vld [vmem:[%s3191_s25 + $0x38] sm:$0xff] }
 0x1e0   : > { %2493 = vmatmul.msk.bf16.gmra.mxu2 %vm1621_vm4, %v1592_v23  ;;  %v1610_v37 = vpack.c.bf16 %v1382_v42, %v1381_v29  ;;  %v3305_v44 = vpop.f32.mrf.mxu2  ;;  %v1845_v29 = vadd.f32 %v3288_v51, %v3286_v21 }
 0x1e1   : > { %v2166_v15 = vadd.f32 %v2134_v20, %v2102_v8  ;;  %2510 = vmatmul.msk.bf16.gmra.mxu3 %vm1621_vm4, %v1912_v3  ;;  %v3303_v43 = vpop.f32.mrf.mxu1  ;;  %v3352_v3 = vld [vmem:[%s2851_s18 + $0xf8] sm:$0xff] }
 0x1e2   : > { %v1848_v21 = vadd.f32 %v3305_v44, %v3303_v43 }
 0x1e3   : > { %2198 = vst.msk [vmem:[%s3216_s30 + $0x18] sm:$0xff] %vm1621_vm4, %v2166_v15 }
 0x1e4   : > { %v1993_v16 = vpop.f32.mrf.mxu3  ;;  %v1500_v34 = vpop.permute.xlu1 %1499  ;;  %2473 = vmatmul.msk.bf16.gmra.mxu1 %vm1621_vm4, %v1610_v37 }
 0x1e5   : > { %v2067_v18 = vadd.f32 %v1993_v16, %v1833_v14  ;;  %v1569_v46 = vmul.f32 %v1500_v34, %v3199_v27  ;;  %v1838_v27 = vadd.f32 %v3231_v52, %v3229_v49  ;;  %v2137_v49 = vld [vmem:[%s3191_s25 + $0x30] sm:$0xff]  ;;  %v2139_v16 = vld [vmem:[%s3191_s25 + $0x40] sm:$0xff] }
 0x1e7   : > { %v2103_v24 = vadd.f32 %v3196_v50, %v2067_v18  ;;  %v1913_v48 = vpack.c.bf16 %v1570_v45, %v1569_v46  ;;  %v1386_v18 = vmul.f32 %v3145_v38, %v3352_v3 }
 0x1e8   : > { %v3323_v0 = vpop.f32.mrf.mxu2 }
 0x1e9   : > { %v2167_v35 = vadd.f32 %v2135_v59, %v2103_v24  ;;  %v3321_v54 = vpop.f32.mrf.mxu1 }
 0x1ea   : > { %v1850_v43 = vadd.f32 %v3323_v0, %v3321_v54 }
 0x1eb   : > { %2199 = vst.msk [vmem:[%s3216_s30 + $0x20] sm:$0xff] %vm1621_vm4, %v2167_v35 }
 0x1ec   : > { %v1995_v39 = vpop.f32.mrf.mxu3  ;;  %v1520_v24 = vpop.permute.xlu2 %1519 }
 0x1ed   : > { %v2068_v40 = vadd.f32 %v1995_v39, %v1835_v41  ;;  %v1573_v36 = vmul.f32 %v1520_v24, %v3282_v9  ;;  %v2140_v39 = vld [vmem:[%s3191_s25 + $0x48] sm:$0xff] }
 0x1ef   : > { %v2104_v7 = vadd.f32 %v3196_v50, %v2068_v40 }
 0x1f0   : > { %2494 = vmatmul.msk.bf16.gmra.mxu2 %vm1621_vm4, %v1593_v31  ;;  %v1852_v26 = vpop.f32.mrf.mxu2 }
 0x1f1   : > { %v2168_v28 = vadd.f32 %v2136_v47, %v2104_v7  ;;  %2511 = vmatmul.msk.bf16.gmra.mxu3 %vm1621_vm4, %v1913_v48  ;;  %v1709_v25 = vpop.f32.mrf.mxu1  ;;  %v2141_v47 = vld [vmem:[%s3191_s25 + $0x50] sm:$0xff] }
 0x1f3   : > { %2200 = vst.msk [vmem:[%s3216_s30 + $0x28] sm:$0xff] %vm1621_vm4, %v2168_v28 }
 0x1f4   : > { %v1998_v33 = vpop.f32.mrf.mxu3  ;;  %v1510_v1 = vpop.permute.xlu0 %1509  ;;  %2474 = vmatmul.msk.bf16.gmra.mxu1 %vm1621_vm4, %v1611_v5 }
 0x1f5   : > { %v2069_v30 = vadd.f32 %v1998_v33, %v1838_v27  ;;  %v1571_v61 = vmul.f32 %v1510_v1, %v3242_v32  ;;  %v1853_v1 = vadd.f32 %v1852_v26, %v1709_v25 }
 0x1f7   : > { %v2105_v52 = vadd.f32 %v3196_v50, %v2069_v30 }
 0x1f8   : > { %v1854_v15 = vpop.f32.mrf.mxu2 }
 0x1f9   : > { %v2169_v53 = vadd.f32 %v2137_v49, %v2105_v52  ;;  %v1711_v14 = vpop.f32.mrf.mxu1 }
 0x1fb   : > { %2201 = vst.msk [vmem:[%s3216_s30 + $0x30] sm:$0xff] %vm1621_vm4, %v2169_v53 }
 0x1fc   : > { %v1515_v6 = vpop.permute.xlu1 %1514  ;;  %v2000_v60 = vpop.f32.mrf.mxu3 }
 0x1fd   : > { %v1572_v62 = vmul.f32 %v1515_v6, %v3245_v55  ;;  %v2070_v10 = vadd.f32 %v2000_v60, %v1840_v58  ;;  %v3349_v55 = vld [vmem:[%s2851_s18 + $0xf0] sm:$0xff]  ;;  %v2143_v6 = vld [vmem:[%s3191_s25 + $0x60] sm:$0xff] }
 0x1fe   : > { %v1594_v23 = vpack.c.bf16 %v3352_v3, %v3349_v55  ;;  %v1385_v19 = vmul.f32 %v3145_v38, %v3349_v55 }
 0x1ff   : > { %v1914_v12 = vpack.c.bf16 %v1572_v62, %v1571_v61  ;;  %v2106_v63 = vadd.f32 %v3196_v50, %v2070_v10  ;;  %v1855_v62 = vadd.f32 %v1854_v15, %v1711_v14 }
 0x200   : > { %2495 = vmatmul.msk.bf16.gmra.mxu2 %vm1621_vm4, %v1594_v23  ;;  %v1612_v42 = vpack.c.bf16 %v1386_v18, %v1385_v19  ;;  %v1857_v37 = vpop.f32.mrf.mxu2 }
 0x201   : > { %v2170_v20 = vadd.f32 %v2138_v11, %v2106_v63  ;;  %2512 = vmatmul.msk.bf16.gmra.mxu3 %vm1621_vm4, %v1914_v12  ;;  %v1714_v38 = vpop.f32.mrf.mxu1 }
 0x203   : > { %2202 = vst.msk [vmem:[%s3216_s30 + $0x38] sm:$0xff] %vm1621_vm4, %v2170_v20  ;;  %v2144_v20 = vld [vmem:[%s3191_s25 + $0x68] sm:$0xff] }
 0x204   : > { %v2003_v32 = vpop.f32.mrf.mxu3  ;;  %2475 = vmatmul.msk.bf16.gmra.mxu1 %vm1621_vm4, %v1612_v42  ;;  %v1535_v30 = vpop.permute.xlu2 %1534  ;;  %v2146_v42 = vld [vmem:[%s3191_s25 + $0x78] sm:$0xff] }
 0x205   : > { %v2071_v8 = vadd.f32 %v2003_v32, %v1843_v2  ;;  %v1576_v49 = vmul.f32 %v1535_v30, %v3316_v17 }
 0x207   : > { %v2107_v13 = vadd.f32 %v3196_v50, %v2071_v8 }
 0x208   : > { %v1859_v27 = vpop.f32.mrf.mxu2 }
 0x209   : > { %v2171_v59 = vadd.f32 %v2139_v16, %v2107_v13  ;;  %v1716_v7 = vpop.f32.mrf.mxu1  ;;  %v1858_v16 = vadd.f32 %v1857_v37, %v1714_v38 }
 0x20b   : > { %2203 = vst.msk [vmem:[%s3216_s30 + $0x40] sm:$0xff] %vm1621_vm4, %v2171_v59  ;;  %v1860_v59 = vadd.f32 %v1859_v27, %v1716_v7 }
 0x20c   : > { %v1525_v34 = vpop.permute.xlu0 %1524  ;;  %v2005_v35 = vpop.f32.mrf.mxu3 }
 0x20d   : > { %v1574_v41 = vmul.f32 %v1525_v34, %v3277_v4  ;;  %v2072_v46 = vadd.f32 %v2005_v35, %v1845_v29 }
 0x20f   : > { %v1915_v45 = vpack.c.bf16 %v1574_v41, %v1573_v36  ;;  %v2108_v40 = vadd.f32 %v3196_v50, %v2072_v46 }
 0x210   : > { %v1862_v54 = vpop.f32.mrf.mxu2 }
 0x211   : > { %v2172_v51 = vadd.f32 %v2140_v39, %v2108_v40  ;;  %2513 = vmatmul.msk.bf16.gmra.mxu3 %vm1621_vm4, %v1915_v45  ;;  %v1719_v5 = vpop.f32.mrf.mxu1  ;;  %v2147_v39 = vld [vmem:[%s3191_s25 + $0x80] sm:$0xff] }
 0x212   : > { %v1863_v41 = vadd.f32 %v1862_v54, %v1719_v5 }
 0x213   : > { %2204 = vst.msk [vmem:[%s3216_s30 + $0x48] sm:$0xff] %vm1621_vm4, %v2172_v51 }
 0x214   : > { %v2008_v4 = vpop.f32.mrf.mxu3  ;;  %v1530_v28 = vpop.permute.xlu1 %1529 }
 0x215   : > { %v2073_v9 = vadd.f32 %v2008_v4, %v1848_v21  ;;  %v1575_v44 = vmul.f32 %v1530_v28, %v3319_v22 }
 0x217   : > { %v2109_v48 = vadd.f32 %v3196_v50, %v2073_v9  ;;  %v1916_v57 = vpack.c.bf16 %v1576_v49, %v1575_v44 }
 0x218   : > { %v1864_v25 = vpop.f32.mrf.mxu2 }
 0x219   : > { %v2173_v33 = vadd.f32 %v2141_v47, %v2109_v48  ;;  %v1721_v10 = vpop.f32.mrf.mxu1  ;;  %v2148_v48 = vld [vmem:[%s3191_s25 + $0x88] sm:$0xff] }
 0x21a   : > { %v1865_v4 = vadd.f32 %v1864_v25, %v1721_v10 }
 0x21b   : > { %2205 = vst.msk [vmem:[%s3216_s30 + $0x50] sm:$0xff] %vm1621_vm4, %v2173_v33 }
 0x21c   : > { %v2010_v31 = vpop.f32.mrf.mxu3 }
 0x21d   : > { %v2074_v52 = vadd.f32 %v2010_v31, %v1850_v43  ;;  %v2149_v31 = vld [vmem:[%s3191_s25 + $0x90] sm:$0xff] }
 0x21f   : > { %v2110_v53 = vadd.f32 %v3196_v50, %v2074_v52 }
 0x220   : > { %v1867_v19 = vpop.f32.mrf.mxu2 }
 0x221   : > { %v2174_v58 = vadd.f32 %v2142_v56, %v2110_v53  ;;  %2514 = vmatmul.msk.bf16.gmra.mxu3 %vm1621_vm4, %v1916_v57  ;;  %v1724_v13 = vpop.f32.mrf.mxu1 }
 0x222   : > { %v1868_v27 = vadd.f32 %v1867_v19, %v1724_v13 }
 0x223   : > { %2206 = vst.msk [vmem:[%s3216_s30 + $0x58] sm:$0xff] %vm1621_vm4, %v2174_v58  ;;  %v2150_v58 = vld [vmem:[%s3191_s25 + $0x98] sm:$0xff] }
 0x224   : > { %v2013_v22 = vpop.f32.mrf.mxu3  ;;  %v1540_v61 = vpop.permute.xlu0 %1539 }
 0x225   : > { %v2075_v0 = vadd.f32 %v2013_v22, %v1853_v1  ;;  %v1577_v12 = vmul.f32 %v1540_v61, %v3349_v55  ;;  %v2145_v55 = vld [vmem:[%s3191_s25 + $0x70] sm:$0xff] }
 0x227   : > { %v2111_v17 = vadd.f32 %v3196_v50, %v2075_v0 }
 0x228   : > { %v1869_v36 = vpop.f32.mrf.mxu2 }
 0x229   : > { %v2175_v60 = vadd.f32 %v2143_v6, %v2111_v17  ;;  %v1726_v35 = vpop.f32.mrf.mxu1 }
 0x22a   : > { %v1870_v56 = vadd.f32 %v1869_v36, %v1726_v35 }
 0x22b   : > { %2207 = vst.msk [vmem:[%s3216_s30 + $0x60] sm:$0xff] %vm1621_vm4, %v2175_v60  ;;  %v2151_v60 = vld [vmem:[%s3191_s25 + $0xa0] sm:$0xff] }
 0x22c   : > { %v1545_v26 = vpop.permute.xlu1 %1544  ;;  %v2015_v11 = vpop.f32.mrf.mxu3 }
 0x22d   : > { %v1578_v63 = vmul.f32 %v1545_v26, %v3352_v3  ;;  %v2076_v2 = vadd.f32 %v2015_v11, %v1855_v62 }
 0x22f   : > { %v1917_v32 = vpack.c.bf16 %v1578_v63, %v1577_v12  ;;  %v2112_v8 = vadd.f32 %v3196_v50, %v2076_v2  ;;  %v2152_v63 = vld [vmem:[%s3191_s25 + $0xa8] sm:$0xff] }
 0x230   : > { %v1872_v51 = vpop.f32.mrf.mxu2 }
 0x231   : > { %v2176_v14 = vadd.f32 %v2144_v20, %v2112_v8  ;;  %2515 = vmatmul.msk.bf16.gmra.mxu3 %vm1621_vm4, %v1917_v32  ;;  %v1729_v21 = vpop.f32.mrf.mxu1 }
 0x232   : > { %v1873_v22 = vadd.f32 %v1872_v51, %v1729_v21 }
 0x233   : > { %2208 = vst.msk [vmem:[%s3216_s30 + $0x68] sm:$0xff] %vm1621_vm4, %v2176_v14 }
 0x234   : > { %v2018_v15 = vpop.f32.mrf.mxu3 }
 0x235   : > { %v2077_v23 = vadd.f32 %v2018_v15, %v1858_v16 }
 0x237   : > { %v2113_v3 = vadd.f32 %v3196_v50, %v2077_v23  ;;  %v2153_v23 = vld [vmem:[%s3191_s25 + $0xb0] sm:$0xff] }
 0x238   : > { %v1874_v43 = vpop.f32.mrf.mxu2 }
 0x239   : > { %v2177_v18 = vadd.f32 %v2145_v55, %v2113_v3  ;;  %v1731_v33 = vpop.f32.mrf.mxu1 }
 0x23a   : > { %v1875_v26 = vadd.f32 %v1874_v43, %v1731_v33 }
 0x23b   : > { %2209 = vst.msk [vmem:[%s3216_s30 + $0x70] sm:$0xff] %vm1621_vm4, %v2177_v18 }
 0x23c   : > { %v2020_v24 = vpop.f32.mrf.mxu3 }
 0x23d   : > { %v2078_v29 = vadd.f32 %v2020_v24, %v1860_v59 }
 0x23f   : > { %v2114_v34 = vadd.f32 %v3196_v50, %v2078_v29  ;;  %v2154_v29 = vld [vmem:[%s3191_s25 + $0xb8] sm:$0xff] }
 0x240   : > { %v1877_v5 = vpop.f32.mrf.mxu2 }
 0x241   : > { %v2178_v46 = vadd.f32 %v2146_v42, %v2114_v34  ;;  %v1734_v1 = vpop.f32.mrf.mxu1 }
 0x242   : > { %v1878_v20 = vadd.f32 %v1877_v5, %v1734_v1 }
 0x243   : > { %2210 = vst.msk [vmem:[%s3216_s30 + $0x78] sm:$0xff] %vm1621_vm4, %v2178_v46 }
 0x244   : > { %v2023_v38 = vpop.f32.mrf.mxu3 }
 0x245   : > { %v2079_v37 = vadd.f32 %v2023_v38, %v1863_v41  ;;  %v2155_v38 = vld [vmem:[%s3191_s25 + $0xc0] sm:$0xff] }
 0x247   : > { %v2115_v45 = vadd.f32 %v3196_v50, %v2079_v37 }
 0x248   : > { %v1879_v10 = vpop.f32.mrf.mxu2 }
 0x249   : > { %v2179_v40 = vadd.f32 %v2147_v39, %v2115_v45  ;;  %v1736_v62 = vpop.f32.mrf.mxu1 }
 0x24a   : > { %v1880_v19 = vadd.f32 %v1879_v10, %v1736_v62 }
 0x24b   : > { %2211 = vst.msk [vmem:[%s3216_s30 + $0x80] sm:$0xff] %vm1621_vm4, %v2179_v40 }
 0x24c   : > { %v2025_v9 = vpop.f32.mrf.mxu3 }
 0x24d   : > { %v2080_v47 = vadd.f32 %v2025_v9, %v1865_v4  ;;  %v2156_v4 = vld [vmem:[%s3191_s25 + $0xc8] sm:$0xff] }
 0x24f   : > { %v2116_v7 = vadd.f32 %v3196_v50, %v2080_v47 }
 0x251   : > { %v2180_v28 = vadd.f32 %v2148_v48, %v2116_v7  ;;  %v1739_v8 = vpop.f32.mrf.mxu1 }
 0x253   : > { %2212 = vst.msk [vmem:[%s3216_s30 + $0x88] sm:$0xff] %vm1621_vm4, %v2180_v28  ;;  %v1882_v16 = vpop.f32.mrf.mxu2 }
 0x254   : > { %v2028_v30 = vpop.f32.mrf.mxu3  ;;  %v1883_v34 = vadd.f32 %v1882_v16, %v1739_v8  ;;  %v2161_v16 = vld [vmem:[%s3191_s25 + $0xf0] sm:$0xff] }
 0x255   : > { %v2081_v44 = vadd.f32 %v2028_v30, %v1868_v27  ;;  %v2157_v30 = vld [vmem:[%s3191_s25 + $0xd0] sm:$0xff] }
 0x257   : > { %v2117_v49 = vadd.f32 %v3196_v50, %v2081_v44 }
 0x259   : > { %v2181_v52 = vadd.f32 %v2149_v31, %v2117_v49  ;;  %v1741_v3 = vpop.f32.mrf.mxu1 }
 0x25b   : > { %2213 = vst.msk [vmem:[%s3216_s30 + $0x90] sm:$0xff] %vm1621_vm4, %v2181_v52  ;;  %v1884_v59 = vpop.f32.mrf.mxu2 }
 0x25c   : > { %v2030_v57 = vpop.f32.mrf.mxu3  ;;  %v1885_v40 = vadd.f32 %v1884_v59, %v1741_v3 }
 0x25d   : > { %v2082_v53 = vadd.f32 %v2030_v57, %v1870_v56 }
 0x25f   : > { %v2118_v54 = vadd.f32 %v3196_v50, %v2082_v53  ;;  %v2158_v53 = vld [vmem:[%s3191_s25 + $0xd8] sm:$0xff] }
 0x261   : > { %v2182_v0 = vadd.f32 %v2150_v58, %v2118_v54  ;;  %v1744_v46 = vpop.f32.mrf.mxu1 }
 0x263   : > { %2214 = vst.msk [vmem:[%s3216_s30 + $0x98] sm:$0xff] %vm1621_vm4, %v2182_v0  ;;  %v1887_v37 = vpop.f32.mrf.mxu2 }
 0x264   : > { %v2033_v6 = vpop.f32.mrf.mxu3  ;;  %v1888_v7 = vadd.f32 %v1887_v37, %v1744_v46 }
 0x265   : > { %v2083_v17 = vadd.f32 %v2033_v6, %v1873_v22 }
 0x267   : > { %v2119_v61 = vadd.f32 %v3196_v50, %v2083_v17  ;;  %v2159_v17 = vld [vmem:[%s3191_s25 + $0xe0] sm:$0xff] }
 0x269   : > { %v2183_v25 = vadd.f32 %v2151_v60, %v2119_v61  ;;  %v1746_v47 = vpop.f32.mrf.mxu1 }
 0x26b   : > { %2215 = vst.msk [vmem:[%s3216_s30 + $0xa0] sm:$0xff] %vm1621_vm4, %v2183_v25  ;;  %v1889_v48 = vpop.f32.mrf.mxu2 }
 0x26c   : > { %v2035_v11 = vpop.f32.mrf.mxu3  ;;  %v1890_v52 = vadd.f32 %v1889_v48, %v1746_v47 }
 0x26d   : > { %v2084_v12 = vadd.f32 %v2035_v11, %v1875_v26 }
 0x26f   : > { %v2120_v2 = vadd.f32 %v3196_v50, %v2084_v12  ;;  %v2160_v12 = vld [vmem:[%s3191_s25 + $0xe8] sm:$0xff] }
 0x271   : > { %v2184_v32 = vadd.f32 %v2152_v63, %v2120_v2  ;;  %v1749_v31 = vpop.f32.mrf.mxu1 }
 0x273   : > { %2216 = vst.msk [vmem:[%s3216_s30 + $0xa8] sm:$0xff] %vm1621_vm4, %v2184_v32  ;;  %v1892_v49 = vpop.f32.mrf.mxu2 }
 0x274   : > { %v2038_v14 = vpop.f32.mrf.mxu3  ;;  %v1893_v58 = vadd.f32 %v1892_v49, %v1749_v31 }
 0x275   : > { %v2085_v15 = vadd.f32 %v2038_v14, %v1878_v20 }
 0x277   : > { %v2121_v13 = vadd.f32 %v3196_v50, %v2085_v15 }
 0x279   : > { %v2185_v55 = vadd.f32 %v2153_v23, %v2121_v13  ;;  %v1751_v54 = vpop.f32.mrf.mxu1 }
 0x27b   : > { %2217 = vst.msk [vmem:[%s3216_s30 + $0xb0] sm:$0xff] %vm1621_vm4, %v2185_v55  ;;  %v1894_v22 = vpop.f32.mrf.mxu2 }
 0x27c   : > { %v2040_v18 = vpop.f32.mrf.mxu3  ;;  %v1895_v62 = vadd.f32 %v1894_v22, %v1751_v54 }
 0x27d   : > { %v2086_v24 = vadd.f32 %v2040_v18, %v1880_v19  ;;  %v2162_v18 = vld [vmem:[%s3191_s25 + $0xf8] sm:$0xff] }
 0x27f   : > { %v2122_v42 = vadd.f32 %v3196_v50, %v2086_v24 }
 0x281   : > { %v2186_v35 = vadd.f32 %v2154_v29, %v2122_v42  ;;  %v1754_v26 = vpop.f32.mrf.mxu1 }
 0x283   : > { %2218 = vst.msk [vmem:[%s3216_s30 + $0xb8] sm:$0xff] %vm1621_vm4, %v2186_v35  ;;  %v1897_v11 = vpop.f32.mrf.mxu2 }
 0x284   : > { %v2043_v36 = vpop.f32.mrf.mxu3  ;;  %v1898_v2 = vadd.f32 %v1897_v11, %v1754_v26 }
 0x285   : > { %v2087_v41 = vadd.f32 %v2043_v36, %v1883_v34 }
 0x287   : > { %v2123_v39 = vadd.f32 %v3196_v50, %v2087_v41 }
 0x289   : > { %v2187_v45 = vadd.f32 %v2155_v38, %v2123_v39  ;;  %v1756_v15 = vpop.f32.mrf.mxu1 }
 0x28b   : > { %2219 = vst.msk [vmem:[%s3216_s30 + $0xc0] sm:$0xff] %vm1621_vm4, %v2187_v45  ;;  %v1899_v23 = vpop.f32.mrf.mxu2 }
 0x28c   : > { %v2045_v21 = vpop.f32.mrf.mxu3  ;;  %v1900_v55 = vadd.f32 %v1899_v23, %v1756_v15 }
 0x28d   : > { %v2088_v51 = vadd.f32 %v2045_v21, %v1885_v40 }
 0x28f   : > { %v2124_v9 = vadd.f32 %v3196_v50, %v2088_v51 }
 0x291   : > { %v2188_v27 = vadd.f32 %v2156_v4, %v2124_v9 }
 0x293   : > { %2220 = vst.msk [vmem:[%s3216_s30 + $0xc8] sm:$0xff] %vm1621_vm4, %v2188_v27 }
 0x294   : > { %v2048_v28 = vpop.f32.mrf.mxu3 }
 0x295   : > { %v2089_v33 = vadd.f32 %v2048_v28, %v1888_v7 }
 0x297   : > { %v2125_v43 = vadd.f32 %v3196_v50, %v2089_v33 }
 0x299   : > { %v2189_v44 = vadd.f32 %v2157_v30, %v2125_v43 }
 0x29b   : > { %2221 = vst.msk [vmem:[%s3216_s30 + $0xd0] sm:$0xff] %vm1621_vm4, %v2189_v44 }
 0x29c   : > { %v2050_v56 = vpop.f32.mrf.mxu3 }
 0x29d   : > { %v2090_v57 = vadd.f32 %v2050_v56, %v1890_v52 }
 0x29f   : > { %v2126_v1 = vadd.f32 %v3196_v50, %v2090_v57 }
 0x2a1   : > { %v2190_v5 = vadd.f32 %v2158_v53, %v2126_v1 }
 0x2a3   : > { %2222 = vst.msk [vmem:[%s3216_s30 + $0xd8] sm:$0xff] %vm1621_vm4, %v2190_v5 }
 0x2a4   : > { %v2053_v0 = vpop.f32.mrf.mxu3 }
 0x2a5   : > { %v2091_v6 = vadd.f32 %v2053_v0, %v1893_v58 }
 0x2a7   : > { %v2127_v60 = vadd.f32 %v3196_v50, %v2091_v6 }
 0x2a9   : > { %v2191_v61 = vadd.f32 %v2159_v17, %v2127_v60 }
 0x2ab   : > { %2223 = vst.msk [vmem:[%s3216_s30 + $0xe0] sm:$0xff] %vm1621_vm4, %v2191_v61 }
 0x2ac   : > { %v2055_v10 = vpop.f32.mrf.mxu3 }
 0x2ad   : > { %v2092_v25 = vadd.f32 %v2055_v10, %v1895_v62 }
 0x2af   : > { %v2128_v63 = vadd.f32 %v3196_v50, %v2092_v25 }
 0x2b1   : > { %v2192_v20 = vadd.f32 %v2160_v12, %v2128_v63 }
 0x2b3   : > { %2224 = vst.msk [vmem:[%s3216_s30 + $0xe8] sm:$0xff] %vm1621_vm4, %v2192_v20 }
 0x2b4   : > { %v2058_v32 = vpop.f32.mrf.mxu3 }
 0x2b5   : > { %v2093_v8 = vadd.f32 %v2058_v32, %v1898_v2 }
 0x2b7   : > { %v2129_v14 = vadd.f32 %v3196_v50, %v2093_v8 }
 0x2b9   : > { %v2193_v13 = vadd.f32 %v2161_v16, %v2129_v14 }
 0x2bb   : > { %2225 = vst.msk [vmem:[%s3216_s30 + $0xf0] sm:$0xff] %vm1621_vm4, %v2193_v13 }
 0x2bc   : > { %v2060_v19 = vpop.f32.mrf.mxu3 }
 0x2bd   : > { %v2094_v3 = vadd.f32 %v2060_v19, %v1900_v55 }
 0x2bf   : > { %v2130_v59 = vadd.f32 %v3196_v50, %v2094_v3 }
 0x2c1   : > { %v2194_v24 = vadd.f32 %v2162_v18, %v2130_v59 }
 0x2c3   : > { %2226 = vst.msk [vmem:[%s3216_s30 + $0xf8] sm:$0xff] %vm1621_vm4, %v2194_v24 }
 0x2c4 PF: > { %s22_s15 = sadd.s32 1, %s2696_s15  }
 0x2c5   : > { %p19_p4 = scmp.ge.s32.totalorder %s22_s15, 4  }
 0x2c7   :  { %21 = sbr.rel (!%p19_p4) target bundleno = 3 (0x3), region = 99 }

// kernel: aib_forward.21
= control target key start
LH: loop header
LB: loop body
LE: loop exit
PB: predicated region body
PF: predicated region fallthrough
CT: control target
= control target key end

     0   :  { %s1299_s21 = smov 0   ;;  %s1537_s0 = inlined_call_operand.vmem [shape: bf16[512,16], index: 0, kind: input, shape index: {}]   ;;  %s1538_s1 = inlined_call_operand.vmem [shape: bf16[512,16], index: 1, kind: input, shape index: {}]   ;;  %s1539_s2 = inlined_call_operand.vmem [shape: bf16[16,8], index: 2, kind: input, shape index: {}]   ;;  %s1540_s3 = inlined_call_operand.vmem [shape: bf16[16,8], index: 3, kind: input, shape index: {}]   ;;  %s1541_s4 = inlined_call_operand.vmem [shape: f32[1,8], index: 4, kind: input, shape index: {}]   ;;  %s1542_s5 = inlined_call_operand.vmem [shape: f32[512,8], index: 5, kind: input, shape index: {}]   ;;  %s1543_s6 = inlined_call_operand.vmem [shape: f32[512,8], index: 6, kind: output, shape index: {}]  }
   0x1 LB: > { %s1028_s22 = sadd.s32 4294967295, %s1262_s21   ;;  %p1032_p0 = scmp.ge.s32.totalorder %s1262_s21, 1  ;;  %s1262_s21 = sphi %s1299_s21, %s16_s21  }
   0x2   : > { %p235_p1 = scmp.lt.s32.totalorder %s1262_s21, 3 }
   0x4   : > { %p236_p2 = pnand %p1032_p0, %p235_p1 }
   0x5   : > { %s1033_s27 = sshll.u32 (!%p236_p2), %s1028_s22, 5 }
   0x6   : > { %239 = sbr.rel (%p236_p2) target bundleno = 277 (0x115), region = 44  ;;  %p276_p3 = scmp.lt.s32.totalorder (!%p236_p2), %s1033_s27, 63 }
   0xb   : > { %v1244_v0 = vld [vmem:[%s1540_s3] sm:$0xff]  ;;  %s1545_s27 = smov (!%p276_p3, %s1033_s27), 63  ;;  %vm454_vm0 = vcmask 130048   ;;  %vm915_vm1 = vcmask 64512  }
   0xc   : > { %v1227_v1 = vld [vmem:[%s1539_s2] sm:$0xff]  ;;  %510 = vmatpush.bf16.msra.mxu0 %v1244_v0  ;;  %1245 = vmatpush.bf16.msra.mxu2 %v1244_v0  ;;  %s1034_s28 = sshll.u32 %s1545_s27, 2  ;;  %s1038_s11 = sshll.u32 %s1545_s27, 3 }
   0xd   : > { %733 = vmatpush.bf16.msra.mxu1 %v1227_v1  ;;  %1246 = vmatpush.bf16.msra.mxu3 %v1227_v1  ;;  %s1319_s7 = scalar_lea.vmem %s1538_s1, %s1034_s28  ;;  %s1324_s10 = scalar_lea.vmem %s1537_s0, %s1034_s28  ;;  %v1399_v35 = vld [vmem:[%s1541_s4] ss:$0 sm:$0xff] }
   0xe   : > { %v1228_v2 = vld [vmem:[%s1319_s7] sm:$0xff]  ;;  %v1229_v6 = vld [vmem:[%s1319_s7 + $0x8] sm:$0xff]  ;;  %v1230_v10 = vld [vmem:[%s1319_s7 + $0x10] sm:$0xff]  ;;  %s1394_s14 = scalar_lea.vmem %s1542_s5, %s1038_s11  ;;  %s1406_s19 = scalar_lea.vmem %s1543_s6, %s1038_s11 }
   0xf   : > { %v1236_v3 = vld [vmem:[%s1319_s7 + $0x40] sm:$0xff]  ;;  %1109 = vmatmul.msk.bf16.vlgmr.msra.gmra.mxu0 %vm454_vm0, %v1228_v2  ;;  %v1237_v7 = vld [vmem:[%s1319_s7 + $0x48] sm:$0xff]  ;;  %v1238_v11 = vld [vmem:[%s1319_s7 + $0x50] sm:$0xff] }
  0x10   : > { %v1211_v4 = vld [vmem:[%s1324_s10] sm:$0xff]  ;;  %1117 = vmatmul.msk.bf16.vlgmr.msra.gmra.mxu2 %vm454_vm0, %v1236_v3  ;;  %v1212_v8 = vld [vmem:[%s1324_s10 + $0x8] sm:$0xff]  ;;  %v1213_v12 = vld [vmem:[%s1324_s10 + $0x10] sm:$0xff] }
  0x11   : > { %v1219_v5 = vld [vmem:[%s1324_s10 + $0x40] sm:$0xff]  ;;  %1193 = vmatmul.msk.bf16.vlgmr.msra.gmra.mxu1 %vm454_vm0, %v1211_v4  ;;  %v1220_v9 = vld [vmem:[%s1324_s10 + $0x48] sm:$0xff]  ;;  %v1221_v13 = vld [vmem:[%s1324_s10 + $0x50] sm:$0xff] }
  0x12   : > { %1201 = vmatmul.msk.bf16.vlgmr.msra.gmra.mxu3 %vm454_vm0, %v1219_v5  ;;  %v1231_v14 = vld [vmem:[%s1319_s7 + $0x18] sm:$0xff]  ;;  %v1232_v18 = vld [vmem:[%s1319_s7 + $0x20] sm:$0xff]  ;;  %v1233_v22 = vld [vmem:[%s1319_s7 + $0x28] sm:$0xff] }
  0x13   : > { %v1239_v15 = vld [vmem:[%s1319_s7 + $0x58] sm:$0xff]  ;;  %v1240_v19 = vld [vmem:[%s1319_s7 + $0x60] sm:$0xff]  ;;  %v1241_v23 = vld [vmem:[%s1319_s7 + $0x68] sm:$0xff] }
  0x14   : > { %v1214_v16 = vld [vmem:[%s1324_s10 + $0x18] sm:$0xff]  ;;  %v1215_v20 = vld [vmem:[%s1324_s10 + $0x20] sm:$0xff]  ;;  %v1216_v24 = vld [vmem:[%s1324_s10 + $0x28] sm:$0xff] }
  0x15   : > { %v1222_v17 = vld [vmem:[%s1324_s10 + $0x58] sm:$0xff]  ;;  %v1223_v21 = vld [vmem:[%s1324_s10 + $0x60] sm:$0xff]  ;;  %v1224_v25 = vld [vmem:[%s1324_s10 + $0x68] sm:$0xff] }
  0x16   : > { %v1234_v26 = vld [vmem:[%s1319_s7 + $0x30] sm:$0xff]  ;;  %v1235_v30 = vld [vmem:[%s1319_s7 + $0x38] sm:$0xff]  ;;  %v851_v38 = vld [vmem:[%s1394_s14] sm:$0xff] }
  0x17   : > { %v1242_v27 = vld [vmem:[%s1319_s7 + $0x70] sm:$0xff]  ;;  %v1243_v31 = vld [vmem:[%s1319_s7 + $0x78] sm:$0xff]  ;;  %v867_v45 = vld [vmem:[%s1394_s14 + $0x80] sm:$0xff] }
  0x18   : > { %v1217_v28 = vld [vmem:[%s1324_s10 + $0x30] sm:$0xff]  ;;  %v1218_v32 = vld [vmem:[%s1324_s10 + $0x38] sm:$0xff]  ;;  %v852_v49 = vld [vmem:[%s1394_s14 + $0x8] sm:$0xff] }
  0x19   : > { %v1225_v29 = vld [vmem:[%s1324_s10 + $0x70] sm:$0xff]  ;;  %v1226_v33 = vld [vmem:[%s1324_s10 + $0x78] sm:$0xff]  ;;  %v868_v57 = vld [vmem:[%s1394_s14 + $0x88] sm:$0xff] }
  0x1a   : > { %v853_v61 = vld [vmem:[%s1394_s14 + $0x10] sm:$0xff] }
  0x1b   : > { %v869_v5 = vld [vmem:[%s1394_s14 + $0x90] sm:$0xff] }
  0x1f   : > { %1110 = vmatmul.msk.bf16.gmra.mxu0 %vm454_vm0, %v1229_v6 }
  0x20   : > { %1118 = vmatmul.msk.bf16.gmra.mxu2 %vm454_vm0, %v1237_v7 }
  0x21   : > { %1194 = vmatmul.msk.bf16.gmra.mxu1 %vm454_vm0, %v1212_v8 }
  0x22   : > { %1202 = vmatmul.msk.bf16.gmra.mxu3 %vm454_vm0, %v1220_v9  ;;  %v854_v9 = vld [vmem:[%s1394_s14 + $0x18] sm:$0xff] }
  0x2f   : > { %1111 = vmatmul.msk.bf16.gmra.mxu0 %vm454_vm0, %v1230_v10 }
  0x30   : > { %1119 = vmatmul.msk.bf16.gmra.mxu2 %vm454_vm0, %v1238_v11 }
  0x31   : > { %1195 = vmatmul.msk.bf16.gmra.mxu1 %vm454_vm0, %v1213_v12 }
  0x32   : > { %1203 = vmatmul.msk.bf16.gmra.mxu3 %vm454_vm0, %v1221_v13 }
  0x3f   : > { %1112 = vmatmul.msk.bf16.gmra.mxu0 %vm454_vm0, %v1231_v14 }
  0x40   : > { %1120 = vmatmul.msk.bf16.gmra.mxu2 %vm454_vm0, %v1239_v15 }
  0x41   : > { %1196 = vmatmul.msk.bf16.gmra.mxu1 %vm454_vm0, %v1214_v16 }
  0x42   : > { %1204 = vmatmul.msk.bf16.gmra.mxu3 %vm454_vm0, %v1222_v17  ;;  %v870_v17 = vld [vmem:[%s1394_s14 + $0x98] sm:$0xff] }
  0x4f   : > { %1113 = vmatmul.msk.bf16.gmra.mxu0 %vm454_vm0, %v1232_v18 }
  0x50   : > { %1121 = vmatmul.msk.bf16.gmra.mxu2 %vm454_vm0, %v1240_v19 }
  0x51   : > { %1197 = vmatmul.msk.bf16.gmra.mxu1 %vm454_vm0, %v1215_v20 }
  0x52   : > { %1205 = vmatmul.msk.bf16.gmra.mxu3 %vm454_vm0, %v1223_v21  ;;  %v855_v21 = vld [vmem:[%s1394_s14 + $0x20] sm:$0xff] }
  0x5f   : > { %1114 = vmatmul.msk.bf16.gmra.mxu0 %vm454_vm0, %v1233_v22 }
  0x60   : > { %1122 = vmatmul.msk.bf16.gmra.mxu2 %vm454_vm0, %v1241_v23 }
  0x61   : > { %1198 = vmatmul.msk.bf16.gmra.mxu1 %vm454_vm0, %v1216_v24 }
  0x62   : > { %1206 = vmatmul.msk.bf16.gmra.mxu3 %vm454_vm0, %v1224_v25 }
  0x6f   : > { %1115 = vmatmul.msk.bf16.gmra.mxu0 %vm454_vm0, %v1234_v26 }
  0x70   : > { %1123 = vmatmul.msk.bf16.gmra.mxu2 %vm454_vm0, %v1242_v27 }
  0x71   : > { %1199 = vmatmul.msk.bf16.gmra.mxu1 %vm454_vm0, %v1217_v28 }
  0x72   : > { %1207 = vmatmul.msk.bf16.gmra.mxu3 %vm454_vm0, %v1225_v29  ;;  %v871_v29 = vld [vmem:[%s1394_s14 + $0xa0] sm:$0xff] }
  0x7f   : > { %1116 = vmatmul.msk.bf16.gmra.mxu0 %vm454_vm0, %v1235_v30 }
  0x80   : > { %1124 = vmatmul.msk.bf16.gmra.mxu2 %vm454_vm0, %v1243_v31 }
  0x81   : > { %1200 = vmatmul.msk.bf16.gmra.mxu1 %vm454_vm0, %v1218_v32 }
  0x82   : > { %1208 = vmatmul.msk.bf16.gmra.mxu3 %vm454_vm0, %v1226_v33  ;;  %v856_v33 = vld [vmem:[%s1394_s14 + $0x28] sm:$0xff] }
  0x8c   : > { %v512_v34 = vpop.f32.mrf.mxu0 }
  0x8e   : > { %v735_v36 = vpop.f32.mrf.mxu1 }
  0x8f   : > { %v736_v37 = vadd.f32 %v735_v36, %v512_v34 }
  0x91   : > { %v819_v39 = vadd.f32 %v1399_v35, %v736_v37 }
  0x93   : > { %v883_v40 = vadd.f32 %v851_v38, %v819_v39  ;;  %v552_v41 = vpop.f32.mrf.mxu2 }
  0x94   : > { %v514_v44 = vpop.f32.mrf.mxu0 }
  0x95   : > { %v775_v42 = vpop.f32.mrf.mxu3  ;;  %916 = vst.msk [vmem:[%s1406_s19] sm:$0xff] %vm915_vm1, %v883_v40 }
  0x96   : > { %v776_v43 = vadd.f32 %v775_v42, %v552_v41  ;;  %v737_v46 = vpop.f32.mrf.mxu1  ;;  %v872_v42 = vld [vmem:[%s1394_s14 + $0xa8] sm:$0xff] }
  0x97   : > { %v738_v48 = vadd.f32 %v737_v46, %v514_v44  ;;  %v857_v46 = vld [vmem:[%s1394_s14 + $0x30] sm:$0xff] }
  0x98   : > { %v835_v47 = vadd.f32 %v1399_v35, %v776_v43 }
  0x99   : > { %v820_v51 = vadd.f32 %v1399_v35, %v738_v48 }
  0x9a   : > { %v899_v50 = vadd.f32 %v867_v45, %v835_v47 }
  0x9b   : > { %v884_v52 = vadd.f32 %v852_v49, %v820_v51  ;;  %v554_v53 = vpop.f32.mrf.mxu2 }
  0x9c   : > { %932 = vst.msk [vmem:[%s1406_s19 + $0x80] sm:$0xff] %vm915_vm1, %v899_v50  ;;  %v517_v56 = vpop.f32.mrf.mxu0 }
  0x9d   : > { %v777_v54 = vpop.f32.mrf.mxu3  ;;  %917 = vst.msk [vmem:[%s1406_s19 + $0x8] sm:$0xff] %vm915_vm1, %v884_v52 }
  0x9e   : > { %v778_v55 = vadd.f32 %v777_v54, %v554_v53  ;;  %v740_v58 = vpop.f32.mrf.mxu1  ;;  %v873_v54 = vld [vmem:[%s1394_s14 + $0xb0] sm:$0xff] }
  0x9f   : > { %v741_v60 = vadd.f32 %v740_v58, %v517_v56  ;;  %v858_v58 = vld [vmem:[%s1394_s14 + $0x38] sm:$0xff] }
  0xa0   : > { %v836_v59 = vadd.f32 %v1399_v35, %v778_v55 }
  0xa1   : > { %v821_v63 = vadd.f32 %v1399_v35, %v741_v60 }
  0xa2   : > { %v900_v62 = vadd.f32 %v868_v57, %v836_v59 }
  0xa3   : > { %v885_v0 = vadd.f32 %v853_v61, %v821_v63  ;;  %v557_v1 = vpop.f32.mrf.mxu2 }
  0xa4   : > { %933 = vst.msk [vmem:[%s1406_s19 + $0x88] sm:$0xff] %vm915_vm1, %v900_v62  ;;  %v519_v4 = vpop.f32.mrf.mxu0 }
  0xa5   : > { %v780_v2 = vpop.f32.mrf.mxu3  ;;  %918 = vst.msk [vmem:[%s1406_s19 + $0x10] sm:$0xff] %vm915_vm1, %v885_v0 }
  0xa6   : > { %v781_v3 = vadd.f32 %v780_v2, %v557_v1  ;;  %v742_v6 = vpop.f32.mrf.mxu1  ;;  %v874_v2 = vld [vmem:[%s1394_s14 + $0xb8] sm:$0xff] }
  0xa7   : > { %v743_v8 = vadd.f32 %v742_v6, %v519_v4  ;;  %v859_v6 = vld [vmem:[%s1394_s14 + $0x40] sm:$0xff] }
  0xa8   : > { %v837_v7 = vadd.f32 %v1399_v35, %v781_v3 }
  0xa9   : > { %v822_v11 = vadd.f32 %v1399_v35, %v743_v8 }
  0xaa   : > { %v901_v10 = vadd.f32 %v869_v5, %v837_v7 }
  0xab   : > { %v886_v12 = vadd.f32 %v854_v9, %v822_v11  ;;  %v559_v13 = vpop.f32.mrf.mxu2 }
  0xac   : > { %934 = vst.msk [vmem:[%s1406_s19 + $0x90] sm:$0xff] %vm915_vm1, %v901_v10  ;;  %v522_v16 = vpop.f32.mrf.mxu0 }
  0xad   : > { %v782_v14 = vpop.f32.mrf.mxu3  ;;  %919 = vst.msk [vmem:[%s1406_s19 + $0x18] sm:$0xff] %vm915_vm1, %v886_v12 }
  0xae   : > { %v783_v15 = vadd.f32 %v782_v14, %v559_v13  ;;  %v745_v18 = vpop.f32.mrf.mxu1  ;;  %v875_v14 = vld [vmem:[%s1394_s14 + $0xc0] sm:$0xff] }
  0xaf   : > { %v746_v20 = vadd.f32 %v745_v18, %v522_v16  ;;  %v860_v18 = vld [vmem:[%s1394_s14 + $0x48] sm:$0xff] }
  0xb0   : > { %v838_v19 = vadd.f32 %v1399_v35, %v783_v15 }
  0xb1   : > { %v823_v23 = vadd.f32 %v1399_v35, %v746_v20 }
  0xb2   : > { %v902_v22 = vadd.f32 %v870_v17, %v838_v19 }
  0xb3   : > { %v887_v24 = vadd.f32 %v855_v21, %v823_v23  ;;  %v562_v25 = vpop.f32.mrf.mxu2 }
  0xb4   : > { %935 = vst.msk [vmem:[%s1406_s19 + $0x98] sm:$0xff] %vm915_vm1, %v902_v22  ;;  %v524_v28 = vpop.f32.mrf.mxu0 }
  0xb5   : > { %v785_v26 = vpop.f32.mrf.mxu3  ;;  %920 = vst.msk [vmem:[%s1406_s19 + $0x20] sm:$0xff] %vm915_vm1, %v887_v24 }
  0xb6   : > { %v786_v27 = vadd.f32 %v785_v26, %v562_v25  ;;  %v747_v30 = vpop.f32.mrf.mxu1  ;;  %v876_v26 = vld [vmem:[%s1394_s14 + $0xc8] sm:$0xff] }
  0xb7   : > { %v748_v32 = vadd.f32 %v747_v30, %v524_v28  ;;  %v861_v30 = vld [vmem:[%s1394_s14 + $0x50] sm:$0xff] }
  0xb8   : > { %v839_v31 = vadd.f32 %v1399_v35, %v786_v27 }
  0xb9   : > { %v824_v36 = vadd.f32 %v1399_v35, %v748_v32 }
  0xba   : > { %v903_v34 = vadd.f32 %v871_v29, %v839_v31 }
  0xbb   : > { %v888_v37 = vadd.f32 %v856_v33, %v824_v36  ;;  %v564_v38 = vpop.f32.mrf.mxu2 }
  0xbc   : > { %936 = vst.msk [vmem:[%s1406_s19 + $0xa0] sm:$0xff] %vm915_vm1, %v903_v34  ;;  %v527_v41 = vpop.f32.mrf.mxu0 }
  0xbd   : > { %v787_v39 = vpop.f32.mrf.mxu3  ;;  %921 = vst.msk [vmem:[%s1406_s19 + $0x28] sm:$0xff] %vm915_vm1, %v888_v37 }
  0xbe   : > { %v788_v40 = vadd.f32 %v787_v39, %v564_v38  ;;  %v750_v43 = vpop.f32.mrf.mxu1  ;;  %v877_v39 = vld [vmem:[%s1394_s14 + $0xd0] sm:$0xff] }
  0xbf   : > { %v751_v45 = vadd.f32 %v750_v43, %v527_v41  ;;  %v862_v43 = vld [vmem:[%s1394_s14 + $0x58] sm:$0xff] }
  0xc0   : > { %v840_v44 = vadd.f32 %v1399_v35, %v788_v40 }
  0xc1   : > { %v825_v48 = vadd.f32 %v1399_v35, %v751_v45 }
  0xc2   : > { %v904_v47 = vadd.f32 %v872_v42, %v840_v44 }
  0xc3   : > { %v889_v49 = vadd.f32 %v857_v46, %v825_v48  ;;  %v567_v50 = vpop.f32.mrf.mxu2 }
  0xc4   : > { %937 = vst.msk [vmem:[%s1406_s19 + $0xa8] sm:$0xff] %vm915_vm1, %v904_v47  ;;  %v529_v53 = vpop.f32.mrf.mxu0 }
  0xc5   : > { %v790_v51 = vpop.f32.mrf.mxu3  ;;  %922 = vst.msk [vmem:[%s1406_s19 + $0x30] sm:$0xff] %vm915_vm1, %v889_v49 }
  0xc6   : > { %v791_v52 = vadd.f32 %v790_v51, %v567_v50  ;;  %v752_v55 = vpop.f32.mrf.mxu1  ;;  %v878_v51 = vld [vmem:[%s1394_s14 + $0xd8] sm:$0xff] }
  0xc7   : > { %v753_v57 = vadd.f32 %v752_v55, %v529_v53  ;;  %v863_v55 = vld [vmem:[%s1394_s14 + $0x60] sm:$0xff] }
  0xc8   : > { %v841_v56 = vadd.f32 %v1399_v35, %v791_v52 }
  0xc9   : > { %v826_v60 = vadd.f32 %v1399_v35, %v753_v57 }
  0xca   : > { %v905_v59 = vadd.f32 %v873_v54, %v841_v56 }
  0xcb   : > { %v890_v61 = vadd.f32 %v858_v58, %v826_v60  ;;  %v569_v62 = vpop.f32.mrf.mxu2 }
  0xcc   : > { %938 = vst.msk [vmem:[%s1406_s19 + $0xb0] sm:$0xff] %vm915_vm1, %v905_v59  ;;  %v532_v1 = vpop.f32.mrf.mxu0 }
  0xcd   : > { %v792_v63 = vpop.f32.mrf.mxu3  ;;  %923 = vst.msk [vmem:[%s1406_s19 + $0x38] sm:$0xff] %vm915_vm1, %v890_v61 }
  0xce   : > { %v793_v0 = vadd.f32 %v792_v63, %v569_v62  ;;  %v755_v3 = vpop.f32.mrf.mxu1  ;;  %v879_v63 = vld [vmem:[%s1394_s14 + $0xe0] sm:$0xff] }
  0xcf   : > { %v756_v5 = vadd.f32 %v755_v3, %v532_v1  ;;  %v864_v3 = vld [vmem:[%s1394_s14 + $0x68] sm:$0xff] }
  0xd0   : > { %v842_v4 = vadd.f32 %v1399_v35, %v793_v0 }
  0xd1   : > { %v827_v8 = vadd.f32 %v1399_v35, %v756_v5 }
  0xd2   : > { %v906_v7 = vadd.f32 %v874_v2, %v842_v4 }
  0xd3   : > { %v891_v9 = vadd.f32 %v859_v6, %v827_v8  ;;  %v572_v10 = vpop.f32.mrf.mxu2 }
  0xd4   : > { %939 = vst.msk [vmem:[%s1406_s19 + $0xb8] sm:$0xff] %vm915_vm1, %v906_v7  ;;  %v534_v13 = vpop.f32.mrf.mxu0 }
  0xd5   : > { %v795_v11 = vpop.f32.mrf.mxu3  ;;  %924 = vst.msk [vmem:[%s1406_s19 + $0x40] sm:$0xff] %vm915_vm1, %v891_v9 }
  0xd6   : > { %v796_v12 = vadd.f32 %v795_v11, %v572_v10  ;;  %v757_v15 = vpop.f32.mrf.mxu1  ;;  %v880_v11 = vld [vmem:[%s1394_s14 + $0xe8] sm:$0xff] }
  0xd7   : > { %v758_v17 = vadd.f32 %v757_v15, %v534_v13  ;;  %v865_v15 = vld [vmem:[%s1394_s14 + $0x70] sm:$0xff] }
  0xd8   : > { %v843_v16 = vadd.f32 %v1399_v35, %v796_v12 }
  0xd9   : > { %v828_v20 = vadd.f32 %v1399_v35, %v758_v17 }
  0xda   : > { %v907_v19 = vadd.f32 %v875_v14, %v843_v16 }
  0xdb   : > { %v892_v21 = vadd.f32 %v860_v18, %v828_v20  ;;  %v574_v22 = vpop.f32.mrf.mxu2 }
  0xdc   : > { %940 = vst.msk [vmem:[%s1406_s19 + $0xc0] sm:$0xff] %vm915_vm1, %v907_v19  ;;  %v537_v25 = vpop.f32.mrf.mxu0 }
  0xdd   : > { %v797_v23 = vpop.f32.mrf.mxu3  ;;  %925 = vst.msk [vmem:[%s1406_s19 + $0x48] sm:$0xff] %vm915_vm1, %v892_v21 }
  0xde   : > { %v798_v24 = vadd.f32 %v797_v23, %v574_v22  ;;  %v760_v27 = vpop.f32.mrf.mxu1  ;;  %v881_v23 = vld [vmem:[%s1394_s14 + $0xf0] sm:$0xff] }
  0xdf   : > { %v761_v29 = vadd.f32 %v760_v27, %v537_v25  ;;  %v866_v27 = vld [vmem:[%s1394_s14 + $0x78] sm:$0xff] }
  0xe0   : > { %v844_v28 = vadd.f32 %v1399_v35, %v798_v24 }
  0xe1   : > { %v829_v32 = vadd.f32 %v1399_v35, %v761_v29 }
  0xe2   : > { %v908_v31 = vadd.f32 %v876_v26, %v844_v28 }
  0xe3   : > { %v893_v33 = vadd.f32 %v861_v30, %v829_v32  ;;  %v577_v34 = vpop.f32.mrf.mxu2 }
  0xe4   : > { %941 = vst.msk [vmem:[%s1406_s19 + $0xc8] sm:$0xff] %vm915_vm1, %v908_v31  ;;  %v539_v38 = vpop.f32.mrf.mxu0 }
  0xe5   : > { %v800_v36 = vpop.f32.mrf.mxu3  ;;  %926 = vst.msk [vmem:[%s1406_s19 + $0x50] sm:$0xff] %vm915_vm1, %v893_v33 }
  0xe6   : > { %v801_v37 = vadd.f32 %v800_v36, %v577_v34  ;;  %v762_v40 = vpop.f32.mrf.mxu1  ;;  %v882_v34 = vld [vmem:[%s1394_s14 + $0xf8] sm:$0xff] }
  0xe7   : > { %v763_v42 = vadd.f32 %v762_v40, %v539_v38 }
  0xe8   : > { %v845_v41 = vadd.f32 %v1399_v35, %v801_v37 }
  0xe9   : > { %v830_v45 = vadd.f32 %v1399_v35, %v763_v42 }
  0xea   : > { %v909_v44 = vadd.f32 %v877_v39, %v845_v41 }
  0xeb   : > { %v894_v46 = vadd.f32 %v862_v43, %v830_v45  ;;  %v579_v47 = vpop.f32.mrf.mxu2 }
  0xec   : > { %942 = vst.msk [vmem:[%s1406_s19 + $0xd0] sm:$0xff] %vm915_vm1, %v909_v44  ;;  %v542_v50 = vpop.f32.mrf.mxu0 }
  0xed   : > { %v802_v48 = vpop.f32.mrf.mxu3  ;;  %927 = vst.msk [vmem:[%s1406_s19 + $0x58] sm:$0xff] %vm915_vm1, %v894_v46 }
  0xee   : > { %v803_v49 = vadd.f32 %v802_v48, %v579_v47  ;;  %v765_v52 = vpop.f32.mrf.mxu1 }
  0xef   : > { %v766_v54 = vadd.f32 %v765_v52, %v542_v50 }
  0xf0   : > { %v846_v53 = vadd.f32 %v1399_v35, %v803_v49 }
  0xf1   : > { %v831_v57 = vadd.f32 %v1399_v35, %v766_v54 }
  0xf2   : > { %v910_v56 = vadd.f32 %v878_v51, %v846_v53 }
  0xf3   : > { %v895_v58 = vadd.f32 %v863_v55, %v831_v57  ;;  %v582_v59 = vpop.f32.mrf.mxu2 }
  0xf4   : > { %943 = vst.msk [vmem:[%s1406_s19 + $0xd8] sm:$0xff] %vm915_vm1, %v910_v56  ;;  %v544_v62 = vpop.f32.mrf.mxu0 }
  0xf5   : > { %v805_v60 = vpop.f32.mrf.mxu3  ;;  %928 = vst.msk [vmem:[%s1406_s19 + $0x60] sm:$0xff] %vm915_vm1, %v895_v58 }
  0xf6   : > { %v806_v61 = vadd.f32 %v805_v60, %v582_v59  ;;  %v767_v0 = vpop.f32.mrf.mxu1 }
  0xf7   : > { %v768_v2 = vadd.f32 %v767_v0, %v544_v62 }
  0xf8   : > { %v847_v1 = vadd.f32 %v1399_v35, %v806_v61 }
  0xf9   : > { %v832_v5 = vadd.f32 %v1399_v35, %v768_v2 }
  0xfa   : > { %v911_v4 = vadd.f32 %v879_v63, %v847_v1 }
  0xfb   : > { %v896_v6 = vadd.f32 %v864_v3, %v832_v5  ;;  %v584_v7 = vpop.f32.mrf.mxu2 }
  0xfc   : > { %944 = vst.msk [vmem:[%s1406_s19 + $0xe0] sm:$0xff] %vm915_vm1, %v911_v4  ;;  %v547_v10 = vpop.f32.mrf.mxu0 }
  0xfd   : > { %v807_v8 = vpop.f32.mrf.mxu3  ;;  %929 = vst.msk [vmem:[%s1406_s19 + $0x68] sm:$0xff] %vm915_vm1, %v896_v6 }
  0xfe   : > { %v808_v9 = vadd.f32 %v807_v8, %v584_v7  ;;  %v770_v12 = vpop.f32.mrf.mxu1 }
  0xff   : > { %v771_v14 = vadd.f32 %v770_v12, %v547_v10 }
 0x100   : > { %v848_v13 = vadd.f32 %v1399_v35, %v808_v9 }
 0x101   : > { %v833_v17 = vadd.f32 %v1399_v35, %v771_v14 }
 0x102   : > { %v912_v16 = vadd.f32 %v880_v11, %v848_v13 }
 0x103   : > { %v897_v18 = vadd.f32 %v865_v15, %v833_v17  ;;  %v587_v19 = vpop.f32.mrf.mxu2 }
 0x104   : > { %945 = vst.msk [vmem:[%s1406_s19 + $0xe8] sm:$0xff] %vm915_vm1, %v912_v16  ;;  %v549_v22 = vpop.f32.mrf.mxu0 }
 0x105   : > { %v810_v20 = vpop.f32.mrf.mxu3  ;;  %930 = vst.msk [vmem:[%s1406_s19 + $0x70] sm:$0xff] %vm915_vm1, %v897_v18 }
 0x106   : > { %v811_v21 = vadd.f32 %v810_v20, %v587_v19  ;;  %v772_v24 = vpop.f32.mrf.mxu1 }
 0x107   : > { %v773_v26 = vadd.f32 %v772_v24, %v549_v22 }
 0x108   : > { %v849_v25 = vadd.f32 %v1399_v35, %v811_v21 }
 0x109   : > { %v834_v29 = vadd.f32 %v1399_v35, %v773_v26 }
 0x10a   : > { %v913_v28 = vadd.f32 %v881_v23, %v849_v25 }
 0x10b   : > { %v898_v30 = vadd.f32 %v866_v27, %v834_v29  ;;  %v589_v31 = vpop.f32.mrf.mxu2 }
 0x10c   : > { %946 = vst.msk [vmem:[%s1406_s19 + $0xf0] sm:$0xff] %vm915_vm1, %v913_v28 }
 0x10d   : > { %v812_v32 = vpop.f32.mrf.mxu3  ;;  %931 = vst.msk [vmem:[%s1406_s19 + $0x78] sm:$0xff] %vm915_vm1, %v898_v30 }
 0x10e   : > { %v813_v33 = vadd.f32 %v812_v32, %v589_v31 }
 0x110   : > { %v850_v36 = vadd.f32 %v1399_v35, %v813_v33 }
 0x112   : > { %v914_v37 = vadd.f32 %v882_v34, %v850_v36 }
 0x114   : > { %947 = vst.msk [vmem:[%s1406_s19 + $0xf8] sm:$0xff] %vm915_vm1, %v914_v37 }
 0x115 PF: > { %s16_s21 = sadd.s32 1, %s1262_s21  }
 0x116   : > { %p13_p4 = scmp.ge.s32.totalorder %s16_s21, 4  }
 0x118   :  { %15 = sbr.rel (!%p13_p4) target bundleno = 1 (0x1), region = 80 }

</bundles_post_ra>
